<compile_context>
chip_gen: v6e
topology: v6e:2x2x1
jax: 0.10.0
libtpu: 0.0.40
codegen_flags: <defaults>
</compile_context>

<pallas_src>
import functools
import math

import jax
import jax.numpy as jnp
from jax.experimental import pallas as pl
from jax.experimental.pallas import tpu as pltpu

_EPS = 1e-5
_NEG_INF = -1e30


# ----------------------------------------------------------------------------
# Single fused kernel: whole TransformerModule forward
# ----------------------------------------------------------------------------
def _transformer_kernel(src_ref, bias_ref, emb_w_ref, emb_b_ref,
                        enc_aw_ref, enc_ab_ref, enc_w1_ref, enc_b1_ref,
                        enc_w2_ref, enc_rows_ref, enc_norm_ref,
                        dec_saw_ref, dec_sab_ref, dec_caw_ref, dec_cab_ref,
                        dec_w1_ref, dec_b1_ref, dec_w2_ref, dec_rows_ref,
                        dec_norm_ref, fc_w_ref, fc_b_ref,
                        out_ref, *, num_heads, group_size):
    """Activations use a (s, b)-major 2-D layout: row = s * group_size + b,
    where s indexes the transformer batch (original sequence positions) and b
    the transformer sequence (original batch).  Independence across s is
    enforced via the block-diagonal additive bias in `bias_ref`."""
    mask_bias = bias_ref[...]                       # (M, M) f32: 0 / -1e30

    def mm(a, w_bf16):                              # f32 x bf16 -> f32 on MXU
        return jnp.dot(a.astype(jnp.bfloat16), w_bf16,
                       preferred_element_type=jnp.float32)

    def layer_norm(z, g, b):                        # f32 LayerNorm over lanes
        mu = jnp.mean(z, axis=-1, keepdims=True)
        zc = z - mu
        var = jnp.mean(zc * zc, axis=-1, keepdims=True)
        return zc * jax.lax.rsqrt(var + _EPS) * g + b

    def mha(x_q, x_kv, aw_ref, ab_ref, l):
        """Multi-head attention block; 1/sqrt(Dh) is folded into W_q / b_q."""
        e = x_q.shape[-1]
        dh = e // num_heads
        q = mm(x_q, aw_ref[l, 0]) + ab_ref[l, 0]
        k = mm(x_kv, aw_ref[l, 1]) + ab_ref[l, 1]
        v = mm(x_kv, aw_ref[l, 2]) + ab_ref[l, 2]
        heads = []
        for h in range(num_heads):
            sl = slice(h * dh, (h + 1) * dh)
            qh = q[:, sl].astype(jnp.bfloat16)
            kh = k[:, sl].astype(jnp.bfloat16)
            vh = v[:, sl].astype(jnp.bfloat16)
            s = jax.lax.dot_general(                 # q @ k^T  -> (Mq, Mk)
                qh, kh, dimension_numbers=(((1,), (1,)), ((), ())),
                preferred_element_type=jnp.float32) + mask_bias
            s = s - jnp.max(s, axis=-1, keepdims=True)
            p = jnp.exp(s)
            p = p / jnp.sum(p, axis=-1, keepdims=True)
            heads.append(mm(p, vh))                  # (Mq, dh)
        o = jnp.concatenate(heads, axis=-1)          # (Mq, E)
        return mm(o, aw_ref[l, 3]) + ab_ref[l, 3]    # single out-projection

    def ffn(x, w1_ref, b1_ref, w2_ref, b2_row, l):
        h = jnp.maximum(mm(x, w1_ref[l]) + b1_ref[l], 0.0)
        return mm(h, w2_ref[l]) + b2_row

    # ---- embedding (f32 matmul; K = input_size is tiny) ---------------------
    x = jnp.dot(src_ref[...], emb_w_ref[...],
                preferred_element_type=jnp.float32) + emb_b_ref[...]

    # ---- encoder stack + final encoder norm ---------------------------------
    mem = x
    for l in range(enc_aw_ref.shape[0]):
        mem = layer_norm(mem + mha(mem, mem, enc_aw_ref, enc_ab_ref, l),
                         enc_rows_ref[l, 0], enc_rows_ref[l, 1])
        mem = layer_norm(mem + ffn(mem, enc_w1_ref, enc_b1_ref, enc_w2_ref,
                                   enc_rows_ref[l, 2], l),
                         enc_rows_ref[l, 3], enc_rows_ref[l, 4])
    mem = layer_norm(mem, enc_norm_ref[0], enc_norm_ref[1])

    # ---- decoder stack -------------------------------------------------------
    t = x
    for l in range(dec_saw_ref.shape[0]):
        t = layer_norm(t + mha(t, t, dec_saw_ref, dec_sab_ref, l),
                       dec_rows_ref[l, 0], dec_rows_ref[l, 1])
        t = layer_norm(t + mha(t, mem, dec_caw_ref, dec_cab_ref, l),
                       dec_rows_ref[l, 2], dec_rows_ref[l, 3])
        t = layer_norm(t + ffn(t, dec_w1_ref, dec_b1_ref, dec_w2_ref,
                               dec_rows_ref[l, 4], l),
                       dec_rows_ref[l, 5], dec_rows_ref[l, 6])

    # ---- tail: only the middle transformer-batch group feeds fc_out ---------
    num_groups = t.shape[0] // group_size
    start = (num_groups // 2) * group_size
    mid = layer_norm(t[start:start + group_size, :],
                     dec_norm_ref[0], dec_norm_ref[1])
    logit = jnp.sum(mid * fc_w_ref[...], axis=-1, keepdims=True) + fc_b_ref[...]
    out_ref[...] = jax.nn.sigmoid(logit)


# ----------------------------------------------------------------------------
# Wrapper
# ----------------------------------------------------------------------------
def transformer_forward(src, params, *, num_heads):
    """src: (batch, seq, input_size) f32 -> (batch, 1) f32 (sigmoid output)."""
    B, S, I = src.shape
    M = S * B
    # src.permute(1, 0, 2) folded into an (s, b)-major flattening of the rows;
    # each transformer-batch group is then a contiguous block of B rows.
    src2 = jnp.transpose(src, (1, 0, 2)).reshape(M, I)
    # Block-diagonal additive attention bias (compile-time constant under jit).
    gid = jnp.arange(M, dtype=jnp.int32) // B
    attn_bias = jnp.where(gid[:, None] == gid[None, :], 0.0,
                          _NEG_INF).astype(jnp.float32)

    kernel = functools.partial(_transformer_kernel,
                               num_heads=num_heads, group_size=B)
    return pl.pallas_call(
        kernel,
        out_shape=jax.ShapeDtypeStruct((B, 1), jnp.float32),
        compiler_params=pltpu.CompilerParams(
            vmem_limit_bytes=32 * 1024 * 1024),
    )(src2, attn_bias, params["emb_w"], params["emb_b"],
      params["enc_aw"], params["enc_ab"], params["enc_w1"], params["enc_b1"],
      params["enc_w2"], params["enc_rows"], params["enc_norm"],
      params["dec_saw"], params["dec_sab"], params["dec_caw"],
      params["dec_cab"], params["dec_w1"], params["dec_b1"], params["dec_w2"],
      params["dec_rows"], params["dec_norm"], params["fc_w"], params["fc_b"])


# ----------------------------------------------------------------------------
# Synthetic parameters (PyTorch layout) + one-time kernel-friendly prep
# ----------------------------------------------------------------------------
def init_params(key, cfg):
    """Random parameters in the PyTorch (nn.Transformer) layout."""
    E, F, I = cfg["hidden_size"], cfg["dim_feedforward"], cfg["input_size"]
    keys = iter(jax.random.split(key, 256))

    def w(shape, s=0.08):
        return (s * jax.random.normal(next(keys), shape)).astype(jnp.float32)

    def g(shape):  # LayerNorm gamma ~ 1
        return (1.0 + 0.1 * jax.random.normal(next(keys), shape)
                ).astype(jnp.float32)

    def attn():
        return {"in_w": w((3 * E, E)), "in_b": w((3 * E,), 0.02),
                "out_w": w((E, E)), "out_b": w((E,), 0.02)}

    def enc_layer():
        return {"self_attn": attn(),
                "ln1_g": g((E,)), "ln1_b": w((E,), 0.02),
                "ff_w1": w((F, E)), "ff_b1": w((F,), 0.02),
                "ff_w2": w((E, F)), "ff_b2": w((E,), 0.02),
                "ln2_g": g((E,)), "ln2_b": w((E,), 0.02)}

    def dec_layer():
        return {"self_attn": attn(), "cross_attn": attn(),
                "ln1_g": g((E,)), "ln1_b": w((E,), 0.02),
                "ln2_g": g((E,)), "ln2_b": w((E,), 0.02),
                "ff_w1": w((F, E)), "ff_b1": w((F,), 0.02),
                "ff_w2": w((E, F)), "ff_b2": w((E,), 0.02),
                "ln3_g": g((E,)), "ln3_b": w((E,), 0.02)}

    L = cfg["num_layers"]
    return {"emb_w": w((E, I)), "emb_b": w((E,), 0.02),
            "encoder": [enc_layer() for _ in range(L)],
            "enc_norm_g": g((E,)), "enc_norm_b": w((E,), 0.02),
            "decoder": [dec_layer() for _ in range(L)],
            "dec_norm_g": g((E,)), "dec_norm_b": w((E,), 0.02),
            "fc_w": w((1, E)), "fc_b": w((1,), 0.02)}


def prepare_params(raw, cfg):
    """One-time prep into the kernel layout: weights transposed to (in, out)
    and cast to bf16, Q/K/V/out stacked per layer (softmax scale folded into
    W_q / b_q), biases + LayerNorm affine kept f32 as (1, N) rows, and all
    per-layer tensors stacked along a leading layer axis."""
    E, nh = cfg["hidden_size"], cfg["num_heads"]
    scale = 1.0 / math.sqrt(E // nh)

    t_bf = lambda a: jnp.asarray(a, jnp.float32).T.astype(jnp.bfloat16)
    row = lambda v: jnp.asarray(v, jnp.float32).reshape(1, -1)

    def attn_stacks(a):
        in_w = jnp.asarray(a["in_w"], jnp.float32)
        in_b = jnp.asarray(a["in_b"], jnp.float32)
        aw = jnp.stack([in_w[:E].T * scale, in_w[E:2 * E].T, in_w[2 * E:].T,
                        jnp.asarray(a["out_w"], jnp.float32).T]
                       ).astype(jnp.bfloat16)                       # (4, E, E)
        ab = jnp.stack([row(in_b[:E] * scale), row(in_b[E:2 * E]),
                        row(in_b[2 * E:]), row(a["out_b"])])        # (4, 1, E)
        return aw, ab

    enc_aw, enc_ab, enc_w1, enc_b1, enc_w2, enc_rows = [], [], [], [], [], []
    for lp in raw["encoder"]:
        aw, ab = attn_stacks(lp["self_attn"])
        enc_aw.append(aw); enc_ab.append(ab)
        enc_w1.append(t_bf(lp["ff_w1"])); enc_b1.append(row(lp["ff_b1"]))
        enc_w2.append(t_bf(lp["ff_w2"]))
        enc_rows.append(jnp.stack([row(lp["ln1_g"]), row(lp["ln1_b"]),
                                   row(lp["ff_b2"]),
                                   row(lp["ln2_g"]), row(lp["ln2_b"])]))

    dec_saw, dec_sab, dec_caw, dec_cab = [], [], [], []
    dec_w1, dec_b1, dec_w2, dec_rows = [], [], [], []
    for lp in raw["decoder"]:
        saw, sab = attn_stacks(lp["self_attn"])
        caw, cab = attn_stacks(lp["cross_attn"])
        dec_saw.append(saw); dec_sab.append(sab)
        dec_caw.append(caw); dec_cab.append(cab)
        dec_w1.append(t_bf(lp["ff_w1"])); dec_b1.append(row(lp["ff_b1"]))
        dec_w2.append(t_bf(lp["ff_w2"]))
        dec_rows.append(jnp.stack([row(lp["ln1_g"]), row(lp["ln1_b"]),
                                   row(lp["ln2_g"]), row(lp["ln2_b"]),
                                   row(lp["ff_b2"]),
                                   row(lp["ln3_g"]), row(lp["ln3_b"])]))

    return {
        "emb_w": jnp.asarray(raw["emb_w"], jnp.float32).T,          # (I, E) f32
        "emb_b": row(raw["emb_b"]),
        "enc_aw": jnp.stack(enc_aw), "enc_ab": jnp.stack(enc_ab),
        "enc_w1": jnp.stack(enc_w1), "enc_b1": jnp.stack(enc_b1),
        "enc_w2": jnp.stack(enc_w2), "enc_rows": jnp.stack(enc_rows),
        "enc_norm": jnp.stack([row(raw["enc_norm_g"]),
                               row(raw["enc_norm_b"])]),
        "dec_saw": jnp.stack(dec_saw), "dec_sab": jnp.stack(dec_sab),
        "dec_caw": jnp.stack(dec_caw), "dec_cab": jnp.stack(dec_cab),
        "dec_w1": jnp.stack(dec_w1), "dec_b1": jnp.stack(dec_b1),
        "dec_w2": jnp.stack(dec_w2), "dec_rows": jnp.stack(dec_rows),
        "dec_norm": jnp.stack([row(raw["dec_norm_g"]),
                               row(raw["dec_norm_b"])]),
        "fc_w": row(raw["fc_w"]),
        "fc_b": jnp.asarray(raw["fc_b"], jnp.float32).reshape(1, 1),
    }


# ----------------------------------------------------------------------------
# Pure-JAX f32 reference of TransformerModule.forward (eval mode)
# ----------------------------------------------------------------------------
def reference_forward(src, raw, cfg):
    E, nh = cfg["hidden_size"], cfg["num_heads"]
    dh = E // nh

    def ln(x, g, b):
        mu = x.mean(-1, keepdims=True)
        var = ((x - mu) ** 2).mean(-1, keepdims=True)
        return (x - mu) / jnp.sqrt(var + _EPS) * g + b

    def mha(xq, xkv, a):
        q = xq @ a["in_w"][:E].T + a["in_b"][:E]
        k = xkv @ a["in_w"][E:2 * E].T + a["in_b"][E:2 * E]
        v = xkv @ a["in_w"][2 * E:].T + a["in_b"][2 * E:]
        G, Tq, _ = q.shape
        Tk = k.shape[1]
        q = q.reshape(G, Tq, nh, dh).transpose(0, 2, 1, 3)
        k = k.reshape(G, Tk, nh, dh).transpose(0, 2, 1, 3)
        v = v.reshape(G, Tk, nh, dh).transpose(0, 2, 1, 3)
        s = jnp.einsum("ghqd,ghkd->ghqk", q, k) / math.sqrt(dh)
        p = jax.nn.softmax(s, axis=-1)
        o = jnp.einsum("ghqk,ghkd->ghqd", p, v)
        o = o.transpose(0, 2, 1, 3).reshape(G, Tq, E)
        return o @ a["out_w"].T + a["out_b"]

    def ffn(x, lp):
        h = jax.nn.relu(x @ lp["ff_w1"].T + lp["ff_b1"])
        return h @ lp["ff_w2"].T + lp["ff_b2"]

    x = src @ raw["emb_w"].T + raw["emb_b"]          # (B, S, E)
    x = jnp.transpose(x, (1, 0, 2))                   # (S, B, E)
    mem = x
    for lp in raw["encoder"]:
        mem = ln(mem + mha(mem, mem, lp["self_attn"]), lp["ln1_g"], lp["ln1_b"])
        mem = ln(mem + ffn(mem, lp), lp["ln2_g"], lp["ln2_b"])
    mem = ln(mem, raw["enc_norm_g"], raw["enc_norm_b"])
    t = x
    for lp in raw["decoder"]:
        t = ln(t + mha(t, t, lp["self_attn"]), lp["ln1_g"], lp["ln1_b"])
        t = ln(t + mha(t, mem, lp["cross_attn"]), lp["ln2_g"], lp["ln2_b"])
        t = ln(t + ffn(t, lp), lp["ln3_g"], lp["ln3_b"])
    t = ln(t, raw["dec_norm_g"], raw["dec_norm_b"])
    mid = t[t.shape[0] // 2]                          # (B, E)
    return jax.nn.sigmoid(mid @ raw["fc_w"].T + raw["fc_b"])


# ----------------------------------------------------------------------------
if __name__ == "__main__":
    cfg = dict(input_size=4, hidden_size=32, num_heads=4, num_layers=2,
               dim_feedforward=64, dropout=0.0)   # dropout: eval-mode identity

    key = jax.random.PRNGKey(0)
    pkey, xkey = jax.random.split(key)
    raw = init_params(pkey, cfg)
    params = prepare_params(raw, cfg)

    batch, seq = 2, 8
    src = jax.random.normal(xkey, (batch, seq, cfg["input_size"]), jnp.float32)

    fwd = jax.jit(functools.partial(transformer_forward,
                                    num_heads=cfg["num_heads"]))
    out = jax.block_until_ready(fwd(src, params))

    assert out.shape == (batch, 1), out.shape
    assert bool(jnp.all(jnp.isfinite(out)))
    assert bool(jnp.all((out >= 0.0) & (out <= 1.0)))   # sigmoid range

    # Parity vs. pure-JAX f32 reference (tolerance covers bf16 matmul weights).
    ref = reference_forward(src, raw, cfg)
    err = float(jnp.max(jnp.abs(out - ref)))
    assert err < 3e-2, f"max |kernel - reference| = {err}"

    print("KERNEL_OK")
</pallas_src>

<mosaic_0001>
module attributes {stable_mosaic.version = 11 : i64} {
  func.func @_transformer_kernel(%arg0: memref<16x4xf32, #tpu.memory_space<vmem>>, %arg1: memref<16x16xf32, #tpu.memory_space<vmem>>, %arg2: memref<4x32xf32, #tpu.memory_space<vmem>>, %arg3: memref<1x32xf32, #tpu.memory_space<vmem>>, %arg4: memref<2x4x32x32xbf16, #tpu.memory_space<vmem>>, %arg5: memref<2x4x1x32xf32, #tpu.memory_space<vmem>>, %arg6: memref<2x32x64xbf16, #tpu.memory_space<vmem>>, %arg7: memref<2x1x64xf32, #tpu.memory_space<vmem>>, %arg8: memref<2x64x32xbf16, #tpu.memory_space<vmem>>, %arg9: memref<2x5x1x32xf32, #tpu.memory_space<vmem>>, %arg10: memref<2x1x32xf32, #tpu.memory_space<vmem>>, %arg11: memref<2x4x32x32xbf16, #tpu.memory_space<vmem>>, %arg12: memref<2x4x1x32xf32, #tpu.memory_space<vmem>>, %arg13: memref<2x4x32x32xbf16, #tpu.memory_space<vmem>>, %arg14: memref<2x4x1x32xf32, #tpu.memory_space<vmem>>, %arg15: memref<2x32x64xbf16, #tpu.memory_space<vmem>>, %arg16: memref<2x1x64xf32, #tpu.memory_space<vmem>>, %arg17: memref<2x64x32xbf16, #tpu.memory_space<vmem>>, %arg18: memref<2x7x1x32xf32, #tpu.memory_space<vmem>>, %arg19: memref<2x1x32xf32, #tpu.memory_space<vmem>>, %arg20: memref<1x32xf32, #tpu.memory_space<vmem>>, %arg21: memref<1x1xf32, #tpu.memory_space<vmem>>, %arg22: memref<2x1xf32, #tpu.memory_space<vmem>>) attributes {dimension_semantics = [], scalar_prefetch = 0 : i64, scratch_operands = 0 : i64, tpu.core_type = #tpu.core_type<tc>} {
    %c0 = arith.constant 0 : index
    %c0_0 = arith.constant 0 : index
    %0 = vector.load %arg1[%c0, %c0_0] : memref<16x16xf32, #tpu.memory_space<vmem>>, vector<16x16xf32>
    %c0_1 = arith.constant 0 : index
    %c0_2 = arith.constant 0 : index
    %1 = vector.load %arg0[%c0_1, %c0_2] : memref<16x4xf32, #tpu.memory_space<vmem>>, vector<16x4xf32>
    %c0_3 = arith.constant 0 : index
    %c0_4 = arith.constant 0 : index
    %2 = vector.load %arg2[%c0_3, %c0_4] : memref<4x32xf32, #tpu.memory_space<vmem>>, vector<4x32xf32>
    %cst = arith.constant dense<0.000000e+00> : vector<16x32xf32>
    %3 = tpu.matmul %1, %2, %cst {dimension_numbers = #tpu.dot_dimension_numbers<[1], [0], [0], [1], [0, 0, 1, 1], [], []>} : vector<16x4xf32>, vector<4x32xf32>, vector<16x32xf32> -> vector<16x32xf32>
    %c0_5 = arith.constant 0 : index
    %c0_6 = arith.constant 0 : index
    %4 = vector.load %arg3[%c0_5, %c0_6] : memref<1x32xf32, #tpu.memory_space<vmem>>, vector<1x32xf32>
    %5 = vector.broadcast %4 : vector<1x32xf32> to vector<16x32xf32>
    %6 = arith.addf %3, %5 : vector<16x32xf32>
    %c0_7 = arith.constant 0 : index
    %c0_8 = arith.constant 0 : index
    %c0_9 = arith.constant 0 : index
    %c0_10 = arith.constant 0 : index
    %7 = vector.load %arg4[%c0_7, %c0_8, %c0_9, %c0_10] : memref<2x4x32x32xbf16, #tpu.memory_space<vmem>>, vector<1x1x32x32xbf16>
    %8 = vector.shape_cast %7 : vector<1x1x32x32xbf16> to vector<32x32xbf16>
    %9 = arith.truncf %6 : vector<16x32xf32> to vector<16x32xbf16>
    %cst_11 = arith.constant dense<0.000000e+00> : vector<16x32xf32>
    %10 = tpu.matmul %9, %8, %cst_11 {dimension_numbers = #tpu.dot_dimension_numbers<[1], [0], [0], [1], [0, 0, 1, 1], [], []>} : vector<16x32xbf16>, vector<32x32xbf16>, vector<16x32xf32> -> vector<16x32xf32>
    %c0_12 = arith.constant 0 : index
    %c0_13 = arith.constant 0 : index
    %c0_14 = arith.constant 0 : index
    %c0_15 = arith.constant 0 : index
    %11 = vector.load %arg5[%c0_12, %c0_13, %c0_14, %c0_15] : memref<2x4x1x32xf32, #tpu.memory_space<vmem>>, vector<1x1x1x32xf32>
    %12 = vector.shape_cast %11 : vector<1x1x1x32xf32> to vector<1x32xf32>
    %13 = vector.broadcast %12 : vector<1x32xf32> to vector<16x32xf32>
    %14 = arith.addf %10, %13 : vector<16x32xf32>
    %c0_16 = arith.constant 0 : index
    %c1 = arith.constant 1 : index
    %c0_17 = arith.constant 0 : index
    %c0_18 = arith.constant 0 : index
    %15 = vector.load %arg4[%c0_16, %c1, %c0_17, %c0_18] : memref<2x4x32x32xbf16, #tpu.memory_space<vmem>>, vector<1x1x32x32xbf16>
    %16 = vector.shape_cast %15 : vector<1x1x32x32xbf16> to vector<32x32xbf16>
    %17 = arith.truncf %6 : vector<16x32xf32> to vector<16x32xbf16>
    %cst_19 = arith.constant dense<0.000000e+00> : vector<16x32xf32>
    %18 = tpu.matmul %17, %16, %cst_19 {dimension_numbers = #tpu.dot_dimension_numbers<[1], [0], [0], [1], [0, 0, 1, 1], [], []>} : vector<16x32xbf16>, vector<32x32xbf16>, vector<16x32xf32> -> vector<16x32xf32>
    %c0_20 = arith.constant 0 : index
    %c1_21 = arith.constant 1 : index
    %c0_22 = arith.constant 0 : index
    %c0_23 = arith.constant 0 : index
    %19 = vector.load %arg5[%c0_20, %c1_21, %c0_22, %c0_23] : memref<2x4x1x32xf32, #tpu.memory_space<vmem>>, vector<1x1x1x32xf32>
    %20 = vector.shape_cast %19 : vector<1x1x1x32xf32> to vector<1x32xf32>
    %21 = vector.broadcast %20 : vector<1x32xf32> to vector<16x32xf32>
    %22 = arith.addf %18, %21 : vector<16x32xf32>
    %c0_24 = arith.constant 0 : index
    %c2 = arith.constant 2 : index
    %c0_25 = arith.constant 0 : index
    %c0_26 = arith.constant 0 : index
    %23 = vector.load %arg4[%c0_24, %c2, %c0_25, %c0_26] : memref<2x4x32x32xbf16, #tpu.memory_space<vmem>>, vector<1x1x32x32xbf16>
    %24 = vector.shape_cast %23 : vector<1x1x32x32xbf16> to vector<32x32xbf16>
    %25 = arith.truncf %6 : vector<16x32xf32> to vector<16x32xbf16>
    %cst_27 = arith.constant dense<0.000000e+00> : vector<16x32xf32>
    %26 = tpu.matmul %25, %24, %cst_27 {dimension_numbers = #tpu.dot_dimension_numbers<[1], [0], [0], [1], [0, 0, 1, 1], [], []>} : vector<16x32xbf16>, vector<32x32xbf16>, vector<16x32xf32> -> vector<16x32xf32>
    %c0_28 = arith.constant 0 : index
    %c2_29 = arith.constant 2 : index
    %c0_30 = arith.constant 0 : index
    %c0_31 = arith.constant 0 : index
    %27 = vector.load %arg5[%c0_28, %c2_29, %c0_30, %c0_31] : memref<2x4x1x32xf32, #tpu.memory_space<vmem>>, vector<1x1x1x32xf32>
    %28 = vector.shape_cast %27 : vector<1x1x1x32xf32> to vector<1x32xf32>
    %29 = vector.broadcast %28 : vector<1x32xf32> to vector<16x32xf32>
    %30 = arith.addf %26, %29 : vector<16x32xf32>
    %31 = vector.extract_strided_slice %14 {offsets = [0, 0], sizes = [16, 8], strides = [1, 1]} : vector<16x32xf32> to vector<16x8xf32>
    %32 = arith.truncf %31 : vector<16x8xf32> to vector<16x8xbf16>
    %33 = vector.extract_strided_slice %22 {offsets = [0, 0], sizes = [16, 8], strides = [1, 1]} : vector<16x32xf32> to vector<16x8xf32>
    %34 = arith.truncf %33 : vector<16x8xf32> to vector<16x8xbf16>
    %35 = vector.extract_strided_slice %30 {offsets = [0, 0], sizes = [16, 8], strides = [1, 1]} : vector<16x32xf32> to vector<16x8xf32>
    %36 = arith.truncf %35 : vector<16x8xf32> to vector<16x8xbf16>
    %cst_32 = arith.constant dense<0.000000e+00> : vector<16x16xf32>
    %37 = tpu.matmul %32, %34, %cst_32 {dimension_numbers = #tpu.dot_dimension_numbers<[1], [1], [0], [0], [0, 0, 1, 0], [], []>} : vector<16x8xbf16>, vector<16x8xbf16>, vector<16x16xf32> -> vector<16x16xf32>
    %38 = arith.addf %37, %0 : vector<16x16xf32>
    %cst_33 = arith.constant dense<0xFF800000> : vector<16xf32>
    %39 = vector.multi_reduction <maximumf>, %38, %cst_33 [1] : vector<16x16xf32> to vector<16xf32>
    %40 = vector.shape_cast %39 : vector<16xf32> to vector<16x1xf32>
    %41 = vector.broadcast %40 : vector<16x1xf32> to vector<16x16xf32>
    %42 = arith.subf %38, %41 : vector<16x16xf32>
    %43 = math.exp %42 : vector<16x16xf32>
    %cst_34 = arith.constant dense<0.000000e+00> : vector<16xf32>
    %44 = vector.multi_reduction <add>, %43, %cst_34 [1] : vector<16x16xf32> to vector<16xf32>
    %45 = vector.shape_cast %44 : vector<16xf32> to vector<16x1xf32>
    %46 = vector.broadcast %45 : vector<16x1xf32> to vector<16x16xf32>
    %47 = arith.divf %43, %46 : vector<16x16xf32>
    %48 = arith.truncf %47 : vector<16x16xf32> to vector<16x16xbf16>
    %cst_35 = arith.constant dense<0.000000e+00> : vector<16x8xf32>
    %49 = tpu.matmul %48, %36, %cst_35 {dimension_numbers = #tpu.dot_dimension_numbers<[1], [0], [0], [1], [0, 0, 1, 1], [], []>} : vector<16x16xbf16>, vector<16x8xbf16>, vector<16x8xf32> -> vector<16x8xf32>
    %50 = vector.extract_strided_slice %14 {offsets = [0, 8], sizes = [16, 8], strides = [1, 1]} : vector<16x32xf32> to vector<16x8xf32>
    %51 = arith.truncf %50 : vector<16x8xf32> to vector<16x8xbf16>
    %52 = vector.extract_strided_slice %22 {offsets = [0, 8], sizes = [16, 8], strides = [1, 1]} : vector<16x32xf32> to vector<16x8xf32>
    %53 = arith.truncf %52 : vector<16x8xf32> to vector<16x8xbf16>
    %54 = vector.extract_strided_slice %30 {offsets = [0, 8], sizes = [16, 8], strides = [1, 1]} : vector<16x32xf32> to vector<16x8xf32>
    %55 = arith.truncf %54 : vector<16x8xf32> to vector<16x8xbf16>
    %cst_36 = arith.constant dense<0.000000e+00> : vector<16x16xf32>
    %56 = tpu.matmul %51, %53, %cst_36 {dimension_numbers = #tpu.dot_dimension_numbers<[1], [1], [0], [0], [0, 0, 1, 0], [], []>} : vector<16x8xbf16>, vector<16x8xbf16>, vector<16x16xf32> -> vector<16x16xf32>
    %57 = arith.addf %56, %0 : vector<16x16xf32>
    %cst_37 = arith.constant dense<0xFF800000> : vector<16xf32>
    %58 = vector.multi_reduction <maximumf>, %57, %cst_37 [1] : vector<16x16xf32> to vector<16xf32>
    %59 = vector.shape_cast %58 : vector<16xf32> to vector<16x1xf32>
    %60 = vector.broadcast %59 : vector<16x1xf32> to vector<16x16xf32>
    %61 = arith.subf %57, %60 : vector<16x16xf32>
    %62 = math.exp %61 : vector<16x16xf32>
    %cst_38 = arith.constant dense<0.000000e+00> : vector<16xf32>
    %63 = vector.multi_reduction <add>, %62, %cst_38 [1] : vector<16x16xf32> to vector<16xf32>
    %64 = vector.shape_cast %63 : vector<16xf32> to vector<16x1xf32>
    %65 = vector.broadcast %64 : vector<16x1xf32> to vector<16x16xf32>
    %66 = arith.divf %62, %65 : vector<16x16xf32>
    %67 = arith.truncf %66 : vector<16x16xf32> to vector<16x16xbf16>
    %cst_39 = arith.constant dense<0.000000e+00> : vector<16x8xf32>
    %68 = tpu.matmul %67, %55, %cst_39 {dimension_numbers = #tpu.dot_dimension_numbers<[1], [0], [0], [1], [0, 0, 1, 1], [], []>} : vector<16x16xbf16>, vector<16x8xbf16>, vector<16x8xf32> -> vector<16x8xf32>
    %69 = vector.extract_strided_slice %14 {offsets = [0, 16], sizes = [16, 8], strides = [1, 1]} : vector<16x32xf32> to vector<16x8xf32>
    %70 = arith.truncf %69 : vector<16x8xf32> to vector<16x8xbf16>
    %71 = vector.extract_strided_slice %22 {offsets = [0, 16], sizes = [16, 8], strides = [1, 1]} : vector<16x32xf32> to vector<16x8xf32>
    %72 = arith.truncf %71 : vector<16x8xf32> to vector<16x8xbf16>
    %73 = vector.extract_strided_slice %30 {offsets = [0, 16], sizes = [16, 8], strides = [1, 1]} : vector<16x32xf32> to vector<16x8xf32>
    %74 = arith.truncf %73 : vector<16x8xf32> to vector<16x8xbf16>
    %cst_40 = arith.constant dense<0.000000e+00> : vector<16x16xf32>
    %75 = tpu.matmul %70, %72, %cst_40 {dimension_numbers = #tpu.dot_dimension_numbers<[1], [1], [0], [0], [0, 0, 1, 0], [], []>} : vector<16x8xbf16>, vector<16x8xbf16>, vector<16x16xf32> -> vector<16x16xf32>
    %76 = arith.addf %75, %0 : vector<16x16xf32>
    %cst_41 = arith.constant dense<0xFF800000> : vector<16xf32>
    %77 = vector.multi_reduction <maximumf>, %76, %cst_41 [1] : vector<16x16xf32> to vector<16xf32>
    %78 = vector.shape_cast %77 : vector<16xf32> to vector<16x1xf32>
    %79 = vector.broadcast %78 : vector<16x1xf32> to vector<16x16xf32>
    %80 = arith.subf %76, %79 : vector<16x16xf32>
    %81 = math.exp %80 : vector<16x16xf32>
    %cst_42 = arith.constant dense<0.000000e+00> : vector<16xf32>
    %82 = vector.multi_reduction <add>, %81, %cst_42 [1] : vector<16x16xf32> to vector<16xf32>
    %83 = vector.shape_cast %82 : vector<16xf32> to vector<16x1xf32>
    %84 = vector.broadcast %83 : vector<16x1xf32> to vector<16x16xf32>
    %85 = arith.divf %81, %84 : vector<16x16xf32>
    %86 = arith.truncf %85 : vector<16x16xf32> to vector<16x16xbf16>
    %cst_43 = arith.constant dense<0.000000e+00> : vector<16x8xf32>
    %87 = tpu.matmul %86, %74, %cst_43 {dimension_numbers = #tpu.dot_dimension_numbers<[1], [0], [0], [1], [0, 0, 1, 1], [], []>} : vector<16x16xbf16>, vector<16x8xbf16>, vector<16x8xf32> -> vector<16x8xf32>
    %88 = vector.extract_strided_slice %14 {offsets = [0, 24], sizes = [16, 8], strides = [1, 1]} : vector<16x32xf32> to vector<16x8xf32>
    %89 = arith.truncf %88 : vector<16x8xf32> to vector<16x8xbf16>
    %90 = vector.extract_strided_slice %22 {offsets = [0, 24], sizes = [16, 8], strides = [1, 1]} : vector<16x32xf32> to vector<16x8xf32>
    %91 = arith.truncf %90 : vector<16x8xf32> to vector<16x8xbf16>
    %92 = vector.extract_strided_slice %30 {offsets = [0, 24], sizes = [16, 8], strides = [1, 1]} : vector<16x32xf32> to vector<16x8xf32>
    %93 = arith.truncf %92 : vector<16x8xf32> to vector<16x8xbf16>
    %cst_44 = arith.constant dense<0.000000e+00> : vector<16x16xf32>
    %94 = tpu.matmul %89, %91, %cst_44 {dimension_numbers = #tpu.dot_dimension_numbers<[1], [1], [0], [0], [0, 0, 1, 0], [], []>} : vector<16x8xbf16>, vector<16x8xbf16>, vector<16x16xf32> -> vector<16x16xf32>
    %95 = arith.addf %94, %0 : vector<16x16xf32>
    %cst_45 = arith.constant dense<0xFF800000> : vector<16xf32>
    %96 = vector.multi_reduction <maximumf>, %95, %cst_45 [1] : vector<16x16xf32> to vector<16xf32>
    %97 = vector.shape_cast %96 : vector<16xf32> to vector<16x1xf32>
    %98 = vector.broadcast %97 : vector<16x1xf32> to vector<16x16xf32>
    %99 = arith.subf %95, %98 : vector<16x16xf32>
    %100 = math.exp %99 : vector<16x16xf32>
    %cst_46 = arith.constant dense<0.000000e+00> : vector<16xf32>
    %101 = vector.multi_reduction <add>, %100, %cst_46 [1] : vector<16x16xf32> to vector<16xf32>
    %102 = vector.shape_cast %101 : vector<16xf32> to vector<16x1xf32>
    %103 = vector.broadcast %102 : vector<16x1xf32> to vector<16x16xf32>
    %104 = arith.divf %100, %103 : vector<16x16xf32>
    %105 = arith.truncf %104 : vector<16x16xf32> to vector<16x16xbf16>
    %cst_47 = arith.constant dense<0.000000e+00> : vector<16x8xf32>
    %106 = tpu.matmul %105, %93, %cst_47 {dimension_numbers = #tpu.dot_dimension_numbers<[1], [0], [0], [1], [0, 0, 1, 1], [], []>} : vector<16x16xbf16>, vector<16x8xbf16>, vector<16x8xf32> -> vector<16x8xf32>
    %107 = tpu.concatenate %49, %68, %87, %106 in 1 : vector<16x8xf32>, vector<16x8xf32>, vector<16x8xf32>, vector<16x8xf32> -> vector<16x32xf32>
    %c0_48 = arith.constant 0 : index
    %c3 = arith.constant 3 : index
    %c0_49 = arith.constant 0 : index
    %c0_50 = arith.constant 0 : index
    %108 = vector.load %arg4[%c0_48, %c3, %c0_49, %c0_50] : memref<2x4x32x32xbf16, #tpu.memory_space<vmem>>, vector<1x1x32x32xbf16>
    %109 = vector.shape_cast %108 : vector<1x1x32x32xbf16> to vector<32x32xbf16>
    %110 = arith.truncf %107 : vector<16x32xf32> to vector<16x32xbf16>
    %cst_51 = arith.constant dense<0.000000e+00> : vector<16x32xf32>
    %111 = tpu.matmul %110, %109, %cst_51 {dimension_numbers = #tpu.dot_dimension_numbers<[1], [0], [0], [1], [0, 0, 1, 1], [], []>} : vector<16x32xbf16>, vector<32x32xbf16>, vector<16x32xf32> -> vector<16x32xf32>
    %c0_52 = arith.constant 0 : index
    %c3_53 = arith.constant 3 : index
    %c0_54 = arith.constant 0 : index
    %c0_55 = arith.constant 0 : index
    %112 = vector.load %arg5[%c0_52, %c3_53, %c0_54, %c0_55] : memref<2x4x1x32xf32, #tpu.memory_space<vmem>>, vector<1x1x1x32xf32>
    %113 = vector.shape_cast %112 : vector<1x1x1x32xf32> to vector<1x32xf32>
    %114 = vector.broadcast %113 : vector<1x32xf32> to vector<16x32xf32>
    %115 = arith.addf %111, %114 : vector<16x32xf32>
    %116 = arith.addf %6, %115 : vector<16x32xf32>
    %c0_56 = arith.constant 0 : index
    %c0_57 = arith.constant 0 : index
    %c0_58 = arith.constant 0 : index
    %c0_59 = arith.constant 0 : index
    %117 = vector.load %arg9[%c0_56, %c0_57, %c0_58, %c0_59] : memref<2x5x1x32xf32, #tpu.memory_space<vmem>>, vector<1x1x1x32xf32>
    %118 = vector.shape_cast %117 : vector<1x1x1x32xf32> to vector<1x32xf32>
    %c0_60 = arith.constant 0 : index
    %c1_61 = arith.constant 1 : index
    %c0_62 = arith.constant 0 : index
    %c0_63 = arith.constant 0 : index
    %119 = vector.load %arg9[%c0_60, %c1_61, %c0_62, %c0_63] : memref<2x5x1x32xf32, #tpu.memory_space<vmem>>, vector<1x1x1x32xf32>
    %120 = vector.shape_cast %119 : vector<1x1x1x32xf32> to vector<1x32xf32>
    %cst_64 = arith.constant dense<0.000000e+00> : vector<16xf32>
    %121 = vector.multi_reduction <add>, %116, %cst_64 [1] : vector<16x32xf32> to vector<16xf32>
    %122 = vector.shape_cast %121 : vector<16xf32> to vector<16x1xf32>
    %cst_65 = arith.constant 3.200000e+01 : f32
    %123 = vector.broadcast %cst_65 : f32 to vector<16x1xf32>
    %124 = arith.divf %122, %123 : vector<16x1xf32>
    %125 = vector.broadcast %124 : vector<16x1xf32> to vector<16x32xf32>
    %126 = arith.subf %116, %125 : vector<16x32xf32>
    %127 = arith.mulf %126, %126 : vector<16x32xf32>
    %cst_66 = arith.constant dense<0.000000e+00> : vector<16xf32>
    %128 = vector.multi_reduction <add>, %127, %cst_66 [1] : vector<16x32xf32> to vector<16xf32>
    %129 = vector.shape_cast %128 : vector<16xf32> to vector<16x1xf32>
    %cst_67 = arith.constant 3.200000e+01 : f32
    %130 = vector.broadcast %cst_67 : f32 to vector<16x1xf32>
    %131 = arith.divf %129, %130 : vector<16x1xf32>
    %cst_68 = arith.constant 9.99999974E-6 : f32
    %132 = vector.broadcast %cst_68 : f32 to vector<16x1xf32>
    %133 = arith.addf %131, %132 : vector<16x1xf32>
    %134 = math.rsqrt %133 : vector<16x1xf32>
    %135 = vector.broadcast %134 : vector<16x1xf32> to vector<16x32xf32>
    %136 = arith.mulf %126, %135 : vector<16x32xf32>
    %137 = vector.broadcast %118 : vector<1x32xf32> to vector<16x32xf32>
    %138 = arith.mulf %136, %137 : vector<16x32xf32>
    %139 = vector.broadcast %120 : vector<1x32xf32> to vector<16x32xf32>
    %140 = arith.addf %138, %139 : vector<16x32xf32>
    %c0_69 = arith.constant 0 : index
    %c2_70 = arith.constant 2 : index
    %c0_71 = arith.constant 0 : index
    %c0_72 = arith.constant 0 : index
    %141 = vector.load %arg9[%c0_69, %c2_70, %c0_71, %c0_72] : memref<2x5x1x32xf32, #tpu.memory_space<vmem>>, vector<1x1x1x32xf32>
    %142 = vector.shape_cast %141 : vector<1x1x1x32xf32> to vector<1x32xf32>
    %c0_73 = arith.constant 0 : index
    %c0_74 = arith.constant 0 : index
    %c0_75 = arith.constant 0 : index
    %143 = vector.load %arg6[%c0_73, %c0_74, %c0_75] : memref<2x32x64xbf16, #tpu.memory_space<vmem>>, vector<1x32x64xbf16>
    %144 = vector.shape_cast %143 : vector<1x32x64xbf16> to vector<32x64xbf16>
    %145 = arith.truncf %140 : vector<16x32xf32> to vector<16x32xbf16>
    %cst_76 = arith.constant dense<0.000000e+00> : vector<16x64xf32>
    %146 = tpu.matmul %145, %144, %cst_76 {dimension_numbers = #tpu.dot_dimension_numbers<[1], [0], [0], [1], [0, 0, 1, 1], [], []>} : vector<16x32xbf16>, vector<32x64xbf16>, vector<16x64xf32> -> vector<16x64xf32>
    %c0_77 = arith.constant 0 : index
    %c0_78 = arith.constant 0 : index
    %c0_79 = arith.constant 0 : index
    %147 = vector.load %arg7[%c0_77, %c0_78, %c0_79] : memref<2x1x64xf32, #tpu.memory_space<vmem>>, vector<1x1x64xf32>
    %148 = vector.shape_cast %147 : vector<1x1x64xf32> to vector<1x64xf32>
    %149 = vector.broadcast %148 : vector<1x64xf32> to vector<16x64xf32>
    %150 = arith.addf %146, %149 : vector<16x64xf32>
    %cst_80 = arith.constant 0.000000e+00 : f32
    %151 = vector.broadcast %cst_80 : f32 to vector<16x64xf32>
    %152 = arith.maximumf %150, %151 : vector<16x64xf32>
    %c0_81 = arith.constant 0 : index
    %c0_82 = arith.constant 0 : index
    %c0_83 = arith.constant 0 : index
    %153 = vector.load %arg8[%c0_81, %c0_82, %c0_83] : memref<2x64x32xbf16, #tpu.memory_space<vmem>>, vector<1x64x32xbf16>
    %154 = vector.shape_cast %153 : vector<1x64x32xbf16> to vector<64x32xbf16>
    %155 = arith.truncf %152 : vector<16x64xf32> to vector<16x64xbf16>
    %cst_84 = arith.constant dense<0.000000e+00> : vector<16x32xf32>
    %156 = tpu.matmul %155, %154, %cst_84 {dimension_numbers = #tpu.dot_dimension_numbers<[1], [0], [0], [1], [0, 0, 1, 1], [], []>} : vector<16x64xbf16>, vector<64x32xbf16>, vector<16x32xf32> -> vector<16x32xf32>
    %157 = vector.broadcast %142 : vector<1x32xf32> to vector<16x32xf32>
    %158 = arith.addf %156, %157 : vector<16x32xf32>
    %159 = arith.addf %140, %158 : vector<16x32xf32>
    %c0_85 = arith.constant 0 : index
    %c3_86 = arith.constant 3 : index
    %c0_87 = arith.constant 0 : index
    %c0_88 = arith.constant 0 : index
    %160 = vector.load %arg9[%c0_85, %c3_86, %c0_87, %c0_88] : memref<2x5x1x32xf32, #tpu.memory_space<vmem>>, vector<1x1x1x32xf32>
    %161 = vector.shape_cast %160 : vector<1x1x1x32xf32> to vector<1x32xf32>
    %c0_89 = arith.constant 0 : index
    %c4 = arith.constant 4 : index
    %c0_90 = arith.constant 0 : index
    %c0_91 = arith.constant 0 : index
    %162 = vector.load %arg9[%c0_89, %c4, %c0_90, %c0_91] : memref<2x5x1x32xf32, #tpu.memory_space<vmem>>, vector<1x1x1x32xf32>
    %163 = vector.shape_cast %162 : vector<1x1x1x32xf32> to vector<1x32xf32>
    %cst_92 = arith.constant dense<0.000000e+00> : vector<16xf32>
    %164 = vector.multi_reduction <add>, %159, %cst_92 [1] : vector<16x32xf32> to vector<16xf32>
    %165 = vector.shape_cast %164 : vector<16xf32> to vector<16x1xf32>
    %cst_93 = arith.constant 3.200000e+01 : f32
    %166 = vector.broadcast %cst_93 : f32 to vector<16x1xf32>
    %167 = arith.divf %165, %166 : vector<16x1xf32>
    %168 = vector.broadcast %167 : vector<16x1xf32> to vector<16x32xf32>
    %169 = arith.subf %159, %168 : vector<16x32xf32>
    %170 = arith.mulf %169, %169 : vector<16x32xf32>
    %cst_94 = arith.constant dense<0.000000e+00> : vector<16xf32>
    %171 = vector.multi_reduction <add>, %170, %cst_94 [1] : vector<16x32xf32> to vector<16xf32>
    %172 = vector.shape_cast %171 : vector<16xf32> to vector<16x1xf32>
    %cst_95 = arith.constant 3.200000e+01 : f32
    %173 = vector.broadcast %cst_95 : f32 to vector<16x1xf32>
    %174 = arith.divf %172, %173 : vector<16x1xf32>
    %cst_96 = arith.constant 9.99999974E-6 : f32
    %175 = vector.broadcast %cst_96 : f32 to vector<16x1xf32>
    %176 = arith.addf %174, %175 : vector<16x1xf32>
    %177 = math.rsqrt %176 : vector<16x1xf32>
    %178 = vector.broadcast %177 : vector<16x1xf32> to vector<16x32xf32>
    %179 = arith.mulf %169, %178 : vector<16x32xf32>
    %180 = vector.broadcast %161 : vector<1x32xf32> to vector<16x32xf32>
    %181 = arith.mulf %179, %180 : vector<16x32xf32>
    %182 = vector.broadcast %163 : vector<1x32xf32> to vector<16x32xf32>
    %183 = arith.addf %181, %182 : vector<16x32xf32>
    %c1_97 = arith.constant 1 : index
    %c0_98 = arith.constant 0 : index
    %c0_99 = arith.constant 0 : index
    %c0_100 = arith.constant 0 : index
    %184 = vector.load %arg4[%c1_97, %c0_98, %c0_99, %c0_100] : memref<2x4x32x32xbf16, #tpu.memory_space<vmem>>, vector<1x1x32x32xbf16>
    %185 = vector.shape_cast %184 : vector<1x1x32x32xbf16> to vector<32x32xbf16>
    %186 = arith.truncf %183 : vector<16x32xf32> to vector<16x32xbf16>
    %cst_101 = arith.constant dense<0.000000e+00> : vector<16x32xf32>
    %187 = tpu.matmul %186, %185, %cst_101 {dimension_numbers = #tpu.dot_dimension_numbers<[1], [0], [0], [1], [0, 0, 1, 1], [], []>} : vector<16x32xbf16>, vector<32x32xbf16>, vector<16x32xf32> -> vector<16x32xf32>
    %c1_102 = arith.constant 1 : index
    %c0_103 = arith.constant 0 : index
    %c0_104 = arith.constant 0 : index
    %c0_105 = arith.constant 0 : index
    %188 = vector.load %arg5[%c1_102, %c0_103, %c0_104, %c0_105] : memref<2x4x1x32xf32, #tpu.memory_space<vmem>>, vector<1x1x1x32xf32>
    %189 = vector.shape_cast %188 : vector<1x1x1x32xf32> to vector<1x32xf32>
    %190 = vector.broadcast %189 : vector<1x32xf32> to vector<16x32xf32>
    %191 = arith.addf %187, %190 : vector<16x32xf32>
    %c1_106 = arith.constant 1 : index
    %c1_107 = arith.constant 1 : index
    %c0_108 = arith.constant 0 : index
    %c0_109 = arith.constant 0 : index
    %192 = vector.load %arg4[%c1_106, %c1_107, %c0_108, %c0_109] : memref<2x4x32x32xbf16, #tpu.memory_space<vmem>>, vector<1x1x32x32xbf16>
    %193 = vector.shape_cast %192 : vector<1x1x32x32xbf16> to vector<32x32xbf16>
    %194 = arith.truncf %183 : vector<16x32xf32> to vector<16x32xbf16>
    %cst_110 = arith.constant dense<0.000000e+00> : vector<16x32xf32>
    %195 = tpu.matmul %194, %193, %cst_110 {dimension_numbers = #tpu.dot_dimension_numbers<[1], [0], [0], [1], [0, 0, 1, 1], [], []>} : vector<16x32xbf16>, vector<32x32xbf16>, vector<16x32xf32> -> vector<16x32xf32>
    %c1_111 = arith.constant 1 : index
    %c1_112 = arith.constant 1 : index
    %c0_113 = arith.constant 0 : index
    %c0_114 = arith.constant 0 : index
    %196 = vector.load %arg5[%c1_111, %c1_112, %c0_113, %c0_114] : memref<2x4x1x32xf32, #tpu.memory_space<vmem>>, vector<1x1x1x32xf32>
    %197 = vector.shape_cast %196 : vector<1x1x1x32xf32> to vector<1x32xf32>
    %198 = vector.broadcast %197 : vector<1x32xf32> to vector<16x32xf32>
    %199 = arith.addf %195, %198 : vector<16x32xf32>
    %c1_115 = arith.constant 1 : index
    %c2_116 = arith.constant 2 : index
    %c0_117 = arith.constant 0 : index
    %c0_118 = arith.constant 0 : index
    %200 = vector.load %arg4[%c1_115, %c2_116, %c0_117, %c0_118] : memref<2x4x32x32xbf16, #tpu.memory_space<vmem>>, vector<1x1x32x32xbf16>
    %201 = vector.shape_cast %200 : vector<1x1x32x32xbf16> to vector<32x32xbf16>
    %202 = arith.truncf %183 : vector<16x32xf32> to vector<16x32xbf16>
    %cst_119 = arith.constant dense<0.000000e+00> : vector<16x32xf32>
    %203 = tpu.matmul %202, %201, %cst_119 {dimension_numbers = #tpu.dot_dimension_numbers<[1], [0], [0], [1], [0, 0, 1, 1], [], []>} : vector<16x32xbf16>, vector<32x32xbf16>, vector<16x32xf32> -> vector<16x32xf32>
    %c1_120 = arith.constant 1 : index
    %c2_121 = arith.constant 2 : index
    %c0_122 = arith.constant 0 : index
    %c0_123 = arith.constant 0 : index
    %204 = vector.load %arg5[%c1_120, %c2_121, %c0_122, %c0_123] : memref<2x4x1x32xf32, #tpu.memory_space<vmem>>, vector<1x1x1x32xf32>
    %205 = vector.shape_cast %204 : vector<1x1x1x32xf32> to vector<1x32xf32>
    %206 = vector.broadcast %205 : vector<1x32xf32> to vector<16x32xf32>
    %207 = arith.addf %203, %206 : vector<16x32xf32>
    %208 = vector.extract_strided_slice %191 {offsets = [0, 0], sizes = [16, 8], strides = [1, 1]} : vector<16x32xf32> to vector<16x8xf32>
    %209 = arith.truncf %208 : vector<16x8xf32> to vector<16x8xbf16>
    %210 = vector.extract_strided_slice %199 {offsets = [0, 0], sizes = [16, 8], strides = [1, 1]} : vector<16x32xf32> to vector<16x8xf32>
    %211 = arith.truncf %210 : vector<16x8xf32> to vector<16x8xbf16>
    %212 = vector.extract_strided_slice %207 {offsets = [0, 0], sizes = [16, 8], strides = [1, 1]} : vector<16x32xf32> to vector<16x8xf32>
    %213 = arith.truncf %212 : vector<16x8xf32> to vector<16x8xbf16>
    %cst_124 = arith.constant dense<0.000000e+00> : vector<16x16xf32>
    %214 = tpu.matmul %209, %211, %cst_124 {dimension_numbers = #tpu.dot_dimension_numbers<[1], [1], [0], [0], [0, 0, 1, 0], [], []>} : vector<16x8xbf16>, vector<16x8xbf16>, vector<16x16xf32> -> vector<16x16xf32>
    %215 = arith.addf %214, %0 : vector<16x16xf32>
    %cst_125 = arith.constant dense<0xFF800000> : vector<16xf32>
    %216 = vector.multi_reduction <maximumf>, %215, %cst_125 [1] : vector<16x16xf32> to vector<16xf32>
    %217 = vector.shape_cast %216 : vector<16xf32> to vector<16x1xf32>
    %218 = vector.broadcast %217 : vector<16x1xf32> to vector<16x16xf32>
    %219 = arith.subf %215, %218 : vector<16x16xf32>
    %220 = math.exp %219 : vector<16x16xf32>
    %cst_126 = arith.constant dense<0.000000e+00> : vector<16xf32>
    %221 = vector.multi_reduction <add>, %220, %cst_126 [1] : vector<16x16xf32> to vector<16xf32>
    %222 = vector.shape_cast %221 : vector<16xf32> to vector<16x1xf32>
    %223 = vector.broadcast %222 : vector<16x1xf32> to vector<16x16xf32>
    %224 = arith.divf %220, %223 : vector<16x16xf32>
    %225 = arith.truncf %224 : vector<16x16xf32> to vector<16x16xbf16>
    %cst_127 = arith.constant dense<0.000000e+00> : vector<16x8xf32>
    %226 = tpu.matmul %225, %213, %cst_127 {dimension_numbers = #tpu.dot_dimension_numbers<[1], [0], [0], [1], [0, 0, 1, 1], [], []>} : vector<16x16xbf16>, vector<16x8xbf16>, vector<16x8xf32> -> vector<16x8xf32>
    %227 = vector.extract_strided_slice %191 {offsets = [0, 8], sizes = [16, 8], strides = [1, 1]} : vector<16x32xf32> to vector<16x8xf32>
    %228 = arith.truncf %227 : vector<16x8xf32> to vector<16x8xbf16>
    %229 = vector.extract_strided_slice %199 {offsets = [0, 8], sizes = [16, 8], strides = [1, 1]} : vector<16x32xf32> to vector<16x8xf32>
    %230 = arith.truncf %229 : vector<16x8xf32> to vector<16x8xbf16>
    %231 = vector.extract_strided_slice %207 {offsets = [0, 8], sizes = [16, 8], strides = [1, 1]} : vector<16x32xf32> to vector<16x8xf32>
    %232 = arith.truncf %231 : vector<16x8xf32> to vector<16x8xbf16>
    %cst_128 = arith.constant dense<0.000000e+00> : vector<16x16xf32>
    %233 = tpu.matmul %228, %230, %cst_128 {dimension_numbers = #tpu.dot_dimension_numbers<[1], [1], [0], [0], [0, 0, 1, 0], [], []>} : vector<16x8xbf16>, vector<16x8xbf16>, vector<16x16xf32> -> vector<16x16xf32>
    %234 = arith.addf %233, %0 : vector<16x16xf32>
    %cst_129 = arith.constant dense<0xFF800000> : vector<16xf32>
    %235 = vector.multi_reduction <maximumf>, %234, %cst_129 [1] : vector<16x16xf32> to vector<16xf32>
    %236 = vector.shape_cast %235 : vector<16xf32> to vector<16x1xf32>
    %237 = vector.broadcast %236 : vector<16x1xf32> to vector<16x16xf32>
    %238 = arith.subf %234, %237 : vector<16x16xf32>
    %239 = math.exp %238 : vector<16x16xf32>
    %cst_130 = arith.constant dense<0.000000e+00> : vector<16xf32>
    %240 = vector.multi_reduction <add>, %239, %cst_130 [1] : vector<16x16xf32> to vector<16xf32>
    %241 = vector.shape_cast %240 : vector<16xf32> to vector<16x1xf32>
    %242 = vector.broadcast %241 : vector<16x1xf32> to vector<16x16xf32>
    %243 = arith.divf %239, %242 : vector<16x16xf32>
    %244 = arith.truncf %243 : vector<16x16xf32> to vector<16x16xbf16>
    %cst_131 = arith.constant dense<0.000000e+00> : vector<16x8xf32>
    %245 = tpu.matmul %244, %232, %cst_131 {dimension_numbers = #tpu.dot_dimension_numbers<[1], [0], [0], [1], [0, 0, 1, 1], [], []>} : vector<16x16xbf16>, vector<16x8xbf16>, vector<16x8xf32> -> vector<16x8xf32>
    %246 = vector.extract_strided_slice %191 {offsets = [0, 16], sizes = [16, 8], strides = [1, 1]} : vector<16x32xf32> to vector<16x8xf32>
    %247 = arith.truncf %246 : vector<16x8xf32> to vector<16x8xbf16>
    %248 = vector.extract_strided_slice %199 {offsets = [0, 16], sizes = [16, 8], strides = [1, 1]} : vector<16x32xf32> to vector<16x8xf32>
    %249 = arith.truncf %248 : vector<16x8xf32> to vector<16x8xbf16>
    %250 = vector.extract_strided_slice %207 {offsets = [0, 16], sizes = [16, 8], strides = [1, 1]} : vector<16x32xf32> to vector<16x8xf32>
    %251 = arith.truncf %250 : vector<16x8xf32> to vector<16x8xbf16>
    %cst_132 = arith.constant dense<0.000000e+00> : vector<16x16xf32>
    %252 = tpu.matmul %247, %249, %cst_132 {dimension_numbers = #tpu.dot_dimension_numbers<[1], [1], [0], [0], [0, 0, 1, 0], [], []>} : vector<16x8xbf16>, vector<16x8xbf16>, vector<16x16xf32> -> vector<16x16xf32>
    %253 = arith.addf %252, %0 : vector<16x16xf32>
    %cst_133 = arith.constant dense<0xFF800000> : vector<16xf32>
    %254 = vector.multi_reduction <maximumf>, %253, %cst_133 [1] : vector<16x16xf32> to vector<16xf32>
    %255 = vector.shape_cast %254 : vector<16xf32> to vector<16x1xf32>
    %256 = vector.broadcast %255 : vector<16x1xf32> to vector<16x16xf32>
    %257 = arith.subf %253, %256 : vector<16x16xf32>
    %258 = math.exp %257 : vector<16x16xf32>
    %cst_134 = arith.constant dense<0.000000e+00> : vector<16xf32>
    %259 = vector.multi_reduction <add>, %258, %cst_134 [1] : vector<16x16xf32> to vector<16xf32>
    %260 = vector.shape_cast %259 : vector<16xf32> to vector<16x1xf32>
    %261 = vector.broadcast %260 : vector<16x1xf32> to vector<16x16xf32>
    %262 = arith.divf %258, %261 : vector<16x16xf32>
    %263 = arith.truncf %262 : vector<16x16xf32> to vector<16x16xbf16>
    %cst_135 = arith.constant dense<0.000000e+00> : vector<16x8xf32>
    %264 = tpu.matmul %263, %251, %cst_135 {dimension_numbers = #tpu.dot_dimension_numbers<[1], [0], [0], [1], [0, 0, 1, 1], [], []>} : vector<16x16xbf16>, vector<16x8xbf16>, vector<16x8xf32> -> vector<16x8xf32>
    %265 = vector.extract_strided_slice %191 {offsets = [0, 24], sizes = [16, 8], strides = [1, 1]} : vector<16x32xf32> to vector<16x8xf32>
    %266 = arith.truncf %265 : vector<16x8xf32> to vector<16x8xbf16>
    %267 = vector.extract_strided_slice %199 {offsets = [0, 24], sizes = [16, 8], strides = [1, 1]} : vector<16x32xf32> to vector<16x8xf32>
    %268 = arith.truncf %267 : vector<16x8xf32> to vector<16x8xbf16>
    %269 = vector.extract_strided_slice %207 {offsets = [0, 24], sizes = [16, 8], strides = [1, 1]} : vector<16x32xf32> to vector<16x8xf32>
    %270 = arith.truncf %269 : vector<16x8xf32> to vector<16x8xbf16>
    %cst_136 = arith.constant dense<0.000000e+00> : vector<16x16xf32>
    %271 = tpu.matmul %266, %268, %cst_136 {dimension_numbers = #tpu.dot_dimension_numbers<[1], [1], [0], [0], [0, 0, 1, 0], [], []>} : vector<16x8xbf16>, vector<16x8xbf16>, vector<16x16xf32> -> vector<16x16xf32>
    %272 = arith.addf %271, %0 : vector<16x16xf32>
    %cst_137 = arith.constant dense<0xFF800000> : vector<16xf32>
    %273 = vector.multi_reduction <maximumf>, %272, %cst_137 [1] : vector<16x16xf32> to vector<16xf32>
    %274 = vector.shape_cast %273 : vector<16xf32> to vector<16x1xf32>
    %275 = vector.broadcast %274 : vector<16x1xf32> to vector<16x16xf32>
    %276 = arith.subf %272, %275 : vector<16x16xf32>
    %277 = math.exp %276 : vector<16x16xf32>
    %cst_138 = arith.constant dense<0.000000e+00> : vector<16xf32>
    %278 = vector.multi_reduction <add>, %277, %cst_138 [1] : vector<16x16xf32> to vector<16xf32>
    %279 = vector.shape_cast %278 : vector<16xf32> to vector<16x1xf32>
    %280 = vector.broadcast %279 : vector<16x1xf32> to vector<16x16xf32>
    %281 = arith.divf %277, %280 : vector<16x16xf32>
    %282 = arith.truncf %281 : vector<16x16xf32> to vector<16x16xbf16>
    %cst_139 = arith.constant dense<0.000000e+00> : vector<16x8xf32>
    %283 = tpu.matmul %282, %270, %cst_139 {dimension_numbers = #tpu.dot_dimension_numbers<[1], [0], [0], [1], [0, 0, 1, 1], [], []>} : vector<16x16xbf16>, vector<16x8xbf16>, vector<16x8xf32> -> vector<16x8xf32>
    %284 = tpu.concatenate %226, %245, %264, %283 in 1 : vector<16x8xf32>, vector<16x8xf32>, vector<16x8xf32>, vector<16x8xf32> -> vector<16x32xf32>
    %c1_140 = arith.constant 1 : index
    %c3_141 = arith.constant 3 : index
    %c0_142 = arith.constant 0 : index
    %c0_143 = arith.constant 0 : index
    %285 = vector.load %arg4[%c1_140, %c3_141, %c0_142, %c0_143] : memref<2x4x32x32xbf16, #tpu.memory_space<vmem>>, vector<1x1x32x32xbf16>
    %286 = vector.shape_cast %285 : vector<1x1x32x32xbf16> to vector<32x32xbf16>
    %287 = arith.truncf %284 : vector<16x32xf32> to vector<16x32xbf16>
    %cst_144 = arith.constant dense<0.000000e+00> : vector<16x32xf32>
    %288 = tpu.matmul %287, %286, %cst_144 {dimension_numbers = #tpu.dot_dimension_numbers<[1], [0], [0], [1], [0, 0, 1, 1], [], []>} : vector<16x32xbf16>, vector<32x32xbf16>, vector<16x32xf32> -> vector<16x32xf32>
    %c1_145 = arith.constant 1 : index
    %c3_146 = arith.constant 3 : index
    %c0_147 = arith.constant 0 : index
    %c0_148 = arith.constant 0 : index
    %289 = vector.load %arg5[%c1_145, %c3_146, %c0_147, %c0_148] : memref<2x4x1x32xf32, #tpu.memory_space<vmem>>, vector<1x1x1x32xf32>
    %290 = vector.shape_cast %289 : vector<1x1x1x32xf32> to vector<1x32xf32>
    %291 = vector.broadcast %290 : vector<1x32xf32> to vector<16x32xf32>
    %292 = arith.addf %288, %291 : vector<16x32xf32>
    %293 = arith.addf %183, %292 : vector<16x32xf32>
    %c1_149 = arith.constant 1 : index
    %c0_150 = arith.constant 0 : index
    %c0_151 = arith.constant 0 : index
    %c0_152 = arith.constant 0 : index
    %294 = vector.load %arg9[%c1_149, %c0_150, %c0_151, %c0_152] : memref<2x5x1x32xf32, #tpu.memory_space<vmem>>, vector<1x1x1x32xf32>
    %295 = vector.shape_cast %294 : vector<1x1x1x32xf32> to vector<1x32xf32>
    %c1_153 = arith.constant 1 : index
    %c1_154 = arith.constant 1 : index
    %c0_155 = arith.constant 0 : index
    %c0_156 = arith.constant 0 : index
    %296 = vector.load %arg9[%c1_153, %c1_154, %c0_155, %c0_156] : memref<2x5x1x32xf32, #tpu.memory_space<vmem>>, vector<1x1x1x32xf32>
    %297 = vector.shape_cast %296 : vector<1x1x1x32xf32> to vector<1x32xf32>
    %cst_157 = arith.constant dense<0.000000e+00> : vector<16xf32>
    %298 = vector.multi_reduction <add>, %293, %cst_157 [1] : vector<16x32xf32> to vector<16xf32>
    %299 = vector.shape_cast %298 : vector<16xf32> to vector<16x1xf32>
    %cst_158 = arith.constant 3.200000e+01 : f32
    %300 = vector.broadcast %cst_158 : f32 to vector<16x1xf32>
    %301 = arith.divf %299, %300 : vector<16x1xf32>
    %302 = vector.broadcast %301 : vector<16x1xf32> to vector<16x32xf32>
    %303 = arith.subf %293, %302 : vector<16x32xf32>
    %304 = arith.mulf %303, %303 : vector<16x32xf32>
    %cst_159 = arith.constant dense<0.000000e+00> : vector<16xf32>
    %305 = vector.multi_reduction <add>, %304, %cst_159 [1] : vector<16x32xf32> to vector<16xf32>
    %306 = vector.shape_cast %305 : vector<16xf32> to vector<16x1xf32>
    %cst_160 = arith.constant 3.200000e+01 : f32
    %307 = vector.broadcast %cst_160 : f32 to vector<16x1xf32>
    %308 = arith.divf %306, %307 : vector<16x1xf32>
    %cst_161 = arith.constant 9.99999974E-6 : f32
    %309 = vector.broadcast %cst_161 : f32 to vector<16x1xf32>
    %310 = arith.addf %308, %309 : vector<16x1xf32>
    %311 = math.rsqrt %310 : vector<16x1xf32>
    %312 = vector.broadcast %311 : vector<16x1xf32> to vector<16x32xf32>
    %313 = arith.mulf %303, %312 : vector<16x32xf32>
    %314 = vector.broadcast %295 : vector<1x32xf32> to vector<16x32xf32>
    %315 = arith.mulf %313, %314 : vector<16x32xf32>
    %316 = vector.broadcast %297 : vector<1x32xf32> to vector<16x32xf32>
    %317 = arith.addf %315, %316 : vector<16x32xf32>
    %c1_162 = arith.constant 1 : index
    %c2_163 = arith.constant 2 : index
    %c0_164 = arith.constant 0 : index
    %c0_165 = arith.constant 0 : index
    %318 = vector.load %arg9[%c1_162, %c2_163, %c0_164, %c0_165] : memref<2x5x1x32xf32, #tpu.memory_space<vmem>>, vector<1x1x1x32xf32>
    %319 = vector.shape_cast %318 : vector<1x1x1x32xf32> to vector<1x32xf32>
    %c1_166 = arith.constant 1 : index
    %c0_167 = arith.constant 0 : index
    %c0_168 = arith.constant 0 : index
    %320 = vector.load %arg6[%c1_166, %c0_167, %c0_168] : memref<2x32x64xbf16, #tpu.memory_space<vmem>>, vector<1x32x64xbf16>
    %321 = vector.shape_cast %320 : vector<1x32x64xbf16> to vector<32x64xbf16>
    %322 = arith.truncf %317 : vector<16x32xf32> to vector<16x32xbf16>
    %cst_169 = arith.constant dense<0.000000e+00> : vector<16x64xf32>
    %323 = tpu.matmul %322, %321, %cst_169 {dimension_numbers = #tpu.dot_dimension_numbers<[1], [0], [0], [1], [0, 0, 1, 1], [], []>} : vector<16x32xbf16>, vector<32x64xbf16>, vector<16x64xf32> -> vector<16x64xf32>
    %c1_170 = arith.constant 1 : index
    %c0_171 = arith.constant 0 : index
    %c0_172 = arith.constant 0 : index
    %324 = vector.load %arg7[%c1_170, %c0_171, %c0_172] : memref<2x1x64xf32, #tpu.memory_space<vmem>>, vector<1x1x64xf32>
    %325 = vector.shape_cast %324 : vector<1x1x64xf32> to vector<1x64xf32>
    %326 = vector.broadcast %325 : vector<1x64xf32> to vector<16x64xf32>
    %327 = arith.addf %323, %326 : vector<16x64xf32>
    %cst_173 = arith.constant 0.000000e+00 : f32
    %328 = vector.broadcast %cst_173 : f32 to vector<16x64xf32>
    %329 = arith.maximumf %327, %328 : vector<16x64xf32>
    %c1_174 = arith.constant 1 : index
    %c0_175 = arith.constant 0 : index
    %c0_176 = arith.constant 0 : index
    %330 = vector.load %arg8[%c1_174, %c0_175, %c0_176] : memref<2x64x32xbf16, #tpu.memory_space<vmem>>, vector<1x64x32xbf16>
    %331 = vector.shape_cast %330 : vector<1x64x32xbf16> to vector<64x32xbf16>
    %332 = arith.truncf %329 : vector<16x64xf32> to vector<16x64xbf16>
    %cst_177 = arith.constant dense<0.000000e+00> : vector<16x32xf32>
    %333 = tpu.matmul %332, %331, %cst_177 {dimension_numbers = #tpu.dot_dimension_numbers<[1], [0], [0], [1], [0, 0, 1, 1], [], []>} : vector<16x64xbf16>, vector<64x32xbf16>, vector<16x32xf32> -> vector<16x32xf32>
    %334 = vector.broadcast %319 : vector<1x32xf32> to vector<16x32xf32>
    %335 = arith.addf %333, %334 : vector<16x32xf32>
    %336 = arith.addf %317, %335 : vector<16x32xf32>
    %c1_178 = arith.constant 1 : index
    %c3_179 = arith.constant 3 : index
    %c0_180 = arith.constant 0 : index
    %c0_181 = arith.constant 0 : index
    %337 = vector.load %arg9[%c1_178, %c3_179, %c0_180, %c0_181] : memref<2x5x1x32xf32, #tpu.memory_space<vmem>>, vector<1x1x1x32xf32>
    %338 = vector.shape_cast %337 : vector<1x1x1x32xf32> to vector<1x32xf32>
    %c1_182 = arith.constant 1 : index
    %c4_183 = arith.constant 4 : index
    %c0_184 = arith.constant 0 : index
    %c0_185 = arith.constant 0 : index
    %339 = vector.load %arg9[%c1_182, %c4_183, %c0_184, %c0_185] : memref<2x5x1x32xf32, #tpu.memory_space<vmem>>, vector<1x1x1x32xf32>
    %340 = vector.shape_cast %339 : vector<1x1x1x32xf32> to vector<1x32xf32>
    %cst_186 = arith.constant dense<0.000000e+00> : vector<16xf32>
    %341 = vector.multi_reduction <add>, %336, %cst_186 [1] : vector<16x32xf32> to vector<16xf32>
    %342 = vector.shape_cast %341 : vector<16xf32> to vector<16x1xf32>
    %cst_187 = arith.constant 3.200000e+01 : f32
    %343 = vector.broadcast %cst_187 : f32 to vector<16x1xf32>
    %344 = arith.divf %342, %343 : vector<16x1xf32>
    %345 = vector.broadcast %344 : vector<16x1xf32> to vector<16x32xf32>
    %346 = arith.subf %336, %345 : vector<16x32xf32>
    %347 = arith.mulf %346, %346 : vector<16x32xf32>
    %cst_188 = arith.constant dense<0.000000e+00> : vector<16xf32>
    %348 = vector.multi_reduction <add>, %347, %cst_188 [1] : vector<16x32xf32> to vector<16xf32>
    %349 = vector.shape_cast %348 : vector<16xf32> to vector<16x1xf32>
    %cst_189 = arith.constant 3.200000e+01 : f32
    %350 = vector.broadcast %cst_189 : f32 to vector<16x1xf32>
    %351 = arith.divf %349, %350 : vector<16x1xf32>
    %cst_190 = arith.constant 9.99999974E-6 : f32
    %352 = vector.broadcast %cst_190 : f32 to vector<16x1xf32>
    %353 = arith.addf %351, %352 : vector<16x1xf32>
    %354 = math.rsqrt %353 : vector<16x1xf32>
    %355 = vector.broadcast %354 : vector<16x1xf32> to vector<16x32xf32>
    %356 = arith.mulf %346, %355 : vector<16x32xf32>
    %357 = vector.broadcast %338 : vector<1x32xf32> to vector<16x32xf32>
    %358 = arith.mulf %356, %357 : vector<16x32xf32>
    %359 = vector.broadcast %340 : vector<1x32xf32> to vector<16x32xf32>
    %360 = arith.addf %358, %359 : vector<16x32xf32>
    %c0_191 = arith.constant 0 : index
    %c0_192 = arith.constant 0 : index
    %c0_193 = arith.constant 0 : index
    %361 = vector.load %arg10[%c0_191, %c0_192, %c0_193] : memref<2x1x32xf32, #tpu.memory_space<vmem>>, vector<1x1x32xf32>
    %362 = vector.shape_cast %361 : vector<1x1x32xf32> to vector<1x32xf32>
    %c1_194 = arith.constant 1 : index
    %c0_195 = arith.constant 0 : index
    %c0_196 = arith.constant 0 : index
    %363 = vector.load %arg10[%c1_194, %c0_195, %c0_196] : memref<2x1x32xf32, #tpu.memory_space<vmem>>, vector<1x1x32xf32>
    %364 = vector.shape_cast %363 : vector<1x1x32xf32> to vector<1x32xf32>
    %cst_197 = arith.constant dense<0.000000e+00> : vector<16xf32>
    %365 = vector.multi_reduction <add>, %360, %cst_197 [1] : vector<16x32xf32> to vector<16xf32>
    %366 = vector.shape_cast %365 : vector<16xf32> to vector<16x1xf32>
    %cst_198 = arith.constant 3.200000e+01 : f32
    %367 = vector.broadcast %cst_198 : f32 to vector<16x1xf32>
    %368 = arith.divf %366, %367 : vector<16x1xf32>
    %369 = vector.broadcast %368 : vector<16x1xf32> to vector<16x32xf32>
    %370 = arith.subf %360, %369 : vector<16x32xf32>
    %371 = arith.mulf %370, %370 : vector<16x32xf32>
    %cst_199 = arith.constant dense<0.000000e+00> : vector<16xf32>
    %372 = vector.multi_reduction <add>, %371, %cst_199 [1] : vector<16x32xf32> to vector<16xf32>
    %373 = vector.shape_cast %372 : vector<16xf32> to vector<16x1xf32>
    %cst_200 = arith.constant 3.200000e+01 : f32
    %374 = vector.broadcast %cst_200 : f32 to vector<16x1xf32>
    %375 = arith.divf %373, %374 : vector<16x1xf32>
    %cst_201 = arith.constant 9.99999974E-6 : f32
    %376 = vector.broadcast %cst_201 : f32 to vector<16x1xf32>
    %377 = arith.addf %375, %376 : vector<16x1xf32>
    %378 = math.rsqrt %377 : vector<16x1xf32>
    %379 = vector.broadcast %378 : vector<16x1xf32> to vector<16x32xf32>
    %380 = arith.mulf %370, %379 : vector<16x32xf32>
    %381 = vector.broadcast %362 : vector<1x32xf32> to vector<16x32xf32>
    %382 = arith.mulf %380, %381 : vector<16x32xf32>
    %383 = vector.broadcast %364 : vector<1x32xf32> to vector<16x32xf32>
    %384 = arith.addf %382, %383 : vector<16x32xf32>
    %c0_202 = arith.constant 0 : index
    %c0_203 = arith.constant 0 : index
    %c0_204 = arith.constant 0 : index
    %c0_205 = arith.constant 0 : index
    %385 = vector.load %arg11[%c0_202, %c0_203, %c0_204, %c0_205] : memref<2x4x32x32xbf16, #tpu.memory_space<vmem>>, vector<1x1x32x32xbf16>
    %386 = vector.shape_cast %385 : vector<1x1x32x32xbf16> to vector<32x32xbf16>
    %387 = arith.truncf %6 : vector<16x32xf32> to vector<16x32xbf16>
    %cst_206 = arith.constant dense<0.000000e+00> : vector<16x32xf32>
    %388 = tpu.matmul %387, %386, %cst_206 {dimension_numbers = #tpu.dot_dimension_numbers<[1], [0], [0], [1], [0, 0, 1, 1], [], []>} : vector<16x32xbf16>, vector<32x32xbf16>, vector<16x32xf32> -> vector<16x32xf32>
    %c0_207 = arith.constant 0 : index
    %c0_208 = arith.constant 0 : index
    %c0_209 = arith.constant 0 : index
    %c0_210 = arith.constant 0 : index
    %389 = vector.load %arg12[%c0_207, %c0_208, %c0_209, %c0_210] : memref<2x4x1x32xf32, #tpu.memory_space<vmem>>, vector<1x1x1x32xf32>
    %390 = vector.shape_cast %389 : vector<1x1x1x32xf32> to vector<1x32xf32>
    %391 = vector.broadcast %390 : vector<1x32xf32> to vector<16x32xf32>
    %392 = arith.addf %388, %391 : vector<16x32xf32>
    %c0_211 = arith.constant 0 : index
    %c1_212 = arith.constant 1 : index
    %c0_213 = arith.constant 0 : index
    %c0_214 = arith.constant 0 : index
    %393 = vector.load %arg11[%c0_211, %c1_212, %c0_213, %c0_214] : memref<2x4x32x32xbf16, #tpu.memory_space<vmem>>, vector<1x1x32x32xbf16>
    %394 = vector.shape_cast %393 : vector<1x1x32x32xbf16> to vector<32x32xbf16>
    %395 = arith.truncf %6 : vector<16x32xf32> to vector<16x32xbf16>
    %cst_215 = arith.constant dense<0.000000e+00> : vector<16x32xf32>
    %396 = tpu.matmul %395, %394, %cst_215 {dimension_numbers = #tpu.dot_dimension_numbers<[1], [0], [0], [1], [0, 0, 1, 1], [], []>} : vector<16x32xbf16>, vector<32x32xbf16>, vector<16x32xf32> -> vector<16x32xf32>
    %c0_216 = arith.constant 0 : index
    %c1_217 = arith.constant 1 : index
    %c0_218 = arith.constant 0 : index
    %c0_219 = arith.constant 0 : index
    %397 = vector.load %arg12[%c0_216, %c1_217, %c0_218, %c0_219] : memref<2x4x1x32xf32, #tpu.memory_space<vmem>>, vector<1x1x1x32xf32>
    %398 = vector.shape_cast %397 : vector<1x1x1x32xf32> to vector<1x32xf32>
    %399 = vector.broadcast %398 : vector<1x32xf32> to vector<16x32xf32>
    %400 = arith.addf %396, %399 : vector<16x32xf32>
    %c0_220 = arith.constant 0 : index
    %c2_221 = arith.constant 2 : index
    %c0_222 = arith.constant 0 : index
    %c0_223 = arith.constant 0 : index
    %401 = vector.load %arg11[%c0_220, %c2_221, %c0_222, %c0_223] : memref<2x4x32x32xbf16, #tpu.memory_space<vmem>>, vector<1x1x32x32xbf16>
    %402 = vector.shape_cast %401 : vector<1x1x32x32xbf16> to vector<32x32xbf16>
    %403 = arith.truncf %6 : vector<16x32xf32> to vector<16x32xbf16>
    %cst_224 = arith.constant dense<0.000000e+00> : vector<16x32xf32>
    %404 = tpu.matmul %403, %402, %cst_224 {dimension_numbers = #tpu.dot_dimension_numbers<[1], [0], [0], [1], [0, 0, 1, 1], [], []>} : vector<16x32xbf16>, vector<32x32xbf16>, vector<16x32xf32> -> vector<16x32xf32>
    %c0_225 = arith.constant 0 : index
    %c2_226 = arith.constant 2 : index
    %c0_227 = arith.constant 0 : index
    %c0_228 = arith.constant 0 : index
    %405 = vector.load %arg12[%c0_225, %c2_226, %c0_227, %c0_228] : memref<2x4x1x32xf32, #tpu.memory_space<vmem>>, vector<1x1x1x32xf32>
    %406 = vector.shape_cast %405 : vector<1x1x1x32xf32> to vector<1x32xf32>
    %407 = vector.broadcast %406 : vector<1x32xf32> to vector<16x32xf32>
    %408 = arith.addf %404, %407 : vector<16x32xf32>
    %409 = vector.extract_strided_slice %392 {offsets = [0, 0], sizes = [16, 8], strides = [1, 1]} : vector<16x32xf32> to vector<16x8xf32>
    %410 = arith.truncf %409 : vector<16x8xf32> to vector<16x8xbf16>
    %411 = vector.extract_strided_slice %400 {offsets = [0, 0], sizes = [16, 8], strides = [1, 1]} : vector<16x32xf32> to vector<16x8xf32>
    %412 = arith.truncf %411 : vector<16x8xf32> to vector<16x8xbf16>
    %413 = vector.extract_strided_slice %408 {offsets = [0, 0], sizes = [16, 8], strides = [1, 1]} : vector<16x32xf32> to vector<16x8xf32>
    %414 = arith.truncf %413 : vector<16x8xf32> to vector<16x8xbf16>
    %cst_229 = arith.constant dense<0.000000e+00> : vector<16x16xf32>
    %415 = tpu.matmul %410, %412, %cst_229 {dimension_numbers = #tpu.dot_dimension_numbers<[1], [1], [0], [0], [0, 0, 1, 0], [], []>} : vector<16x8xbf16>, vector<16x8xbf16>, vector<16x16xf32> -> vector<16x16xf32>
    %416 = arith.addf %415, %0 : vector<16x16xf32>
    %cst_230 = arith.constant dense<0xFF800000> : vector<16xf32>
    %417 = vector.multi_reduction <maximumf>, %416, %cst_230 [1] : vector<16x16xf32> to vector<16xf32>
    %418 = vector.shape_cast %417 : vector<16xf32> to vector<16x1xf32>
    %419 = vector.broadcast %418 : vector<16x1xf32> to vector<16x16xf32>
    %420 = arith.subf %416, %419 : vector<16x16xf32>
    %421 = math.exp %420 : vector<16x16xf32>
    %cst_231 = arith.constant dense<0.000000e+00> : vector<16xf32>
    %422 = vector.multi_reduction <add>, %421, %cst_231 [1] : vector<16x16xf32> to vector<16xf32>
    %423 = vector.shape_cast %422 : vector<16xf32> to vector<16x1xf32>
    %424 = vector.broadcast %423 : vector<16x1xf32> to vector<16x16xf32>
    %425 = arith.divf %421, %424 : vector<16x16xf32>
    %426 = arith.truncf %425 : vector<16x16xf32> to vector<16x16xbf16>
    %cst_232 = arith.constant dense<0.000000e+00> : vector<16x8xf32>
    %427 = tpu.matmul %426, %414, %cst_232 {dimension_numbers = #tpu.dot_dimension_numbers<[1], [0], [0], [1], [0, 0, 1, 1], [], []>} : vector<16x16xbf16>, vector<16x8xbf16>, vector<16x8xf32> -> vector<16x8xf32>
    %428 = vector.extract_strided_slice %392 {offsets = [0, 8], sizes = [16, 8], strides = [1, 1]} : vector<16x32xf32> to vector<16x8xf32>
    %429 = arith.truncf %428 : vector<16x8xf32> to vector<16x8xbf16>
    %430 = vector.extract_strided_slice %400 {offsets = [0, 8], sizes = [16, 8], strides = [1, 1]} : vector<16x32xf32> to vector<16x8xf32>
    %431 = arith.truncf %430 : vector<16x8xf32> to vector<16x8xbf16>
    %432 = vector.extract_strided_slice %408 {offsets = [0, 8], sizes = [16, 8], strides = [1, 1]} : vector<16x32xf32> to vector<16x8xf32>
    %433 = arith.truncf %432 : vector<16x8xf32> to vector<16x8xbf16>
    %cst_233 = arith.constant dense<0.000000e+00> : vector<16x16xf32>
    %434 = tpu.matmul %429, %431, %cst_233 {dimension_numbers = #tpu.dot_dimension_numbers<[1], [1], [0], [0], [0, 0, 1, 0], [], []>} : vector<16x8xbf16>, vector<16x8xbf16>, vector<16x16xf32> -> vector<16x16xf32>
    %435 = arith.addf %434, %0 : vector<16x16xf32>
    %cst_234 = arith.constant dense<0xFF800000> : vector<16xf32>
    %436 = vector.multi_reduction <maximumf>, %435, %cst_234 [1] : vector<16x16xf32> to vector<16xf32>
    %437 = vector.shape_cast %436 : vector<16xf32> to vector<16x1xf32>
    %438 = vector.broadcast %437 : vector<16x1xf32> to vector<16x16xf32>
    %439 = arith.subf %435, %438 : vector<16x16xf32>
    %440 = math.exp %439 : vector<16x16xf32>
    %cst_235 = arith.constant dense<0.000000e+00> : vector<16xf32>
    %441 = vector.multi_reduction <add>, %440, %cst_235 [1] : vector<16x16xf32> to vector<16xf32>
    %442 = vector.shape_cast %441 : vector<16xf32> to vector<16x1xf32>
    %443 = vector.broadcast %442 : vector<16x1xf32> to vector<16x16xf32>
    %444 = arith.divf %440, %443 : vector<16x16xf32>
    %445 = arith.truncf %444 : vector<16x16xf32> to vector<16x16xbf16>
    %cst_236 = arith.constant dense<0.000000e+00> : vector<16x8xf32>
    %446 = tpu.matmul %445, %433, %cst_236 {dimension_numbers = #tpu.dot_dimension_numbers<[1], [0], [0], [1], [0, 0, 1, 1], [], []>} : vector<16x16xbf16>, vector<16x8xbf16>, vector<16x8xf32> -> vector<16x8xf32>
    %447 = vector.extract_strided_slice %392 {offsets = [0, 16], sizes = [16, 8], strides = [1, 1]} : vector<16x32xf32> to vector<16x8xf32>
    %448 = arith.truncf %447 : vector<16x8xf32> to vector<16x8xbf16>
    %449 = vector.extract_strided_slice %400 {offsets = [0, 16], sizes = [16, 8], strides = [1, 1]} : vector<16x32xf32> to vector<16x8xf32>
    %450 = arith.truncf %449 : vector<16x8xf32> to vector<16x8xbf16>
    %451 = vector.extract_strided_slice %408 {offsets = [0, 16], sizes = [16, 8], strides = [1, 1]} : vector<16x32xf32> to vector<16x8xf32>
    %452 = arith.truncf %451 : vector<16x8xf32> to vector<16x8xbf16>
    %cst_237 = arith.constant dense<0.000000e+00> : vector<16x16xf32>
    %453 = tpu.matmul %448, %450, %cst_237 {dimension_numbers = #tpu.dot_dimension_numbers<[1], [1], [0], [0], [0, 0, 1, 0], [], []>} : vector<16x8xbf16>, vector<16x8xbf16>, vector<16x16xf32> -> vector<16x16xf32>
    %454 = arith.addf %453, %0 : vector<16x16xf32>
    %cst_238 = arith.constant dense<0xFF800000> : vector<16xf32>
    %455 = vector.multi_reduction <maximumf>, %454, %cst_238 [1] : vector<16x16xf32> to vector<16xf32>
    %456 = vector.shape_cast %455 : vector<16xf32> to vector<16x1xf32>
    %457 = vector.broadcast %456 : vector<16x1xf32> to vector<16x16xf32>
    %458 = arith.subf %454, %457 : vector<16x16xf32>
    %459 = math.exp %458 : vector<16x16xf32>
    %cst_239 = arith.constant dense<0.000000e+00> : vector<16xf32>
    %460 = vector.multi_reduction <add>, %459, %cst_239 [1] : vector<16x16xf32> to vector<16xf32>
    %461 = vector.shape_cast %460 : vector<16xf32> to vector<16x1xf32>
    %462 = vector.broadcast %461 : vector<16x1xf32> to vector<16x16xf32>
    %463 = arith.divf %459, %462 : vector<16x16xf32>
    %464 = arith.truncf %463 : vector<16x16xf32> to vector<16x16xbf16>
    %cst_240 = arith.constant dense<0.000000e+00> : vector<16x8xf32>
    %465 = tpu.matmul %464, %452, %cst_240 {dimension_numbers = #tpu.dot_dimension_numbers<[1], [0], [0], [1], [0, 0, 1, 1], [], []>} : vector<16x16xbf16>, vector<16x8xbf16>, vector<16x8xf32> -> vector<16x8xf32>
    %466 = vector.extract_strided_slice %392 {offsets = [0, 24], sizes = [16, 8], strides = [1, 1]} : vector<16x32xf32> to vector<16x8xf32>
    %467 = arith.truncf %466 : vector<16x8xf32> to vector<16x8xbf16>
    %468 = vector.extract_strided_slice %400 {offsets = [0, 24], sizes = [16, 8], strides = [1, 1]} : vector<16x32xf32> to vector<16x8xf32>
    %469 = arith.truncf %468 : vector<16x8xf32> to vector<16x8xbf16>
    %470 = vector.extract_strided_slice %408 {offsets = [0, 24], sizes = [16, 8], strides = [1, 1]} : vector<16x32xf32> to vector<16x8xf32>
    %471 = arith.truncf %470 : vector<16x8xf32> to vector<16x8xbf16>
    %cst_241 = arith.constant dense<0.000000e+00> : vector<16x16xf32>
    %472 = tpu.matmul %467, %469, %cst_241 {dimension_numbers = #tpu.dot_dimension_numbers<[1], [1], [0], [0], [0, 0, 1, 0], [], []>} : vector<16x8xbf16>, vector<16x8xbf16>, vector<16x16xf32> -> vector<16x16xf32>
    %473 = arith.addf %472, %0 : vector<16x16xf32>
    %cst_242 = arith.constant dense<0xFF800000> : vector<16xf32>
    %474 = vector.multi_reduction <maximumf>, %473, %cst_242 [1] : vector<16x16xf32> to vector<16xf32>
    %475 = vector.shape_cast %474 : vector<16xf32> to vector<16x1xf32>
    %476 = vector.broadcast %475 : vector<16x1xf32> to vector<16x16xf32>
    %477 = arith.subf %473, %476 : vector<16x16xf32>
    %478 = math.exp %477 : vector<16x16xf32>
    %cst_243 = arith.constant dense<0.000000e+00> : vector<16xf32>
    %479 = vector.multi_reduction <add>, %478, %cst_243 [1] : vector<16x16xf32> to vector<16xf32>
    %480 = vector.shape_cast %479 : vector<16xf32> to vector<16x1xf32>
    %481 = vector.broadcast %480 : vector<16x1xf32> to vector<16x16xf32>
    %482 = arith.divf %478, %481 : vector<16x16xf32>
    %483 = arith.truncf %482 : vector<16x16xf32> to vector<16x16xbf16>
    %cst_244 = arith.constant dense<0.000000e+00> : vector<16x8xf32>
    %484 = tpu.matmul %483, %471, %cst_244 {dimension_numbers = #tpu.dot_dimension_numbers<[1], [0], [0], [1], [0, 0, 1, 1], [], []>} : vector<16x16xbf16>, vector<16x8xbf16>, vector<16x8xf32> -> vector<16x8xf32>
    %485 = tpu.concatenate %427, %446, %465, %484 in 1 : vector<16x8xf32>, vector<16x8xf32>, vector<16x8xf32>, vector<16x8xf32> -> vector<16x32xf32>
    %c0_245 = arith.constant 0 : index
    %c3_246 = arith.constant 3 : index
    %c0_247 = arith.constant 0 : index
    %c0_248 = arith.constant 0 : index
    %486 = vector.load %arg11[%c0_245, %c3_246, %c0_247, %c0_248] : memref<2x4x32x32xbf16, #tpu.memory_space<vmem>>, vector<1x1x32x32xbf16>
    %487 = vector.shape_cast %486 : vector<1x1x32x32xbf16> to vector<32x32xbf16>
    %488 = arith.truncf %485 : vector<16x32xf32> to vector<16x32xbf16>
    %cst_249 = arith.constant dense<0.000000e+00> : vector<16x32xf32>
    %489 = tpu.matmul %488, %487, %cst_249 {dimension_numbers = #tpu.dot_dimension_numbers<[1], [0], [0], [1], [0, 0, 1, 1], [], []>} : vector<16x32xbf16>, vector<32x32xbf16>, vector<16x32xf32> -> vector<16x32xf32>
    %c0_250 = arith.constant 0 : index
    %c3_251 = arith.constant 3 : index
    %c0_252 = arith.constant 0 : index
    %c0_253 = arith.constant 0 : index
    %490 = vector.load %arg12[%c0_250, %c3_251, %c0_252, %c0_253] : memref<2x4x1x32xf32, #tpu.memory_space<vmem>>, vector<1x1x1x32xf32>
    %491 = vector.shape_cast %490 : vector<1x1x1x32xf32> to vector<1x32xf32>
    %492 = vector.broadcast %491 : vector<1x32xf32> to vector<16x32xf32>
    %493 = arith.addf %489, %492 : vector<16x32xf32>
    %494 = arith.addf %6, %493 : vector<16x32xf32>
    %c0_254 = arith.constant 0 : index
    %c0_255 = arith.constant 0 : index
    %c0_256 = arith.constant 0 : index
    %c0_257 = arith.constant 0 : index
    %495 = vector.load %arg18[%c0_254, %c0_255, %c0_256, %c0_257] : memref<2x7x1x32xf32, #tpu.memory_space<vmem>>, vector<1x1x1x32xf32>
    %496 = vector.shape_cast %495 : vector<1x1x1x32xf32> to vector<1x32xf32>
    %c0_258 = arith.constant 0 : index
    %c1_259 = arith.constant 1 : index
    %c0_260 = arith.constant 0 : index
    %c0_261 = arith.constant 0 : index
    %497 = vector.load %arg18[%c0_258, %c1_259, %c0_260, %c0_261] : memref<2x7x1x32xf32, #tpu.memory_space<vmem>>, vector<1x1x1x32xf32>
    %498 = vector.shape_cast %497 : vector<1x1x1x32xf32> to vector<1x32xf32>
    %cst_262 = arith.constant dense<0.000000e+00> : vector<16xf32>
    %499 = vector.multi_reduction <add>, %494, %cst_262 [1] : vector<16x32xf32> to vector<16xf32>
    %500 = vector.shape_cast %499 : vector<16xf32> to vector<16x1xf32>
    %cst_263 = arith.constant 3.200000e+01 : f32
    %501 = vector.broadcast %cst_263 : f32 to vector<16x1xf32>
    %502 = arith.divf %500, %501 : vector<16x1xf32>
    %503 = vector.broadcast %502 : vector<16x1xf32> to vector<16x32xf32>
    %504 = arith.subf %494, %503 : vector<16x32xf32>
    %505 = arith.mulf %504, %504 : vector<16x32xf32>
    %cst_264 = arith.constant dense<0.000000e+00> : vector<16xf32>
    %506 = vector.multi_reduction <add>, %505, %cst_264 [1] : vector<16x32xf32> to vector<16xf32>
    %507 = vector.shape_cast %506 : vector<16xf32> to vector<16x1xf32>
    %cst_265 = arith.constant 3.200000e+01 : f32
    %508 = vector.broadcast %cst_265 : f32 to vector<16x1xf32>
    %509 = arith.divf %507, %508 : vector<16x1xf32>
    %cst_266 = arith.constant 9.99999974E-6 : f32
    %510 = vector.broadcast %cst_266 : f32 to vector<16x1xf32>
    %511 = arith.addf %509, %510 : vector<16x1xf32>
    %512 = math.rsqrt %511 : vector<16x1xf32>
    %513 = vector.broadcast %512 : vector<16x1xf32> to vector<16x32xf32>
    %514 = arith.mulf %504, %513 : vector<16x32xf32>
    %515 = vector.broadcast %496 : vector<1x32xf32> to vector<16x32xf32>
    %516 = arith.mulf %514, %515 : vector<16x32xf32>
    %517 = vector.broadcast %498 : vector<1x32xf32> to vector<16x32xf32>
    %518 = arith.addf %516, %517 : vector<16x32xf32>
    %c0_267 = arith.constant 0 : index
    %c0_268 = arith.constant 0 : index
    %c0_269 = arith.constant 0 : index
    %c0_270 = arith.constant 0 : index
    %519 = vector.load %arg13[%c0_267, %c0_268, %c0_269, %c0_270] : memref<2x4x32x32xbf16, #tpu.memory_space<vmem>>, vector<1x1x32x32xbf16>
    %520 = vector.shape_cast %519 : vector<1x1x32x32xbf16> to vector<32x32xbf16>
    %521 = arith.truncf %518 : vector<16x32xf32> to vector<16x32xbf16>
    %cst_271 = arith.constant dense<0.000000e+00> : vector<16x32xf32>
    %522 = tpu.matmul %521, %520, %cst_271 {dimension_numbers = #tpu.dot_dimension_numbers<[1], [0], [0], [1], [0, 0, 1, 1], [], []>} : vector<16x32xbf16>, vector<32x32xbf16>, vector<16x32xf32> -> vector<16x32xf32>
    %c0_272 = arith.constant 0 : index
    %c0_273 = arith.constant 0 : index
    %c0_274 = arith.constant 0 : index
    %c0_275 = arith.constant 0 : index
    %523 = vector.load %arg14[%c0_272, %c0_273, %c0_274, %c0_275] : memref<2x4x1x32xf32, #tpu.memory_space<vmem>>, vector<1x1x1x32xf32>
    %524 = vector.shape_cast %523 : vector<1x1x1x32xf32> to vector<1x32xf32>
    %525 = vector.broadcast %524 : vector<1x32xf32> to vector<16x32xf32>
    %526 = arith.addf %522, %525 : vector<16x32xf32>
    %c0_276 = arith.constant 0 : index
    %c1_277 = arith.constant 1 : index
    %c0_278 = arith.constant 0 : index
    %c0_279 = arith.constant 0 : index
    %527 = vector.load %arg13[%c0_276, %c1_277, %c0_278, %c0_279] : memref<2x4x32x32xbf16, #tpu.memory_space<vmem>>, vector<1x1x32x32xbf16>
    %528 = vector.shape_cast %527 : vector<1x1x32x32xbf16> to vector<32x32xbf16>
    %529 = arith.truncf %384 : vector<16x32xf32> to vector<16x32xbf16>
    %cst_280 = arith.constant dense<0.000000e+00> : vector<16x32xf32>
    %530 = tpu.matmul %529, %528, %cst_280 {dimension_numbers = #tpu.dot_dimension_numbers<[1], [0], [0], [1], [0, 0, 1, 1], [], []>} : vector<16x32xbf16>, vector<32x32xbf16>, vector<16x32xf32> -> vector<16x32xf32>
    %c0_281 = arith.constant 0 : index
    %c1_282 = arith.constant 1 : index
    %c0_283 = arith.constant 0 : index
    %c0_284 = arith.constant 0 : index
    %531 = vector.load %arg14[%c0_281, %c1_282, %c0_283, %c0_284] : memref<2x4x1x32xf32, #tpu.memory_space<vmem>>, vector<1x1x1x32xf32>
    %532 = vector.shape_cast %531 : vector<1x1x1x32xf32> to vector<1x32xf32>
    %533 = vector.broadcast %532 : vector<1x32xf32> to vector<16x32xf32>
    %534 = arith.addf %530, %533 : vector<16x32xf32>
    %c0_285 = arith.constant 0 : index
    %c2_286 = arith.constant 2 : index
    %c0_287 = arith.constant 0 : index
    %c0_288 = arith.constant 0 : index
    %535 = vector.load %arg13[%c0_285, %c2_286, %c0_287, %c0_288] : memref<2x4x32x32xbf16, #tpu.memory_space<vmem>>, vector<1x1x32x32xbf16>
    %536 = vector.shape_cast %535 : vector<1x1x32x32xbf16> to vector<32x32xbf16>
    %537 = arith.truncf %384 : vector<16x32xf32> to vector<16x32xbf16>
    %cst_289 = arith.constant dense<0.000000e+00> : vector<16x32xf32>
    %538 = tpu.matmul %537, %536, %cst_289 {dimension_numbers = #tpu.dot_dimension_numbers<[1], [0], [0], [1], [0, 0, 1, 1], [], []>} : vector<16x32xbf16>, vector<32x32xbf16>, vector<16x32xf32> -> vector<16x32xf32>
    %c0_290 = arith.constant 0 : index
    %c2_291 = arith.constant 2 : index
    %c0_292 = arith.constant 0 : index
    %c0_293 = arith.constant 0 : index
    %539 = vector.load %arg14[%c0_290, %c2_291, %c0_292, %c0_293] : memref<2x4x1x32xf32, #tpu.memory_space<vmem>>, vector<1x1x1x32xf32>
    %540 = vector.shape_cast %539 : vector<1x1x1x32xf32> to vector<1x32xf32>
    %541 = vector.broadcast %540 : vector<1x32xf32> to vector<16x32xf32>
    %542 = arith.addf %538, %541 : vector<16x32xf32>
    %543 = vector.extract_strided_slice %526 {offsets = [0, 0], sizes = [16, 8], strides = [1, 1]} : vector<16x32xf32> to vector<16x8xf32>
    %544 = arith.truncf %543 : vector<16x8xf32> to vector<16x8xbf16>
    %545 = vector.extract_strided_slice %534 {offsets = [0, 0], sizes = [16, 8], strides = [1, 1]} : vector<16x32xf32> to vector<16x8xf32>
    %546 = arith.truncf %545 : vector<16x8xf32> to vector<16x8xbf16>
    %547 = vector.extract_strided_slice %542 {offsets = [0, 0], sizes = [16, 8], strides = [1, 1]} : vector<16x32xf32> to vector<16x8xf32>
    %548 = arith.truncf %547 : vector<16x8xf32> to vector<16x8xbf16>
    %cst_294 = arith.constant dense<0.000000e+00> : vector<16x16xf32>
    %549 = tpu.matmul %544, %546, %cst_294 {dimension_numbers = #tpu.dot_dimension_numbers<[1], [1], [0], [0], [0, 0, 1, 0], [], []>} : vector<16x8xbf16>, vector<16x8xbf16>, vector<16x16xf32> -> vector<16x16xf32>
    %550 = arith.addf %549, %0 : vector<16x16xf32>
    %cst_295 = arith.constant dense<0xFF800000> : vector<16xf32>
    %551 = vector.multi_reduction <maximumf>, %550, %cst_295 [1] : vector<16x16xf32> to vector<16xf32>
    %552 = vector.shape_cast %551 : vector<16xf32> to vector<16x1xf32>
    %553 = vector.broadcast %552 : vector<16x1xf32> to vector<16x16xf32>
    %554 = arith.subf %550, %553 : vector<16x16xf32>
    %555 = math.exp %554 : vector<16x16xf32>
    %cst_296 = arith.constant dense<0.000000e+00> : vector<16xf32>
    %556 = vector.multi_reduction <add>, %555, %cst_296 [1] : vector<16x16xf32> to vector<16xf32>
    %557 = vector.shape_cast %556 : vector<16xf32> to vector<16x1xf32>
    %558 = vector.broadcast %557 : vector<16x1xf32> to vector<16x16xf32>
    %559 = arith.divf %555, %558 : vector<16x16xf32>
    %560 = arith.truncf %559 : vector<16x16xf32> to vector<16x16xbf16>
    %cst_297 = arith.constant dense<0.000000e+00> : vector<16x8xf32>
    %561 = tpu.matmul %560, %548, %cst_297 {dimension_numbers = #tpu.dot_dimension_numbers<[1], [0], [0], [1], [0, 0, 1, 1], [], []>} : vector<16x16xbf16>, vector<16x8xbf16>, vector<16x8xf32> -> vector<16x8xf32>
    %562 = vector.extract_strided_slice %526 {offsets = [0, 8], sizes = [16, 8], strides = [1, 1]} : vector<16x32xf32> to vector<16x8xf32>
    %563 = arith.truncf %562 : vector<16x8xf32> to vector<16x8xbf16>
    %564 = vector.extract_strided_slice %534 {offsets = [0, 8], sizes = [16, 8], strides = [1, 1]} : vector<16x32xf32> to vector<16x8xf32>
    %565 = arith.truncf %564 : vector<16x8xf32> to vector<16x8xbf16>
    %566 = vector.extract_strided_slice %542 {offsets = [0, 8], sizes = [16, 8], strides = [1, 1]} : vector<16x32xf32> to vector<16x8xf32>
    %567 = arith.truncf %566 : vector<16x8xf32> to vector<16x8xbf16>
    %cst_298 = arith.constant dense<0.000000e+00> : vector<16x16xf32>
    %568 = tpu.matmul %563, %565, %cst_298 {dimension_numbers = #tpu.dot_dimension_numbers<[1], [1], [0], [0], [0, 0, 1, 0], [], []>} : vector<16x8xbf16>, vector<16x8xbf16>, vector<16x16xf32> -> vector<16x16xf32>
    %569 = arith.addf %568, %0 : vector<16x16xf32>
    %cst_299 = arith.constant dense<0xFF800000> : vector<16xf32>
    %570 = vector.multi_reduction <maximumf>, %569, %cst_299 [1] : vector<16x16xf32> to vector<16xf32>
    %571 = vector.shape_cast %570 : vector<16xf32> to vector<16x1xf32>
    %572 = vector.broadcast %571 : vector<16x1xf32> to vector<16x16xf32>
    %573 = arith.subf %569, %572 : vector<16x16xf32>
    %574 = math.exp %573 : vector<16x16xf32>
    %cst_300 = arith.constant dense<0.000000e+00> : vector<16xf32>
    %575 = vector.multi_reduction <add>, %574, %cst_300 [1] : vector<16x16xf32> to vector<16xf32>
    %576 = vector.shape_cast %575 : vector<16xf32> to vector<16x1xf32>
    %577 = vector.broadcast %576 : vector<16x1xf32> to vector<16x16xf32>
    %578 = arith.divf %574, %577 : vector<16x16xf32>
    %579 = arith.truncf %578 : vector<16x16xf32> to vector<16x16xbf16>
    %cst_301 = arith.constant dense<0.000000e+00> : vector<16x8xf32>
    %580 = tpu.matmul %579, %567, %cst_301 {dimension_numbers = #tpu.dot_dimension_numbers<[1], [0], [0], [1], [0, 0, 1, 1], [], []>} : vector<16x16xbf16>, vector<16x8xbf16>, vector<16x8xf32> -> vector<16x8xf32>
    %581 = vector.extract_strided_slice %526 {offsets = [0, 16], sizes = [16, 8], strides = [1, 1]} : vector<16x32xf32> to vector<16x8xf32>
    %582 = arith.truncf %581 : vector<16x8xf32> to vector<16x8xbf16>
    %583 = vector.extract_strided_slice %534 {offsets = [0, 16], sizes = [16, 8], strides = [1, 1]} : vector<16x32xf32> to vector<16x8xf32>
    %584 = arith.truncf %583 : vector<16x8xf32> to vector<16x8xbf16>
    %585 = vector.extract_strided_slice %542 {offsets = [0, 16], sizes = [16, 8], strides = [1, 1]} : vector<16x32xf32> to vector<16x8xf32>
    %586 = arith.truncf %585 : vector<16x8xf32> to vector<16x8xbf16>
    %cst_302 = arith.constant dense<0.000000e+00> : vector<16x16xf32>
    %587 = tpu.matmul %582, %584, %cst_302 {dimension_numbers = #tpu.dot_dimension_numbers<[1], [1], [0], [0], [0, 0, 1, 0], [], []>} : vector<16x8xbf16>, vector<16x8xbf16>, vector<16x16xf32> -> vector<16x16xf32>
    %588 = arith.addf %587, %0 : vector<16x16xf32>
    %cst_303 = arith.constant dense<0xFF800000> : vector<16xf32>
    %589 = vector.multi_reduction <maximumf>, %588, %cst_303 [1] : vector<16x16xf32> to vector<16xf32>
    %590 = vector.shape_cast %589 : vector<16xf32> to vector<16x1xf32>
    %591 = vector.broadcast %590 : vector<16x1xf32> to vector<16x16xf32>
    %592 = arith.subf %588, %591 : vector<16x16xf32>
    %593 = math.exp %592 : vector<16x16xf32>
    %cst_304 = arith.constant dense<0.000000e+00> : vector<16xf32>
    %594 = vector.multi_reduction <add>, %593, %cst_304 [1] : vector<16x16xf32> to vector<16xf32>
    %595 = vector.shape_cast %594 : vector<16xf32> to vector<16x1xf32>
    %596 = vector.broadcast %595 : vector<16x1xf32> to vector<16x16xf32>
    %597 = arith.divf %593, %596 : vector<16x16xf32>
    %598 = arith.truncf %597 : vector<16x16xf32> to vector<16x16xbf16>
    %cst_305 = arith.constant dense<0.000000e+00> : vector<16x8xf32>
    %599 = tpu.matmul %598, %586, %cst_305 {dimension_numbers = #tpu.dot_dimension_numbers<[1], [0], [0], [1], [0, 0, 1, 1], [], []>} : vector<16x16xbf16>, vector<16x8xbf16>, vector<16x8xf32> -> vector<16x8xf32>
    %600 = vector.extract_strided_slice %526 {offsets = [0, 24], sizes = [16, 8], strides = [1, 1]} : vector<16x32xf32> to vector<16x8xf32>
    %601 = arith.truncf %600 : vector<16x8xf32> to vector<16x8xbf16>
    %602 = vector.extract_strided_slice %534 {offsets = [0, 24], sizes = [16, 8], strides = [1, 1]} : vector<16x32xf32> to vector<16x8xf32>
    %603 = arith.truncf %602 : vector<16x8xf32> to vector<16x8xbf16>
    %604 = vector.extract_strided_slice %542 {offsets = [0, 24], sizes = [16, 8], strides = [1, 1]} : vector<16x32xf32> to vector<16x8xf32>
    %605 = arith.truncf %604 : vector<16x8xf32> to vector<16x8xbf16>
    %cst_306 = arith.constant dense<0.000000e+00> : vector<16x16xf32>
    %606 = tpu.matmul %601, %603, %cst_306 {dimension_numbers = #tpu.dot_dimension_numbers<[1], [1], [0], [0], [0, 0, 1, 0], [], []>} : vector<16x8xbf16>, vector<16x8xbf16>, vector<16x16xf32> -> vector<16x16xf32>
    %607 = arith.addf %606, %0 : vector<16x16xf32>
    %cst_307 = arith.constant dense<0xFF800000> : vector<16xf32>
    %608 = vector.multi_reduction <maximumf>, %607, %cst_307 [1] : vector<16x16xf32> to vector<16xf32>
    %609 = vector.shape_cast %608 : vector<16xf32> to vector<16x1xf32>
    %610 = vector.broadcast %609 : vector<16x1xf32> to vector<16x16xf32>
    %611 = arith.subf %607, %610 : vector<16x16xf32>
    %612 = math.exp %611 : vector<16x16xf32>
    %cst_308 = arith.constant dense<0.000000e+00> : vector<16xf32>
    %613 = vector.multi_reduction <add>, %612, %cst_308 [1] : vector<16x16xf32> to vector<16xf32>
    %614 = vector.shape_cast %613 : vector<16xf32> to vector<16x1xf32>
    %615 = vector.broadcast %614 : vector<16x1xf32> to vector<16x16xf32>
    %616 = arith.divf %612, %615 : vector<16x16xf32>
    %617 = arith.truncf %616 : vector<16x16xf32> to vector<16x16xbf16>
    %cst_309 = arith.constant dense<0.000000e+00> : vector<16x8xf32>
    %618 = tpu.matmul %617, %605, %cst_309 {dimension_numbers = #tpu.dot_dimension_numbers<[1], [0], [0], [1], [0, 0, 1, 1], [], []>} : vector<16x16xbf16>, vector<16x8xbf16>, vector<16x8xf32> -> vector<16x8xf32>
    %619 = tpu.concatenate %561, %580, %599, %618 in 1 : vector<16x8xf32>, vector<16x8xf32>, vector<16x8xf32>, vector<16x8xf32> -> vector<16x32xf32>
    %c0_310 = arith.constant 0 : index
    %c3_311 = arith.constant 3 : index
    %c0_312 = arith.constant 0 : index
    %c0_313 = arith.constant 0 : index
    %620 = vector.load %arg13[%c0_310, %c3_311, %c0_312, %c0_313] : memref<2x4x32x32xbf16, #tpu.memory_space<vmem>>, vector<1x1x32x32xbf16>
    %621 = vector.shape_cast %620 : vector<1x1x32x32xbf16> to vector<32x32xbf16>
    %622 = arith.truncf %619 : vector<16x32xf32> to vector<16x32xbf16>
    %cst_314 = arith.constant dense<0.000000e+00> : vector<16x32xf32>
    %623 = tpu.matmul %622, %621, %cst_314 {dimension_numbers = #tpu.dot_dimension_numbers<[1], [0], [0], [1], [0, 0, 1, 1], [], []>} : vector<16x32xbf16>, vector<32x32xbf16>, vector<16x32xf32> -> vector<16x32xf32>
    %c0_315 = arith.constant 0 : index
    %c3_316 = arith.constant 3 : index
    %c0_317 = arith.constant 0 : index
    %c0_318 = arith.constant 0 : index
    %624 = vector.load %arg14[%c0_315, %c3_316, %c0_317, %c0_318] : memref<2x4x1x32xf32, #tpu.memory_space<vmem>>, vector<1x1x1x32xf32>
    %625 = vector.shape_cast %624 : vector<1x1x1x32xf32> to vector<1x32xf32>
    %626 = vector.broadcast %625 : vector<1x32xf32> to vector<16x32xf32>
    %627 = arith.addf %623, %626 : vector<16x32xf32>
    %628 = arith.addf %518, %627 : vector<16x32xf32>
    %c0_319 = arith.constant 0 : index
    %c2_320 = arith.constant 2 : index
    %c0_321 = arith.constant 0 : index
    %c0_322 = arith.constant 0 : index
    %629 = vector.load %arg18[%c0_319, %c2_320, %c0_321, %c0_322] : memref<2x7x1x32xf32, #tpu.memory_space<vmem>>, vector<1x1x1x32xf32>
    %630 = vector.shape_cast %629 : vector<1x1x1x32xf32> to vector<1x32xf32>
    %c0_323 = arith.constant 0 : index
    %c3_324 = arith.constant 3 : index
    %c0_325 = arith.constant 0 : index
    %c0_326 = arith.constant 0 : index
    %631 = vector.load %arg18[%c0_323, %c3_324, %c0_325, %c0_326] : memref<2x7x1x32xf32, #tpu.memory_space<vmem>>, vector<1x1x1x32xf32>
    %632 = vector.shape_cast %631 : vector<1x1x1x32xf32> to vector<1x32xf32>
    %cst_327 = arith.constant dense<0.000000e+00> : vector<16xf32>
    %633 = vector.multi_reduction <add>, %628, %cst_327 [1] : vector<16x32xf32> to vector<16xf32>
    %634 = vector.shape_cast %633 : vector<16xf32> to vector<16x1xf32>
    %cst_328 = arith.constant 3.200000e+01 : f32
    %635 = vector.broadcast %cst_328 : f32 to vector<16x1xf32>
    %636 = arith.divf %634, %635 : vector<16x1xf32>
    %637 = vector.broadcast %636 : vector<16x1xf32> to vector<16x32xf32>
    %638 = arith.subf %628, %637 : vector<16x32xf32>
    %639 = arith.mulf %638, %638 : vector<16x32xf32>
    %cst_329 = arith.constant dense<0.000000e+00> : vector<16xf32>
    %640 = vector.multi_reduction <add>, %639, %cst_329 [1] : vector<16x32xf32> to vector<16xf32>
    %641 = vector.shape_cast %640 : vector<16xf32> to vector<16x1xf32>
    %cst_330 = arith.constant 3.200000e+01 : f32
    %642 = vector.broadcast %cst_330 : f32 to vector<16x1xf32>
    %643 = arith.divf %641, %642 : vector<16x1xf32>
    %cst_331 = arith.constant 9.99999974E-6 : f32
    %644 = vector.broadcast %cst_331 : f32 to vector<16x1xf32>
    %645 = arith.addf %643, %644 : vector<16x1xf32>
    %646 = math.rsqrt %645 : vector<16x1xf32>
    %647 = vector.broadcast %646 : vector<16x1xf32> to vector<16x32xf32>
    %648 = arith.mulf %638, %647 : vector<16x32xf32>
    %649 = vector.broadcast %630 : vector<1x32xf32> to vector<16x32xf32>
    %650 = arith.mulf %648, %649 : vector<16x32xf32>
    %651 = vector.broadcast %632 : vector<1x32xf32> to vector<16x32xf32>
    %652 = arith.addf %650, %651 : vector<16x32xf32>
    %c0_332 = arith.constant 0 : index
    %c4_333 = arith.constant 4 : index
    %c0_334 = arith.constant 0 : index
    %c0_335 = arith.constant 0 : index
    %653 = vector.load %arg18[%c0_332, %c4_333, %c0_334, %c0_335] : memref<2x7x1x32xf32, #tpu.memory_space<vmem>>, vector<1x1x1x32xf32>
    %654 = vector.shape_cast %653 : vector<1x1x1x32xf32> to vector<1x32xf32>
    %c0_336 = arith.constant 0 : index
    %c0_337 = arith.constant 0 : index
    %c0_338 = arith.constant 0 : index
    %655 = vector.load %arg15[%c0_336, %c0_337, %c0_338] : memref<2x32x64xbf16, #tpu.memory_space<vmem>>, vector<1x32x64xbf16>
    %656 = vector.shape_cast %655 : vector<1x32x64xbf16> to vector<32x64xbf16>
    %657 = arith.truncf %652 : vector<16x32xf32> to vector<16x32xbf16>
    %cst_339 = arith.constant dense<0.000000e+00> : vector<16x64xf32>
    %658 = tpu.matmul %657, %656, %cst_339 {dimension_numbers = #tpu.dot_dimension_numbers<[1], [0], [0], [1], [0, 0, 1, 1], [], []>} : vector<16x32xbf16>, vector<32x64xbf16>, vector<16x64xf32> -> vector<16x64xf32>
    %c0_340 = arith.constant 0 : index
    %c0_341 = arith.constant 0 : index
    %c0_342 = arith.constant 0 : index
    %659 = vector.load %arg16[%c0_340, %c0_341, %c0_342] : memref<2x1x64xf32, #tpu.memory_space<vmem>>, vector<1x1x64xf32>
    %660 = vector.shape_cast %659 : vector<1x1x64xf32> to vector<1x64xf32>
    %661 = vector.broadcast %660 : vector<1x64xf32> to vector<16x64xf32>
    %662 = arith.addf %658, %661 : vector<16x64xf32>
    %cst_343 = arith.constant 0.000000e+00 : f32
    %663 = vector.broadcast %cst_343 : f32 to vector<16x64xf32>
    %664 = arith.maximumf %662, %663 : vector<16x64xf32>
    %c0_344 = arith.constant 0 : index
    %c0_345 = arith.constant 0 : index
    %c0_346 = arith.constant 0 : index
    %665 = vector.load %arg17[%c0_344, %c0_345, %c0_346] : memref<2x64x32xbf16, #tpu.memory_space<vmem>>, vector<1x64x32xbf16>
    %666 = vector.shape_cast %665 : vector<1x64x32xbf16> to vector<64x32xbf16>
    %667 = arith.truncf %664 : vector<16x64xf32> to vector<16x64xbf16>
    %cst_347 = arith.constant dense<0.000000e+00> : vector<16x32xf32>
    %668 = tpu.matmul %667, %666, %cst_347 {dimension_numbers = #tpu.dot_dimension_numbers<[1], [0], [0], [1], [0, 0, 1, 1], [], []>} : vector<16x64xbf16>, vector<64x32xbf16>, vector<16x32xf32> -> vector<16x32xf32>
    %669 = vector.broadcast %654 : vector<1x32xf32> to vector<16x32xf32>
    %670 = arith.addf %668, %669 : vector<16x32xf32>
    %671 = arith.addf %652, %670 : vector<16x32xf32>
    %c0_348 = arith.constant 0 : index
    %c5 = arith.constant 5 : index
    %c0_349 = arith.constant 0 : index
    %c0_350 = arith.constant 0 : index
    %672 = vector.load %arg18[%c0_348, %c5, %c0_349, %c0_350] : memref<2x7x1x32xf32, #tpu.memory_space<vmem>>, vector<1x1x1x32xf32>
    %673 = vector.shape_cast %672 : vector<1x1x1x32xf32> to vector<1x32xf32>
    %c0_351 = arith.constant 0 : index
    %c6 = arith.constant 6 : index
    %c0_352 = arith.constant 0 : index
    %c0_353 = arith.constant 0 : index
    %674 = vector.load %arg18[%c0_351, %c6, %c0_352, %c0_353] : memref<2x7x1x32xf32, #tpu.memory_space<vmem>>, vector<1x1x1x32xf32>
    %675 = vector.shape_cast %674 : vector<1x1x1x32xf32> to vector<1x32xf32>
    %cst_354 = arith.constant dense<0.000000e+00> : vector<16xf32>
    %676 = vector.multi_reduction <add>, %671, %cst_354 [1] : vector<16x32xf32> to vector<16xf32>
    %677 = vector.shape_cast %676 : vector<16xf32> to vector<16x1xf32>
    %cst_355 = arith.constant 3.200000e+01 : f32
    %678 = vector.broadcast %cst_355 : f32 to vector<16x1xf32>
    %679 = arith.divf %677, %678 : vector<16x1xf32>
    %680 = vector.broadcast %679 : vector<16x1xf32> to vector<16x32xf32>
    %681 = arith.subf %671, %680 : vector<16x32xf32>
    %682 = arith.mulf %681, %681 : vector<16x32xf32>
    %cst_356 = arith.constant dense<0.000000e+00> : vector<16xf32>
    %683 = vector.multi_reduction <add>, %682, %cst_356 [1] : vector<16x32xf32> to vector<16xf32>
    %684 = vector.shape_cast %683 : vector<16xf32> to vector<16x1xf32>
    %cst_357 = arith.constant 3.200000e+01 : f32
    %685 = vector.broadcast %cst_357 : f32 to vector<16x1xf32>
    %686 = arith.divf %684, %685 : vector<16x1xf32>
    %cst_358 = arith.constant 9.99999974E-6 : f32
    %687 = vector.broadcast %cst_358 : f32 to vector<16x1xf32>
    %688 = arith.addf %686, %687 : vector<16x1xf32>
    %689 = math.rsqrt %688 : vector<16x1xf32>
    %690 = vector.broadcast %689 : vector<16x1xf32> to vector<16x32xf32>
    %691 = arith.mulf %681, %690 : vector<16x32xf32>
    %692 = vector.broadcast %673 : vector<1x32xf32> to vector<16x32xf32>
    %693 = arith.mulf %691, %692 : vector<16x32xf32>
    %694 = vector.broadcast %675 : vector<1x32xf32> to vector<16x32xf32>
    %695 = arith.addf %693, %694 : vector<16x32xf32>
    %c1_359 = arith.constant 1 : index
    %c0_360 = arith.constant 0 : index
    %c0_361 = arith.constant 0 : index
    %c0_362 = arith.constant 0 : index
    %696 = vector.load %arg11[%c1_359, %c0_360, %c0_361, %c0_362] : memref<2x4x32x32xbf16, #tpu.memory_space<vmem>>, vector<1x1x32x32xbf16>
    %697 = vector.shape_cast %696 : vector<1x1x32x32xbf16> to vector<32x32xbf16>
    %698 = arith.truncf %695 : vector<16x32xf32> to vector<16x32xbf16>
    %cst_363 = arith.constant dense<0.000000e+00> : vector<16x32xf32>
    %699 = tpu.matmul %698, %697, %cst_363 {dimension_numbers = #tpu.dot_dimension_numbers<[1], [0], [0], [1], [0, 0, 1, 1], [], []>} : vector<16x32xbf16>, vector<32x32xbf16>, vector<16x32xf32> -> vector<16x32xf32>
    %c1_364 = arith.constant 1 : index
    %c0_365 = arith.constant 0 : index
    %c0_366 = arith.constant 0 : index
    %c0_367 = arith.constant 0 : index
    %700 = vector.load %arg12[%c1_364, %c0_365, %c0_366, %c0_367] : memref<2x4x1x32xf32, #tpu.memory_space<vmem>>, vector<1x1x1x32xf32>
    %701 = vector.shape_cast %700 : vector<1x1x1x32xf32> to vector<1x32xf32>
    %702 = vector.broadcast %701 : vector<1x32xf32> to vector<16x32xf32>
    %703 = arith.addf %699, %702 : vector<16x32xf32>
    %c1_368 = arith.constant 1 : index
    %c1_369 = arith.constant 1 : index
    %c0_370 = arith.constant 0 : index
    %c0_371 = arith.constant 0 : index
    %704 = vector.load %arg11[%c1_368, %c1_369, %c0_370, %c0_371] : memref<2x4x32x32xbf16, #tpu.memory_space<vmem>>, vector<1x1x32x32xbf16>
    %705 = vector.shape_cast %704 : vector<1x1x32x32xbf16> to vector<32x32xbf16>
    %706 = arith.truncf %695 : vector<16x32xf32> to vector<16x32xbf16>
    %cst_372 = arith.constant dense<0.000000e+00> : vector<16x32xf32>
    %707 = tpu.matmul %706, %705, %cst_372 {dimension_numbers = #tpu.dot_dimension_numbers<[1], [0], [0], [1], [0, 0, 1, 1], [], []>} : vector<16x32xbf16>, vector<32x32xbf16>, vector<16x32xf32> -> vector<16x32xf32>
    %c1_373 = arith.constant 1 : index
    %c1_374 = arith.constant 1 : index
    %c0_375 = arith.constant 0 : index
    %c0_376 = arith.constant 0 : index
    %708 = vector.load %arg12[%c1_373, %c1_374, %c0_375, %c0_376] : memref<2x4x1x32xf32, #tpu.memory_space<vmem>>, vector<1x1x1x32xf32>
    %709 = vector.shape_cast %708 : vector<1x1x1x32xf32> to vector<1x32xf32>
    %710 = vector.broadcast %709 : vector<1x32xf32> to vector<16x32xf32>
    %711 = arith.addf %707, %710 : vector<16x32xf32>
    %c1_377 = arith.constant 1 : index
    %c2_378 = arith.constant 2 : index
    %c0_379 = arith.constant 0 : index
    %c0_380 = arith.constant 0 : index
    %712 = vector.load %arg11[%c1_377, %c2_378, %c0_379, %c0_380] : memref<2x4x32x32xbf16, #tpu.memory_space<vmem>>, vector<1x1x32x32xbf16>
    %713 = vector.shape_cast %712 : vector<1x1x32x32xbf16> to vector<32x32xbf16>
    %714 = arith.truncf %695 : vector<16x32xf32> to vector<16x32xbf16>
    %cst_381 = arith.constant dense<0.000000e+00> : vector<16x32xf32>
    %715 = tpu.matmul %714, %713, %cst_381 {dimension_numbers = #tpu.dot_dimension_numbers<[1], [0], [0], [1], [0, 0, 1, 1], [], []>} : vector<16x32xbf16>, vector<32x32xbf16>, vector<16x32xf32> -> vector<16x32xf32>
    %c1_382 = arith.constant 1 : index
    %c2_383 = arith.constant 2 : index
    %c0_384 = arith.constant 0 : index
    %c0_385 = arith.constant 0 : index
    %716 = vector.load %arg12[%c1_382, %c2_383, %c0_384, %c0_385] : memref<2x4x1x32xf32, #tpu.memory_space<vmem>>, vector<1x1x1x32xf32>
    %717 = vector.shape_cast %716 : vector<1x1x1x32xf32> to vector<1x32xf32>
    %718 = vector.broadcast %717 : vector<1x32xf32> to vector<16x32xf32>
    %719 = arith.addf %715, %718 : vector<16x32xf32>
    %720 = vector.extract_strided_slice %703 {offsets = [0, 0], sizes = [16, 8], strides = [1, 1]} : vector<16x32xf32> to vector<16x8xf32>
    %721 = arith.truncf %720 : vector<16x8xf32> to vector<16x8xbf16>
    %722 = vector.extract_strided_slice %711 {offsets = [0, 0], sizes = [16, 8], strides = [1, 1]} : vector<16x32xf32> to vector<16x8xf32>
    %723 = arith.truncf %722 : vector<16x8xf32> to vector<16x8xbf16>
    %724 = vector.extract_strided_slice %719 {offsets = [0, 0], sizes = [16, 8], strides = [1, 1]} : vector<16x32xf32> to vector<16x8xf32>
    %725 = arith.truncf %724 : vector<16x8xf32> to vector<16x8xbf16>
    %cst_386 = arith.constant dense<0.000000e+00> : vector<16x16xf32>
    %726 = tpu.matmul %721, %723, %cst_386 {dimension_numbers = #tpu.dot_dimension_numbers<[1], [1], [0], [0], [0, 0, 1, 0], [], []>} : vector<16x8xbf16>, vector<16x8xbf16>, vector<16x16xf32> -> vector<16x16xf32>
    %727 = arith.addf %726, %0 : vector<16x16xf32>
    %cst_387 = arith.constant dense<0xFF800000> : vector<16xf32>
    %728 = vector.multi_reduction <maximumf>, %727, %cst_387 [1] : vector<16x16xf32> to vector<16xf32>
    %729 = vector.shape_cast %728 : vector<16xf32> to vector<16x1xf32>
    %730 = vector.broadcast %729 : vector<16x1xf32> to vector<16x16xf32>
    %731 = arith.subf %727, %730 : vector<16x16xf32>
    %732 = math.exp %731 : vector<16x16xf32>
    %cst_388 = arith.constant dense<0.000000e+00> : vector<16xf32>
    %733 = vector.multi_reduction <add>, %732, %cst_388 [1] : vector<16x16xf32> to vector<16xf32>
    %734 = vector.shape_cast %733 : vector<16xf32> to vector<16x1xf32>
    %735 = vector.broadcast %734 : vector<16x1xf32> to vector<16x16xf32>
    %736 = arith.divf %732, %735 : vector<16x16xf32>
    %737 = arith.truncf %736 : vector<16x16xf32> to vector<16x16xbf16>
    %cst_389 = arith.constant dense<0.000000e+00> : vector<16x8xf32>
    %738 = tpu.matmul %737, %725, %cst_389 {dimension_numbers = #tpu.dot_dimension_numbers<[1], [0], [0], [1], [0, 0, 1, 1], [], []>} : vector<16x16xbf16>, vector<16x8xbf16>, vector<16x8xf32> -> vector<16x8xf32>
    %739 = vector.extract_strided_slice %703 {offsets = [0, 8], sizes = [16, 8], strides = [1, 1]} : vector<16x32xf32> to vector<16x8xf32>
    %740 = arith.truncf %739 : vector<16x8xf32> to vector<16x8xbf16>
    %741 = vector.extract_strided_slice %711 {offsets = [0, 8], sizes = [16, 8], strides = [1, 1]} : vector<16x32xf32> to vector<16x8xf32>
    %742 = arith.truncf %741 : vector<16x8xf32> to vector<16x8xbf16>
    %743 = vector.extract_strided_slice %719 {offsets = [0, 8], sizes = [16, 8], strides = [1, 1]} : vector<16x32xf32> to vector<16x8xf32>
    %744 = arith.truncf %743 : vector<16x8xf32> to vector<16x8xbf16>
    %cst_390 = arith.constant dense<0.000000e+00> : vector<16x16xf32>
    %745 = tpu.matmul %740, %742, %cst_390 {dimension_numbers = #tpu.dot_dimension_numbers<[1], [1], [0], [0], [0, 0, 1, 0], [], []>} : vector<16x8xbf16>, vector<16x8xbf16>, vector<16x16xf32> -> vector<16x16xf32>
    %746 = arith.addf %745, %0 : vector<16x16xf32>
    %cst_391 = arith.constant dense<0xFF800000> : vector<16xf32>
    %747 = vector.multi_reduction <maximumf>, %746, %cst_391 [1] : vector<16x16xf32> to vector<16xf32>
    %748 = vector.shape_cast %747 : vector<16xf32> to vector<16x1xf32>
    %749 = vector.broadcast %748 : vector<16x1xf32> to vector<16x16xf32>
    %750 = arith.subf %746, %749 : vector<16x16xf32>
    %751 = math.exp %750 : vector<16x16xf32>
    %cst_392 = arith.constant dense<0.000000e+00> : vector<16xf32>
    %752 = vector.multi_reduction <add>, %751, %cst_392 [1] : vector<16x16xf32> to vector<16xf32>
    %753 = vector.shape_cast %752 : vector<16xf32> to vector<16x1xf32>
    %754 = vector.broadcast %753 : vector<16x1xf32> to vector<16x16xf32>
    %755 = arith.divf %751, %754 : vector<16x16xf32>
    %756 = arith.truncf %755 : vector<16x16xf32> to vector<16x16xbf16>
    %cst_393 = arith.constant dense<0.000000e+00> : vector<16x8xf32>
    %757 = tpu.matmul %756, %744, %cst_393 {dimension_numbers = #tpu.dot_dimension_numbers<[1], [0], [0], [1], [0, 0, 1, 1], [], []>} : vector<16x16xbf16>, vector<16x8xbf16>, vector<16x8xf32> -> vector<16x8xf32>
    %758 = vector.extract_strided_slice %703 {offsets = [0, 16], sizes = [16, 8], strides = [1, 1]} : vector<16x32xf32> to vector<16x8xf32>
    %759 = arith.truncf %758 : vector<16x8xf32> to vector<16x8xbf16>
    %760 = vector.extract_strided_slice %711 {offsets = [0, 16], sizes = [16, 8], strides = [1, 1]} : vector<16x32xf32> to vector<16x8xf32>
    %761 = arith.truncf %760 : vector<16x8xf32> to vector<16x8xbf16>
    %762 = vector.extract_strided_slice %719 {offsets = [0, 16], sizes = [16, 8], strides = [1, 1]} : vector<16x32xf32> to vector<16x8xf32>
    %763 = arith.truncf %762 : vector<16x8xf32> to vector<16x8xbf16>
    %cst_394 = arith.constant dense<0.000000e+00> : vector<16x16xf32>
    %764 = tpu.matmul %759, %761, %cst_394 {dimension_numbers = #tpu.dot_dimension_numbers<[1], [1], [0], [0], [0, 0, 1, 0], [], []>} : vector<16x8xbf16>, vector<16x8xbf16>, vector<16x16xf32> -> vector<16x16xf32>
    %765 = arith.addf %764, %0 : vector<16x16xf32>
    %cst_395 = arith.constant dense<0xFF800000> : vector<16xf32>
    %766 = vector.multi_reduction <maximumf>, %765, %cst_395 [1] : vector<16x16xf32> to vector<16xf32>
    %767 = vector.shape_cast %766 : vector<16xf32> to vector<16x1xf32>
    %768 = vector.broadcast %767 : vector<16x1xf32> to vector<16x16xf32>
    %769 = arith.subf %765, %768 : vector<16x16xf32>
    %770 = math.exp %769 : vector<16x16xf32>
    %cst_396 = arith.constant dense<0.000000e+00> : vector<16xf32>
    %771 = vector.multi_reduction <add>, %770, %cst_396 [1] : vector<16x16xf32> to vector<16xf32>
    %772 = vector.shape_cast %771 : vector<16xf32> to vector<16x1xf32>
    %773 = vector.broadcast %772 : vector<16x1xf32> to vector<16x16xf32>
    %774 = arith.divf %770, %773 : vector<16x16xf32>
    %775 = arith.truncf %774 : vector<16x16xf32> to vector<16x16xbf16>
    %cst_397 = arith.constant dense<0.000000e+00> : vector<16x8xf32>
    %776 = tpu.matmul %775, %763, %cst_397 {dimension_numbers = #tpu.dot_dimension_numbers<[1], [0], [0], [1], [0, 0, 1, 1], [], []>} : vector<16x16xbf16>, vector<16x8xbf16>, vector<16x8xf32> -> vector<16x8xf32>
    %777 = vector.extract_strided_slice %703 {offsets = [0, 24], sizes = [16, 8], strides = [1, 1]} : vector<16x32xf32> to vector<16x8xf32>
    %778 = arith.truncf %777 : vector<16x8xf32> to vector<16x8xbf16>
    %779 = vector.extract_strided_slice %711 {offsets = [0, 24], sizes = [16, 8], strides = [1, 1]} : vector<16x32xf32> to vector<16x8xf32>
    %780 = arith.truncf %779 : vector<16x8xf32> to vector<16x8xbf16>
    %781 = vector.extract_strided_slice %719 {offsets = [0, 24], sizes = [16, 8], strides = [1, 1]} : vector<16x32xf32> to vector<16x8xf32>
    %782 = arith.truncf %781 : vector<16x8xf32> to vector<16x8xbf16>
    %cst_398 = arith.constant dense<0.000000e+00> : vector<16x16xf32>
    %783 = tpu.matmul %778, %780, %cst_398 {dimension_numbers = #tpu.dot_dimension_numbers<[1], [1], [0], [0], [0, 0, 1, 0], [], []>} : vector<16x8xbf16>, vector<16x8xbf16>, vector<16x16xf32> -> vector<16x16xf32>
    %784 = arith.addf %783, %0 : vector<16x16xf32>
    %cst_399 = arith.constant dense<0xFF800000> : vector<16xf32>
    %785 = vector.multi_reduction <maximumf>, %784, %cst_399 [1] : vector<16x16xf32> to vector<16xf32>
    %786 = vector.shape_cast %785 : vector<16xf32> to vector<16x1xf32>
    %787 = vector.broadcast %786 : vector<16x1xf32> to vector<16x16xf32>
    %788 = arith.subf %784, %787 : vector<16x16xf32>
    %789 = math.exp %788 : vector<16x16xf32>
    %cst_400 = arith.constant dense<0.000000e+00> : vector<16xf32>
    %790 = vector.multi_reduction <add>, %789, %cst_400 [1] : vector<16x16xf32> to vector<16xf32>
    %791 = vector.shape_cast %790 : vector<16xf32> to vector<16x1xf32>
    %792 = vector.broadcast %791 : vector<16x1xf32> to vector<16x16xf32>
    %793 = arith.divf %789, %792 : vector<16x16xf32>
    %794 = arith.truncf %793 : vector<16x16xf32> to vector<16x16xbf16>
    %cst_401 = arith.constant dense<0.000000e+00> : vector<16x8xf32>
    %795 = tpu.matmul %794, %782, %cst_401 {dimension_numbers = #tpu.dot_dimension_numbers<[1], [0], [0], [1], [0, 0, 1, 1], [], []>} : vector<16x16xbf16>, vector<16x8xbf16>, vector<16x8xf32> -> vector<16x8xf32>
    %796 = tpu.concatenate %738, %757, %776, %795 in 1 : vector<16x8xf32>, vector<16x8xf32>, vector<16x8xf32>, vector<16x8xf32> -> vector<16x32xf32>
    %c1_402 = arith.constant 1 : index
    %c3_403 = arith.constant 3 : index
    %c0_404 = arith.constant 0 : index
    %c0_405 = arith.constant 0 : index
    %797 = vector.load %arg11[%c1_402, %c3_403, %c0_404, %c0_405] : memref<2x4x32x32xbf16, #tpu.memory_space<vmem>>, vector<1x1x32x32xbf16>
    %798 = vector.shape_cast %797 : vector<1x1x32x32xbf16> to vector<32x32xbf16>
    %799 = arith.truncf %796 : vector<16x32xf32> to vector<16x32xbf16>
    %cst_406 = arith.constant dense<0.000000e+00> : vector<16x32xf32>
    %800 = tpu.matmul %799, %798, %cst_406 {dimension_numbers = #tpu.dot_dimension_numbers<[1], [0], [0], [1], [0, 0, 1, 1], [], []>} : vector<16x32xbf16>, vector<32x32xbf16>, vector<16x32xf32> -> vector<16x32xf32>
    %c1_407 = arith.constant 1 : index
    %c3_408 = arith.constant 3 : index
    %c0_409 = arith.constant 0 : index
    %c0_410 = arith.constant 0 : index
    %801 = vector.load %arg12[%c1_407, %c3_408, %c0_409, %c0_410] : memref<2x4x1x32xf32, #tpu.memory_space<vmem>>, vector<1x1x1x32xf32>
    %802 = vector.shape_cast %801 : vector<1x1x1x32xf32> to vector<1x32xf32>
    %803 = vector.broadcast %802 : vector<1x32xf32> to vector<16x32xf32>
    %804 = arith.addf %800, %803 : vector<16x32xf32>
    %805 = arith.addf %695, %804 : vector<16x32xf32>
    %c1_411 = arith.constant 1 : index
    %c0_412 = arith.constant 0 : index
    %c0_413 = arith.constant 0 : index
    %c0_414 = arith.constant 0 : index
    %806 = vector.load %arg18[%c1_411, %c0_412, %c0_413, %c0_414] : memref<2x7x1x32xf32, #tpu.memory_space<vmem>>, vector<1x1x1x32xf32>
    %807 = vector.shape_cast %806 : vector<1x1x1x32xf32> to vector<1x32xf32>
    %c1_415 = arith.constant 1 : index
    %c1_416 = arith.constant 1 : index
    %c0_417 = arith.constant 0 : index
    %c0_418 = arith.constant 0 : index
    %808 = vector.load %arg18[%c1_415, %c1_416, %c0_417, %c0_418] : memref<2x7x1x32xf32, #tpu.memory_space<vmem>>, vector<1x1x1x32xf32>
    %809 = vector.shape_cast %808 : vector<1x1x1x32xf32> to vector<1x32xf32>
    %cst_419 = arith.constant dense<0.000000e+00> : vector<16xf32>
    %810 = vector.multi_reduction <add>, %805, %cst_419 [1] : vector<16x32xf32> to vector<16xf32>
    %811 = vector.shape_cast %810 : vector<16xf32> to vector<16x1xf32>
    %cst_420 = arith.constant 3.200000e+01 : f32
    %812 = vector.broadcast %cst_420 : f32 to vector<16x1xf32>
    %813 = arith.divf %811, %812 : vector<16x1xf32>
    %814 = vector.broadcast %813 : vector<16x1xf32> to vector<16x32xf32>
    %815 = arith.subf %805, %814 : vector<16x32xf32>
    %816 = arith.mulf %815, %815 : vector<16x32xf32>
    %cst_421 = arith.constant dense<0.000000e+00> : vector<16xf32>
    %817 = vector.multi_reduction <add>, %816, %cst_421 [1] : vector<16x32xf32> to vector<16xf32>
    %818 = vector.shape_cast %817 : vector<16xf32> to vector<16x1xf32>
    %cst_422 = arith.constant 3.200000e+01 : f32
    %819 = vector.broadcast %cst_422 : f32 to vector<16x1xf32>
    %820 = arith.divf %818, %819 : vector<16x1xf32>
    %cst_423 = arith.constant 9.99999974E-6 : f32
    %821 = vector.broadcast %cst_423 : f32 to vector<16x1xf32>
    %822 = arith.addf %820, %821 : vector<16x1xf32>
    %823 = math.rsqrt %822 : vector<16x1xf32>
    %824 = vector.broadcast %823 : vector<16x1xf32> to vector<16x32xf32>
    %825 = arith.mulf %815, %824 : vector<16x32xf32>
    %826 = vector.broadcast %807 : vector<1x32xf32> to vector<16x32xf32>
    %827 = arith.mulf %825, %826 : vector<16x32xf32>
    %828 = vector.broadcast %809 : vector<1x32xf32> to vector<16x32xf32>
    %829 = arith.addf %827, %828 : vector<16x32xf32>
    %c1_424 = arith.constant 1 : index
    %c0_425 = arith.constant 0 : index
    %c0_426 = arith.constant 0 : index
    %c0_427 = arith.constant 0 : index
    %830 = vector.load %arg13[%c1_424, %c0_425, %c0_426, %c0_427] : memref<2x4x32x32xbf16, #tpu.memory_space<vmem>>, vector<1x1x32x32xbf16>
    %831 = vector.shape_cast %830 : vector<1x1x32x32xbf16> to vector<32x32xbf16>
    %832 = arith.truncf %829 : vector<16x32xf32> to vector<16x32xbf16>
    %cst_428 = arith.constant dense<0.000000e+00> : vector<16x32xf32>
    %833 = tpu.matmul %832, %831, %cst_428 {dimension_numbers = #tpu.dot_dimension_numbers<[1], [0], [0], [1], [0, 0, 1, 1], [], []>} : vector<16x32xbf16>, vector<32x32xbf16>, vector<16x32xf32> -> vector<16x32xf32>
    %c1_429 = arith.constant 1 : index
    %c0_430 = arith.constant 0 : index
    %c0_431 = arith.constant 0 : index
    %c0_432 = arith.constant 0 : index
    %834 = vector.load %arg14[%c1_429, %c0_430, %c0_431, %c0_432] : memref<2x4x1x32xf32, #tpu.memory_space<vmem>>, vector<1x1x1x32xf32>
    %835 = vector.shape_cast %834 : vector<1x1x1x32xf32> to vector<1x32xf32>
    %836 = vector.broadcast %835 : vector<1x32xf32> to vector<16x32xf32>
    %837 = arith.addf %833, %836 : vector<16x32xf32>
    %c1_433 = arith.constant 1 : index
    %c1_434 = arith.constant 1 : index
    %c0_435 = arith.constant 0 : index
    %c0_436 = arith.constant 0 : index
    %838 = vector.load %arg13[%c1_433, %c1_434, %c0_435, %c0_436] : memref<2x4x32x32xbf16, #tpu.memory_space<vmem>>, vector<1x1x32x32xbf16>
    %839 = vector.shape_cast %838 : vector<1x1x32x32xbf16> to vector<32x32xbf16>
    %840 = arith.truncf %384 : vector<16x32xf32> to vector<16x32xbf16>
    %cst_437 = arith.constant dense<0.000000e+00> : vector<16x32xf32>
    %841 = tpu.matmul %840, %839, %cst_437 {dimension_numbers = #tpu.dot_dimension_numbers<[1], [0], [0], [1], [0, 0, 1, 1], [], []>} : vector<16x32xbf16>, vector<32x32xbf16>, vector<16x32xf32> -> vector<16x32xf32>
    %c1_438 = arith.constant 1 : index
    %c1_439 = arith.constant 1 : index
    %c0_440 = arith.constant 0 : index
    %c0_441 = arith.constant 0 : index
    %842 = vector.load %arg14[%c1_438, %c1_439, %c0_440, %c0_441] : memref<2x4x1x32xf32, #tpu.memory_space<vmem>>, vector<1x1x1x32xf32>
    %843 = vector.shape_cast %842 : vector<1x1x1x32xf32> to vector<1x32xf32>
    %844 = vector.broadcast %843 : vector<1x32xf32> to vector<16x32xf32>
    %845 = arith.addf %841, %844 : vector<16x32xf32>
    %c1_442 = arith.constant 1 : index
    %c2_443 = arith.constant 2 : index
    %c0_444 = arith.constant 0 : index
    %c0_445 = arith.constant 0 : index
    %846 = vector.load %arg13[%c1_442, %c2_443, %c0_444, %c0_445] : memref<2x4x32x32xbf16, #tpu.memory_space<vmem>>, vector<1x1x32x32xbf16>
    %847 = vector.shape_cast %846 : vector<1x1x32x32xbf16> to vector<32x32xbf16>
    %848 = arith.truncf %384 : vector<16x32xf32> to vector<16x32xbf16>
    %cst_446 = arith.constant dense<0.000000e+00> : vector<16x32xf32>
    %849 = tpu.matmul %848, %847, %cst_446 {dimension_numbers = #tpu.dot_dimension_numbers<[1], [0], [0], [1], [0, 0, 1, 1], [], []>} : vector<16x32xbf16>, vector<32x32xbf16>, vector<16x32xf32> -> vector<16x32xf32>
    %c1_447 = arith.constant 1 : index
    %c2_448 = arith.constant 2 : index
    %c0_449 = arith.constant 0 : index
    %c0_450 = arith.constant 0 : index
    %850 = vector.load %arg14[%c1_447, %c2_448, %c0_449, %c0_450] : memref<2x4x1x32xf32, #tpu.memory_space<vmem>>, vector<1x1x1x32xf32>
    %851 = vector.shape_cast %850 : vector<1x1x1x32xf32> to vector<1x32xf32>
    %852 = vector.broadcast %851 : vector<1x32xf32> to vector<16x32xf32>
    %853 = arith.addf %849, %852 : vector<16x32xf32>
    %854 = vector.extract_strided_slice %837 {offsets = [0, 0], sizes = [16, 8], strides = [1, 1]} : vector<16x32xf32> to vector<16x8xf32>
    %855 = arith.truncf %854 : vector<16x8xf32> to vector<16x8xbf16>
    %856 = vector.extract_strided_slice %845 {offsets = [0, 0], sizes = [16, 8], strides = [1, 1]} : vector<16x32xf32> to vector<16x8xf32>
    %857 = arith.truncf %856 : vector<16x8xf32> to vector<16x8xbf16>
    %858 = vector.extract_strided_slice %853 {offsets = [0, 0], sizes = [16, 8], strides = [1, 1]} : vector<16x32xf32> to vector<16x8xf32>
    %859 = arith.truncf %858 : vector<16x8xf32> to vector<16x8xbf16>
    %cst_451 = arith.constant dense<0.000000e+00> : vector<16x16xf32>
    %860 = tpu.matmul %855, %857, %cst_451 {dimension_numbers = #tpu.dot_dimension_numbers<[1], [1], [0], [0], [0, 0, 1, 0], [], []>} : vector<16x8xbf16>, vector<16x8xbf16>, vector<16x16xf32> -> vector<16x16xf32>
    %861 = arith.addf %860, %0 : vector<16x16xf32>
    %cst_452 = arith.constant dense<0xFF800000> : vector<16xf32>
    %862 = vector.multi_reduction <maximumf>, %861, %cst_452 [1] : vector<16x16xf32> to vector<16xf32>
    %863 = vector.shape_cast %862 : vector<16xf32> to vector<16x1xf32>
    %864 = vector.broadcast %863 : vector<16x1xf32> to vector<16x16xf32>
    %865 = arith.subf %861, %864 : vector<16x16xf32>
    %866 = math.exp %865 : vector<16x16xf32>
    %cst_453 = arith.constant dense<0.000000e+00> : vector<16xf32>
    %867 = vector.multi_reduction <add>, %866, %cst_453 [1] : vector<16x16xf32> to vector<16xf32>
    %868 = vector.shape_cast %867 : vector<16xf32> to vector<16x1xf32>
    %869 = vector.broadcast %868 : vector<16x1xf32> to vector<16x16xf32>
    %870 = arith.divf %866, %869 : vector<16x16xf32>
    %871 = arith.truncf %870 : vector<16x16xf32> to vector<16x16xbf16>
    %cst_454 = arith.constant dense<0.000000e+00> : vector<16x8xf32>
    %872 = tpu.matmul %871, %859, %cst_454 {dimension_numbers = #tpu.dot_dimension_numbers<[1], [0], [0], [1], [0, 0, 1, 1], [], []>} : vector<16x16xbf16>, vector<16x8xbf16>, vector<16x8xf32> -> vector<16x8xf32>
    %873 = vector.extract_strided_slice %837 {offsets = [0, 8], sizes = [16, 8], strides = [1, 1]} : vector<16x32xf32> to vector<16x8xf32>
    %874 = arith.truncf %873 : vector<16x8xf32> to vector<16x8xbf16>
    %875 = vector.extract_strided_slice %845 {offsets = [0, 8], sizes = [16, 8], strides = [1, 1]} : vector<16x32xf32> to vector<16x8xf32>
    %876 = arith.truncf %875 : vector<16x8xf32> to vector<16x8xbf16>
    %877 = vector.extract_strided_slice %853 {offsets = [0, 8], sizes = [16, 8], strides = [1, 1]} : vector<16x32xf32> to vector<16x8xf32>
    %878 = arith.truncf %877 : vector<16x8xf32> to vector<16x8xbf16>
    %cst_455 = arith.constant dense<0.000000e+00> : vector<16x16xf32>
    %879 = tpu.matmul %874, %876, %cst_455 {dimension_numbers = #tpu.dot_dimension_numbers<[1], [1], [0], [0], [0, 0, 1, 0], [], []>} : vector<16x8xbf16>, vector<16x8xbf16>, vector<16x16xf32> -> vector<16x16xf32>
    %880 = arith.addf %879, %0 : vector<16x16xf32>
    %cst_456 = arith.constant dense<0xFF800000> : vector<16xf32>
    %881 = vector.multi_reduction <maximumf>, %880, %cst_456 [1] : vector<16x16xf32> to vector<16xf32>
    %882 = vector.shape_cast %881 : vector<16xf32> to vector<16x1xf32>
    %883 = vector.broadcast %882 : vector<16x1xf32> to vector<16x16xf32>
    %884 = arith.subf %880, %883 : vector<16x16xf32>
    %885 = math.exp %884 : vector<16x16xf32>
    %cst_457 = arith.constant dense<0.000000e+00> : vector<16xf32>
    %886 = vector.multi_reduction <add>, %885, %cst_457 [1] : vector<16x16xf32> to vector<16xf32>
    %887 = vector.shape_cast %886 : vector<16xf32> to vector<16x1xf32>
    %888 = vector.broadcast %887 : vector<16x1xf32> to vector<16x16xf32>
    %889 = arith.divf %885, %888 : vector<16x16xf32>
    %890 = arith.truncf %889 : vector<16x16xf32> to vector<16x16xbf16>
    %cst_458 = arith.constant dense<0.000000e+00> : vector<16x8xf32>
    %891 = tpu.matmul %890, %878, %cst_458 {dimension_numbers = #tpu.dot_dimension_numbers<[1], [0], [0], [1], [0, 0, 1, 1], [], []>} : vector<16x16xbf16>, vector<16x8xbf16>, vector<16x8xf32> -> vector<16x8xf32>
    %892 = vector.extract_strided_slice %837 {offsets = [0, 16], sizes = [16, 8], strides = [1, 1]} : vector<16x32xf32> to vector<16x8xf32>
    %893 = arith.truncf %892 : vector<16x8xf32> to vector<16x8xbf16>
    %894 = vector.extract_strided_slice %845 {offsets = [0, 16], sizes = [16, 8], strides = [1, 1]} : vector<16x32xf32> to vector<16x8xf32>
    %895 = arith.truncf %894 : vector<16x8xf32> to vector<16x8xbf16>
    %896 = vector.extract_strided_slice %853 {offsets = [0, 16], sizes = [16, 8], strides = [1, 1]} : vector<16x32xf32> to vector<16x8xf32>
    %897 = arith.truncf %896 : vector<16x8xf32> to vector<16x8xbf16>
    %cst_459 = arith.constant dense<0.000000e+00> : vector<16x16xf32>
    %898 = tpu.matmul %893, %895, %cst_459 {dimension_numbers = #tpu.dot_dimension_numbers<[1], [1], [0], [0], [0, 0, 1, 0], [], []>} : vector<16x8xbf16>, vector<16x8xbf16>, vector<16x16xf32> -> vector<16x16xf32>
    %899 = arith.addf %898, %0 : vector<16x16xf32>
    %cst_460 = arith.constant dense<0xFF800000> : vector<16xf32>
    %900 = vector.multi_reduction <maximumf>, %899, %cst_460 [1] : vector<16x16xf32> to vector<16xf32>
    %901 = vector.shape_cast %900 : vector<16xf32> to vector<16x1xf32>
    %902 = vector.broadcast %901 : vector<16x1xf32> to vector<16x16xf32>
    %903 = arith.subf %899, %902 : vector<16x16xf32>
    %904 = math.exp %903 : vector<16x16xf32>
    %cst_461 = arith.constant dense<0.000000e+00> : vector<16xf32>
    %905 = vector.multi_reduction <add>, %904, %cst_461 [1] : vector<16x16xf32> to vector<16xf32>
    %906 = vector.shape_cast %905 : vector<16xf32> to vector<16x1xf32>
    %907 = vector.broadcast %906 : vector<16x1xf32> to vector<16x16xf32>
    %908 = arith.divf %904, %907 : vector<16x16xf32>
    %909 = arith.truncf %908 : vector<16x16xf32> to vector<16x16xbf16>
    %cst_462 = arith.constant dense<0.000000e+00> : vector<16x8xf32>
    %910 = tpu.matmul %909, %897, %cst_462 {dimension_numbers = #tpu.dot_dimension_numbers<[1], [0], [0], [1], [0, 0, 1, 1], [], []>} : vector<16x16xbf16>, vector<16x8xbf16>, vector<16x8xf32> -> vector<16x8xf32>
    %911 = vector.extract_strided_slice %837 {offsets = [0, 24], sizes = [16, 8], strides = [1, 1]} : vector<16x32xf32> to vector<16x8xf32>
    %912 = arith.truncf %911 : vector<16x8xf32> to vector<16x8xbf16>
    %913 = vector.extract_strided_slice %845 {offsets = [0, 24], sizes = [16, 8], strides = [1, 1]} : vector<16x32xf32> to vector<16x8xf32>
    %914 = arith.truncf %913 : vector<16x8xf32> to vector<16x8xbf16>
    %915 = vector.extract_strided_slice %853 {offsets = [0, 24], sizes = [16, 8], strides = [1, 1]} : vector<16x32xf32> to vector<16x8xf32>
    %916 = arith.truncf %915 : vector<16x8xf32> to vector<16x8xbf16>
    %cst_463 = arith.constant dense<0.000000e+00> : vector<16x16xf32>
    %917 = tpu.matmul %912, %914, %cst_463 {dimension_numbers = #tpu.dot_dimension_numbers<[1], [1], [0], [0], [0, 0, 1, 0], [], []>} : vector<16x8xbf16>, vector<16x8xbf16>, vector<16x16xf32> -> vector<16x16xf32>
    %918 = arith.addf %917, %0 : vector<16x16xf32>
    %cst_464 = arith.constant dense<0xFF800000> : vector<16xf32>
    %919 = vector.multi_reduction <maximumf>, %918, %cst_464 [1] : vector<16x16xf32> to vector<16xf32>
    %920 = vector.shape_cast %919 : vector<16xf32> to vector<16x1xf32>
    %921 = vector.broadcast %920 : vector<16x1xf32> to vector<16x16xf32>
    %922 = arith.subf %918, %921 : vector<16x16xf32>
    %923 = math.exp %922 : vector<16x16xf32>
    %cst_465 = arith.constant dense<0.000000e+00> : vector<16xf32>
    %924 = vector.multi_reduction <add>, %923, %cst_465 [1] : vector<16x16xf32> to vector<16xf32>
    %925 = vector.shape_cast %924 : vector<16xf32> to vector<16x1xf32>
    %926 = vector.broadcast %925 : vector<16x1xf32> to vector<16x16xf32>
    %927 = arith.divf %923, %926 : vector<16x16xf32>
    %928 = arith.truncf %927 : vector<16x16xf32> to vector<16x16xbf16>
    %cst_466 = arith.constant dense<0.000000e+00> : vector<16x8xf32>
    %929 = tpu.matmul %928, %916, %cst_466 {dimension_numbers = #tpu.dot_dimension_numbers<[1], [0], [0], [1], [0, 0, 1, 1], [], []>} : vector<16x16xbf16>, vector<16x8xbf16>, vector<16x8xf32> -> vector<16x8xf32>
    %930 = tpu.concatenate %872, %891, %910, %929 in 1 : vector<16x8xf32>, vector<16x8xf32>, vector<16x8xf32>, vector<16x8xf32> -> vector<16x32xf32>
    %c1_467 = arith.constant 1 : index
    %c3_468 = arith.constant 3 : index
    %c0_469 = arith.constant 0 : index
    %c0_470 = arith.constant 0 : index
    %931 = vector.load %arg13[%c1_467, %c3_468, %c0_469, %c0_470] : memref<2x4x32x32xbf16, #tpu.memory_space<vmem>>, vector<1x1x32x32xbf16>
    %932 = vector.shape_cast %931 : vector<1x1x32x32xbf16> to vector<32x32xbf16>
    %933 = arith.truncf %930 : vector<16x32xf32> to vector<16x32xbf16>
    %cst_471 = arith.constant dense<0.000000e+00> : vector<16x32xf32>
    %934 = tpu.matmul %933, %932, %cst_471 {dimension_numbers = #tpu.dot_dimension_numbers<[1], [0], [0], [1], [0, 0, 1, 1], [], []>} : vector<16x32xbf16>, vector<32x32xbf16>, vector<16x32xf32> -> vector<16x32xf32>
    %c1_472 = arith.constant 1 : index
    %c3_473 = arith.constant 3 : index
    %c0_474 = arith.constant 0 : index
    %c0_475 = arith.constant 0 : index
    %935 = vector.load %arg14[%c1_472, %c3_473, %c0_474, %c0_475] : memref<2x4x1x32xf32, #tpu.memory_space<vmem>>, vector<1x1x1x32xf32>
    %936 = vector.shape_cast %935 : vector<1x1x1x32xf32> to vector<1x32xf32>
    %937 = vector.broadcast %936 : vector<1x32xf32> to vector<16x32xf32>
    %938 = arith.addf %934, %937 : vector<16x32xf32>
    %939 = arith.addf %829, %938 : vector<16x32xf32>
    %c1_476 = arith.constant 1 : index
    %c2_477 = arith.constant 2 : index
    %c0_478 = arith.constant 0 : index
    %c0_479 = arith.constant 0 : index
    %940 = vector.load %arg18[%c1_476, %c2_477, %c0_478, %c0_479] : memref<2x7x1x32xf32, #tpu.memory_space<vmem>>, vector<1x1x1x32xf32>
    %941 = vector.shape_cast %940 : vector<1x1x1x32xf32> to vector<1x32xf32>
    %c1_480 = arith.constant 1 : index
    %c3_481 = arith.constant 3 : index
    %c0_482 = arith.constant 0 : index
    %c0_483 = arith.constant 0 : index
    %942 = vector.load %arg18[%c1_480, %c3_481, %c0_482, %c0_483] : memref<2x7x1x32xf32, #tpu.memory_space<vmem>>, vector<1x1x1x32xf32>
    %943 = vector.shape_cast %942 : vector<1x1x1x32xf32> to vector<1x32xf32>
    %cst_484 = arith.constant dense<0.000000e+00> : vector<16xf32>
    %944 = vector.multi_reduction <add>, %939, %cst_484 [1] : vector<16x32xf32> to vector<16xf32>
    %945 = vector.shape_cast %944 : vector<16xf32> to vector<16x1xf32>
    %cst_485 = arith.constant 3.200000e+01 : f32
    %946 = vector.broadcast %cst_485 : f32 to vector<16x1xf32>
    %947 = arith.divf %945, %946 : vector<16x1xf32>
    %948 = vector.broadcast %947 : vector<16x1xf32> to vector<16x32xf32>
    %949 = arith.subf %939, %948 : vector<16x32xf32>
    %950 = arith.mulf %949, %949 : vector<16x32xf32>
    %cst_486 = arith.constant dense<0.000000e+00> : vector<16xf32>
    %951 = vector.multi_reduction <add>, %950, %cst_486 [1] : vector<16x32xf32> to vector<16xf32>
    %952 = vector.shape_cast %951 : vector<16xf32> to vector<16x1xf32>
    %cst_487 = arith.constant 3.200000e+01 : f32
    %953 = vector.broadcast %cst_487 : f32 to vector<16x1xf32>
    %954 = arith.divf %952, %953 : vector<16x1xf32>
    %cst_488 = arith.constant 9.99999974E-6 : f32
    %955 = vector.broadcast %cst_488 : f32 to vector<16x1xf32>
    %956 = arith.addf %954, %955 : vector<16x1xf32>
    %957 = math.rsqrt %956 : vector<16x1xf32>
    %958 = vector.broadcast %957 : vector<16x1xf32> to vector<16x32xf32>
    %959 = arith.mulf %949, %958 : vector<16x32xf32>
    %960 = vector.broadcast %941 : vector<1x32xf32> to vector<16x32xf32>
    %961 = arith.mulf %959, %960 : vector<16x32xf32>
    %962 = vector.broadcast %943 : vector<1x32xf32> to vector<16x32xf32>
    %963 = arith.addf %961, %962 : vector<16x32xf32>
    %c1_489 = arith.constant 1 : index
    %c4_490 = arith.constant 4 : index
    %c0_491 = arith.constant 0 : index
    %c0_492 = arith.constant 0 : index
    %964 = vector.load %arg18[%c1_489, %c4_490, %c0_491, %c0_492] : memref<2x7x1x32xf32, #tpu.memory_space<vmem>>, vector<1x1x1x32xf32>
    %965 = vector.shape_cast %964 : vector<1x1x1x32xf32> to vector<1x32xf32>
    %c1_493 = arith.constant 1 : index
    %c0_494 = arith.constant 0 : index
    %c0_495 = arith.constant 0 : index
    %966 = vector.load %arg15[%c1_493, %c0_494, %c0_495] : memref<2x32x64xbf16, #tpu.memory_space<vmem>>, vector<1x32x64xbf16>
    %967 = vector.shape_cast %966 : vector<1x32x64xbf16> to vector<32x64xbf16>
    %968 = arith.truncf %963 : vector<16x32xf32> to vector<16x32xbf16>
    %cst_496 = arith.constant dense<0.000000e+00> : vector<16x64xf32>
    %969 = tpu.matmul %968, %967, %cst_496 {dimension_numbers = #tpu.dot_dimension_numbers<[1], [0], [0], [1], [0, 0, 1, 1], [], []>} : vector<16x32xbf16>, vector<32x64xbf16>, vector<16x64xf32> -> vector<16x64xf32>
    %c1_497 = arith.constant 1 : index
    %c0_498 = arith.constant 0 : index
    %c0_499 = arith.constant 0 : index
    %970 = vector.load %arg16[%c1_497, %c0_498, %c0_499] : memref<2x1x64xf32, #tpu.memory_space<vmem>>, vector<1x1x64xf32>
    %971 = vector.shape_cast %970 : vector<1x1x64xf32> to vector<1x64xf32>
    %972 = vector.broadcast %971 : vector<1x64xf32> to vector<16x64xf32>
    %973 = arith.addf %969, %972 : vector<16x64xf32>
    %cst_500 = arith.constant 0.000000e+00 : f32
    %974 = vector.broadcast %cst_500 : f32 to vector<16x64xf32>
    %975 = arith.maximumf %973, %974 : vector<16x64xf32>
    %c1_501 = arith.constant 1 : index
    %c0_502 = arith.constant 0 : index
    %c0_503 = arith.constant 0 : index
    %976 = vector.load %arg17[%c1_501, %c0_502, %c0_503] : memref<2x64x32xbf16, #tpu.memory_space<vmem>>, vector<1x64x32xbf16>
    %977 = vector.shape_cast %976 : vector<1x64x32xbf16> to vector<64x32xbf16>
    %978 = arith.truncf %975 : vector<16x64xf32> to vector<16x64xbf16>
    %cst_504 = arith.constant dense<0.000000e+00> : vector<16x32xf32>
    %979 = tpu.matmul %978, %977, %cst_504 {dimension_numbers = #tpu.dot_dimension_numbers<[1], [0], [0], [1], [0, 0, 1, 1], [], []>} : vector<16x64xbf16>, vector<64x32xbf16>, vector<16x32xf32> -> vector<16x32xf32>
    %980 = vector.broadcast %965 : vector<1x32xf32> to vector<16x32xf32>
    %981 = arith.addf %979, %980 : vector<16x32xf32>
    %982 = arith.addf %963, %981 : vector<16x32xf32>
    %c1_505 = arith.constant 1 : index
    %c5_506 = arith.constant 5 : index
    %c0_507 = arith.constant 0 : index
    %c0_508 = arith.constant 0 : index
    %983 = vector.load %arg18[%c1_505, %c5_506, %c0_507, %c0_508] : memref<2x7x1x32xf32, #tpu.memory_space<vmem>>, vector<1x1x1x32xf32>
    %984 = vector.shape_cast %983 : vector<1x1x1x32xf32> to vector<1x32xf32>
    %c1_509 = arith.constant 1 : index
    %c6_510 = arith.constant 6 : index
    %c0_511 = arith.constant 0 : index
    %c0_512 = arith.constant 0 : index
    %985 = vector.load %arg18[%c1_509, %c6_510, %c0_511, %c0_512] : memref<2x7x1x32xf32, #tpu.memory_space<vmem>>, vector<1x1x1x32xf32>
    %986 = vector.shape_cast %985 : vector<1x1x1x32xf32> to vector<1x32xf32>
    %cst_513 = arith.constant dense<0.000000e+00> : vector<16xf32>
    %987 = vector.multi_reduction <add>, %982, %cst_513 [1] : vector<16x32xf32> to vector<16xf32>
    %988 = vector.shape_cast %987 : vector<16xf32> to vector<16x1xf32>
    %cst_514 = arith.constant 3.200000e+01 : f32
    %989 = vector.broadcast %cst_514 : f32 to vector<16x1xf32>
    %990 = arith.divf %988, %989 : vector<16x1xf32>
    %991 = vector.broadcast %990 : vector<16x1xf32> to vector<16x32xf32>
    %992 = arith.subf %982, %991 : vector<16x32xf32>
    %993 = arith.mulf %992, %992 : vector<16x32xf32>
    %cst_515 = arith.constant dense<0.000000e+00> : vector<16xf32>
    %994 = vector.multi_reduction <add>, %993, %cst_515 [1] : vector<16x32xf32> to vector<16xf32>
    %995 = vector.shape_cast %994 : vector<16xf32> to vector<16x1xf32>
    %cst_516 = arith.constant 3.200000e+01 : f32
    %996 = vector.broadcast %cst_516 : f32 to vector<16x1xf32>
    %997 = arith.divf %995, %996 : vector<16x1xf32>
    %cst_517 = arith.constant 9.99999974E-6 : f32
    %998 = vector.broadcast %cst_517 : f32 to vector<16x1xf32>
    %999 = arith.addf %997, %998 : vector<16x1xf32>
    %1000 = math.rsqrt %999 : vector<16x1xf32>
    %1001 = vector.broadcast %1000 : vector<16x1xf32> to vector<16x32xf32>
    %1002 = arith.mulf %992, %1001 : vector<16x32xf32>
    %1003 = vector.broadcast %984 : vector<1x32xf32> to vector<16x32xf32>
    %1004 = arith.mulf %1002, %1003 : vector<16x32xf32>
    %1005 = vector.broadcast %986 : vector<1x32xf32> to vector<16x32xf32>
    %1006 = arith.addf %1004, %1005 : vector<16x32xf32>
    %1007 = vector.extract_strided_slice %1006 {offsets = [8, 0], sizes = [2, 32], strides = [1, 1]} : vector<16x32xf32> to vector<2x32xf32>
    %c0_518 = arith.constant 0 : index
    %c0_519 = arith.constant 0 : index
    %c0_520 = arith.constant 0 : index
    %1008 = vector.load %arg19[%c0_518, %c0_519, %c0_520] : memref<2x1x32xf32, #tpu.memory_space<vmem>>, vector<1x1x32xf32>
    %1009 = vector.shape_cast %1008 : vector<1x1x32xf32> to vector<1x32xf32>
    %c1_521 = arith.constant 1 : index
    %c0_522 = arith.constant 0 : index
    %c0_523 = arith.constant 0 : index
    %1010 = vector.load %arg19[%c1_521, %c0_522, %c0_523] : memref<2x1x32xf32, #tpu.memory_space<vmem>>, vector<1x1x32xf32>
    %1011 = vector.shape_cast %1010 : vector<1x1x32xf32> to vector<1x32xf32>
    %cst_524 = arith.constant dense<0.000000e+00> : vector<2xf32>
    %1012 = vector.multi_reduction <add>, %1007, %cst_524 [1] : vector<2x32xf32> to vector<2xf32>
    %1013 = vector.shape_cast %1012 : vector<2xf32> to vector<2x1xf32>
    %cst_525 = arith.constant 3.200000e+01 : f32
    %1014 = vector.broadcast %cst_525 : f32 to vector<2x1xf32>
    %1015 = arith.divf %1013, %1014 : vector<2x1xf32>
    %1016 = vector.broadcast %1015 : vector<2x1xf32> to vector<2x32xf32>
    %1017 = arith.subf %1007, %1016 : vector<2x32xf32>
    %1018 = arith.mulf %1017, %1017 : vector<2x32xf32>
    %cst_526 = arith.constant dense<0.000000e+00> : vector<2xf32>
    %1019 = vector.multi_reduction <add>, %1018, %cst_526 [1] : vector<2x32xf32> to vector<2xf32>
    %1020 = vector.shape_cast %1019 : vector<2xf32> to vector<2x1xf32>
    %cst_527 = arith.constant 3.200000e+01 : f32
    %1021 = vector.broadcast %cst_527 : f32 to vector<2x1xf32>
    %1022 = arith.divf %1020, %1021 : vector<2x1xf32>
    %cst_528 = arith.constant 9.99999974E-6 : f32
    %1023 = vector.broadcast %cst_528 : f32 to vector<2x1xf32>
    %1024 = arith.addf %1022, %1023 : vector<2x1xf32>
    %1025 = math.rsqrt %1024 : vector<2x1xf32>
    %1026 = vector.broadcast %1025 : vector<2x1xf32> to vector<2x32xf32>
    %1027 = arith.mulf %1017, %1026 : vector<2x32xf32>
    %1028 = vector.broadcast %1009 : vector<1x32xf32> to vector<2x32xf32>
    %1029 = arith.mulf %1027, %1028 : vector<2x32xf32>
    %1030 = vector.broadcast %1011 : vector<1x32xf32> to vector<2x32xf32>
    %1031 = arith.addf %1029, %1030 : vector<2x32xf32>
    %c0_529 = arith.constant 0 : index
    %c0_530 = arith.constant 0 : index
    %1032 = vector.load %arg20[%c0_529, %c0_530] : memref<1x32xf32, #tpu.memory_space<vmem>>, vector<1x32xf32>
    %1033 = vector.broadcast %1032 : vector<1x32xf32> to vector<2x32xf32>
    %1034 = arith.mulf %1031, %1033 : vector<2x32xf32>
    %cst_531 = arith.constant dense<0.000000e+00> : vector<2xf32>
    %1035 = vector.multi_reduction <add>, %1034, %cst_531 [1] : vector<2x32xf32> to vector<2xf32>
    %1036 = vector.shape_cast %1035 : vector<2xf32> to vector<2x1xf32>
    %c0_532 = arith.constant 0 : index
    %c0_533 = arith.constant 0 : index
    %1037 = vector.load %arg21[%c0_532, %c0_533] : memref<1x1xf32, #tpu.memory_space<vmem>>, vector<1x1xf32>
    %1038 = vector.broadcast %1037 : vector<1x1xf32> to vector<2x1xf32>
    %1039 = arith.addf %1036, %1038 : vector<2x1xf32>
    %1040 = arith.negf %1039 : vector<2x1xf32>
    %1041 = math.exp %1040 : vector<2x1xf32>
    %cst_534 = arith.constant 1.000000e+00 : f32
    %1042 = vector.broadcast %cst_534 : f32 to vector<2x1xf32>
    %1043 = arith.addf %1042, %1041 : vector<2x1xf32>
    %1044 = arith.divf %1042, %1043 : vector<2x1xf32>
    %c0_535 = arith.constant 0 : index
    %c0_536 = arith.constant 0 : index
    %1045 = vector.load %arg22[%c0_535, %c0_536] : memref<2x1xf32, #tpu.memory_space<vmem>>, vector<2x1xf32>
    tpu.vector_store %arg22[%c0_535, %c0_536], %1044 {strides = array<i32>} : memref<2x1xf32, #tpu.memory_space<vmem>>, vector<2x1xf32>,
    return
  }
}

</mosaic_0001>

<bundles_post_ra>
// kernel: transformer_forward.1
= control target key start
LH: loop header
LB: loop body
LE: loop exit
PB: predicated region body
PF: predicated region fallthrough
CT: control target
= control target key end

     0   :  { %s9212_s0 = inlined_call_operand.vmem [shape: f32[16,4], index: 0, kind: input, shape index: {}]   ;;  %s9213_s1 = inlined_call_operand.vmem [shape: f32[16,16], index: 1, kind: input, shape index: {}]   ;;  %s9214_s2 = inlined_call_operand.hbm [shape: f32[4,32], index: 2, kind: input, shape index: {}]   ;;  %s9215_s3 = inlined_call_operand.hbm [shape: f32[1,32], index: 3, kind: input, shape index: {}]   ;;  %s9216_s4 = inlined_call_operand.vmem [shape: bf16[2,4,32,32], index: 4, kind: input, shape index: {}]   ;;  %s9217_s5 = inlined_call_operand.hbm [shape: f32[2,4,1,32], index: 5, kind: input, shape index: {}]   ;;  %s9218_s6 = inlined_call_operand.hbm [shape: bf16[2,32,64], index: 6, kind: input, shape index: {}]   ;;  %s9219_s7 = inlined_call_operand.vmem [shape: f32[2,1,64], index: 7, kind: input, shape index: {}]   ;;  %s9220_s8 = inlined_call_operand.vmem [shape: bf16[2,64,32], index: 8, kind: input, shape index: {}]   ;;  %s9221_s9 = inlined_call_operand.vmem [shape: f32[2,5,1,32], index: 9, kind: input, shape index: {}]   ;;  %s9222_s10 = inlined_call_operand.hbm [shape: f32[2,1,32], index: 10, kind: input, shape index: {}]   ;;  %s9223_s11 = inlined_call_operand.vmem [shape: bf16[2,4,32,32], index: 11, kind: input, shape index: {}]   ;;  %s9224_s12 = inlined_call_operand.hbm [shape: f32[2,4,1,32], index: 12, kind: input, shape index: {}]   ;;  %s9225_s13 = inlined_call_operand.hbm [shape: bf16[2,4,32,32], index: 13, kind: input, shape index: {}]   ;;  %s9226_s14 = inlined_call_operand.hbm [shape: f32[2,4,1,32], index: 14, kind: input, shape index: {}]   ;;  %s9227_s15 = inlined_call_operand.hbm [shape: bf16[2,32,64], index: 15, kind: input, shape index: {}]   ;;  %s9228_s16 = inlined_call_operand.hbm [shape: f32[2,1,64], index: 16, kind: input, shape index: {}]   ;;  %s9229_s17 = inlined_call_operand.vmem [shape: bf16[2,64,32], index: 17, kind: input, shape index: {}]   ;;  %s9230_s18 = inlined_call_operand.hbm [shape: f32[2,7,1,32], index: 18, kind: input, shape index: {}]   ;;  %s9231_s19 = inlined_call_operand.hbm [shape: f32[2,1,32], index: 19, kind: input, shape index: {}]   ;;  %s9232_s20 = inlined_call_operand.vmem [shape: f32[1,32], index: 20, kind: input, shape index: {}]   ;;  %s9233_s21 = inlined_call_operand.<no memory space> [shape: f32[1,1], index: 21, kind: input, shape index: {}]   ;;  %s9234_s22 = inlined_call_operand.vmem [shape: f32[2,1], index: 22, kind: output, shape index: {}]  }
   0x1   :  { %9238 = sst [smem:[#allocation29_spill]] %s9212_s0  ;;  %v27_v0 = vstv %s9233_s21 }
   0x2   :  { %9239 = sst [smem:[#allocation30_spill]] %s9213_s1  ;;  %28 = vst [vmem:[#allocation2] sm:$0x1] %v27_v0 }
   0x3   :  { %9240 = sst [smem:[#allocation31_spill]] %s9214_s2 }
   0x4   :  { %9241 = sst [smem:[#allocation32_spill]] %s9215_s3 }
   0x5   :  { %9242 = sst [smem:[#allocation33_spill]] %s9216_s4 }
   0x6   :  { %9243 = sst [smem:[#allocation34_spill]] %s9217_s5 }
   0x7   :  { %9244 = sst [smem:[#allocation35_spill]] %s9218_s6 }
   0x8   :  { %29 = vsyncpa [#allocation4], 0 }
   0x9   :  { %30 = vsyncpa [#allocation6], 0 }
   0xa   :  { %31 = vsyncpa [#allocation9], 0 }
   0xb   :  { %32 = vsyncpa [#allocation12], 0 }
   0xc   :  { %33 = vsyncpa [#allocation15], 0 }
   0xd   :  { %34 = vsyncpa [#allocation18], 0 }
   0xe   :  { %35 = vsyncpa [#allocation21], 0  ;;  %s7990_s29 = smov [#allocation5]   ;;  %s7991_s4 = smov [#allocation8]  }
   0xf   :  { %s56_s30 = sshll.u32 %s7990_s29, 4  ;;  %s79_s0 = sshll.u32 %s7991_s4, 4  ;;  %s57_s30 = int_to_ptr.vmem [resolvable:$true] %s56_s30  ;;  %s80_s0 = int_to_ptr.vmem [resolvable:$true] %s79_s0 }
  0x10   :  { %s7744_s23 = scalar_lea.vmem %s57_s30, 16  ;;  %s7748_s1 = scalar_lea.vmem %s57_s30, 32 }
  0x11   :  { %p7745_p0 = scmp.ne.s32.totalorder %s57_s30, %s7744_s23  ;;  %p7749_p1 = scmp.lt.s32.totalorder %s57_s30, %s57_s30 }
  0x12   :  { %p7750_p2 = scmp.lt.s32.totalorder %s7748_s1, %s7744_s23 }
  0x14   :  { %p7751_p3 = por %p7750_p2, %p7749_p1 }
  0x16   :  { %p7752_p4 = pnand %p7751_p3, %p7745_p0 }
  0x18   :  { %7755 = shalt.err (!%p7752_p4)
}
  0x19   :  { %s9245_s24 = sld [smem:[#allocation32_spill]]  ;;  %s7764_s6 = scalar_lea.vmem %s80_s0, 512 }
  0x1a   :  { %p7765_p5 = scmp.ne.s32.totalorder %s80_s0, %s7764_s6  ;;  %p7769_p6 = scmp.lt.s32.totalorder %s80_s0, %s80_s0 }
  0x1b   :  { %p7770_p7 = scmp.lt.s32.totalorder %s7764_s6, %s7764_s6 }
  0x1d   :  { %p7771_p8 = por %p7770_p7, %p7769_p6 }
  0x1f   :  { %59 = dma.hbm_to_vmem [thread:$0]  %s9245_s24, 16, %s57_s30, [#allocation6]  }
  0x20   :  { %p7772_p9 = pnand %p7771_p8, %p7765_p5 }
  0x22   :  { %7775 = shalt.err (!%p7772_p9)
}
  0x23   :  { %s7992_s25 = smov 64   ;;  %s7993_s26 = smov 4  }
  0x24   :  { %s9246_s3 = sld [smem:[#allocation35_spill]]  ;;  %s7994_s28 = smov [#allocation11]  }
  0x25   :  { %s111_s29 = sshll.u32 %s7994_s28, 4  ;;  %s7995_s4 = smov [#allocation14]   ;;  %s112_s29 = int_to_ptr.vmem [resolvable:$true] %s111_s29 }
  0x26   :  { %s135_s30 = sshll.u32 %s7995_s4, 4  ;;  %s7784_s23 = scalar_lea.vmem %s112_s29, 128  ;;  %s136_s30 = int_to_ptr.vmem [resolvable:$true] %s135_s30 }
  0x27   :  { %p7785_p10 = scmp.ne.s32.totalorder %s112_s29, %s7784_s23  ;;  %p7789_p11 = scmp.lt.s32.totalorder %s112_s29, %s112_s29 }
  0x28   :  { %p7790_p12 = scmp.lt.s32.totalorder %s7784_s23, %s7784_s23 }
  0x2a   :  { %85 = dma.hbm_to_vmem [thread:$0]  %s9246_s3, 512, %s80_s0, [#allocation9], %s7992_s25, %s7992_s25, %s7993_s26  }
  0x2b   :  { %p7791_p13 = por %p7790_p12, %p7789_p11 }
  0x2d   :  { %p7792_p0 = pnand %p7791_p13, %p7785_p10 }
  0x2f   :  { %7795 = shalt.err (!%p7792_p0)
}
  0x30   :  { %s7996_s1 = smov 16   ;;  %s7997_s21 = smov 1  }
  0x31   :  { %117 = dma.hbm_to_vmem [thread:$0]  %s9224_s12, 128, %s112_s29, [#allocation12], %s7996_s1, %s7996_s1, %s7997_s21  }
  0x32   :  { %s7804_s24 = scalar_lea.vmem %s136_s30, 128  ;;  %p7809_p2 = scmp.lt.s32.totalorder %s136_s30, %s136_s30 }
  0x33   :  { %p7805_p1 = scmp.ne.s32.totalorder %s136_s30, %s7804_s24  ;;  %p7810_p3 = scmp.lt.s32.totalorder %s7804_s24, %s7804_s24 }
  0x35   :  { %p7811_p4 = por %p7810_p3, %p7809_p2 }
  0x37   :  { %p7812_p5 = pnand %p7811_p4, %p7805_p1 }
  0x39   :  { %7815 = shalt.err (!%p7812_p5)
}
  0x3a   :  { %141 = dma.hbm_to_vmem [thread:$0]  %s9226_s14, 128, %s136_s30, [#allocation15], %s7996_s1, %s7996_s1, %s7997_s21  }
  0x3b   :  { %s7998_s27 = smov [#allocation17]   ;;  %s7999_s28 = smov [#allocation3]  }
  0x3c   :  { %s159_s3 = sshll.u32 %s7998_s27, 4  ;;  %s46_s4 = sshll.u32 %s7999_s28, 4  ;;  %s160_s3 = int_to_ptr.vmem [resolvable:$true] %s159_s3  ;;  %s47_s4 = int_to_ptr.vmem [resolvable:$true] %s46_s4 }
  0x3d   :  { %s7824_s12 = scalar_lea.vmem %s160_s3, 32  ;;  %p7829_p7 = scmp.lt.s32.totalorder %s160_s3, %s160_s3 }
  0x3e   :  { %p7825_p6 = scmp.ne.s32.totalorder %s160_s3, %s7824_s12  ;;  %p7830_p8 = scmp.lt.s32.totalorder %s7824_s12, %s7824_s12 }
  0x40   :  { %p7831_p9 = por %p7830_p8, %p7829_p7 }
  0x42   :  { %p7832_p10 = pnand %p7831_p9, %p7825_p6 }
  0x44   :  { %7835 = shalt.err (!%p7832_p10)
}
  0x45   :  { %165 = dma.hbm_to_vmem [thread:$0]  %s9228_s16, 32, %s160_s3, [#allocation18], %s7996_s1, %s7996_s1, %s7997_s21  }
  0x46   :  { %s7844_s14 = scalar_lea.vmem %s47_s4, 64  ;;  %p7849_p12 = scmp.lt.s32.totalorder %s47_s4, %s47_s4 }
  0x47   :  { %p7845_p11 = scmp.ne.s32.totalorder %s47_s4, %s7844_s14  ;;  %p7850_p13 = scmp.lt.s32.totalorder %s7844_s14, %s7844_s14 }
  0x49   :  { %p7851_p0 = por %p7850_p13, %p7849_p12 }
  0x4b   :  { %p7852_p1 = pnand %p7851_p0, %p7845_p11 }
  0x4d   :  { %7855 = shalt.err (!%p7852_p1)
}
  0x4e   :  { %s9247_s0 = sld [smem:[#allocation31_spill]]  ;;  %s8000_s24 = smov [#allocation7]  }
  0x4f   :  { %s67_s6 = sshll.u32 %s8000_s24, 4  ;;  %s8001_s2 = smov [#allocation10]   ;;  %s68_s6 = int_to_ptr.vmem [resolvable:$true] %s67_s6 }
  0x50   :  { %s97_s27 = sshll.u32 %s8001_s2, 4  ;;  %s7864_s28 = scalar_lea.vmem %s68_s6, 128  ;;  %s98_s27 = int_to_ptr.vmem [resolvable:$true] %s97_s27 }
  0x51   :  { %p7865_p2 = scmp.ne.s32.totalorder %s68_s6, %s7864_s28  ;;  %p7869_p3 = scmp.lt.s32.totalorder %s68_s6, %s68_s6 }
  0x52   :  { %p7870_p4 = scmp.lt.s32.totalorder %s7864_s28, %s7864_s28 }
  0x54   :  { %49 = dma.hbm_to_vmem [thread:$0]  %s9247_s0, 64, %s47_s4, [#allocation4]  }
  0x55   :  { %p7871_p5 = por %p7870_p4, %p7869_p3 }
  0x57   :  { %p7872_p6 = pnand %p7871_p5, %p7865_p2 }
  0x59   :  { %7875 = shalt.err (!%p7872_p6)
}
  0x5a   :  { %s9248_s12 = sld [smem:[#allocation34_spill]]  ;;  %s7884_s4 = scalar_lea.vmem %s98_s27, 32 }
  0x5b   :  { %p7885_p7 = scmp.ne.s32.totalorder %s98_s27, %s7884_s4  ;;  %p7889_p8 = scmp.lt.s32.totalorder %s98_s27, %s98_s27 }
  0x5c   :  { %p7890_p9 = scmp.lt.s32.totalorder %s7884_s4, %s7884_s4 }
  0x5e   :  { %p7891_p10 = por %p7890_p9, %p7889_p8 }
  0x60   :  { %73 = dma.hbm_to_vmem [thread:$0]  %s9248_s12, 128, %s68_s6, [#allocation6], %s7996_s1, %s7996_s1, %s7997_s21  }
  0x61   :  { %p7892_p11 = pnand %p7891_p10, %p7885_p7 }
  0x63   :  { %7895 = shalt.err (!%p7892_p11)
}
  0x64   :  { %103 = dma.hbm_to_vmem [thread:$0]  %s9222_s10, 32, %s98_s27, [#allocation9], %s7996_s1, %s7996_s1, %s7997_s21  }
  0x65   :  { %s8002_s14 = smov [#allocation13]   ;;  %s8003_s5 = smov [#allocation16]  }
  0x66   :  { %s123_s30 = sshll.u32 %s8002_s14, 4  ;;  %s147_s0 = sshll.u32 %s8003_s5, 4  ;;  %s124_s30 = int_to_ptr.vmem [resolvable:$true] %s123_s30  ;;  %s148_s0 = int_to_ptr.vmem [resolvable:$true] %s147_s0 }
  0x67   :  { %s7904_s24 = scalar_lea.vmem %s124_s30, 2048  ;;  %p7909_p13 = scmp.lt.s32.totalorder %s124_s30, %s124_s30 }
  0x68   :  { %p7905_p12 = scmp.ne.s32.totalorder %s124_s30, %s7904_s24  ;;  %p7910_p0 = scmp.lt.s32.totalorder %s7904_s24, %s7904_s24 }
  0x6a   :  { %p7911_p1 = por %p7910_p0, %p7909_p13 }
  0x6c   :  { %p7912_p2 = pnand %p7911_p1, %p7905_p12 }
  0x6e   :  { %7915 = shalt.err (!%p7912_p2)
}
  0x6f   :  { %129 = dma.hbm_to_vmem [thread:$0]  %s9225_s13, 2048, %s124_s30, [#allocation12], %s7992_s25, %s7992_s25, %s7993_s26  }
  0x70   :  { %s7924_s10 = scalar_lea.vmem %s148_s0, 512  ;;  %p7929_p4 = scmp.lt.s32.totalorder %s148_s0, %s148_s0 }
  0x71   :  { %p7925_p3 = scmp.ne.s32.totalorder %s148_s0, %s7924_s10  ;;  %p7930_p5 = scmp.lt.s32.totalorder %s7924_s10, %s7924_s10 }
  0x73   :  { %p7931_p6 = por %p7930_p5, %p7929_p4 }
  0x75   :  { %p7932_p7 = pnand %p7931_p6, %p7925_p3 }
  0x77   :  { %7935 = shalt.err (!%p7932_p7)
}
  0x78   :  { %153 = dma.hbm_to_vmem [thread:$0]  %s9227_s15, 512, %s148_s0, [#allocation15], %s7992_s25, %s7992_s25, %s7993_s26  }
  0x79   :  { %s8004_s16 = smov [#allocation19]   ;;  %s8005_s12 = smov [#allocation20]  }
  0x7a   :  { %s173_s3 = sshll.u32 %s8004_s16, 4  ;;  %s185_s4 = sshll.u32 %s8005_s12, 4  ;;  %s174_s3 = int_to_ptr.vmem [resolvable:$true] %s173_s3  ;;  %s186_s4 = int_to_ptr.vmem [resolvable:$true] %s185_s4 }
  0x7b   :  { %s7944_s13 = scalar_lea.vmem %s174_s3, 224  ;;  %p7949_p9 = scmp.lt.s32.totalorder %s174_s3, %s174_s3 }
  0x7c   :  { %p7945_p8 = scmp.ne.s32.totalorder %s174_s3, %s7944_s13  ;;  %p7950_p10 = scmp.lt.s32.totalorder %s7944_s13, %s7944_s13 }
  0x7e   :  { %p7951_p11 = por %p7950_p10, %p7949_p9 }
  0x80   :  { %p7952_p12 = pnand %p7951_p11, %p7945_p8 }
  0x82   :  { %7955 = shalt.err (!%p7952_p12)
}
  0x83   :  { %179 = dma.hbm_to_vmem [thread:$0]  %s9230_s18, 224, %s174_s3, [#allocation18], %s7996_s1, %s7996_s1, %s7997_s21  }
  0x84   :  { %s7964_s15 = scalar_lea.vmem %s186_s4, 32  ;;  %p7969_p0 = scmp.lt.s32.totalorder %s186_s4, %s186_s4 }
  0x85   :  { %p7965_p13 = scmp.ne.s32.totalorder %s186_s4, %s7964_s15  ;;  %p7970_p1 = scmp.lt.s32.totalorder %s7964_s15, %s7964_s15 }
  0x87   :  { %p7971_p2 = por %p7970_p1, %p7969_p0 }
  0x89   :  { %p7972_p3 = pnand %p7971_p2, %p7965_p13 }
  0x8b   :  { %7975 = shalt.err (!%p7972_p3)
}
  0x8c   :  { %191 = dma.hbm_to_vmem [thread:$0]  %s9231_s19, 32, %s186_s4, [#allocation21], %s7996_s1, %s7996_s1, %s7997_s21  }
  0x8d   :  { %7976 = dma.done.wait [#allocation4], 64  }
  0x8e   :  { %7977 = vsyncadd [#allocation4], 4294967232 }
  0x8f   :  { %7978 = dma.done.wait [#allocation6], 144  }
  0x90   :  { %7979 = vsyncadd [#allocation6], 4294967152 }
  0x91   :  { %7980 = dma.done.wait [#allocation9], 544  }
  0x92   :  { %7981 = vsyncadd [#allocation9], 4294966752 }
  0x93   :  { %7982 = dma.done.wait [#allocation12], 2176  }
  0x94   :  { %7983 = vsyncadd [#allocation12], 4294965120 }
  0x95   :  { %7984 = dma.done.wait [#allocation15], 640  }
  0x96   :  { %7985 = vsyncadd [#allocation15], 4294966656 }
  0x97   :  { %7986 = dma.done.wait [#allocation18], 256  }
  0x98   :  { %7987 = vsyncadd [#allocation18], 4294967040 }
  0x99   :  { %7988 = dma.done.wait [#allocation21], 32  }
  0x9a   :  { %7989 = vsyncadd [#allocation21], 4294967264  ;;  %v8006_v1 = vmov 0.0   ;;  %vm252_vm0 = vcmask 1043456   ;;  %vm245_vm1 = vcmask 31744   ;;  %s9249_s21 = sld [smem:[#allocation29_spill]] }
  0x9b   :  { %6763 = vmatprep.subr.bf16.mxu1 %v8006_v1  ;;  %v237_v2 = vld [vmem:[#allocation3] sm:$0xf]  ;;  %s9250_s24 = sld [smem:[#allocation33_spill]]  ;;  %vm8007_vm2 = vmmov 0   ;;  %v6242_v10 = vld [vmem:[#allocation5] ss:$0 sm:$0xff] }
  0x9c   :  { %6742 = vmatprep.subr.msk.mxu0 %vm252_vm0, %v237_v2  ;;  %6767 = vmatprep.mubr.msk.bf16.mxu1 %vm8007_vm2, %v8006_v1  ;;  %vm355_vm3 = vcmask 261120   ;;  %v6262_v19 = vld [vmem:[#allocation7 + $0x2] ss:$0 sm:$0xff]  ;;  %v6254_v30 = vld [vmem:[#allocation7 + $0x1] ss:$0 sm:$0xff]  ;;  %vm535_vm4 = vcmask 64512  }
  0x9d   :  { %6743 = vmatpush3.msk.msra.mxu0 %vm252_vm0, %v237_v2  ;;  %v6246_v35 = vld [vmem:[#allocation7] ss:$0 sm:$0xff]  ;;  %s8008_s29 = smov 112   ;;  %s8009_s23 = smov 120   ;;  %vm583_vm5 = vcmask 130048   ;;  %vm1045_vm6 = vcmask 195584  }
  0x9e   :  { %6747 = vmatprep.subr.bf16.mxu0 %v8006_v1  ;;  %s8010_s15 = smov 104   ;;  %s9251_s18 = sld [smem:[#allocation30_spill]]  ;;  %vm1277_vm7 = vcmask 523264   ;;  %vm6176_vm8 = vcmask 254976   ;;  %vm6229_vm9 = vcmask 1024  }
  0x9f   :  { %s8011_s5 = smov 8   ;;  %s8012_s2 = smov 24  }
  0xa0   :  { %v235_v3 = vld [vmem:[%s9249_s21] sm:$0xff]  ;;  %v236_v4 = vld [vmem:[%s9249_s21 + $0x8] sm:$0xff] }
  0xa1   :  { %6744 = vmatprep.mubr.msk.f32.mxu0 %vm245_vm1, %v235_v3  ;;  %v7420_v5 = vld [vmem:[%s9250_s24 + $0x8] sm:$0xff]   ;;  %v7422_v7 = vld [vmem:[%s9250_s24] sm:$0xff]   ;;  %v7424_v14 = vld [vmem:[%s9250_s24 + $0x18] sm:$0xff]  }
  0xa2   :  { %6745 = vmatmul.mubr.msk.f32.vlgmr.msra.gmra.mxu0 %vm245_vm1, %v236_v4  ;;  %v7421_v6 = vld [vmem:[%s9250_s24 + $0x28] sm:$0xff]   ;;  %v7423_v8 = vld [vmem:[%s9250_s24 + $0x20] sm:$0xff]   ;;  %v7425_v16 = vld [vmem:[%s9250_s24 + $0x10] sm:$0xff]  }
  0xa3   :  { %6748 = vmatpush3.bf16.msra.mxu0 %v7420_v5  ;;  %6764 = vmatpush3.bf16.msra.mxu1 %v7421_v6 }
  0xa4   :  { %6749 = vmatprep.subr.bf16.mxu0 %v8006_v1  ;;  %6765 = vmatprep.subr.bf16.mxu1 %v8006_v1  ;;  %v8286_v51 = vld [vmem:[%s9251_s18] sm:$0xff]  ;;  %v8292_v55 = vld [vmem:[%s9251_s18 + $0x8] sm:$0xff] }
  0xa5   :  { %6751 = vmatprep.mubr.msk.bf16.mxu0 %vm8007_vm2, %v8006_v1 }
  0xa7   :  { %6750 = vmatpush3.bf16.msra.mxu0 %v7422_v7  ;;  %6766 = vmatpush3.bf16.msra.mxu1 %v7423_v8 }
  0xa8   :  { %6755 = vmatprep.subr.bf16.mxu0 %v8006_v1  ;;  %6777 = vmatprep.subr.bf16.mxu1 %v8006_v1 }
 0x162   :  { %v6746_v9 = vpop.f32.mrf.mxu0 }
 0x163   :  { %v8225_v12 = vadd.f32 %v6746_v9, %v6242_v10 }
 0x164   :  { %v322_v11 = vpop.f32.mrf.mxu0 }
 0x165   :  { %v8227_v13 = vadd.f32 %v6242_v10, %v322_v11 }
 0x167   :  { %v8234_v15 = vpack.c.bf16 %v8225_v12, %v8227_v13 }
 0x169   :  { %6752 = vmatmul.mubr.msk.bf16.vlgmr.msra.gmra.mxu0 %vm355_vm3, %v8234_v15  ;;  %6768 = vmatmul.mubr.msk.bf16.vlgmr.msra.gmra.mxu1 %vm355_vm3, %v8234_v15 }
 0x16a   :  { %6756 = vmatpush3.bf16.msra.mxu0 %v7424_v14  ;;  %6759 = vmatprep.mubr.msk.bf16.mxu0 %vm8007_vm2, %v8006_v1 }
 0x16b   :  { %6757 = vmatprep.subr.bf16.mxu0 %v8006_v1  ;;  %6779 = vmatprep.mubr.msk.bf16.mxu1 %vm8007_vm2, %v8006_v1 }
 0x16e   :  { %6758 = vmatpush3.bf16.msra.mxu0 %v7425_v16 }
 0x16f   :  { %6771 = vmatprep.subr.bf16.mxu0 %v8006_v1 }
 0x171   :  { %6760 = vmatmul.mubr.msk.bf16.vlgmr.msra.gmra.mxu0 %vm355_vm3, %v8234_v15 }
 0x172   :  { %6773 = vmatprep.mubr.msk.bf16.mxu0 %vm8007_vm2, %v8006_v1 }
 0x229   :  { %v393_v17 = vpop.f32.mrf.mxu0  ;;  %v525_v18 = vpop.f32.mrf.mxu1 }
 0x22a   :  { %v526_v24 = vadd.f32 %v6262_v19, %v525_v18  ;;  %v394_v39 = vadd.f32 %v6246_v35, %v393_v17 }
 0x22b   :  { %v6753_v20 = vpop.f32.mrf.mxu0  ;;  %v6769_v21 = vpop.f32.mrf.mxu1 }
 0x22d   :  { %v396_v22 = vpop.f32.mrf.mxu0  ;;  %v528_v23 = vpop.f32.mrf.mxu1 }
 0x22e   :  { %v529_v25 = vadd.f32 %v6262_v19, %v528_v23  ;;  %v397_v37 = vadd.f32 %v6246_v35, %v396_v22 }
 0x22f   :  { %v6754_v26 = vpop.f32.mrf.mxu0  ;;  %v6770_v27 = vpop.f32.mrf.mxu1 }
 0x230   :  { %v8253_v28 = vpack.c.bf16 %v529_v25, %v526_v24  ;;  %v532_v41 = vpack.c.bf16 %v397_v37, %v394_v39 }
 0x231   :  { %v459_v29 = vpop.f32.mrf.mxu0 }
 0x232   :  { %6778 = vmatpush3.bf16.msra.mxu1 %v8253_v28  ;;  %v460_v33 = vadd.f32 %v6254_v30, %v459_v29 }
 0x233   :  { %v6761_v31 = vpop.f32.mrf.mxu0  ;;  %6789 = vmatprep.subr.bf16.mxu1 %v8006_v1 }
 0x235   :  { %v462_v32 = vpop.f32.mrf.mxu0 }
 0x236   :  { %v463_v34 = vadd.f32 %v6254_v30, %v462_v32 }
 0x237   :  { %v6762_v36 = vpop.f32.mrf.mxu0 }
 0x238   :  { %v533_v38 = vpack.c.bf16 %v463_v34, %v460_v33 }
 0x23a   :  { %777 = vrot.lane.b32.xlu1 %v533_v38, %s8008_s29  ;;  %655 = vrot.lane.b32.xlu0 %v533_v38, %s8009_s23  ;;  %v540_v40 = vsel %vm535_vm4, %v533_v38, 0 }
 0x23b   :  { %6772 = vmatpush3.bf16.xpose.msra.mxu0 %v540_v40 }
 0x23c   :  { %6783 = vmatprep.subr.bf16.mxu0 %v8006_v1 }
 0x23e   :  { %775 = vrot.lane.b32.xlu1 %v532_v41, %s8008_s29  ;;  %652 = vrot.lane.b32.xlu0 %v532_v41, %s8009_s23 }
 0x242   :  { %896 = vrot.lane.b32.xlu1 %v532_v41, %s8010_s15  ;;  %898 = vrot.lane.b32.xlu0 %v533_v38, %s8010_s15 }
 0x243   :  { %6774 = vmatmul.mubr.msk.bf16.vlgmr.msra.gmra.mxu0 %vm535_vm4, %v532_v41 }
 0x244   :  { %6785 = vmatprep.mubr.msk.bf16.mxu0 %vm8007_vm2, %v8006_v1 }
 0x2ac   :  { %v656_v42 = vpop.permute.xlu0 %655  ;;  %v778_v44 = vpop.permute.xlu1 %777 }
 0x2ad   :  { %v661_v43 = vsel %vm535_vm4, %v656_v42, 0  ;;  %v783_v46 = vsel %vm535_vm4, %v778_v44, 0 }
 0x2ae   :  { %6784 = vmatpush3.bf16.xpose.msra.mxu0 %v661_v43 }
 0x2af   :  { %6795 = vmatprep.subr.bf16.mxu0 %v8006_v1 }
 0x2b0   :  { %v653_v45 = vpop.permute.xlu0 %652  ;;  %v776_v48 = vpop.permute.xlu1 %775 }
 0x2b4   :  { %v899_v47 = vpop.permute.xlu0 %898  ;;  %v897_v50 = vpop.permute.xlu1 %896 }
 0x2b5   :  { %6786 = vmatmul.mubr.msk.bf16.vlgmr.msra.gmra.mxu0 %vm535_vm4, %v653_v45  ;;  %v904_v49 = vsel %vm535_vm4, %v899_v47, 0 }
 0x2b6   :  { %6796 = vmatpush3.bf16.xpose.msra.mxu0 %v783_v46  ;;  %6797 = vmatprep.mubr.msk.bf16.mxu0 %vm8007_vm2, %v8006_v1 }
 0x2b7   :  { %6807 = vmatprep.subr.bf16.mxu0 %v8006_v1 }
 0x2bd   :  { %6798 = vmatmul.mubr.msk.bf16.vlgmr.msra.gmra.mxu0 %vm535_vm4, %v776_v48 }
 0x2be   :  { %6808 = vmatpush3.bf16.xpose.msra.mxu0 %v904_v49  ;;  %6809 = vmatprep.mubr.msk.bf16.mxu0 %vm8007_vm2, %v8006_v1 }
 0x2bf   :  { %6819 = vmatprep.subr.bf16.mxu0 %v8006_v1 }
 0x2c5   :  { %6810 = vmatmul.mubr.msk.bf16.vlgmr.msra.gmra.mxu0 %vm535_vm4, %v897_v50 }
 0x2c6   :  { %6823 = vmatprep.mubr.msk.bf16.mxu0 %vm8007_vm2, %v8006_v1 }
 0x303   :  { %v576_v52 = vpop.f32.mrf.mxu0 }
 0x304   :  { %v577_v53 = vadd.f32 %v576_v52, %v8286_v51 }
 0x305   :  { %v6775_v54 = vpop.f32.mrf.mxu0 }
 0x306   :  { %v584_v56 = vsel %vm583_vm5, %v577_v53, -inf }
 0x307   :  { %v579_v57 = vpop.f32.mrf.mxu0  ;;  %585 = vmax.xlane.f32.xlu0 %v584_v56 }
 0x308   :  { %v580_v58 = vadd.f32 %v579_v57, %v8292_v55 }
 0x309   :  { %v6776_v59 = vpop.f32.mrf.mxu0 }
 0x30a   :  { %v587_v60 = vsel %vm583_vm5, %v580_v58, -inf }
 0x30b   :  { %588 = vmax.xlane.f32.xlu1 %v587_v60 }
 0x375   :  { %v697_v61 = vpop.f32.mrf.mxu0 }
 0x376   :  { %v698_v62 = vadd.f32 %v697_v61, %v8286_v51 }
 0x377   :  { %v6787_v63 = vpop.f32.mrf.mxu0 }
 0x378   :  { %v704_v0 = vsel %vm583_vm5, %v698_v62, -inf }
 0x379   :  { %v700_v2 = vpop.f32.mrf.mxu0  ;;  %705 = vmax.xlane.f32.xlu0 %v704_v0 }
 0x37a   :  { %v701_v3 = vadd.f32 %v700_v2, %v8292_v55 }
 0x37b   :  { %v6788_v4 = vpop.f32.mrf.mxu0 }
 0x37c   :  { %v707_v5 = vsel %vm583_vm5, %v701_v3, -inf }
 0x37d   :  { %v819_v6 = vpop.f32.mrf.mxu0  ;;  %708 = vmax.xlane.f32.xlu0 %v707_v5 }
 0x37e   :  { %v820_v7 = vadd.f32 %v819_v6, %v8286_v51 }
 0x37f   :  { %v6799_v8 = vpop.f32.mrf.mxu0 }
 0x380   :  { %v826_v9 = vsel %vm583_vm5, %v820_v7, -inf }
 0x381   :  { %v822_v10 = vpop.f32.mrf.mxu0  ;;  %827 = vmax.xlane.f32.xlu1 %v826_v9 }
 0x382   :  { %v823_v11 = vadd.f32 %v822_v10, %v8292_v55 }
 0x383   :  { %v6800_v14 = vpop.f32.mrf.mxu0 }
 0x384   :  { %v829_v16 = vsel %vm583_vm5, %v823_v11, -inf }
 0x385   :  { %v940_v17 = vpop.f32.mrf.mxu0  ;;  %830 = vmax.xlane.f32.xlu0 %v829_v16 }
 0x386   :  { %v941_v18 = vadd.f32 %v940_v17, %v8286_v51 }
 0x387   :  { %v6811_v19 = vpop.f32.mrf.mxu0 }
 0x388   :  { %v947_v20 = vsel %vm583_vm5, %v941_v18, -inf }
 0x389   :  { %v943_v21 = vpop.f32.mrf.mxu0  ;;  %948 = vmax.xlane.f32.xlu1 %v947_v20 }
 0x38a   :  { %v944_v22 = vadd.f32 %v943_v21, %v8292_v55 }
 0x38b   :  { %v6812_v23 = vpop.f32.mrf.mxu0 }
 0x38c   :  { %v950_v24 = vsel %vm583_vm5, %v944_v22, -inf }
 0x38d   :  { %951 = vmax.xlane.f32.xlu0 %v950_v24 }
 0x390   :  { %v586_v25 = vpop.xlane.xlu0 %585 }
 0x391   :  { %v590_v26 = vsub.f32 %v577_v53, %v586_v25 }
 0x393   :  { %v592_v27 = vmul.f32 1.442695, %v590_v26 }
 0x394   :  { %v589_v29 = vpop.xlane.xlu1 %588 }
 0x395   :  { %7492 = vpow2.f32 %v592_v27  ;;  %v591_v30 = vsub.f32 %v580_v58, %v589_v29 }
 0x397   :  { %v594_v31 = vmul.f32 1.442695, %v591_v30 }
 0x399   :  { %7494 = vpow2.f32 %v594_v31 }
 0x3a2   :  { %v7493_v32 = vpop.eup %7492 }
 0x3a3   :  { %v596_v33 = vsel %vm583_vm5, %v7493_v32, 0.0 }
 0x3a4   :  { %597 = vadd.xlane.f32.xlu1 %v596_v33 }
 0x3a6   :  { %v7495_v34 = vpop.eup %7494 }
 0x3a7   :  { %v599_v35 = vsel %vm583_vm5, %v7495_v34, 0.0 }
 0x3a8   :  { %600 = vadd.xlane.f32.xlu0 %v599_v35 }
 0x3b5   :  { %728 = vrot.lane.b32.xlu1 %v8253_v28, %s8009_s23 }
 0x402   :  { %v706_v36 = vpop.xlane.xlu0 %705 }
 0x403   :  { %v710_v37 = vsub.f32 %v698_v62, %v706_v36 }
 0x405   :  { %v712_v38 = vmul.f32 1.442695, %v710_v37 }
 0x406   :  { %v709_v39 = vpop.xlane.xlu0 %708 }
 0x407   :  { %7496 = vpow2.f32 %v712_v38  ;;  %v711_v40 = vsub.f32 %v701_v3, %v709_v39 }
 0x409   :  { %v714_v41 = vmul.f32 1.442695, %v711_v40 }
 0x40a   :  { %v828_v42 = vpop.xlane.xlu1 %827 }
 0x40b   :  { %7498 = vpow2.f32 %v714_v41  ;;  %v832_v43 = vsub.f32 %v820_v7, %v828_v42 }
 0x40d   :  { %v834_v44 = vmul.f32 1.442695, %v832_v43 }
 0x40e   :  { %v831_v45 = vpop.xlane.xlu0 %830 }
 0x40f   :  { %7500 = vpow2.f32 %v834_v44  ;;  %v833_v46 = vsub.f32 %v823_v11, %v831_v45 }
 0x411   :  { %v836_v47 = vmul.f32 1.442695, %v833_v46  ;;  %v7426_v46 = vld [vmem:[%s9250_s24 + $0x38] sm:$0xff]  }
 0x412   :  { %v949_v48 = vpop.xlane.xlu1 %948  ;;  %6820 = vmatpush3.bf16.msra.mxu0 %v7426_v46 }
 0x413   :  { %7502 = vpow2.f32 %v836_v47  ;;  %v953_v49 = vsub.f32 %v941_v18, %v949_v48  ;;  %6821 = vmatprep.subr.bf16.mxu0 %v8006_v1 }
 0x414   :  { %v7497_v50 = vpop.eup %7496 }
 0x415   :  { %v955_v52 = vmul.f32 1.442695, %v953_v49  ;;  %v716_v53 = vsel %vm583_vm5, %v7497_v50, 0.0 }
 0x416   :  { %717 = vadd.xlane.f32.xlu1 %v716_v53  ;;  %v952_v54 = vpop.xlane.xlu0 %951  ;;  %v7427_v53 = vld [vmem:[%s9250_s24 + $0x30] sm:$0xff]  }
 0x417   :  { %7504 = vpow2.f32 %v955_v52  ;;  %v954_v56 = vsub.f32 %v944_v22, %v952_v54  ;;  %6822 = vmatpush3.bf16.msra.mxu0 %v7427_v53 }
 0x418   :  { %v7499_v57 = vpop.eup %7498  ;;  %6835 = vmatprep.subr.bf16.mxu0 %v8006_v1 }
 0x419   :  { %v957_v58 = vmul.f32 1.442695, %v954_v56  ;;  %v719_v59 = vsel %vm583_vm5, %v7499_v57, 0.0 }
 0x41a   :  { %720 = vadd.xlane.f32.xlu0 %v719_v59 }
 0x41b   :  { %7506 = vpow2.f32 %v957_v58 }
 0x41c   :  { %v7501_v60 = vpop.eup %7500 }
 0x41d   :  { %v838_v61 = vsel %vm583_vm5, %v7501_v60, 0.0 }
 0x41e   :  { %839 = vadd.xlane.f32.xlu1 %v838_v61 }
 0x420   :  { %v7503_v62 = vpop.eup %7502 }
 0x421   :  { %v841_v63 = vsel %vm583_vm5, %v7503_v62, 0.0 }
 0x422   :  { %842 = vadd.xlane.f32.xlu0 %v841_v63 }
 0x424   :  { %v7505_v0 = vpop.eup %7504 }
 0x425   :  { %v959_v2 = vsel %vm583_vm5, %v7505_v0, 0.0 }
 0x426   :  { %960 = vadd.xlane.f32.xlu1 %v959_v2 }
 0x428   :  { %v7507_v3 = vpop.eup %7506 }
 0x429   :  { %v962_v4 = vsel %vm583_vm5, %v7507_v3, 0.0 }
 0x42a   :  { %963 = vadd.xlane.f32.xlu0 %v962_v4 }
 0x42d   :  { %v598_v5 = vpop.xlane.xlu1 %597 }
 0x42e   :  { %7508 = vrcp.f32 %v598_v5 }
 0x431   :  { %v601_v6 = vpop.xlane.xlu0 %600  ;;  %v729_v14 = vpop.permute.xlu1 %728 }
 0x432   :  { %7510 = vrcp.f32 %v601_v6 }
 0x437   :  { %970 = vrot.lane.b32.xlu1 %v8253_v28, %s8010_s15 }
 0x43b   :  { %v7509_v7 = vpop.eup %7508 }
 0x43c   :  { %v603_v9 = vmul.f32 %v7509_v7, %v7493_v32 }
 0x43f   :  { %v7511_v8 = vpop.eup %7510 }
 0x440   :  { %849 = vrot.lane.b32.xlu0 %v8253_v28, %s8008_s29  ;;  %v605_v10 = vmul.f32 %v7511_v8, %v7495_v34 }
 0x442   :  { %v606_v11 = vpack.c.bf16 %v605_v10, %v603_v9 }
 0x444   :  { %6780 = vmatmul.mubr.msk.bf16.vlgmr.msra.gmra.mxu1 %vm583_vm5, %v606_v11 }
 0x445   :  { %6790 = vmatpush3.bf16.msra.mxu1 %v729_v14  ;;  %6791 = vmatprep.mubr.msk.bf16.mxu1 %vm8007_vm2, %v8006_v1 }
 0x446   :  { %6801 = vmatprep.subr.bf16.mxu1 %v8006_v1 }
 0x49f   :  { %v718_v16 = vpop.xlane.xlu1 %717 }
 0x4a0   :  { %7512 = vrcp.f32 %v718_v16 }
 0x4a3   :  { %v721_v17 = vpop.xlane.xlu0 %720 }
 0x4a4   :  { %7514 = vrcp.f32 %v721_v17 }
 0x4a7   :  { %v840_v18 = vpop.xlane.xlu1 %839 }
 0x4a8   :  { %7516 = vrcp.f32 %v840_v18  ;;  %v6278_v18 = vld [vmem:[#allocation7 + $0x3] ss:$0 sm:$0xff] }
 0x4ab   :  { %v843_v19 = vpop.xlane.xlu0 %842 }
 0x4ac   :  { %7518 = vrcp.f32 %v843_v19 }
 0x4ad   :  { %v7513_v28 = vpop.eup %7512 }
 0x4ae   :  { %v723_v22 = vmul.f32 %v7513_v28, %v7497_v50 }
 0x4af   :  { %v961_v20 = vpop.xlane.xlu1 %960 }
 0x4b0   :  { %7520 = vrcp.f32 %v961_v20 }
 0x4b1   :  { %v7515_v21 = vpop.eup %7514 }
 0x4b2   :  { %v725_v23 = vmul.f32 %v7515_v21, %v7499_v57 }
 0x4b3   :  { %v964_v24 = vpop.xlane.xlu0 %963  ;;  %v971_v33 = vpop.permute.xlu1 %970 }
 0x4b4   :  { %7522 = vrcp.f32 %v964_v24  ;;  %v726_v25 = vpack.c.bf16 %v725_v23, %v723_v22 }
 0x4b5   :  { %v7517_v26 = vpop.eup %7516 }
 0x4b6   :  { %6792 = vmatmul.mubr.msk.bf16.vlgmr.msra.gmra.mxu1 %vm583_vm5, %v726_v25  ;;  %v845_v30 = vmul.f32 %v7517_v26, %v7501_v60 }
 0x4b7   :  { %v850_v27 = vpop.permute.xlu0 %849  ;;  %6803 = vmatprep.mubr.msk.bf16.mxu1 %vm8007_vm2, %v8006_v1 }
 0x4b8   :  { %6802 = vmatpush3.bf16.msra.mxu1 %v850_v27 }
 0x4b9   :  { %v7519_v29 = vpop.eup %7518  ;;  %6813 = vmatprep.subr.bf16.mxu1 %v8006_v1 }
 0x4ba   :  { %v847_v31 = vmul.f32 %v7519_v29, %v7503_v62 }
 0x4bc   :  { %v848_v32 = vpack.c.bf16 %v847_v31, %v845_v30 }
 0x4bd   :  { %v7521_v34 = vpop.eup %7520 }
 0x4be   :  { %6804 = vmatmul.mubr.msk.bf16.vlgmr.msra.gmra.mxu1 %vm583_vm5, %v848_v32  ;;  %v966_v36 = vmul.f32 %v7521_v34, %v7505_v0 }
 0x4bf   :  { %6814 = vmatpush3.bf16.msra.mxu1 %v971_v33  ;;  %6815 = vmatprep.mubr.msk.bf16.mxu1 %vm8007_vm2, %v8006_v1 }
 0x4c0   :  { %6827 = vmatprep.subr.bf16.mxu1 %v8006_v1 }
 0x4c1   :  { %v7523_v35 = vpop.eup %7522 }
 0x4c2   :  { %v968_v37 = vmul.f32 %v7523_v35, %v7507_v3 }
 0x4c4   :  { %v969_v38 = vpack.c.bf16 %v968_v37, %v966_v36 }
 0x4c6   :  { %6816 = vmatmul.mubr.msk.bf16.vlgmr.msra.gmra.mxu1 %vm583_vm5, %v969_v38 }
 0x4c7   :  { %6831 = vmatprep.mubr.msk.bf16.mxu1 %vm8007_vm2, %v8006_v1 }
 0x504   :  { %v644_v39 = vpop.f32.mrf.mxu1 }
 0x506   :  { %v6781_v40 = vpop.f32.mrf.mxu1 }
 0x507   :  { %v7429_v40 = vld [vmem:[#allocation8] sm:$0xff]  }
 0x508   :  { %v647_v41 = vpop.f32.mrf.mxu1 }
 0x50a   :  { %v6782_v42 = vpop.f32.mrf.mxu1 }
 0x576   :  { %v768_v43 = vpop.f32.mrf.mxu1 }
 0x578   :  { %v6793_v44 = vpop.f32.mrf.mxu1 }
 0x57a   :  { %v771_v45 = vpop.f32.mrf.mxu1 }
 0x57b   :  { %v7330_v47 = vpack.i.bf16 %v771_v45, %v768_v43 }
 0x57c   :  { %v6794_v48 = vpop.f32.mrf.mxu1 }
 0x57d   :  { %7331 = vrot.lane.b32.xlu1 %v7330_v47, %s8011_s5 }
 0x57e   :  { %v889_v49 = vpop.f32.mrf.mxu1 }
 0x580   :  { %v6805_v50 = vpop.f32.mrf.mxu1 }
 0x581   :  { %v6283_v50 = vld [vmem:[%s9221_s9] ss:$0 sm:$0xff] }
 0x582   :  { %v892_v52 = vpop.f32.mrf.mxu1 }
 0x583   :  { %v7335_v54 = vpack.i.bf16 %v892_v52, %v889_v49 }
 0x584   :  { %v6806_v56 = vpop.f32.mrf.mxu1 }
 0x585   :  { %7336 = vrot.lane.b32.xlu0 %v7335_v54, %s7996_s1  ;;  %v6284_v56 = vld [vmem:[%s9221_s9 + $0x1] ss:$0 sm:$0xff] }
 0x586   :  { %v1010_v57 = vpop.f32.mrf.mxu1 }
 0x588   :  { %v6817_v58 = vpop.f32.mrf.mxu1 }
 0x58a   :  { %v1013_v59 = vpop.f32.mrf.mxu1 }
 0x58b   :  { %v7340_v60 = vpack.i.bf16 %v1013_v59, %v1010_v57 }
 0x58c   :  { %v6818_v61 = vpop.f32.mrf.mxu1 }
 0x58d   :  { %7341 = vrot.lane.b32.xlu1 %v7340_v60, %s8012_s2  ;;  %v7431_v61 = vld [vmem:[%s9220_s8 + $0x10] sm:$0xff]  }
 0x5ef   :  { %v7332_v62 = vpop.permute.xlu1 %7331 }
 0x5f0   :  { %v7334_v0 = vunpack.i.h.bf16 %v7332_v62  ;;  %v7333_v2 = vunpack.i.l.bf16 %v7332_v62  ;;  %v7432_v62 = vld [vmem:[%s9220_s8 + $0x8] sm:$0xff]  }
 0x5f2   :  { %v1042_v6 = vsel %vm535_vm4, %v647_v41, %v7334_v0  ;;  %v1041_v7 = vsel %vm535_vm4, %v644_v39, %v7333_v2  ;;  %v7428_v39 = vld [vmem:[#allocation8 + $0x8] sm:$0xff]   ;;  %v6286_v0 = vld [vmem:[%s9219_s7] ss:$0 sm:$0xff] }
 0x5f3   :  { %6828 = vmatpush3.bf16.msra.mxu1 %v7428_v39  ;;  %v7430_v41 = vld [vmem:[%s9220_s8 + $0x18] sm:$0xff]  }
 0x5f4   :  { %6829 = vmatprep.subr.bf16.mxu1 %v8006_v1 }
 0x5f7   :  { %v7337_v63 = vpop.permute.xlu0 %7336  ;;  %6830 = vmatpush3.bf16.msra.mxu1 %v7429_v40 }
 0x5f8   :  { %v7339_v3 = vunpack.i.h.bf16 %v7337_v63  ;;  %v7338_v4 = vunpack.i.l.bf16 %v7337_v63  ;;  %6847 = vmatprep.subr.bf16.mxu1 %v8006_v1  ;;  %v7433_v63 = vld [vmem:[%s9220_s8] sm:$0xff]  }
 0x5fa   :  { %v1044_v10 = vsel %vm583_vm5, %v1042_v6, %v7339_v3  ;;  %v1043_v11 = vsel %vm583_vm5, %v1041_v7, %v7338_v4 }
 0x5ff   :  { %v7342_v5 = vpop.permute.xlu1 %7341 }
 0x600   :  { %v7344_v8 = vunpack.i.h.bf16 %v7342_v5  ;;  %v7343_v9 = vunpack.i.l.bf16 %v7342_v5 }
 0x602   :  { %v1047_v14 = vsel %vm1045_vm6, %v1044_v10, %v7344_v8  ;;  %v1046_v16 = vsel %vm1045_vm6, %v1043_v11, %v7343_v9  ;;  %v6290_v11 = vld [vmem:[%s9221_s9 + $0x2] ss:$0 sm:$0xff] }
 0x603   :  { %v1053_v17 = vpack.c.bf16 %v1047_v14, %v1046_v16 }
 0x605   :  { %6824 = vmatmul.mubr.msk.bf16.vlgmr.msra.gmra.mxu0 %vm355_vm3, %v1053_v17 }
 0x606   :  { %6843 = vmatprep.mubr.msk.bf16.mxu0 %vm8007_vm2, %v8006_v1  ;;  %6836 = vmatpush3.bf16.msra.mxu0 %v7430_v41 }
 0x607   :  { %6837 = vmatprep.subr.bf16.mxu0 %v8006_v1 }
 0x60a   :  { %6838 = vmatpush3.bf16.msra.mxu0 %v7431_v61 }
 0x60b   :  { %6839 = vmatprep.subr.bf16.mxu0 %v8006_v1 }
 0x60e   :  { %6840 = vmatpush3.bf16.msra.mxu0 %v7432_v62  ;;  %v6304_v62 = vld [vmem:[#allocation7 + $0x4] ss:$0 sm:$0xff] }
 0x60f   :  { %6841 = vmatprep.subr.bf16.mxu0 %v8006_v1 }
 0x612   :  { %6842 = vmatpush3.bf16.msra.mxu0 %v7433_v63  ;;  %v6320_v63 = vld [vmem:[#allocation7 + $0x6] ss:$0 sm:$0xff] }
 0x613   :  { %6863 = vmatprep.subr.bf16.mxu0 %v8006_v1 }
 0x6c5   :  { %v1111_v19 = vpop.f32.mrf.mxu0 }
 0x6c6   :  { %v1112_v28 = vadd.f32 %v6278_v18, %v1111_v19 }
 0x6c7   :  { %v6825_v20 = vpop.f32.mrf.mxu0 }
 0x6c8   :  { %v1118_v21 = vadd.f32 %v1112_v28, %v8227_v13 }
 0x6c9   :  { %v1114_v22 = vpop.f32.mrf.mxu0 }
 0x6ca   :  { %v1115_v23 = vadd.f32 %v6278_v18, %v1114_v22  ;;  %v1123_v24 = vsel %vm355_vm3, %v1118_v21, 0.0 }
 0x6cb   :  { %1124 = vadd.xlane.f32.xlu0 %v1123_v24  ;;  %v6826_v25 = vpop.f32.mrf.mxu0 }
 0x6cc   :  { %v1119_v26 = vadd.f32 %v1115_v23, %v8225_v12 }
 0x6ce   :  { %v1126_v27 = vsel %vm355_vm3, %v1119_v26, 0.0 }
 0x6cf   :  { %1127 = vadd.xlane.f32.xlu1 %v1126_v27 }
 0x754   :  { %v1125_v29 = vpop.xlane.xlu0 %1124 }
 0x755   :  { %v1130_v30 = vmul.f32 0.03125, %v1125_v29 }
 0x757   :  { %v1132_v31 = vsub.f32 %v1118_v21, %v1130_v30 }
 0x758   :  { %v1128_v32 = vpop.xlane.xlu1 %1127 }
 0x759   :  { %v1131_v33 = vmul.f32 0.03125, %v1128_v32  ;;  %v1134_v34 = vmul.f32 %v1132_v31, %v1132_v31 }
 0x75b   :  { %v1133_v35 = vsub.f32 %v1119_v26, %v1131_v33  ;;  %v1136_v36 = vsel %vm355_vm3, %v1134_v34, 0.0 }
 0x75c   :  { %1137 = vadd.xlane.f32.xlu0 %v1136_v36  ;;  %v7435_v36 = vld [vmem:[%s9250_s24 + $0x68] sm:$0xff]  }
 0x75d   :  { %v1135_v37 = vmul.f32 %v1133_v35, %v1133_v35 }
 0x75f   :  { %v1139_v38 = vsel %vm355_vm3, %v1135_v37, 0.0  ;;  %v7436_v37 = vld [vmem:[%s9250_s24 + $0x40] sm:$0xff]  }
 0x760   :  { %1140 = vadd.xlane.f32.xlu0 %v1139_v38  ;;  %v7437_v38 = vld [vmem:[%s9250_s24 + $0x60] sm:$0xff]  }
 0x7e5   :  { %v1138_v42 = vpop.xlane.xlu0 %1137 }
 0x7e6   :  { %v1142_v43 = vmul.f32 0.03125, %v1138_v42 }
 0x7e8   :  { %v1144_v44 = vadd.f32 1e-05, %v1142_v43 }
 0x7e9   :  { %v1141_v45 = vpop.xlane.xlu0 %1140 }
 0x7ea   :  { %7524 = vrsqrt.f32 %v1144_v44  ;;  %v1143_v46 = vmul.f32 0.03125, %v1141_v45 }
 0x7ec   :  { %v1145_v47 = vadd.f32 1e-05, %v1143_v46 }
 0x7ee   :  { %7526 = vrsqrt.f32 %v1145_v47  ;;  %v6298_v47 = vld [vmem:[%s9221_s9 + $0x3] ss:$0 sm:$0xff] }
 0x7f7   :  { %v7525_v48 = vpop.eup %7524 }
 0x7f8   :  { %v1148_v49 = vmul.f32 %v7525_v48, %v1132_v31 }
 0x7fa   :  { %v1156_v54 = vmul.f32 %v6283_v50, %v1148_v49 }
 0x7fb   :  { %v7527_v52 = vpop.eup %7526 }
 0x7fc   :  { %v1149_v53 = vmul.f32 %v7527_v52, %v1133_v35  ;;  %v1164_v58 = vadd.f32 %v6284_v56, %v1156_v54  ;;  %v7434_v35 = vld [vmem:[%s9250_s24 + $0x48] sm:$0xff]   ;;  %v6299_v52 = vld [vmem:[%s9221_s9 + $0x4] ss:$0 sm:$0xff] }
 0x7fe   :  { %v1157_v57 = vmul.f32 %v6283_v50, %v1149_v53 }
 0x800   :  { %v1165_v59 = vadd.f32 %v6284_v56, %v1157_v57  ;;  %v7438_v57 = vld [vmem:[%s9250_s24 + $0x58] sm:$0xff]  }
 0x802   :  { %v1172_v60 = vpack.c.bf16 %v1165_v59, %v1164_v58 }
 0x804   :  { %6832 = vmatmul.mubr.msk.bf16.vlgmr.msra.gmra.mxu1 %vm355_vm3, %v1172_v60 }
 0x805   :  { %6851 = vmatprep.mubr.msk.bf16.mxu1 %vm8007_vm2, %v8006_v1  ;;  %6848 = vmatpush3.bf16.msra.mxu1 %v7434_v35 }
 0x806   :  { %6849 = vmatprep.subr.bf16.mxu1 %v8006_v1 }
 0x809   :  { %6850 = vmatpush3.bf16.msra.mxu1 %v7436_v37 }
 0x80a   :  { %6855 = vmatprep.subr.bf16.mxu1 %v8006_v1 }
 0x8c4   :  { %v1229_v2 = vpop.f32.mrf.mxu1 }
 0x8c5   :  { %v1230_v4 = vadd.f32 %v6286_v0, %v1229_v2 }
 0x8c6   :  { %v6833_v3 = vpop.f32.mrf.mxu1 }
 0x8c7   :  { %v1236_v8 = vmax.f32 %v1230_v4, 0.0 }
 0x8c8   :  { %v1232_v5 = vpop.f32.mrf.mxu1 }
 0x8c9   :  { %v1233_v6 = vadd.f32 %v6286_v0, %v1232_v5 }
 0x8ca   :  { %v6834_v7 = vpop.f32.mrf.mxu1 }
 0x8cb   :  { %v1237_v9 = vmax.f32 %v1233_v6, 0.0 }
 0x8cd   :  { %v1246_v10 = vpack.c.bf16 %v1237_v9, %v1236_v8 }
 0x8cf   :  { %6844 = vmatmul.mubr.msk.bf16.vlgmr.msra.gmra.mxu0 %vm1277_vm7, %v1246_v10 }
 0x8d0   :  { %6867 = vmatprep.mubr.msk.bf16.mxu0 %vm8007_vm2, %v8006_v1  ;;  %6864 = vmatpush3.bf16.msra.mxu0 %v7435_v36 }
 0x8d1   :  { %6865 = vmatprep.subr.bf16.mxu0 %v8006_v1 }
 0x8d4   :  { %6866 = vmatpush3.bf16.msra.mxu0 %v7437_v38 }
 0x8d5   :  { %6877 = vmatprep.subr.bf16.mxu0 %v8006_v1 }
 0x98f   :  { %v1315_v14 = vpop.f32.mrf.mxu0 }
 0x990   :  { %v1316_v16 = vadd.f32 %v6290_v11, %v1315_v14 }
 0x991   :  { %v6845_v17 = vpop.f32.mrf.mxu0 }
 0x992   :  { %v1322_v18 = vadd.f32 %v1316_v16, %v1164_v58  ;;  %v6312_v17 = vld [vmem:[#allocation7 + $0x5] ss:$0 sm:$0xff] }
 0x993   :  { %v1318_v19 = vpop.f32.mrf.mxu0 }
 0x994   :  { %v1319_v28 = vadd.f32 %v6290_v11, %v1318_v19  ;;  %v1328_v20 = vsel %vm355_vm3, %v1322_v18, 0.0 }
 0x995   :  { %1329 = vadd.xlane.f32.xlu1 %v1328_v20  ;;  %v6846_v21 = vpop.f32.mrf.mxu0 }
 0x996   :  { %v1323_v22 = vadd.f32 %v1319_v28, %v1165_v59  ;;  %v7439_v59 = vld [vmem:[%s9250_s24 + $0x50] sm:$0xff]  }
 0x998   :  { %v1331_v23 = vsel %vm355_vm3, %v1323_v22, 0.0 }
 0x999   :  { %1332 = vadd.xlane.f32.xlu0 %v1331_v23 }
 0xa1e   :  { %v1330_v24 = vpop.xlane.xlu1 %1329 }
 0xa1f   :  { %v1334_v25 = vmul.f32 0.03125, %v1330_v24 }
 0xa21   :  { %v1336_v26 = vsub.f32 %v1322_v18, %v1334_v25 }
 0xa22   :  { %v1333_v27 = vpop.xlane.xlu0 %1332 }
 0xa23   :  { %v1335_v29 = vmul.f32 0.03125, %v1333_v27  ;;  %v1338_v30 = vmul.f32 %v1336_v26, %v1336_v26 }
 0xa25   :  { %v1337_v31 = vsub.f32 %v1323_v22, %v1335_v29  ;;  %v1340_v32 = vsel %vm355_vm3, %v1338_v30, 0.0 }
 0xa26   :  { %1341 = vadd.xlane.f32.xlu1 %v1340_v32 }
 0xa27   :  { %v1339_v33 = vmul.f32 %v1337_v31, %v1337_v31 }
 0xa29   :  { %v1343_v34 = vsel %vm355_vm3, %v1339_v33, 0.0 }
 0xa2a   :  { %1344 = vadd.xlane.f32.xlu0 %v1343_v34 }
 0xaaf   :  { %v1342_v39 = vpop.xlane.xlu1 %1341 }
 0xab0   :  { %v1346_v40 = vmul.f32 0.03125, %v1342_v39 }
 0xab2   :  { %v1348_v41 = vadd.f32 1e-05, %v1346_v40 }
 0xab3   :  { %v1345_v42 = vpop.xlane.xlu0 %1344 }
 0xab4   :  { %7528 = vrsqrt.f32 %v1348_v41  ;;  %v1347_v43 = vmul.f32 0.03125, %v1345_v42 }
 0xab6   :  { %v1349_v44 = vadd.f32 1e-05, %v1347_v43 }
 0xab8   :  { %7530 = vrsqrt.f32 %v1349_v44 }
 0xac1   :  { %v7529_v45 = vpop.eup %7528 }
 0xac2   :  { %v1352_v46 = vmul.f32 %v7529_v45, %v1336_v26 }
 0xac4   :  { %v1360_v50 = vmul.f32 %v6298_v47, %v1352_v46 }
 0xac5   :  { %v7531_v48 = vpop.eup %7530 }
 0xac6   :  { %v1353_v49 = vmul.f32 %v7531_v48, %v1337_v31  ;;  %v8426_v54 = vadd.f32 %v6299_v52, %v1360_v50 }
 0xac8   :  { %v1361_v53 = vmul.f32 %v6298_v47, %v1353_v49 }
 0xaca   :  { %v8428_v56 = vadd.f32 %v6299_v52, %v1361_v53 }
 0xacc   :  { %v1375_v58 = vpack.c.bf16 %v8428_v56, %v8426_v54 }
 0xace   :  { %6852 = vmatmul.mubr.msk.bf16.vlgmr.msra.gmra.mxu1 %vm355_vm3, %v1375_v58  ;;  %6868 = vmatmul.mubr.msk.bf16.vlgmr.msra.gmra.mxu0 %vm355_vm3, %v1375_v58 }
 0xacf   :  { %6856 = vmatpush3.bf16.msra.mxu1 %v7438_v57  ;;  %6859 = vmatprep.mubr.msk.bf16.mxu1 %vm8007_vm2, %v8006_v1 }
 0xad0   :  { %6857 = vmatprep.subr.bf16.mxu1 %v8006_v1  ;;  %6879 = vmatprep.mubr.msk.bf16.mxu0 %vm8007_vm2, %v8006_v1 }
 0xad3   :  { %6858 = vmatpush3.bf16.msra.mxu1 %v7439_v59 }
 0xad4   :  { %6871 = vmatprep.subr.bf16.mxu1 %v8006_v1 }
 0xad6   :  { %6860 = vmatmul.mubr.msk.bf16.vlgmr.msra.gmra.mxu1 %vm355_vm3, %v1375_v58 }
 0xad7   :  { %6873 = vmatprep.mubr.msk.bf16.mxu1 %vm8007_vm2, %v8006_v1 }
 0xb8e   :  { %v1433_v60 = vpop.f32.mrf.mxu1  ;;  %v1565_v61 = vpop.f32.mrf.mxu0 }
 0xb8f   :  { %v1434_v5 = vadd.f32 %v6304_v62, %v1433_v60  ;;  %v1566_v6 = vadd.f32 %v6320_v63, %v1565_v61 }
 0xb90   :  { %v6853_v0 = vpop.f32.mrf.mxu1  ;;  %v6869_v2 = vpop.f32.mrf.mxu0 }
 0xb92   :  { %v1436_v3 = vpop.f32.mrf.mxu1  ;;  %v1568_v4 = vpop.f32.mrf.mxu0 }
 0xb93   :  { %v1437_v7 = vadd.f32 %v6304_v62, %v1436_v3  ;;  %v1569_v8 = vadd.f32 %v6320_v63, %v1568_v4 }
 0xb94   :  { %v6854_v9 = vpop.f32.mrf.mxu1  ;;  %v6870_v10 = vpop.f32.mrf.mxu0 }
 0xb95   :  { %v1572_v11 = vpack.c.bf16 %v1437_v7, %v1434_v5  ;;  %v8449_v14 = vpack.c.bf16 %v1569_v8, %v1566_v6 }
 0xb96   :  { %v1499_v16 = vpop.f32.mrf.mxu1 }
 0xb97   :  { %6878 = vmatpush3.bf16.msra.mxu0 %v8449_v14  ;;  %1690 = vrot.lane.b32.xlu0 %v1572_v11, %s8009_s23  ;;  %v1500_v28 = vadd.f32 %v6312_v17, %v1499_v16 }
 0xb98   :  { %v6861_v18 = vpop.f32.mrf.mxu1  ;;  %6889 = vmatprep.subr.bf16.mxu0 %v8006_v1 }
 0xb9a   :  { %v1502_v19 = vpop.f32.mrf.mxu1 }
 0xb9b   :  { %v1503_v20 = vadd.f32 %v6312_v17, %v1502_v19 }
 0xb9c   :  { %v6862_v21 = vpop.f32.mrf.mxu1 }
 0xb9d   :  { %v1573_v22 = vpack.c.bf16 %v1503_v20, %v1500_v28 }
 0xb9f   :  { %1936 = vrot.lane.b32.xlu0 %v1573_v22, %s8010_s15  ;;  %1693 = vrot.lane.b32.xlu1 %v1573_v22, %s8009_s23  ;;  %v1579_v23 = vsel %vm535_vm4, %v1573_v22, 0 }
 0xba0   :  { %6872 = vmatpush3.bf16.xpose.msra.mxu1 %v1579_v23 }
 0xba1   :  { %6883 = vmatprep.subr.bf16.mxu1 %v8006_v1 }
 0xba3   :  { %1815 = vrot.lane.b32.xlu1 %v1573_v22, %s8008_s29 }
 0xba7   :  { %1813 = vrot.lane.b32.xlu1 %v1572_v11, %s8008_s29  ;;  %6874 = vmatmul.mubr.msk.bf16.vlgmr.msra.gmra.mxu1 %vm535_vm4, %v1572_v11 }
 0xba8   :  { %6885 = vmatprep.mubr.msk.bf16.mxu1 %vm8007_vm2, %v8006_v1 }
 0xbab   :  { %1934 = vrot.lane.b32.xlu1 %v1572_v11, %s8010_s15 }
 0xc09   :  { %v1691_v27 = vpop.permute.xlu0 %1690 }
 0xc11   :  { %v1694_v24 = vpop.permute.xlu1 %1693  ;;  %v1937_v30 = vpop.permute.xlu0 %1936 }
 0xc12   :  { %v1699_v25 = vsel %vm535_vm4, %v1694_v24, 0  ;;  %v1942_v32 = vsel %vm535_vm4, %v1937_v30, 0 }
 0xc13   :  { %6884 = vmatpush3.bf16.xpose.msra.mxu1 %v1699_v25 }
 0xc14   :  { %6895 = vmatprep.subr.bf16.mxu1 %v8006_v1 }
 0xc15   :  { %v1816_v26 = vpop.permute.xlu1 %1815 }
 0xc16   :  { %v1821_v29 = vsel %vm535_vm4, %v1816_v26, 0 }
 0xc19   :  { %v1814_v31 = vpop.permute.xlu1 %1813 }
 0xc1a   :  { %6886 = vmatmul.mubr.msk.bf16.vlgmr.msra.gmra.mxu1 %vm535_vm4, %v1691_v27 }
 0xc1b   :  { %6896 = vmatpush3.bf16.xpose.msra.mxu1 %v1821_v29  ;;  %6897 = vmatprep.mubr.msk.bf16.mxu1 %vm8007_vm2, %v8006_v1 }
 0xc1c   :  { %6907 = vmatprep.subr.bf16.mxu1 %v8006_v1 }
 0xc1d   :  { %v1935_v33 = vpop.permute.xlu1 %1934 }
 0xc22   :  { %6898 = vmatmul.mubr.msk.bf16.vlgmr.msra.gmra.mxu1 %vm535_vm4, %v1814_v31 }
 0xc23   :  { %6908 = vmatpush3.bf16.xpose.msra.mxu1 %v1942_v32  ;;  %6909 = vmatprep.mubr.msk.bf16.mxu1 %vm8007_vm2, %v8006_v1 }
 0xc24   :  { %6919 = vmatprep.subr.bf16.mxu1 %v8006_v1 }
 0xc2a   :  { %6910 = vmatmul.mubr.msk.bf16.vlgmr.msra.gmra.mxu1 %vm535_vm4, %v1935_v33 }
 0xc2b   :  { %6923 = vmatprep.mubr.msk.bf16.mxu1 %vm8007_vm2, %v8006_v1 }
 0xc67   :  { %v1615_v34 = vpop.f32.mrf.mxu1 }
 0xc68   :  { %v1616_v35 = vadd.f32 %v1615_v34, %v8286_v51 }
 0xc69   :  { %v6875_v36 = vpop.f32.mrf.mxu1 }
 0xc6a   :  { %v1622_v37 = vsel %vm583_vm5, %v1616_v35, -inf }
 0xc6b   :  { %1623 = vmax.xlane.f32.xlu0 %v1622_v37  ;;  %v1618_v38 = vpop.f32.mrf.mxu1 }
 0xc6c   :  { %v1619_v39 = vadd.f32 %v1618_v38, %v8292_v55 }
 0xc6d   :  { %v6876_v40 = vpop.f32.mrf.mxu1 }
 0xc6e   :  { %v1625_v41 = vsel %vm583_vm5, %v1619_v39, -inf }
 0xc6f   :  { %1626 = vmax.xlane.f32.xlu1 %v1625_v41 }
 0xcda   :  { %v1735_v42 = vpop.f32.mrf.mxu1 }
 0xcdb   :  { %v1736_v43 = vadd.f32 %v1735_v42, %v8286_v51 }
 0xcdc   :  { %v6887_v44 = vpop.f32.mrf.mxu1 }
 0xcdd   :  { %v1742_v45 = vsel %vm583_vm5, %v1736_v43, -inf }
 0xcde   :  { %1743 = vmax.xlane.f32.xlu0 %v1742_v45  ;;  %v1738_v46 = vpop.f32.mrf.mxu1 }
 0xcdf   :  { %v1739_v47 = vadd.f32 %v1738_v46, %v8292_v55 }
 0xce0   :  { %v6888_v48 = vpop.f32.mrf.mxu1 }
 0xce1   :  { %v1745_v49 = vsel %vm583_vm5, %v1739_v47, -inf }
 0xce2   :  { %1746 = vmax.xlane.f32.xlu0 %v1745_v49  ;;  %v1857_v50 = vpop.f32.mrf.mxu1 }
 0xce3   :  { %v1858_v52 = vadd.f32 %v1857_v50, %v8286_v51 }
 0xce4   :  { %v6899_v53 = vpop.f32.mrf.mxu1 }
 0xce5   :  { %v1864_v57 = vsel %vm583_vm5, %v1858_v52, -inf }
 0xce6   :  { %1865 = vmax.xlane.f32.xlu1 %v1864_v57  ;;  %v1860_v58 = vpop.f32.mrf.mxu1 }
 0xce7   :  { %v1861_v59 = vadd.f32 %v1860_v58, %v8292_v55 }
 0xce8   :  { %v6900_v60 = vpop.f32.mrf.mxu1 }
 0xce9   :  { %v1867_v61 = vsel %vm583_vm5, %v1861_v59, -inf }
 0xcea   :  { %1868 = vmax.xlane.f32.xlu0 %v1867_v61  ;;  %v1978_v62 = vpop.f32.mrf.mxu1 }
 0xceb   :  { %v1979_v63 = vadd.f32 %v1978_v62, %v8286_v51 }
 0xcec   :  { %v6911_v0 = vpop.f32.mrf.mxu1 }
 0xced   :  { %v1985_v2 = vsel %vm583_vm5, %v1979_v63, -inf }
 0xcee   :  { %1986 = vmax.xlane.f32.xlu1 %v1985_v2  ;;  %v1981_v3 = vpop.f32.mrf.mxu1 }
 0xcef   :  { %v1982_v4 = vadd.f32 %v1981_v3, %v8292_v55 }
 0xcf0   :  { %v6912_v5 = vpop.f32.mrf.mxu1 }
 0xcf1   :  { %v1988_v6 = vsel %vm583_vm5, %v1982_v4, -inf }
 0xcf2   :  { %1989 = vmax.xlane.f32.xlu0 %v1988_v6 }
 0xcf4   :  { %v1624_v7 = vpop.xlane.xlu0 %1623 }
 0xcf5   :  { %v1628_v8 = vsub.f32 %v1616_v35, %v1624_v7 }
 0xcf7   :  { %v1630_v9 = vmul.f32 1.442695, %v1628_v8 }
 0xcf8   :  { %v1627_v10 = vpop.xlane.xlu1 %1626 }
 0xcf9   :  { %7532 = vpow2.f32 %v1630_v9  ;;  %v1629_v11 = vsub.f32 %v1619_v39, %v1627_v10 }
 0xcfb   :  { %v1632_v16 = vmul.f32 1.442695, %v1629_v11 }
 0xcfd   :  { %7534 = vpow2.f32 %v1632_v16 }
 0xd06   :  { %v7533_v51 = vpop.eup %7532 }
 0xd07   :  { %v1634_v17 = vsel %vm583_vm5, %v7533_v51, 0.0 }
 0xd08   :  { %1635 = vadd.xlane.f32.xlu1 %v1634_v17 }
 0xd0a   :  { %v7535_v18 = vpop.eup %7534 }
 0xd0b   :  { %v1637_v19 = vsel %vm583_vm5, %v7535_v18, 0.0 }
 0xd0c   :  { %1638 = vadd.xlane.f32.xlu0 %v1637_v19 }
 0xd19   :  { %1766 = vrot.lane.b32.xlu1 %v8449_v14, %s8009_s23 }
 0xd67   :  { %v1744_v55 = vpop.xlane.xlu0 %1743 }
 0xd68   :  { %v1748_v28 = vsub.f32 %v1736_v43, %v1744_v55 }
 0xd6a   :  { %v1750_v20 = vmul.f32 1.442695, %v1748_v28 }
 0xd6b   :  { %v1747_v21 = vpop.xlane.xlu0 %1746 }
 0xd6c   :  { %7536 = vpow2.f32 %v1750_v20  ;;  %v1749_v22 = vsub.f32 %v1739_v47, %v1747_v21 }
 0xd6e   :  { %v1752_v23 = vmul.f32 1.442695, %v1749_v22 }
 0xd6f   :  { %v1866_v24 = vpop.xlane.xlu1 %1865 }
 0xd70   :  { %7538 = vpow2.f32 %v1752_v23  ;;  %v1870_v25 = vsub.f32 %v1858_v52, %v1866_v24 }
 0xd72   :  { %v1872_v26 = vmul.f32 1.442695, %v1870_v25 }
 0xd73   :  { %v1869_v27 = vpop.xlane.xlu0 %1868 }
 0xd74   :  { %7540 = vpow2.f32 %v1872_v26  ;;  %v1871_v29 = vsub.f32 %v1861_v59, %v1869_v27 }
 0xd76   :  { %v1874_v30 = vmul.f32 1.442695, %v1871_v29  ;;  %v7440_v29 = vld [vmem:[%s9250_s24 + $0x78] sm:$0xff]  }
 0xd77   :  { %v1987_v31 = vpop.xlane.xlu1 %1986  ;;  %6920 = vmatpush3.bf16.msra.mxu1 %v7440_v29 }
 0xd78   :  { %7542 = vpow2.f32 %v1874_v30  ;;  %v1991_v32 = vsub.f32 %v1979_v63, %v1987_v31  ;;  %6921 = vmatprep.subr.bf16.mxu1 %v8006_v1 }
 0xd79   :  { %v7537_v33 = vpop.eup %7536 }
 0xd7a   :  { %v1993_v34 = vmul.f32 1.442695, %v1991_v32  ;;  %v1754_v35 = vsel %vm583_vm5, %v7537_v33, 0.0 }
 0xd7b   :  { %1755 = vadd.xlane.f32.xlu1 %v1754_v35  ;;  %v1990_v36 = vpop.xlane.xlu0 %1989  ;;  %v7441_v35 = vld [vmem:[%s9250_s24 + $0x70] sm:$0xff]  }
 0xd7c   :  { %7544 = vpow2.f32 %v1993_v34  ;;  %v1992_v37 = vsub.f32 %v1982_v4, %v1990_v36  ;;  %6922 = vmatpush3.bf16.msra.mxu1 %v7441_v35  ;;  %v6343_v35 = vld [vmem:[%s9221_s9 + $0x6] ss:$0 sm:$0xff] }
 0xd7d   :  { %v7539_v38 = vpop.eup %7538  ;;  %6935 = vmatprep.subr.bf16.mxu1 %v8006_v1 }
 0xd7e   :  { %v1995_v39 = vmul.f32 1.442695, %v1992_v37  ;;  %v1757_v40 = vsel %vm583_vm5, %v7539_v38, 0.0 }
 0xd7f   :  { %1758 = vadd.xlane.f32.xlu0 %v1757_v40 }
 0xd80   :  { %7546 = vpow2.f32 %v1995_v39 }
 0xd81   :  { %v7541_v41 = vpop.eup %7540 }
 0xd82   :  { %v1876_v42 = vsel %vm583_vm5, %v7541_v41, 0.0 }
 0xd83   :  { %1877 = vadd.xlane.f32.xlu1 %v1876_v42 }
 0xd85   :  { %v7543_v43 = vpop.eup %7542 }
 0xd86   :  { %v1879_v44 = vsel %vm583_vm5, %v7543_v43, 0.0 }
 0xd87   :  { %1880 = vadd.xlane.f32.xlu0 %v1879_v44 }
 0xd89   :  { %v7545_v45 = vpop.eup %7544 }
 0xd8a   :  { %v1997_v46 = vsel %vm583_vm5, %v7545_v45, 0.0 }
 0xd8b   :  { %1998 = vadd.xlane.f32.xlu1 %v1997_v46 }
 0xd8d   :  { %v7547_v47 = vpop.eup %7546 }
 0xd8e   :  { %v2000_v48 = vsel %vm583_vm5, %v7547_v47, 0.0 }
 0xd8f   :  { %2001 = vadd.xlane.f32.xlu0 %v2000_v48 }
 0xd91   :  { %v1636_v49 = vpop.xlane.xlu1 %1635 }
 0xd92   :  { %7548 = vrcp.f32 %v1636_v49 }
 0xd95   :  { %v1639_v50 = vpop.xlane.xlu0 %1638  ;;  %v1767_v60 = vpop.permute.xlu1 %1766 }
 0xd96   :  { %7550 = vrcp.f32 %v1639_v50 }
 0xd9c   :  { %2008 = vrot.lane.b32.xlu1 %v8449_v14, %s8010_s15 }
 0xd9f   :  { %v7549_v52 = vpop.eup %7548 }
 0xda0   :  { %v1641_v57 = vmul.f32 %v7549_v52, %v7533_v51 }
 0xda3   :  { %v7551_v53 = vpop.eup %7550 }
 0xda4   :  { %v1643_v58 = vmul.f32 %v7551_v53, %v7535_v18 }
 0xda5   :  { %1887 = vrot.lane.b32.xlu0 %v8449_v14, %s8008_s29 }
 0xda6   :  { %v1644_v59 = vpack.c.bf16 %v1643_v58, %v1641_v57 }
 0xda8   :  { %6880 = vmatmul.mubr.msk.bf16.vlgmr.msra.gmra.mxu0 %vm583_vm5, %v1644_v59 }
 0xda9   :  { %6890 = vmatpush3.bf16.msra.mxu0 %v1767_v60  ;;  %6891 = vmatprep.mubr.msk.bf16.mxu0 %vm8007_vm2, %v8006_v1 }
 0xdaa   :  { %6901 = vmatprep.subr.bf16.mxu0 %v8006_v1 }
 0xe04   :  { %v1756_v61 = vpop.xlane.xlu1 %1755 }
 0xe05   :  { %7552 = vrcp.f32 %v1756_v61 }
 0xe08   :  { %v1759_v62 = vpop.xlane.xlu0 %1758 }
 0xe09   :  { %7554 = vrcp.f32 %v1759_v62 }
 0xe0c   :  { %v1878_v63 = vpop.xlane.xlu1 %1877 }
 0xe0d   :  { %7556 = vrcp.f32 %v1878_v63  ;;  %v6336_v63 = vld [vmem:[#allocation7 + $0x7] ss:$0 sm:$0xff] }
 0xe10   :  { %v1881_v0 = vpop.xlane.xlu0 %1880 }
 0xe11   :  { %7558 = vrcp.f32 %v1881_v0 }
 0xe12   :  { %v7553_v2 = vpop.eup %7552 }
 0xe13   :  { %v1761_v4 = vmul.f32 %v7553_v2, %v7537_v33 }
 0xe14   :  { %v1999_v14 = vpop.xlane.xlu1 %1998 }
 0xe15   :  { %7560 = vrcp.f32 %v1999_v14 }
 0xe16   :  { %v7555_v3 = vpop.eup %7554 }
 0xe17   :  { %v1763_v5 = vmul.f32 %v7555_v3, %v7539_v38 }
 0xe18   :  { %v2002_v6 = vpop.xlane.xlu0 %2001  ;;  %v2009_v17 = vpop.permute.xlu1 %2008 }
 0xe19   :  { %7562 = vrcp.f32 %v2002_v6  ;;  %v1764_v7 = vpack.c.bf16 %v1763_v5, %v1761_v4 }
 0xe1a   :  { %v7557_v8 = vpop.eup %7556 }
 0xe1b   :  { %6892 = vmatmul.mubr.msk.bf16.vlgmr.msra.gmra.mxu0 %vm583_vm5, %v1764_v7  ;;  %v1883_v11 = vmul.f32 %v7557_v8, %v7541_v41 }
 0xe1c   :  { %v1888_v9 = vpop.permute.xlu0 %1887  ;;  %6903 = vmatprep.mubr.msk.bf16.mxu0 %vm8007_vm2, %v8006_v1 }
 0xe1d   :  { %6902 = vmatpush3.bf16.msra.mxu0 %v1888_v9 }
 0xe1e   :  { %v7559_v10 = vpop.eup %7558  ;;  %6913 = vmatprep.subr.bf16.mxu0 %v8006_v1 }
 0xe1f   :  { %v1885_v16 = vmul.f32 %v7559_v10, %v7543_v43 }
 0xe21   :  { %v1886_v51 = vpack.c.bf16 %v1885_v16, %v1883_v11 }
 0xe22   :  { %v7561_v18 = vpop.eup %7560 }
 0xe23   :  { %6904 = vmatmul.mubr.msk.bf16.vlgmr.msra.gmra.mxu0 %vm583_vm5, %v1886_v51  ;;  %v2004_v55 = vmul.f32 %v7561_v18, %v7545_v45 }
 0xe24   :  { %6914 = vmatpush3.bf16.msra.mxu0 %v2009_v17  ;;  %6915 = vmatprep.mubr.msk.bf16.mxu0 %vm8007_vm2, %v8006_v1 }
 0xe25   :  { %6927 = vmatprep.subr.bf16.mxu0 %v8006_v1 }
 0xe26   :  { %v7563_v19 = vpop.eup %7562 }
 0xe27   :  { %v2006_v28 = vmul.f32 %v7563_v19, %v7547_v47 }
 0xe29   :  { %v2007_v20 = vpack.c.bf16 %v2006_v28, %v2004_v55 }
 0xe2b   :  { %6916 = vmatmul.mubr.msk.bf16.vlgmr.msra.gmra.mxu0 %vm583_vm5, %v2007_v20  ;;  %v7442_v20 = vld [vmem:[#allocation8 + $0x18] sm:$0xff]  }
 0xe2c   :  { %6931 = vmatprep.mubr.msk.bf16.mxu0 %vm8007_vm2, %v8006_v1  ;;  %6928 = vmatpush3.bf16.msra.mxu0 %v7442_v20 }
 0xe2d   :  { %6929 = vmatprep.subr.bf16.mxu0 %v8006_v1 }
 0xe68   :  { %v1682_v21 = vpop.f32.mrf.mxu0 }
 0xe6a   :  { %v6881_v22 = vpop.f32.mrf.mxu0 }
 0xe6c   :  { %v1685_v23 = vpop.f32.mrf.mxu0 }
 0xe6e   :  { %v6882_v24 = vpop.f32.mrf.mxu0 }
 0xedb   :  { %v1806_v25 = vpop.f32.mrf.mxu0 }
 0xedd   :  { %v6893_v26 = vpop.f32.mrf.mxu0 }
 0xedf   :  { %v1809_v27 = vpop.f32.mrf.mxu0 }
 0xee0   :  { %v7345_v30 = vpack.i.bf16 %v1809_v27, %v1806_v25 }
 0xee1   :  { %v6894_v31 = vpop.f32.mrf.mxu0 }
 0xee2   :  { %7346 = vrot.lane.b32.xlu1 %v7345_v30, %s8011_s5  ;;  %v6342_v31 = vld [vmem:[%s9221_s9 + $0x5] ss:$0 sm:$0xff] }
 0xee3   :  { %v1927_v32 = vpop.f32.mrf.mxu0 }
 0xee5   :  { %v6905_v33 = vpop.f32.mrf.mxu0 }
 0xee7   :  { %v1930_v34 = vpop.f32.mrf.mxu0 }
 0xee8   :  { %v7350_v36 = vpack.i.bf16 %v1930_v34, %v1927_v32 }
 0xee9   :  { %v6906_v37 = vpop.f32.mrf.mxu0 }
 0xeea   :  { %7351 = vrot.lane.b32.xlu0 %v7350_v36, %s7996_s1 }
 0xeeb   :  { %v2048_v38 = vpop.f32.mrf.mxu0 }
 0xeed   :  { %v6917_v39 = vpop.f32.mrf.mxu0 }
 0xeee   :  { %v7444_v39 = vld [vmem:[%s9223_s11 + $0x8] sm:$0xff]  }
 0xeef   :  { %v2051_v40 = vpop.f32.mrf.mxu0 }
 0xef0   :  { %v7355_v41 = vpack.i.bf16 %v2051_v40, %v2048_v38 }
 0xef1   :  { %v6918_v42 = vpop.f32.mrf.mxu0 }
 0xef2   :  { %7356 = vrot.lane.b32.xlu1 %v7355_v41, %s8012_s2  ;;  %v7445_v41 = vld [vmem:[%s9223_s11] sm:$0xff]   ;;  %v7446_v42 = vld [vmem:[%s9223_s11 + $0x18] sm:$0xff]  }
 0xf54   :  { %v7347_v43 = vpop.permute.xlu1 %7346 }
 0xf55   :  { %v7349_v45 = vunpack.i.h.bf16 %v7347_v43  ;;  %v7348_v46 = vunpack.i.l.bf16 %v7347_v43  ;;  %v7447_v43 = vld [vmem:[%s9223_s11 + $0x10] sm:$0xff]  }
 0xf57   :  { %v2080_v50 = vsel %vm535_vm4, %v1685_v23, %v7349_v45  ;;  %v2079_v52 = vsel %vm535_vm4, %v1682_v21, %v7348_v46  ;;  %v7448_v21 = vld [vmem:[%s9220_s8 + $0x38] sm:$0xff]   ;;  %v7450_v45 = vld [vmem:[%s9220_s8 + $0x28] sm:$0xff]   ;;  %v7451_v46 = vld [vmem:[%s9220_s8 + $0x20] sm:$0xff]  }
 0xf5c   :  { %v7352_v44 = vpop.permute.xlu0 %7351 }
 0xf5d   :  { %v7354_v47 = vunpack.i.h.bf16 %v7352_v44  ;;  %v7353_v48 = vunpack.i.l.bf16 %v7352_v44  ;;  %v7449_v44 = vld [vmem:[%s9220_s8 + $0x30] sm:$0xff]  }
 0xf5f   :  { %v2082_v58 = vsel %vm583_vm5, %v2080_v50, %v7354_v47  ;;  %v2081_v59 = vsel %vm583_vm5, %v2079_v52, %v7353_v48  ;;  %v6346_v47 = vld [vmem:[%s9219_s7 + $0x1] ss:$0 sm:$0xff] }
 0xf64   :  { %v7357_v49 = vpop.permute.xlu1 %7356 }
 0xf65   :  { %v7359_v53 = vunpack.i.h.bf16 %v7357_v49  ;;  %v7358_v57 = vunpack.i.l.bf16 %v7357_v49 }
 0xf67   :  { %v2084_v60 = vsel %vm1045_vm6, %v2082_v58, %v7359_v53  ;;  %v2083_v61 = vsel %vm1045_vm6, %v2081_v59, %v7358_v57 }
 0xf68   :  { %v2090_v62 = vpack.c.bf16 %v2084_v60, %v2083_v61  ;;  %v7452_v61 = vld [vmem:[%s9223_s11 + $0x28] sm:$0xff]  }
 0xf6a   :  { %6924 = vmatmul.mubr.msk.bf16.vlgmr.msra.gmra.mxu1 %vm355_vm3, %v2090_v62 }
 0xf6b   :  { %6943 = vmatprep.mubr.msk.bf16.mxu1 %vm8007_vm2, %v8006_v1  ;;  %6936 = vmatpush3.bf16.msra.mxu1 %v7448_v21 }
 0xf6c   :  { %6937 = vmatprep.subr.bf16.mxu1 %v8006_v1 }
 0xf6f   :  { %6938 = vmatpush3.bf16.msra.mxu1 %v7449_v44  ;;  %v8669_v44 = vld [vmem:[%s9251_s18 + $0x8] sm:$0xff] }
 0xf70   :  { %6939 = vmatprep.subr.bf16.mxu1 %v8006_v1 }
 0xf73   :  { %6940 = vmatpush3.bf16.msra.mxu1 %v7450_v45 }
 0xf74   :  { %6941 = vmatprep.subr.bf16.mxu1 %v8006_v1 }
 0xf77   :  { %6942 = vmatpush3.bf16.msra.mxu1 %v7451_v46 }
 0xf78   :  { %6963 = vmatprep.subr.bf16.mxu1 %v8006_v1 }
0x102a   :  { %v2148_v0 = vpop.f32.mrf.mxu1 }
0x102b   :  { %v2149_v2 = vadd.f32 %v6336_v63, %v2148_v0 }
0x102c   :  { %v6925_v14 = vpop.f32.mrf.mxu1 }
0x102d   :  { %v2155_v3 = vadd.f32 %v2149_v2, %v8426_v54  ;;  %v7453_v14 = vld [vmem:[%s9223_s11 + $0x20] sm:$0xff]  }
0x102e   :  { %v2151_v4 = vpop.f32.mrf.mxu1 }
0x102f   :  { %v2152_v5 = vadd.f32 %v6336_v63, %v2151_v4  ;;  %v2161_v6 = vsel %vm355_vm3, %v2155_v3, 0.0  ;;  %v6370_v63 = vld [vmem:[#allocation11] ss:$0 sm:$0xff] }
0x1030   :  { %2162 = vadd.xlane.f32.xlu0 %v2161_v6  ;;  %v6926_v7 = vpop.f32.mrf.mxu1 }
0x1031   :  { %v2156_v8 = vadd.f32 %v2152_v5, %v8428_v56  ;;  %v7443_v56 = vld [vmem:[#allocation8 + $0x10] sm:$0xff]  }
0x1032   :  { %6930 = vmatpush3.bf16.msra.mxu0 %v7443_v56 }
0x1033   :  { %v2164_v9 = vsel %vm355_vm3, %v2156_v8, 0.0  ;;  %6947 = vmatprep.subr.bf16.mxu0 %v8006_v1 }
0x1034   :  { %2165 = vadd.xlane.f32.xlu1 %v2164_v9 }
0x10b9   :  { %v2163_v10 = vpop.xlane.xlu0 %2162 }
0x10ba   :  { %v2167_v11 = vmul.f32 0.03125, %v2163_v10 }
0x10bc   :  { %v2169_v16 = vsub.f32 %v2155_v3, %v2167_v11 }
0x10bd   :  { %v2166_v51 = vpop.xlane.xlu1 %2165 }
0x10be   :  { %v2168_v17 = vmul.f32 0.03125, %v2166_v51  ;;  %v2171_v18 = vmul.f32 %v2169_v16, %v2169_v16 }
0x10c0   :  { %v2170_v19 = vsub.f32 %v2156_v8, %v2168_v17  ;;  %v2173_v54 = vsel %vm355_vm3, %v2171_v18, 0.0  ;;  %v6378_v8 = vld [vmem:[#allocation11 + $0x1] ss:$0 sm:$0xff] }
0x10c1   :  { %2174 = vadd.xlane.f32.xlu0 %v2173_v54 }
0x10c2   :  { %v2172_v55 = vmul.f32 %v2170_v19, %v2170_v19 }
0x10c4   :  { %v2176_v28 = vsel %vm355_vm3, %v2172_v55, 0.0 }
0x10c5   :  { %2177 = vadd.xlane.f32.xlu0 %v2176_v28 }
0x114a   :  { %v2175_v22 = vpop.xlane.xlu0 %2174 }
0x114b   :  { %v2179_v23 = vmul.f32 0.03125, %v2175_v22 }
0x114d   :  { %v2181_v24 = vadd.f32 1e-05, %v2179_v23 }
0x114e   :  { %v2178_v25 = vpop.xlane.xlu0 %2177 }
0x114f   :  { %7564 = vrsqrt.f32 %v2181_v24  ;;  %v2180_v26 = vmul.f32 0.03125, %v2178_v25 }
0x1151   :  { %v2182_v27 = vadd.f32 1e-05, %v2180_v26 }
0x1153   :  { %7566 = vrsqrt.f32 %v2182_v27 }
0x115c   :  { %v7565_v29 = vpop.eup %7564 }
0x115d   :  { %v2185_v30 = vmul.f32 %v7565_v29, %v2169_v16  ;;  %v6386_v29 = vld [vmem:[#allocation11 + $0x2] ss:$0 sm:$0xff] }
0x115f   :  { %v2193_v34 = vmul.f32 %v6342_v31, %v2185_v30 }
0x1160   :  { %v7567_v32 = vpop.eup %7566 }
0x1161   :  { %v2186_v33 = vmul.f32 %v7567_v32, %v2170_v19  ;;  %v8562_v37 = vadd.f32 %v6343_v35, %v2193_v34 }
0x1163   :  { %v2194_v36 = vmul.f32 %v6342_v31, %v2186_v33 }
0x1165   :  { %v8564_v38 = vadd.f32 %v6343_v35, %v2194_v36 }
0x1167   :  { %v2210_v40 = vpack.c.bf16 %v8564_v38, %v8562_v37 }
0x1169   :  { %6932 = vmatmul.mubr.msk.bf16.vlgmr.msra.gmra.mxu0 %vm355_vm3, %v2210_v40 }
0x116a   :  { %6948 = vmatpush3.bf16.msra.mxu0 %v7444_v39  ;;  %6951 = vmatprep.mubr.msk.bf16.mxu0 %vm8007_vm2, %v8006_v1  ;;  %v8662_v39 = vld [vmem:[%s9251_s18] sm:$0xff] }
0x116b   :  { %6949 = vmatprep.subr.bf16.mxu0 %v8006_v1 }
0x116e   :  { %6950 = vmatpush3.bf16.msra.mxu0 %v7445_v41 }
0x116f   :  { %6955 = vmatprep.subr.bf16.mxu0 %v8006_v1 }
0x1171   :  { %6952 = vmatmul.mubr.msk.bf16.vlgmr.msra.gmra.mxu0 %vm355_vm3, %v8234_v15 }
0x1172   :  { %6956 = vmatpush3.bf16.msra.mxu0 %v7446_v42  ;;  %6959 = vmatprep.mubr.msk.bf16.mxu0 %vm8007_vm2, %v8006_v1 }
0x1173   :  { %6957 = vmatprep.subr.bf16.mxu0 %v8006_v1 }
0x1176   :  { %6958 = vmatpush3.bf16.msra.mxu0 %v7447_v43 }
0x1177   :  { %6971 = vmatprep.subr.bf16.mxu0 %v8006_v1 }
0x1179   :  { %6960 = vmatmul.mubr.msk.bf16.vlgmr.msra.gmra.mxu0 %vm355_vm3, %v8234_v15 }
0x117a   :  { %6973 = vmatprep.mubr.msk.bf16.mxu0 %vm8007_vm2, %v8006_v1 }
0x1229   :  { %v2268_v48 = vpop.f32.mrf.mxu0 }
0x122a   :  { %v2269_v50 = vadd.f32 %v6346_v47, %v2268_v48 }
0x122b   :  { %v6933_v49 = vpop.f32.mrf.mxu0 }
0x122c   :  { %v2275_v58 = vmax.f32 %v2269_v50, 0.0 }
0x122d   :  { %v2271_v52 = vpop.f32.mrf.mxu0 }
0x122e   :  { %v2272_v53 = vadd.f32 %v6346_v47, %v2271_v52 }
0x122f   :  { %v6934_v57 = vpop.f32.mrf.mxu0 }
0x1230   :  { %v2276_v59 = vmax.f32 %v2272_v53, 0.0 }
0x1231   :  { %v2511_v60 = vpop.f32.mrf.mxu0 }
0x1232   :  { %v2286_v62 = vpack.c.bf16 %v2276_v59, %v2275_v58  ;;  %v2512_v3 = vadd.f32 %v6370_v63, %v2511_v60 }
0x1233   :  { %v6953_v0 = vpop.f32.mrf.mxu0 }
0x1234   :  { %6944 = vmatmul.mubr.msk.bf16.vlgmr.msra.gmra.mxu1 %vm1277_vm7, %v2286_v62 }
0x1235   :  { %v2514_v2 = vpop.f32.mrf.mxu0  ;;  %6964 = vmatpush3.bf16.msra.mxu1 %v7452_v61  ;;  %6967 = vmatprep.mubr.msk.bf16.mxu1 %vm8007_vm2, %v8006_v1 }
0x1236   :  { %v2515_v4 = vadd.f32 %v6370_v63, %v2514_v2  ;;  %6965 = vmatprep.subr.bf16.mxu1 %v8006_v1 }
0x1237   :  { %v6954_v5 = vpop.f32.mrf.mxu0 }
0x1238   :  { %v2650_v6 = vpack.c.bf16 %v2515_v4, %v2512_v3 }
0x1239   :  { %v2577_v7 = vpop.f32.mrf.mxu0  ;;  %6966 = vmatpush3.bf16.msra.mxu1 %v7453_v14 }
0x123a   :  { %2768 = vrot.lane.b32.xlu0 %v2650_v6, %s8009_s23  ;;  %6977 = vmatprep.subr.bf16.mxu1 %v8006_v1  ;;  %v2578_v11 = vadd.f32 %v6378_v8, %v2577_v7 }
0x123b   :  { %v6961_v9 = vpop.f32.mrf.mxu0 }
0x123c   :  { %6968 = vmatmul.mubr.msk.bf16.vlgmr.msra.gmra.mxu1 %vm355_vm3, %v8234_v15 }
0x123d   :  { %v2580_v10 = vpop.f32.mrf.mxu0  ;;  %6979 = vmatprep.mubr.msk.bf16.mxu1 %vm8007_vm2, %v8006_v1 }
0x123e   :  { %v2581_v16 = vadd.f32 %v6378_v8, %v2580_v10 }
0x123f   :  { %v6962_v51 = vpop.f32.mrf.mxu0 }
0x1240   :  { %v2651_v17 = vpack.c.bf16 %v2581_v16, %v2578_v11 }
0x1242   :  { %3014 = vrot.lane.b32.xlu0 %v2651_v17, %s8010_s15  ;;  %2771 = vrot.lane.b32.xlu1 %v2651_v17, %s8009_s23  ;;  %v2657_v18 = vsel %vm535_vm4, %v2651_v17, 0 }
0x1243   :  { %6972 = vmatpush3.bf16.xpose.msra.mxu0 %v2657_v18 }
0x1244   :  { %6983 = vmatprep.subr.bf16.mxu0 %v8006_v1 }
0x1246   :  { %2893 = vrot.lane.b32.xlu1 %v2651_v17, %s8008_s29 }
0x124a   :  { %2891 = vrot.lane.b32.xlu1 %v2650_v6, %s8008_s29  ;;  %6974 = vmatmul.mubr.msk.bf16.vlgmr.msra.gmra.mxu0 %vm535_vm4, %v2650_v6 }
0x124b   :  { %6985 = vmatprep.mubr.msk.bf16.mxu0 %vm8007_vm2, %v8006_v1 }
0x124e   :  { %3012 = vrot.lane.b32.xlu1 %v2650_v6, %s8010_s15 }
0x12ac   :  { %v2769_v55 = vpop.permute.xlu0 %2768 }
0x12b4   :  { %v2772_v15 = vpop.permute.xlu1 %2771  ;;  %v3015_v20 = vpop.permute.xlu0 %3014 }
0x12b5   :  { %v2777_v19 = vsel %vm535_vm4, %v2772_v15, 0  ;;  %v3020_v21 = vsel %vm535_vm4, %v3015_v20, 0 }
0x12b6   :  { %6984 = vmatpush3.bf16.xpose.msra.mxu0 %v2777_v19 }
0x12b7   :  { %6995 = vmatprep.subr.bf16.mxu0 %v8006_v1 }
0x12b8   :  { %v2894_v54 = vpop.permute.xlu1 %2893 }
0x12b9   :  { %v2899_v28 = vsel %vm535_vm4, %v2894_v54, 0 }
0x12bc   :  { %v2892_v56 = vpop.permute.xlu1 %2891 }
0x12bd   :  { %6986 = vmatmul.mubr.msk.bf16.vlgmr.msra.gmra.mxu0 %vm535_vm4, %v2769_v55 }
0x12be   :  { %6996 = vmatpush3.bf16.xpose.msra.mxu0 %v2899_v28  ;;  %6997 = vmatprep.mubr.msk.bf16.mxu0 %vm8007_vm2, %v8006_v1 }
0x12bf   :  { %7007 = vmatprep.subr.bf16.mxu0 %v8006_v1 }
0x12c0   :  { %v3013_v22 = vpop.permute.xlu1 %3012 }
0x12c5   :  { %6998 = vmatmul.mubr.msk.bf16.vlgmr.msra.gmra.mxu0 %vm535_vm4, %v2892_v56 }
0x12c6   :  { %7008 = vmatpush3.bf16.xpose.msra.mxu0 %v3020_v21  ;;  %7009 = vmatprep.mubr.msk.bf16.mxu0 %vm8007_vm2, %v8006_v1 }
0x12c7   :  { %7019 = vmatprep.subr.bf16.mxu0 %v8006_v1 }
0x12cd   :  { %7010 = vmatmul.mubr.msk.bf16.vlgmr.msra.gmra.mxu0 %vm535_vm4, %v3013_v22 }
0x12ce   :  { %7023 = vmatprep.mubr.msk.bf16.mxu0 %vm8007_vm2, %v8006_v1 }
0x12f4   :  { %v8651_v23 = vpop.f32.mrf.mxu1 }
0x12f6   :  { %v6945_v24 = vpop.f32.mrf.mxu1 }
0x12f8   :  { %v8653_v25 = vpop.f32.mrf.mxu1 }
0x12fa   :  { %v6946_v26 = vpop.f32.mrf.mxu1 }
0x12fc   :  { %v2643_v27 = vpop.f32.mrf.mxu1 }
0x12fd   :  { %v2644_v32 = vadd.f32 %v6386_v29, %v2643_v27 }
0x12fe   :  { %v6969_v30 = vpop.f32.mrf.mxu1 }
0x1300   :  { %v2646_v31 = vpop.f32.mrf.mxu1 }
0x1301   :  { %v2647_v33 = vadd.f32 %v6386_v29, %v2646_v31 }
0x1302   :  { %v6970_v34 = vpop.f32.mrf.mxu1 }
0x1303   :  { %v8655_v35 = vpack.c.bf16 %v2647_v33, %v2644_v32 }
0x1305   :  { %6978 = vmatpush3.bf16.msra.mxu1 %v8655_v35 }
0x1306   :  { %6989 = vmatprep.subr.bf16.mxu1 %v8006_v1 }
0x130a   :  { %v2693_v36 = vpop.f32.mrf.mxu0 }
0x130b   :  { %v2694_v40 = vadd.f32 %v8662_v39, %v2693_v36 }
0x130c   :  { %v6975_v41 = vpop.f32.mrf.mxu0 }
0x130d   :  { %v2700_v42 = vsel %vm583_vm5, %v2694_v40, -inf }
0x130e   :  { %2701 = vmax.xlane.f32.xlu0 %v2700_v42  ;;  %v2696_v43 = vpop.f32.mrf.mxu0 }
0x130f   :  { %v2697_v45 = vadd.f32 %v8669_v44, %v2696_v43 }
0x1310   :  { %v6976_v46 = vpop.f32.mrf.mxu0 }
0x1311   :  { %v2703_v47 = vsel %vm583_vm5, %v2697_v45, -inf }
0x1312   :  { %2704 = vmax.xlane.f32.xlu1 %v2703_v47 }
0x137d   :  { %v2813_v48 = vpop.f32.mrf.mxu0 }
0x137e   :  { %v2814_v49 = vadd.f32 %v8662_v39, %v2813_v48 }
0x137f   :  { %v6987_v50 = vpop.f32.mrf.mxu0 }
0x1380   :  { %v2820_v52 = vsel %vm583_vm5, %v2814_v49, -inf }
0x1381   :  { %2821 = vmax.xlane.f32.xlu0 %v2820_v52  ;;  %v2816_v53 = vpop.f32.mrf.mxu0 }
0x1382   :  { %v2817_v57 = vadd.f32 %v8669_v44, %v2816_v53 }
0x1383   :  { %v6988_v58 = vpop.f32.mrf.mxu0 }
0x1384   :  { %v2823_v59 = vsel %vm583_vm5, %v2817_v57, -inf }
0x1385   :  { %2824 = vmax.xlane.f32.xlu0 %v2823_v59  ;;  %v2935_v60 = vpop.f32.mrf.mxu0 }
0x1386   :  { %v2936_v61 = vadd.f32 %v8662_v39, %v2935_v60 }
0x1387   :  { %v6999_v62 = vpop.f32.mrf.mxu0 }
0x1388   :  { %v2942_v63 = vsel %vm583_vm5, %v2936_v61, -inf }
0x1389   :  { %2943 = vmax.xlane.f32.xlu1 %v2942_v63  ;;  %v2938_v0 = vpop.f32.mrf.mxu0 }
0x138a   :  { %v2939_v2 = vadd.f32 %v8669_v44, %v2938_v0 }
0x138b   :  { %v7000_v14 = vpop.f32.mrf.mxu0 }
0x138c   :  { %v2945_v3 = vsel %vm583_vm5, %v2939_v2, -inf }
0x138d   :  { %2946 = vmax.xlane.f32.xlu0 %v2945_v3  ;;  %v3056_v4 = vpop.f32.mrf.mxu0 }
0x138e   :  { %v3057_v5 = vadd.f32 %v8662_v39, %v3056_v4 }
0x138f   :  { %v7011_v6 = vpop.f32.mrf.mxu0 }
0x1390   :  { %v3063_v7 = vsel %vm583_vm5, %v3057_v5, -inf }
0x1391   :  { %3064 = vmax.xlane.f32.xlu1 %v3063_v7  ;;  %v3059_v8 = vpop.f32.mrf.mxu0 }
0x1392   :  { %v3060_v9 = vadd.f32 %v8669_v44, %v3059_v8 }
0x1393   :  { %v7012_v10 = vpop.f32.mrf.mxu0 }
0x1394   :  { %v3066_v11 = vsel %vm583_vm5, %v3060_v9, -inf }
0x1395   :  { %3067 = vmax.xlane.f32.xlu0 %v3066_v11 }
0x1397   :  { %v2702_v16 = vpop.xlane.xlu0 %2701 }
0x1398   :  { %v2706_v51 = vsub.f32 %v2694_v40, %v2702_v16 }
0x139a   :  { %v2708_v17 = vmul.f32 1.442695, %v2706_v51 }
0x139b   :  { %v2705_v18 = vpop.xlane.xlu1 %2704 }
0x139c   :  { %7568 = vpow2.f32 %v2708_v17  ;;  %v2707_v15 = vsub.f32 %v2697_v45, %v2705_v18 }
0x139e   :  { %v2710_v19 = vmul.f32 1.442695, %v2707_v15 }
0x13a0   :  { %7570 = vpow2.f32 %v2710_v19 }
0x13a9   :  { %v7569_v54 = vpop.eup %7568 }
0x13aa   :  { %v2712_v55 = vsel %vm583_vm5, %v7569_v54, 0.0 }
0x13ab   :  { %2713 = vadd.xlane.f32.xlu1 %v2712_v55 }
0x13ad   :  { %v7571_v28 = vpop.eup %7570 }
0x13ae   :  { %v2715_v20 = vsel %vm583_vm5, %v7571_v28, 0.0 }
0x13af   :  { %2716 = vadd.xlane.f32.xlu0 %v2715_v20 }
0x13bc   :  { %2844 = vrot.lane.b32.xlu1 %v8655_v35, %s8009_s23 }
0x140a   :  { %v2822_v56 = vpop.xlane.xlu0 %2821 }
0x140b   :  { %v2826_v21 = vsub.f32 %v2814_v49, %v2822_v56 }
0x140d   :  { %v2828_v22 = vmul.f32 1.442695, %v2826_v21 }
0x140e   :  { %v2825_v24 = vpop.xlane.xlu0 %2824 }
0x140f   :  { %7572 = vpow2.f32 %v2828_v22  ;;  %v2827_v26 = vsub.f32 %v2817_v57, %v2825_v24 }
0x1411   :  { %v2830_v27 = vmul.f32 1.442695, %v2827_v26 }
0x1412   :  { %v2944_v29 = vpop.xlane.xlu1 %2943 }
0x1413   :  { %7574 = vpow2.f32 %v2830_v27  ;;  %v2948_v30 = vsub.f32 %v2936_v61, %v2944_v29 }
0x1415   :  { %v2950_v31 = vmul.f32 1.442695, %v2948_v30 }
0x1416   :  { %v2947_v32 = vpop.xlane.xlu0 %2946 }
0x1417   :  { %7576 = vpow2.f32 %v2950_v31  ;;  %v2949_v33 = vsub.f32 %v2939_v2, %v2947_v32 }
0x1419   :  { %v2952_v34 = vmul.f32 1.442695, %v2949_v33 }
0x141a   :  { %v3065_v36 = vpop.xlane.xlu1 %3064 }
0x141b   :  { %7578 = vpow2.f32 %v2952_v34  ;;  %v3069_v40 = vsub.f32 %v3057_v5, %v3065_v36 }
0x141c   :  { %v7573_v41 = vpop.eup %7572 }
0x141d   :  { %v3071_v42 = vmul.f32 1.442695, %v3069_v40  ;;  %v2832_v43 = vsel %vm583_vm5, %v7573_v41, 0.0  ;;  %v7454_v40 = vld [vmem:[%s9223_s11 + $0x38] sm:$0xff]  }
0x141e   :  { %v3068_v45 = vpop.xlane.xlu0 %3067  ;;  %2833 = vadd.xlane.f32.xlu1 %v2832_v43  ;;  %7020 = vmatpush3.bf16.msra.mxu0 %v7454_v40  ;;  %v6366_v40 = vld [vmem:[%s9221_s9 + $0x8] ss:$0 sm:$0xff] }
0x141f   :  { %7580 = vpow2.f32 %v3071_v42  ;;  %v3070_v46 = vsub.f32 %v3060_v9, %v3068_v45  ;;  %7021 = vmatprep.subr.bf16.mxu0 %v8006_v1 }
0x1420   :  { %v7575_v47 = vpop.eup %7574 }
0x1421   :  { %v3073_v48 = vmul.f32 1.442695, %v3070_v46  ;;  %v2835_v49 = vsel %vm583_vm5, %v7575_v47, 0.0 }
0x1422   :  { %2836 = vadd.xlane.f32.xlu0 %v2835_v49 }
0x1423   :  { %7582 = vpow2.f32 %v3073_v48 }
0x1424   :  { %v7577_v50 = vpop.eup %7576 }
0x1425   :  { %v2954_v52 = vsel %vm583_vm5, %v7577_v50, 0.0 }
0x1426   :  { %2955 = vadd.xlane.f32.xlu1 %v2954_v52 }
0x1428   :  { %v7579_v53 = vpop.eup %7578 }
0x1429   :  { %v2957_v57 = vsel %vm583_vm5, %v7579_v53, 0.0 }
0x142a   :  { %2958 = vadd.xlane.f32.xlu0 %v2957_v57 }
0x142c   :  { %v7581_v58 = vpop.eup %7580 }
0x142d   :  { %v3075_v59 = vsel %vm583_vm5, %v7581_v58, 0.0 }
0x142e   :  { %3076 = vadd.xlane.f32.xlu1 %v3075_v59  ;;  %v6358_v59 = vld [vmem:[%s9221_s9 + $0x7] ss:$0 sm:$0xff] }
0x1430   :  { %v7583_v60 = vpop.eup %7582 }
0x1431   :  { %v3078_v61 = vsel %vm583_vm5, %v7583_v60, 0.0 }
0x1432   :  { %3079 = vadd.xlane.f32.xlu0 %v3078_v61 }
0x1434   :  { %v2714_v62 = vpop.xlane.xlu1 %2713 }
0x1435   :  { %7584 = vrcp.f32 %v2714_v62 }
0x1438   :  { %v2717_v63 = vpop.xlane.xlu0 %2716  ;;  %v2845_v5 = vpop.permute.xlu1 %2844 }
0x1439   :  { %7586 = vrcp.f32 %v2717_v63  ;;  %v2358_v63 = vadd.f32 %v6358_v59, %v8653_v25 }
0x143f   :  { %3086 = vrot.lane.b32.xlu1 %v8655_v35, %s8010_s15 }
0x1442   :  { %v7585_v0 = vpop.eup %7584 }
0x1443   :  { %v2719_v14 = vmul.f32 %v7585_v0, %v7569_v54  ;;  %v2362_v0 = vadd.f32 %v2358_v63, %v8564_v38 }
0x1446   :  { %v7587_v2 = vpop.eup %7586 }
0x1447   :  { %v2721_v3 = vmul.f32 %v7587_v2, %v7571_v28  ;;  %v2370_v2 = vsel %vm355_vm3, %v2362_v0, 0.0 }
0x1448   :  { %2965 = vrot.lane.b32.xlu0 %v8655_v35, %s8008_s29 }
0x1449   :  { %v2722_v4 = vpack.c.bf16 %v2721_v3, %v2719_v14 }
0x144b   :  { %6980 = vmatmul.mubr.msk.bf16.vlgmr.msra.gmra.mxu1 %vm583_vm5, %v2722_v4 }
0x144c   :  { %6990 = vmatpush3.bf16.msra.mxu1 %v2845_v5  ;;  %6991 = vmatprep.mubr.msk.bf16.mxu1 %vm8007_vm2, %v8006_v1 }
0x144d   :  { %7001 = vmatprep.subr.bf16.mxu1 %v8006_v1 }
0x14a7   :  { %v2834_v6 = vpop.xlane.xlu1 %2833 }
0x14a8   :  { %7588 = vrcp.f32 %v2834_v6 }
0x14ab   :  { %v2837_v7 = vpop.xlane.xlu0 %2836 }
0x14ac   :  { %7590 = vrcp.f32 %v2837_v7 }
0x14af   :  { %v2956_v8 = vpop.xlane.xlu1 %2955 }
0x14b0   :  { %7592 = vrcp.f32 %v2956_v8 }
0x14b3   :  { %v2959_v9 = vpop.xlane.xlu0 %2958 }
0x14b4   :  { %7594 = vrcp.f32 %v2959_v9 }
0x14b5   :  { %v7589_v10 = vpop.eup %7588 }
0x14b6   :  { %v2839_v16 = vmul.f32 %v7589_v10, %v7573_v41 }
0x14b7   :  { %v3077_v35 = vpop.xlane.xlu1 %3076 }
0x14b8   :  { %7596 = vrcp.f32 %v3077_v35 }
0x14b9   :  { %v7591_v11 = vpop.eup %7590 }
0x14ba   :  { %v2841_v51 = vmul.f32 %v7591_v11, %v7575_v47  ;;  %v7455_v47 = vld [vmem:[%s9223_s11 + $0x30] sm:$0xff]  }
0x14bb   :  { %v3080_v17 = vpop.xlane.xlu0 %3079  ;;  %v3087_v56 = vpop.permute.xlu1 %3086  ;;  %7022 = vmatpush3.bf16.msra.mxu0 %v7455_v47 }
0x14bc   :  { %7598 = vrcp.f32 %v3080_v17  ;;  %v2842_v18 = vpack.c.bf16 %v2841_v51, %v2839_v16  ;;  %7035 = vmatprep.subr.bf16.mxu0 %v8006_v1 }
0x14bd   :  { %v7593_v15 = vpop.eup %7592 }
0x14be   :  { %6992 = vmatmul.mubr.msk.bf16.vlgmr.msra.gmra.mxu1 %vm583_vm5, %v2842_v18  ;;  %v2961_v55 = vmul.f32 %v7593_v15, %v7577_v50 }
0x14bf   :  { %v2966_v19 = vpop.permute.xlu0 %2965  ;;  %7003 = vmatprep.mubr.msk.bf16.mxu1 %vm8007_vm2, %v8006_v1 }
0x14c0   :  { %7002 = vmatpush3.bf16.msra.mxu1 %v2966_v19 }
0x14c1   :  { %v7595_v54 = vpop.eup %7594  ;;  %7013 = vmatprep.subr.bf16.mxu1 %v8006_v1 }
0x14c2   :  { %v2963_v28 = vmul.f32 %v7595_v54, %v7579_v53 }
0x14c4   :  { %v2964_v20 = vpack.c.bf16 %v2963_v28, %v2961_v55 }
0x14c5   :  { %v7597_v21 = vpop.eup %7596 }
0x14c6   :  { %7004 = vmatmul.mubr.msk.bf16.vlgmr.msra.gmra.mxu1 %vm583_vm5, %v2964_v20  ;;  %v3082_v24 = vmul.f32 %v7597_v21, %v7581_v58 }
0x14c7   :  { %7014 = vmatpush3.bf16.msra.mxu1 %v3087_v56  ;;  %7015 = vmatprep.mubr.msk.bf16.mxu1 %vm8007_vm2, %v8006_v1 }
0x14c8   :  { %7027 = vmatprep.subr.bf16.mxu1 %v8006_v1 }
0x14c9   :  { %v7599_v22 = vpop.eup %7598 }
0x14ca   :  { %v3084_v26 = vmul.f32 %v7599_v22, %v7583_v60  ;;  %v2355_v60 = vadd.f32 %v6358_v59, %v8651_v23 }
0x14cc   :  { %v3085_v27 = vpack.c.bf16 %v3084_v26, %v3082_v24  ;;  %v2361_v61 = vadd.f32 %v2355_v60, %v8562_v37 }
0x14ce   :  { %7016 = vmatmul.mubr.msk.bf16.vlgmr.msra.gmra.mxu1 %vm583_vm5, %v3085_v27  ;;  %v2367_v62 = vsel %vm355_vm3, %v2361_v61, 0.0 }
0x14cf   :  { %7031 = vmatprep.mubr.msk.bf16.mxu1 %vm8007_vm2, %v8006_v1 }
0x150b   :  { %v2760_v29 = vpop.f32.mrf.mxu1 }
0x150d   :  { %v6981_v30 = vpop.f32.mrf.mxu1 }
0x150f   :  { %v2763_v31 = vpop.f32.mrf.mxu1 }
0x1511   :  { %v6982_v32 = vpop.f32.mrf.mxu1 }
0x157e   :  { %v2884_v33 = vpop.f32.mrf.mxu1 }
0x1580   :  { %v6993_v34 = vpop.f32.mrf.mxu1 }
0x1582   :  { %v2887_v36 = vpop.f32.mrf.mxu1 }
0x1583   :  { %v7360_v41 = vpack.i.bf16 %v2887_v36, %v2884_v33  ;;  %v6402_v36 = vld [vmem:[#allocation11 + $0x3] ss:$0 sm:$0xff] }
0x1584   :  { %v6994_v42 = vpop.f32.mrf.mxu1 }
0x1585   :  { %7361 = vrot.lane.b32.xlu1 %v7360_v41, %s8011_s5  ;;  %v6367_v42 = vld [vmem:[%s9221_s9 + $0x9] ss:$0 sm:$0xff] }
0x1586   :  { %v3005_v43 = vpop.f32.mrf.mxu1 }
0x1588   :  { %v7005_v45 = vpop.f32.mrf.mxu1 }
0x158a   :  { %v3008_v46 = vpop.f32.mrf.mxu1 }
0x158b   :  { %v7365_v48 = vpack.i.bf16 %v3008_v46, %v3005_v43 }
0x158c   :  { %v7006_v49 = vpop.f32.mrf.mxu1 }
0x158d   :  { %7366 = vrot.lane.b32.xlu0 %v7365_v48, %s7996_s1 }
0x158e   :  { %v3126_v50 = vpop.f32.mrf.mxu1 }
0x1590   :  { %v7017_v52 = vpop.f32.mrf.mxu1 }
0x1592   :  { %v3129_v53 = vpop.f32.mrf.mxu1 }
0x1593   :  { %v7370_v57 = vpack.i.bf16 %v3129_v53, %v3126_v50 }
0x1594   :  { %v7018_v58 = vpop.f32.mrf.mxu1 }
0x1595   :  { %7371 = vrot.lane.b32.xlu1 %v7370_v57, %s8012_s2 }
0x15ac   :  { %2368 = vadd.xlane.f32.xlu0 %v2367_v62 }
0x15b9   :  { %2371 = vadd.xlane.f32.xlu1 %v2370_v2 }
0x15f7   :  { %v7362_v14 = vpop.permute.xlu1 %7361 }
0x15f8   :  { %v7364_v4 = vunpack.i.h.bf16 %v7362_v14  ;;  %v7363_v5 = vunpack.i.l.bf16 %v7362_v14 }
0x15fa   :  { %v3158_v23 = vsel %vm535_vm4, %v2763_v31, %v7364_v4  ;;  %v3157_v37 = vsel %vm535_vm4, %v2760_v29, %v7363_v5 }
0x15ff   :  { %v7367_v3 = vpop.permute.xlu0 %7366 }
0x1600   :  { %v7369_v6 = vunpack.i.h.bf16 %v7367_v3  ;;  %v7368_v7 = vunpack.i.l.bf16 %v7367_v3 }
0x1602   :  { %v3160_v25 = vsel %vm583_vm5, %v3158_v23, %v7369_v6  ;;  %v3159_v38 = vsel %vm583_vm5, %v3157_v37, %v7368_v7 }
0x1607   :  { %v7372_v8 = vpop.permute.xlu1 %7371 }
0x1608   :  { %v7374_v9 = vunpack.i.h.bf16 %v7372_v8  ;;  %v7373_v10 = vunpack.i.l.bf16 %v7372_v8 }
0x160a   :  { %v3162_v35 = vsel %vm1045_vm6, %v3160_v25, %v7374_v9  ;;  %v3161_v11 = vsel %vm1045_vm6, %v3159_v38, %v7373_v10 }
0x160b   :  { %v3168_v16 = vpack.c.bf16 %v3162_v35, %v3161_v11  ;;  %v7456_v11 = vld [vmem:[#allocation13 + $0x18] sm:$0xff]  }
0x160d   :  { %7024 = vmatmul.mubr.msk.bf16.vlgmr.msra.gmra.mxu0 %vm355_vm3, %v3168_v16  ;;  %v7457_v16 = vld [vmem:[#allocation13 + $0x8] sm:$0xff]  }
0x160e   :  { %7039 = vmatprep.mubr.msk.bf16.mxu0 %vm8007_vm2, %v8006_v1  ;;  %7036 = vmatpush3.bf16.msra.mxu0 %v7456_v11 }
0x160f   :  { %7037 = vmatprep.subr.bf16.mxu0 %v8006_v1  ;;  %7028 = vmatpush3.bf16.msra.mxu1 %v7457_v16 }
0x1610   :  { %7029 = vmatprep.subr.bf16.mxu1 %v8006_v1 }
0x1635   :  { %v2369_v51 = vpop.xlane.xlu0 %2368 }
0x1636   :  { %v2373_v17 = vmul.f32 0.03125, %v2369_v51  ;;  %v7458_v51 = vld [vmem:[#allocation13 + $0x10] sm:$0xff]  }
0x1637   :  { %7038 = vmatpush3.bf16.msra.mxu0 %v7458_v51 }
0x1638   :  { %v2375_v18 = vsub.f32 %v2361_v61, %v2373_v17  ;;  %v7459_v17 = vld [vmem:[#allocation13] sm:$0xff]   ;;  %7051 = vmatprep.subr.bf16.mxu0 %v8006_v1 }
0x1639   :  { %7030 = vmatpush3.bf16.msra.mxu1 %v7459_v17 }
0x163a   :  { %v2377_v15 = vmul.f32 %v2375_v18, %v2375_v18  ;;  %7043 = vmatprep.subr.bf16.mxu1 %v8006_v1 }
0x163c   :  { %v2379_v19 = vsel %vm355_vm3, %v2377_v15, 0.0 }
0x163d   :  { %2380 = vadd.xlane.f32.xlu0 %v2379_v19 }
0x1642   :  { %v2372_v54 = vpop.xlane.xlu1 %2371 }
0x1643   :  { %v2374_v55 = vmul.f32 0.03125, %v2372_v54 }
0x1645   :  { %v2376_v28 = vsub.f32 %v2362_v0, %v2374_v55 }
0x1647   :  { %v2378_v20 = vmul.f32 %v2376_v28, %v2376_v28 }
0x1649   :  { %v2382_v56 = vsel %vm355_vm3, %v2378_v20, 0.0 }
0x164a   :  { %2383 = vadd.xlane.f32.xlu0 %v2382_v56 }
0x16c6   :  { %v2381_v21 = vpop.xlane.xlu0 %2380 }
0x16c7   :  { %v2385_v22 = vmul.f32 0.03125, %v2381_v21 }
0x16c9   :  { %v2387_v24 = vadd.f32 1e-05, %v2385_v22 }
0x16cb   :  { %7600 = vrsqrt.f32 %v2387_v24 }
0x16cd   :  { %v3226_v26 = vpop.f32.mrf.mxu0 }
0x16ce   :  { %v3227_v43 = vadd.f32 %v6402_v36, %v3226_v26 }
0x16cf   :  { %v7025_v27 = vpop.f32.mrf.mxu0 }
0x16d0   :  { %v3233_v47 = vadd.f32 %v3227_v43, %v8227_v13 }
0x16d1   :  { %v3229_v29 = vpop.f32.mrf.mxu0 }
0x16d2   :  { %v3238_v49 = vsel %vm355_vm3, %v3233_v47, 0.0  ;;  %v3230_v53 = vadd.f32 %v6402_v36, %v3229_v29 }
0x16d3   :  { %v2384_v30 = vpop.xlane.xlu0 %2383  ;;  %v7026_v31 = vpop.f32.mrf.mxu0 }
0x16d4   :  { %v2386_v32 = vmul.f32 0.03125, %v2384_v30  ;;  %v3234_v59 = vadd.f32 %v3230_v53, %v8225_v12  ;;  %v6368_v31 = vld [vmem:[#allocation10] ss:$0 sm:$0xff] }
0x16d6   :  { %v2388_v33 = vadd.f32 1e-05, %v2386_v32  ;;  %v3241_v61 = vsel %vm355_vm3, %v3234_v59, 0.0 }
0x16d8   :  { %v7601_v34 = vpop.eup %7600  ;;  %7602 = vrsqrt.f32 %v2388_v33 }
0x16d9   :  { %v2391_v41 = vmul.f32 %v7601_v34, %v2375_v18 }
0x16db   :  { %v2399_v45 = vmul.f32 %v6366_v40, %v2391_v41  ;;  %v6406_v41 = vld [vmem:[#allocation19] ss:$0 sm:$0xff] }
0x16dd   :  { %v2407_v46 = vadd.f32 %v6367_v42, %v2399_v45 }
0x16df   :  { %v2412_v48 = vsel %vm355_vm3, %v2407_v46, 0.0 }
0x16e0   :  { %2413 = vadd.xlane.f32.xlu1 %v2412_v48 }
0x16e4   :  { %3239 = vadd.xlane.f32.xlu1 %v3238_v49  ;;  %v6407_v49 = vld [vmem:[#allocation19 + $0x1] ss:$0 sm:$0xff] }
0x16e5   :  { %v7603_v50 = vpop.eup %7602 }
0x16e6   :  { %v2392_v52 = vmul.f32 %v7603_v50, %v2376_v28 }
0x16e8   :  { %v2400_v57 = vmul.f32 %v6366_v40, %v2392_v52  ;;  %v6369_v40 = vld [vmem:[#allocation10 + $0x1] ss:$0 sm:$0xff] }
0x16ea   :  { %v2408_v58 = vadd.f32 %v6367_v42, %v2400_v57 }
0x16ec   :  { %v2415_v60 = vsel %vm355_vm3, %v2408_v58, 0.0 }
0x16ed   :  { %2416 = vadd.xlane.f32.xlu0 %v2415_v60  ;;  %v7461_v60 = vld [vmem:[#allocation13 + $0x20] sm:$0xff]  }
0x16f1   :  { %3242 = vadd.xlane.f32.xlu0 %v3241_v61 }
0x1769   :  { %v2414_v13 = vpop.xlane.xlu1 %2413 }
0x176a   :  { %v2418_v62 = vmul.f32 0.03125, %v2414_v13  ;;  %v6412_v13 = vld [vmem:[#allocation14 + $0x1] ss:$0 sm:$0xff] }
0x176c   :  { %v2420_v63 = vsub.f32 %v2407_v46, %v2418_v62 }
0x176d   :  { %v3240_v0 = vpop.xlane.xlu1 %3239 }
0x176e   :  { %v3244_v2 = vmul.f32 0.03125, %v3240_v0  ;;  %v2422_v14 = vmul.f32 %v2420_v63, %v2420_v63 }
0x1770   :  { %v3246_v3 = vsub.f32 %v3233_v47, %v3244_v2  ;;  %v2424_v4 = vsel %vm355_vm3, %v2422_v14, 0.0 }
0x1771   :  { %2425 = vadd.xlane.f32.xlu1 %v2424_v4 }
0x1772   :  { %v3248_v5 = vmul.f32 %v3246_v3, %v3246_v3 }
0x1774   :  { %v3250_v6 = vsel %vm355_vm3, %v3248_v5, 0.0 }
0x1775   :  { %3251 = vadd.xlane.f32.xlu1 %v3250_v6 }
0x1776   :  { %v2417_v12 = vpop.xlane.xlu0 %2416 }
0x1777   :  { %v2419_v7 = vmul.f32 0.03125, %v2417_v12 }
0x1779   :  { %v2421_v8 = vsub.f32 %v2408_v58, %v2419_v7  ;;  %v7460_v58 = vld [vmem:[#allocation13 + $0x28] sm:$0xff]  }
0x177a   :  { %v3243_v23 = vpop.xlane.xlu0 %3242 }
0x177b   :  { %v3245_v37 = vmul.f32 0.03125, %v3243_v23  ;;  %v2423_v9 = vmul.f32 %v2421_v8, %v2421_v8 }
0x177d   :  { %v3247_v10 = vsub.f32 %v3234_v59, %v3245_v37  ;;  %v2427_v25 = vsel %vm355_vm3, %v2423_v9, 0.0 }
0x177e   :  { %2428 = vadd.xlane.f32.xlu0 %v2427_v25  ;;  %v6416_v25 = vld [vmem:[#allocation14 + $0x2] ss:$0 sm:$0xff] }
0x177f   :  { %v3249_v38 = vmul.f32 %v3247_v10, %v3247_v10 }
0x1781   :  { %v3253_v35 = vsel %vm355_vm3, %v3249_v38, 0.0 }
0x1782   :  { %3254 = vadd.xlane.f32.xlu0 %v3253_v35 }
0x17fa   :  { %v2426_v18 = vpop.xlane.xlu1 %2425 }
0x17fb   :  { %v2430_v15 = vmul.f32 0.03125, %v2426_v18 }
0x17fd   :  { %v2432_v54 = vadd.f32 1e-05, %v2430_v15 }
0x17fe   :  { %v3252_v19 = vpop.xlane.xlu1 %3251 }
0x17ff   :  { %v3256_v55 = vmul.f32 0.03125, %v3252_v19  ;;  %7604 = vrsqrt.f32 %v2432_v54 }
0x1801   :  { %v3258_v28 = vadd.f32 1e-05, %v3256_v55 }
0x1803   :  { %7606 = vrsqrt.f32 %v3258_v28 }
0x1807   :  { %v2429_v20 = vpop.xlane.xlu0 %2428 }
0x1808   :  { %v2431_v56 = vmul.f32 0.03125, %v2429_v20 }
0x180a   :  { %v2433_v21 = vadd.f32 1e-05, %v2431_v56 }
0x180b   :  { %v3255_v22 = vpop.xlane.xlu0 %3254 }
0x180c   :  { %7608 = vrsqrt.f32 %v2433_v21  ;;  %v3257_v24 = vmul.f32 0.03125, %v3255_v22  ;;  %v7605_v27 = vpop.eup %7604 }
0x180d   :  { %v2436_v29 = vmul.f32 %v7605_v27, %v2420_v63 }
0x180e   :  { %v3259_v26 = vadd.f32 1e-05, %v3257_v24 }
0x180f   :  { %v2444_v36 = vmul.f32 %v6368_v31, %v2436_v29 }
0x1810   :  { %7610 = vrsqrt.f32 %v3259_v26  ;;  %v7607_v30 = vpop.eup %7606 }
0x1811   :  { %v3262_v33 = vmul.f32 %v7607_v30, %v3246_v3  ;;  %v2452_v46 = vadd.f32 %v6369_v40, %v2444_v36  ;;  %v6408_v3 = vld [vmem:[#allocation14] ss:$0 sm:$0xff] }
0x1813   :  { %v3270_v48 = vmul.f32 %v6406_v41, %v3262_v33 }
0x1815   :  { %v8769_v53 = vadd.f32 %v6407_v49, %v3270_v48 }
0x1819   :  { %v7609_v32 = vpop.eup %7608 }
0x181a   :  { %v2437_v34 = vmul.f32 %v7609_v32, %v2421_v8 }
0x181c   :  { %v2445_v42 = vmul.f32 %v6368_v31, %v2437_v34 }
0x181d   :  { %v7611_v43 = vpop.eup %7610 }
0x181e   :  { %v3263_v45 = vmul.f32 %v7611_v43, %v3247_v10  ;;  %v2453_v47 = vadd.f32 %v6369_v40, %v2445_v42 }
0x1820   :  { %v8765_v50 = vpack.c.bf16 %v2453_v47, %v2452_v46  ;;  %v3271_v52 = vmul.f32 %v6406_v41, %v3263_v45 }
0x1822   :  { %7040 = vmatmul.mubr.msk.bf16.vlgmr.msra.gmra.mxu0 %vm355_vm3, %v8765_v50  ;;  %v8771_v57 = vadd.f32 %v6407_v49, %v3271_v52 }
0x1823   :  { %7053 = vmatprep.mubr.msk.bf16.mxu0 %vm8007_vm2, %v8006_v1 }
0x1824   :  { %v3284_v59 = vpack.c.bf16 %v8771_v57, %v8769_v53 }
0x1826   :  { %7032 = vmatmul.mubr.msk.bf16.vlgmr.msra.gmra.mxu1 %vm355_vm3, %v3284_v59 }
0x1827   :  { %7044 = vmatpush3.bf16.msra.mxu1 %v7460_v58  ;;  %7047 = vmatprep.mubr.msk.bf16.mxu1 %vm8007_vm2, %v8006_v1 }
0x1828   :  { %7045 = vmatprep.subr.bf16.mxu1 %v8006_v1 }
0x182b   :  { %7046 = vmatpush3.bf16.msra.mxu1 %v7461_v60 }
0x182c   :  { %7057 = vmatprep.subr.bf16.mxu1 %v8006_v1 }
0x182e   :  { %7048 = vmatmul.mubr.msk.bf16.vlgmr.msra.gmra.mxu1 %vm355_vm3, %v8765_v50 }
0x182f   :  { %7059 = vmatprep.mubr.msk.bf16.mxu1 %vm8007_vm2, %v8006_v1 }
0x18e2   :  { %v3411_v61 = vpop.f32.mrf.mxu0 }
0x18e3   :  { %v3412_v2 = vadd.f32 %v6412_v13, %v3411_v61 }
0x18e4   :  { %v7041_v62 = vpop.f32.mrf.mxu0 }
0x18e6   :  { %v3341_v63 = vpop.f32.mrf.mxu1  ;;  %v3414_v0 = vpop.f32.mrf.mxu0 }
0x18e7   :  { %v3415_v14 = vadd.f32 %v6412_v13, %v3414_v0  ;;  %v3342_v7 = vadd.f32 %v6408_v3, %v3341_v63 }
0x18e8   :  { %v7033_v4 = vpop.f32.mrf.mxu1  ;;  %v7042_v5 = vpop.f32.mrf.mxu0 }
0x18e9   :  { %v3485_v6 = vpack.c.bf16 %v3415_v14, %v3412_v2 }
0x18ea   :  { %v3344_v12 = vpop.f32.mrf.mxu1 }
0x18eb   :  { %v3345_v8 = vadd.f32 %v6408_v3, %v3344_v12  ;;  %3605 = vrot.lane.b32.xlu1 %v3485_v6, %s8009_s23  ;;  %v3491_v23 = vsel %vm535_vm4, %v3485_v6, 0 }
0x18ec   :  { %v7034_v37 = vpop.f32.mrf.mxu1  ;;  %7052 = vmatpush3.bf16.xpose.msra.mxu0 %v3491_v23 }
0x18ed   :  { %v3484_v9 = vpack.c.bf16 %v3345_v8, %v3342_v7  ;;  %7063 = vmatprep.subr.bf16.mxu0 %v8006_v1 }
0x18ee   :  { %v3477_v10 = vpop.f32.mrf.mxu1 }
0x18ef   :  { %3727 = vrot.lane.b32.xlu1 %v3485_v6, %s8008_s29  ;;  %3602 = vrot.lane.b32.xlu0 %v3484_v9, %s8009_s23  ;;  %v3478_v11 = vadd.f32 %v6416_v25, %v3477_v10 }
0x18f0   :  { %v7049_v38 = vpop.f32.mrf.mxu1 }
0x18f2   :  { %v3480_v35 = vpop.f32.mrf.mxu1 }
0x18f3   :  { %v3481_v16 = vadd.f32 %v6416_v25, %v3480_v35  ;;  %3725 = vrot.lane.b32.xlu1 %v3484_v9, %s8008_s29  ;;  %3848 = vrot.lane.b32.xlu0 %v3485_v6, %s8010_s15 }
0x18f4   :  { %7054 = vmatmul.mubr.msk.bf16.vlgmr.msra.gmra.mxu0 %vm535_vm4, %v3484_v9  ;;  %v7050_v51 = vpop.f32.mrf.mxu1 }
0x18f5   :  { %v8794_v17 = vpack.c.bf16 %v3481_v16, %v3478_v11  ;;  %7065 = vmatprep.mubr.msk.bf16.mxu0 %vm8007_vm2, %v8006_v1 }
0x18f7   :  { %3846 = vrot.lane.b32.xlu1 %v3484_v9, %s8010_s15  ;;  %7058 = vmatpush3.bf16.msra.mxu1 %v8794_v17 }
0x18f8   :  { %7069 = vmatprep.subr.bf16.mxu1 %v8006_v1 }
0x195d   :  { %v3606_v18 = vpop.permute.xlu1 %3605 }
0x195e   :  { %v3611_v15 = vsel %vm535_vm4, %v3606_v18, 0 }
0x195f   :  { %7064 = vmatpush3.bf16.xpose.msra.mxu0 %v3611_v15 }
0x1960   :  { %7075 = vmatprep.subr.bf16.mxu0 %v8006_v1 }
0x1961   :  { %v3728_v19 = vpop.permute.xlu1 %3727  ;;  %v3603_v54 = vpop.permute.xlu0 %3602 }
0x1962   :  { %v3733_v55 = vsel %vm535_vm4, %v3728_v19, 0 }
0x1965   :  { %v3849_v28 = vpop.permute.xlu0 %3848  ;;  %v3726_v20 = vpop.permute.xlu1 %3725 }
0x1966   :  { %7066 = vmatmul.mubr.msk.bf16.vlgmr.msra.gmra.mxu0 %vm535_vm4, %v3603_v54  ;;  %v3854_v56 = vsel %vm535_vm4, %v3849_v28, 0 }
0x1967   :  { %7076 = vmatpush3.bf16.xpose.msra.mxu0 %v3733_v55  ;;  %7077 = vmatprep.mubr.msk.bf16.mxu0 %vm8007_vm2, %v8006_v1 }
0x1968   :  { %7087 = vmatprep.subr.bf16.mxu0 %v8006_v1 }
0x1969   :  { %v3847_v21 = vpop.permute.xlu1 %3846 }
0x196e   :  { %7078 = vmatmul.mubr.msk.bf16.vlgmr.msra.gmra.mxu0 %vm535_vm4, %v3726_v20 }
0x196f   :  { %7088 = vmatpush3.bf16.xpose.msra.mxu0 %v3854_v56  ;;  %7089 = vmatprep.mubr.msk.bf16.mxu0 %vm8007_vm2, %v8006_v1 }
0x1970   :  { %7099 = vmatprep.subr.bf16.mxu0 %v8006_v1 }
0x1976   :  { %7090 = vmatmul.mubr.msk.bf16.vlgmr.msra.gmra.mxu0 %vm535_vm4, %v3847_v21 }
0x1977   :  { %7103 = vmatprep.mubr.msk.bf16.mxu0 %vm8007_vm2, %v8006_v1 }
0x19b4   :  { %v3527_v22 = vpop.f32.mrf.mxu0 }
0x19b5   :  { %v3528_v24 = vadd.f32 %v8662_v39, %v3527_v22 }
0x19b6   :  { %v7055_v26 = vpop.f32.mrf.mxu0 }
0x19b7   :  { %v3534_v27 = vsel %vm583_vm5, %v3528_v24, -inf }
0x19b8   :  { %3535 = vmax.xlane.f32.xlu0 %v3534_v27  ;;  %v3530_v29 = vpop.f32.mrf.mxu0 }
0x19b9   :  { %v3531_v30 = vadd.f32 %v8669_v44, %v3530_v29 }
0x19ba   :  { %v7056_v31 = vpop.f32.mrf.mxu0 }
0x19bb   :  { %v3537_v32 = vsel %vm583_vm5, %v3531_v30, -inf }
0x19bc   :  { %3538 = vmax.xlane.f32.xlu1 %v3537_v32 }
0x1a26   :  { %v3647_v33 = vpop.f32.mrf.mxu0 }
0x1a27   :  { %v3648_v34 = vadd.f32 %v8662_v39, %v3647_v33 }
0x1a28   :  { %v7067_v36 = vpop.f32.mrf.mxu0 }
0x1a29   :  { %v3654_v40 = vsel %vm583_vm5, %v3648_v34, -inf }
0x1a2a   :  { %3655 = vmax.xlane.f32.xlu0 %v3654_v40  ;;  %v3650_v41 = vpop.f32.mrf.mxu0 }
0x1a2b   :  { %v3651_v42 = vadd.f32 %v8669_v44, %v3650_v41 }
0x1a2c   :  { %v7068_v43 = vpop.f32.mrf.mxu0 }
0x1a2d   :  { %v3657_v45 = vsel %vm583_vm5, %v3651_v42, -inf }
0x1a2e   :  { %3658 = vmax.xlane.f32.xlu0 %v3657_v45  ;;  %v3769_v46 = vpop.f32.mrf.mxu0 }
0x1a2f   :  { %v3770_v47 = vadd.f32 %v8662_v39, %v3769_v46 }
0x1a30   :  { %v7079_v48 = vpop.f32.mrf.mxu0 }
0x1a31   :  { %v3776_v49 = vsel %vm583_vm5, %v3770_v47, -inf }
0x1a32   :  { %3777 = vmax.xlane.f32.xlu1 %v3776_v49  ;;  %v3772_v52 = vpop.f32.mrf.mxu0 }
0x1a33   :  { %v3773_v58 = vadd.f32 %v8669_v44, %v3772_v52 }
0x1a34   :  { %v7080_v59 = vpop.f32.mrf.mxu0 }
0x1a35   :  { %v3779_v60 = vsel %vm583_vm5, %v3773_v58, -inf }
0x1a36   :  { %3780 = vmax.xlane.f32.xlu0 %v3779_v60  ;;  %v3890_v61 = vpop.f32.mrf.mxu0 }
0x1a37   :  { %v3891_v13 = vadd.f32 %v8662_v39, %v3890_v61 }
0x1a38   :  { %v7091_v62 = vpop.f32.mrf.mxu0 }
0x1a39   :  { %v3897_v63 = vsel %vm583_vm5, %v3891_v13, -inf }
0x1a3a   :  { %3898 = vmax.xlane.f32.xlu1 %v3897_v63  ;;  %v3893_v0 = vpop.f32.mrf.mxu0 }
0x1a3b   :  { %v3894_v2 = vadd.f32 %v8669_v44, %v3893_v0 }
0x1a3c   :  { %v7092_v14 = vpop.f32.mrf.mxu0 }
0x1a3d   :  { %v3900_v3 = vsel %vm583_vm5, %v3894_v2, -inf }
0x1a3e   :  { %3901 = vmax.xlane.f32.xlu0 %v3900_v3 }
0x1a41   :  { %v3536_v4 = vpop.xlane.xlu0 %3535 }
0x1a42   :  { %v3540_v5 = vsub.f32 %v3528_v24, %v3536_v4 }
0x1a44   :  { %v3542_v6 = vmul.f32 1.442695, %v3540_v5 }
0x1a45   :  { %v3539_v12 = vpop.xlane.xlu1 %3538 }
0x1a46   :  { %7612 = vpow2.f32 %v3542_v6  ;;  %v3541_v7 = vsub.f32 %v3531_v30, %v3539_v12 }
0x1a48   :  { %v3544_v8 = vmul.f32 1.442695, %v3541_v7 }
0x1a4a   :  { %7614 = vpow2.f32 %v3544_v8 }
0x1a53   :  { %v7613_v39 = vpop.eup %7612 }
0x1a54   :  { %v3546_v23 = vsel %vm583_vm5, %v7613_v39, 0.0 }
0x1a55   :  { %3547 = vadd.xlane.f32.xlu1 %v3546_v23 }
0x1a57   :  { %v7615_v37 = vpop.eup %7614 }
0x1a58   :  { %v3549_v9 = vsel %vm583_vm5, %v7615_v37, 0.0 }
0x1a59   :  { %3550 = vadd.xlane.f32.xlu0 %v3549_v9 }
0x1a66   :  { %3678 = vrot.lane.b32.xlu1 %v8794_v17, %s8009_s23 }
0x1ab3   :  { %v3656_v44 = vpop.xlane.xlu0 %3655 }
0x1ab4   :  { %v3660_v10 = vsub.f32 %v3648_v34, %v3656_v44 }
0x1ab6   :  { %v3662_v25 = vmul.f32 1.442695, %v3660_v10 }
0x1ab7   :  { %v3659_v38 = vpop.xlane.xlu0 %3658 }
0x1ab8   :  { %7616 = vpow2.f32 %v3662_v25  ;;  %v3661_v35 = vsub.f32 %v3651_v42, %v3659_v38 }
0x1aba   :  { %v3664_v11 = vmul.f32 1.442695, %v3661_v35 }
0x1abb   :  { %v3778_v16 = vpop.xlane.xlu1 %3777 }
0x1abc   :  { %7618 = vpow2.f32 %v3664_v11  ;;  %v3782_v51 = vsub.f32 %v3770_v47, %v3778_v16 }
0x1abe   :  { %v3784_v18 = vmul.f32 1.442695, %v3782_v51 }
0x1abf   :  { %v3781_v15 = vpop.xlane.xlu0 %3780 }
0x1ac0   :  { %7620 = vpow2.f32 %v3784_v18  ;;  %v3783_v19 = vsub.f32 %v3773_v58, %v3781_v15  ;;  %v7462_v18 = vld [vmem:[#allocation13 + $0x38] sm:$0xff]  }
0x1ac1   :  { %7100 = vmatpush3.bf16.msra.mxu0 %v7462_v18  ;;  %v6432_v18 = vld [vmem:[#allocation19 + $0x2] ss:$0 sm:$0xff] }
0x1ac2   :  { %v3786_v54 = vmul.f32 1.442695, %v3783_v19  ;;  %7101 = vmatprep.subr.bf16.mxu0 %v8006_v1 }
0x1ac3   :  { %v3899_v55 = vpop.xlane.xlu1 %3898 }
0x1ac4   :  { %7622 = vpow2.f32 %v3786_v54  ;;  %v3903_v28 = vsub.f32 %v3891_v13, %v3899_v55 }
0x1ac5   :  { %v7617_v20 = vpop.eup %7616 }
0x1ac6   :  { %v3905_v56 = vmul.f32 1.442695, %v3903_v28  ;;  %v3666_v21 = vsel %vm583_vm5, %v7617_v20, 0.0 }
0x1ac7   :  { %v3902_v22 = vpop.xlane.xlu0 %3901  ;;  %3667 = vadd.xlane.f32.xlu1 %v3666_v21 }
0x1ac8   :  { %7624 = vpow2.f32 %v3905_v56  ;;  %v3904_v24 = vsub.f32 %v3894_v2, %v3902_v22 }
0x1ac9   :  { %v7619_v26 = vpop.eup %7618 }
0x1aca   :  { %v3907_v27 = vmul.f32 1.442695, %v3904_v24  ;;  %v3669_v29 = vsel %vm583_vm5, %v7619_v26, 0.0 }
0x1acb   :  { %3670 = vadd.xlane.f32.xlu0 %v3669_v29 }
0x1acc   :  { %7626 = vpow2.f32 %v3907_v27 }
0x1acd   :  { %v7621_v30 = vpop.eup %7620 }
0x1ace   :  { %v3788_v31 = vsel %vm583_vm5, %v7621_v30, 0.0 }
0x1acf   :  { %3789 = vadd.xlane.f32.xlu1 %v3788_v31 }
0x1ad1   :  { %v7623_v32 = vpop.eup %7622 }
0x1ad2   :  { %v3791_v33 = vsel %vm583_vm5, %v7623_v32, 0.0 }
0x1ad3   :  { %3792 = vadd.xlane.f32.xlu0 %v3791_v33 }
0x1ad5   :  { %v7625_v34 = vpop.eup %7624 }
0x1ad6   :  { %v3909_v36 = vsel %vm583_vm5, %v7625_v34, 0.0 }
0x1ad7   :  { %3910 = vadd.xlane.f32.xlu1 %v3909_v36 }
0x1ad9   :  { %v7627_v40 = vpop.eup %7626 }
0x1ada   :  { %v3912_v41 = vsel %vm583_vm5, %v7627_v40, 0.0 }
0x1adb   :  { %3913 = vadd.xlane.f32.xlu0 %v3912_v41 }
0x1ade   :  { %v3548_v42 = vpop.xlane.xlu1 %3547 }
0x1adf   :  { %7628 = vrcp.f32 %v3548_v42 }
0x1ae2   :  { %v3551_v43 = vpop.xlane.xlu0 %3550  ;;  %v3679_v52 = vpop.permute.xlu1 %3678 }
0x1ae3   :  { %7630 = vrcp.f32 %v3551_v43 }
0x1ae8   :  { %3920 = vrot.lane.b32.xlu1 %v8794_v17, %s8010_s15 }
0x1aec   :  { %v7629_v45 = vpop.eup %7628 }
0x1aed   :  { %v3553_v47 = vmul.f32 %v7629_v45, %v7613_v39 }
0x1af0   :  { %v7631_v46 = vpop.eup %7630 }
0x1af1   :  { %3799 = vrot.lane.b32.xlu0 %v8794_v17, %s8008_s29  ;;  %v3555_v48 = vmul.f32 %v7631_v46, %v7615_v37 }
0x1af3   :  { %v3556_v49 = vpack.c.bf16 %v3555_v48, %v3553_v47 }
0x1af5   :  { %7060 = vmatmul.mubr.msk.bf16.vlgmr.msra.gmra.mxu1 %vm583_vm5, %v3556_v49 }
0x1af6   :  { %7070 = vmatpush3.bf16.msra.mxu1 %v3679_v52  ;;  %7071 = vmatprep.mubr.msk.bf16.mxu1 %vm8007_vm2, %v8006_v1 }
0x1af7   :  { %7081 = vmatprep.subr.bf16.mxu1 %v8006_v1 }
0x1b50   :  { %v3668_v58 = vpop.xlane.xlu1 %3667 }
0x1b51   :  { %7632 = vrcp.f32 %v3668_v58  ;;  %v6428_v58 = vld [vmem:[#allocation14 + $0x3] ss:$0 sm:$0xff] }
0x1b54   :  { %v3671_v59 = vpop.xlane.xlu0 %3670 }
0x1b55   :  { %7634 = vrcp.f32 %v3671_v59 }
0x1b58   :  { %v3790_v60 = vpop.xlane.xlu1 %3789 }
0x1b59   :  { %7636 = vrcp.f32 %v3790_v60 }
0x1b5c   :  { %v3793_v61 = vpop.xlane.xlu0 %3792 }
0x1b5d   :  { %7638 = vrcp.f32 %v3793_v61 }
0x1b5e   :  { %v7633_v17 = vpop.eup %7632 }
0x1b5f   :  { %v3673_v63 = vmul.f32 %v7633_v17, %v7617_v20  ;;  %v7463_v20 = vld [vmem:[#allocation13 + $0x30] sm:$0xff]  }
0x1b60   :  { %v3911_v13 = vpop.xlane.xlu1 %3910  ;;  %7102 = vmatpush3.bf16.msra.mxu0 %v7463_v20 }
0x1b61   :  { %7640 = vrcp.f32 %v3911_v13  ;;  %7115 = vmatprep.subr.bf16.mxu0 %v8006_v1 }
0x1b62   :  { %v7635_v62 = vpop.eup %7634 }
0x1b63   :  { %v3675_v0 = vmul.f32 %v7635_v62, %v7619_v26 }
0x1b64   :  { %v3914_v2 = vpop.xlane.xlu0 %3913  ;;  %v3921_v8 = vpop.permute.xlu1 %3920 }
0x1b65   :  { %7642 = vrcp.f32 %v3914_v2  ;;  %v3676_v14 = vpack.c.bf16 %v3675_v0, %v3673_v63 }
0x1b66   :  { %v7637_v3 = vpop.eup %7636 }
0x1b67   :  { %7072 = vmatmul.mubr.msk.bf16.vlgmr.msra.gmra.mxu1 %vm583_vm5, %v3676_v14  ;;  %v3795_v6 = vmul.f32 %v7637_v3, %v7621_v30 }
0x1b68   :  { %v3800_v4 = vpop.permute.xlu0 %3799  ;;  %7083 = vmatprep.mubr.msk.bf16.mxu1 %vm8007_vm2, %v8006_v1 }
0x1b69   :  { %7082 = vmatpush3.bf16.msra.mxu1 %v3800_v4 }
0x1b6a   :  { %v7639_v5 = vpop.eup %7638  ;;  %7093 = vmatprep.subr.bf16.mxu1 %v8006_v1 }
0x1b6b   :  { %v3797_v12 = vmul.f32 %v7639_v5, %v7623_v32 }
0x1b6d   :  { %v3798_v7 = vpack.c.bf16 %v3797_v12, %v3795_v6 }
0x1b6e   :  { %v7641_v39 = vpop.eup %7640 }
0x1b6f   :  { %7084 = vmatmul.mubr.msk.bf16.vlgmr.msra.gmra.mxu1 %vm583_vm5, %v3798_v7  ;;  %v3916_v37 = vmul.f32 %v7641_v39, %v7625_v34 }
0x1b70   :  { %7094 = vmatpush3.bf16.msra.mxu1 %v3921_v8  ;;  %7095 = vmatprep.mubr.msk.bf16.mxu1 %vm8007_vm2, %v8006_v1 }
0x1b71   :  { %7107 = vmatprep.subr.bf16.mxu1 %v8006_v1 }
0x1b72   :  { %v7643_v23 = vpop.eup %7642 }
0x1b73   :  { %v3918_v9 = vmul.f32 %v7643_v23, %v7627_v40 }
0x1b75   :  { %v3919_v44 = vpack.c.bf16 %v3918_v9, %v3916_v37  ;;  %v7464_v37 = vld [vmem:[#allocation16 + $0x8] sm:$0xff]   ;;  %v7466_v9 = vld [vmem:[%s9229_s17 + $0x18] sm:$0xff]  }
0x1b77   :  { %7096 = vmatmul.mubr.msk.bf16.vlgmr.msra.gmra.mxu1 %vm583_vm5, %v3919_v44 }
0x1b78   :  { %7111 = vmatprep.mubr.msk.bf16.mxu1 %vm8007_vm2, %v8006_v1  ;;  %7108 = vmatpush3.bf16.msra.mxu1 %v7464_v37 }
0x1b79   :  { %7109 = vmatprep.subr.bf16.mxu1 %v8006_v1 }
0x1bb5   :  { %v3594_v10 = vpop.f32.mrf.mxu1 }
0x1bb7   :  { %v7061_v25 = vpop.f32.mrf.mxu1 }
0x1bb9   :  { %v3597_v38 = vpop.f32.mrf.mxu1 }
0x1bbb   :  { %v7062_v35 = vpop.f32.mrf.mxu1 }
0x1c27   :  { %v3718_v11 = vpop.f32.mrf.mxu1 }
0x1c29   :  { %v7073_v16 = vpop.f32.mrf.mxu1 }
0x1c2b   :  { %v3721_v51 = vpop.f32.mrf.mxu1 }
0x1c2c   :  { %v7375_v15 = vpack.i.bf16 %v3721_v51, %v3718_v11 }
0x1c2d   :  { %v7074_v19 = vpop.f32.mrf.mxu1 }
0x1c2e   :  { %7376 = vrot.lane.b32.xlu1 %v7375_v15, %s8011_s5 }
0x1c2f   :  { %v3839_v54 = vpop.f32.mrf.mxu1 }
0x1c31   :  { %v7085_v55 = vpop.f32.mrf.mxu1 }
0x1c32   :  { %v6433_v55 = vld [vmem:[#allocation19 + $0x3] ss:$0 sm:$0xff] }
0x1c33   :  { %v3842_v28 = vpop.f32.mrf.mxu1 }
0x1c34   :  { %v7380_v56 = vpack.i.bf16 %v3842_v28, %v3839_v54 }
0x1c35   :  { %v7086_v21 = vpop.f32.mrf.mxu1 }
0x1c36   :  { %7381 = vrot.lane.b32.xlu0 %v7380_v56, %s7996_s1 }
0x1c37   :  { %v3960_v22 = vpop.f32.mrf.mxu1 }
0x1c39   :  { %v7097_v24 = vpop.f32.mrf.mxu1 }
0x1c3a   :  { %v7468_v24 = vld [vmem:[%s9229_s17 + $0x8] sm:$0xff]  }
0x1c3b   :  { %v3963_v26 = vpop.f32.mrf.mxu1 }
0x1c3c   :  { %v7385_v27 = vpack.i.bf16 %v3963_v26, %v3960_v22  ;;  %v7467_v22 = vld [vmem:[%s9229_s17 + $0x10] sm:$0xff]   ;;  %v7469_v26 = vld [vmem:[%s9229_s17] sm:$0xff]  }
0x1c3d   :  { %v7098_v29 = vpop.f32.mrf.mxu1 }
0x1c3e   :  { %7386 = vrot.lane.b32.xlu1 %v7385_v27, %s8012_s2  ;;  %v6434_v27 = vld [vmem:[#allocation17] ss:$0 sm:$0xff] }
0x1ca0   :  { %v7377_v30 = vpop.permute.xlu1 %7376 }
0x1ca1   :  { %v7379_v32 = vunpack.i.h.bf16 %v7377_v30  ;;  %v7378_v33 = vunpack.i.l.bf16 %v7377_v30 }
0x1ca3   :  { %v3992_v41 = vsel %vm535_vm4, %v3597_v38, %v7379_v32  ;;  %v3991_v42 = vsel %vm535_vm4, %v3594_v10, %v7378_v33 }
0x1ca8   :  { %v7382_v31 = vpop.permute.xlu0 %7381 }
0x1ca9   :  { %v7384_v34 = vunpack.i.h.bf16 %v7382_v31  ;;  %v7383_v36 = vunpack.i.l.bf16 %v7382_v31 }
0x1cab   :  { %v3994_v46 = vsel %vm583_vm5, %v3992_v41, %v7384_v34  ;;  %v3993_v47 = vsel %vm583_vm5, %v3991_v42, %v7383_v36  ;;  %v6438_v42 = vld [vmem:[#allocation19 + $0x4] ss:$0 sm:$0xff] }
0x1cb0   :  { %v7387_v40 = vpop.permute.xlu1 %7386 }
0x1cb1   :  { %v7389_v43 = vunpack.i.h.bf16 %v7387_v40  ;;  %v7388_v45 = vunpack.i.l.bf16 %v7387_v40 }
0x1cb3   :  { %v3996_v48 = vsel %vm1045_vm6, %v3994_v46, %v7389_v43  ;;  %v3995_v49 = vsel %vm1045_vm6, %v3993_v47, %v7388_v45 }
0x1cb4   :  { %v4002_v52 = vpack.c.bf16 %v3996_v48, %v3995_v49 }
0x1cb6   :  { %7104 = vmatmul.mubr.msk.bf16.vlgmr.msra.gmra.mxu0 %vm355_vm3, %v4002_v52 }
0x1cb7   :  { %7123 = vmatprep.mubr.msk.bf16.mxu0 %vm8007_vm2, %v8006_v1  ;;  %7116 = vmatpush3.bf16.msra.mxu0 %v7466_v9 }
0x1cb8   :  { %7117 = vmatprep.subr.bf16.mxu0 %v8006_v1 }
0x1cbb   :  { %7118 = vmatpush3.bf16.msra.mxu0 %v7467_v22 }
0x1cbc   :  { %7119 = vmatprep.subr.bf16.mxu0 %v8006_v1 }
0x1cbf   :  { %7120 = vmatpush3.bf16.msra.mxu0 %v7468_v24 }
0x1cc0   :  { %7121 = vmatprep.subr.bf16.mxu0 %v8006_v1 }
0x1cc3   :  { %7122 = vmatpush3.bf16.msra.mxu0 %v7469_v26 }
0x1cc4   :  { %7143 = vmatprep.subr.bf16.mxu0 %v8006_v1 }
0x1d76   :  { %v4060_v59 = vpop.f32.mrf.mxu0 }
0x1d77   :  { %v4061_v60 = vadd.f32 %v6428_v58, %v4060_v59 }
0x1d78   :  { %v7105_v61 = vpop.f32.mrf.mxu0 }
0x1d79   :  { %v4067_v17 = vadd.f32 %v4061_v60, %v8769_v53 }
0x1d7a   :  { %v4063_v13 = vpop.f32.mrf.mxu0 }
0x1d7b   :  { %v4064_v62 = vadd.f32 %v6428_v58, %v4063_v13  ;;  %v4073_v63 = vsel %vm355_vm3, %v4067_v17, 0.0 }
0x1d7c   :  { %4074 = vadd.xlane.f32.xlu0 %v4073_v63  ;;  %v7106_v0 = vpop.f32.mrf.mxu0 }
0x1d7d   :  { %v4068_v2 = vadd.f32 %v4064_v62, %v8771_v57  ;;  %v7465_v57 = vld [vmem:[#allocation16] sm:$0xff]  }
0x1d7e   :  { %7110 = vmatpush3.bf16.msra.mxu1 %v7465_v57 }
0x1d7f   :  { %v4076_v14 = vsel %vm355_vm3, %v4068_v2, 0.0  ;;  %7127 = vmatprep.subr.bf16.mxu1 %v8006_v1 }
0x1d80   :  { %4077 = vadd.xlane.f32.xlu1 %v4076_v14 }
0x1e05   :  { %v4075_v3 = vpop.xlane.xlu0 %4074 }
0x1e06   :  { %v4079_v4 = vmul.f32 0.03125, %v4075_v3 }
0x1e08   :  { %v4081_v5 = vsub.f32 %v4067_v17, %v4079_v4 }
0x1e09   :  { %v4078_v6 = vpop.xlane.xlu1 %4077 }
0x1e0a   :  { %v4080_v12 = vmul.f32 0.03125, %v4078_v6  ;;  %v4083_v7 = vmul.f32 %v4081_v5, %v4081_v5  ;;  %v7471_v6 = vld [vmem:[%s9223_s11 + $0x68] sm:$0xff]  }
0x1e0c   :  { %v4082_v8 = vsub.f32 %v4068_v2, %v4080_v12  ;;  %v4085_v53 = vsel %vm355_vm3, %v4083_v7, 0.0  ;;  %v7472_v12 = vld [vmem:[%s9223_s11 + $0x40] sm:$0xff]  }
0x1e0d   :  { %4086 = vadd.xlane.f32.xlu0 %v4085_v53  ;;  %v7473_v7 = vld [vmem:[%s9223_s11 + $0x60] sm:$0xff]  }
0x1e0e   :  { %v4084_v39 = vmul.f32 %v4082_v8, %v4082_v8 }
0x1e10   :  { %v4088_v23 = vsel %vm355_vm3, %v4084_v39, 0.0 }
0x1e11   :  { %4089 = vadd.xlane.f32.xlu0 %v4088_v23 }
0x1e96   :  { %v4087_v44 = vpop.xlane.xlu0 %4086 }
0x1e97   :  { %v4091_v10 = vmul.f32 0.03125, %v4087_v44 }
0x1e99   :  { %v4093_v25 = vadd.f32 1e-05, %v4091_v10  ;;  %v6444_v10 = vld [vmem:[#allocation19 + $0x5] ss:$0 sm:$0xff] }
0x1e9a   :  { %v4090_v38 = vpop.xlane.xlu0 %4089 }
0x1e9b   :  { %7644 = vrsqrt.f32 %v4093_v25  ;;  %v4092_v35 = vmul.f32 0.03125, %v4090_v38 }
0x1e9d   :  { %v4094_v11 = vadd.f32 1e-05, %v4092_v35 }
0x1e9f   :  { %7646 = vrsqrt.f32 %v4094_v11  ;;  %v6445_v11 = vld [vmem:[#allocation19 + $0x6] ss:$0 sm:$0xff] }
0x1ea8   :  { %v7645_v16 = vpop.eup %7644 }
0x1ea9   :  { %v4097_v51 = vmul.f32 %v7645_v16, %v4081_v5  ;;  %v7470_v5 = vld [vmem:[%s9223_s11 + $0x48] sm:$0xff]  }
0x1eab   :  { %v4105_v54 = vmul.f32 %v6432_v18, %v4097_v51 }
0x1eac   :  { %v7647_v15 = vpop.eup %7646 }
0x1ead   :  { %v4098_v19 = vmul.f32 %v7647_v15, %v4082_v8  ;;  %v4113_v20 = vadd.f32 %v6433_v55, %v4105_v54  ;;  %v7474_v15 = vld [vmem:[%s9223_s11 + $0x58] sm:$0xff]   ;;  %v7475_v54 = vld [vmem:[%s9223_s11 + $0x50] sm:$0xff]  }
0x1eaf   :  { %v4106_v28 = vmul.f32 %v6432_v18, %v4098_v19 }
0x1eb1   :  { %v4114_v56 = vadd.f32 %v6433_v55, %v4106_v28 }
0x1eb3   :  { %v4121_v21 = vpack.c.bf16 %v4114_v56, %v4113_v20 }
0x1eb5   :  { %7112 = vmatmul.mubr.msk.bf16.vlgmr.msra.gmra.mxu1 %vm355_vm3, %v4121_v21 }
0x1eb6   :  { %7131 = vmatprep.mubr.msk.bf16.mxu1 %vm8007_vm2, %v8006_v1  ;;  %7128 = vmatpush3.bf16.msra.mxu1 %v7470_v5 }
0x1eb7   :  { %7129 = vmatprep.subr.bf16.mxu1 %v8006_v1 }
0x1eba   :  { %7130 = vmatpush3.bf16.msra.mxu1 %v7472_v12 }
0x1ebb   :  { %7135 = vmatprep.subr.bf16.mxu1 %v8006_v1 }
0x1f75   :  { %v4178_v29 = vpop.f32.mrf.mxu1 }
0x1f76   :  { %v4179_v31 = vadd.f32 %v6434_v27, %v4178_v29 }
0x1f77   :  { %v7113_v30 = vpop.f32.mrf.mxu1 }
0x1f78   :  { %v4185_v36 = vmax.f32 %v4179_v31, 0.0 }
0x1f79   :  { %v4181_v32 = vpop.f32.mrf.mxu1 }
0x1f7a   :  { %v4182_v33 = vadd.f32 %v6434_v27, %v4181_v32 }
0x1f7b   :  { %v7114_v34 = vpop.f32.mrf.mxu1 }
0x1f7c   :  { %v4186_v40 = vmax.f32 %v4182_v33, 0.0 }
0x1f7e   :  { %v4195_v41 = vpack.c.bf16 %v4186_v40, %v4185_v36 }
0x1f80   :  { %7124 = vmatmul.mubr.msk.bf16.vlgmr.msra.gmra.mxu0 %vm1277_vm7, %v4195_v41  ;;  %v6458_v41 = vld [vmem:[#allocation11 + $0x5] ss:$0 sm:$0xff] }
0x1f81   :  { %7147 = vmatprep.mubr.msk.bf16.mxu0 %vm8007_vm2, %v8006_v1  ;;  %7144 = vmatpush3.bf16.msra.mxu0 %v7471_v6  ;;  %v8988_v6 = vld [vmem:[%s9251_s18 + $0x8] sm:$0xff] }
0x1f82   :  { %7145 = vmatprep.subr.bf16.mxu0 %v8006_v1 }
0x1f85   :  { %7146 = vmatpush3.bf16.msra.mxu0 %v7473_v7 }
0x1f86   :  { %7157 = vmatprep.subr.bf16.mxu0 %v8006_v1 }
0x2040   :  { %v4263_v43 = vpop.f32.mrf.mxu0 }
0x2041   :  { %v4264_v45 = vadd.f32 %v6438_v42, %v4263_v43 }
0x2042   :  { %v7125_v46 = vpop.f32.mrf.mxu0 }
0x2043   :  { %v4270_v47 = vadd.f32 %v4264_v45, %v4113_v20  ;;  %v6450_v20 = vld [vmem:[#allocation11 + $0x4] ss:$0 sm:$0xff] }
0x2044   :  { %v4266_v48 = vpop.f32.mrf.mxu0 }
0x2045   :  { %v4267_v49 = vadd.f32 %v6438_v42, %v4266_v48  ;;  %v4276_v52 = vsel %vm355_vm3, %v4270_v47, 0.0 }
0x2046   :  { %4277 = vadd.xlane.f32.xlu1 %v4276_v52  ;;  %v7126_v58 = vpop.f32.mrf.mxu0 }
0x2047   :  { %v4271_v59 = vadd.f32 %v4267_v49, %v4114_v56  ;;  %v6466_v56 = vld [vmem:[#allocation11 + $0x6] ss:$0 sm:$0xff] }
0x2049   :  { %v4279_v60 = vsel %vm355_vm3, %v4271_v59, 0.0 }
0x204a   :  { %4280 = vadd.xlane.f32.xlu0 %v4279_v60 }
0x20cf   :  { %v4278_v61 = vpop.xlane.xlu1 %4277 }
0x20d0   :  { %v4282_v17 = vmul.f32 0.03125, %v4278_v61 }
0x20d2   :  { %v4284_v13 = vsub.f32 %v4270_v47, %v4282_v17 }
0x20d3   :  { %v4281_v62 = vpop.xlane.xlu0 %4280 }
0x20d4   :  { %v4283_v63 = vmul.f32 0.03125, %v4281_v62  ;;  %v4286_v0 = vmul.f32 %v4284_v13, %v4284_v13 }
0x20d6   :  { %v4285_v2 = vsub.f32 %v4271_v59, %v4283_v63  ;;  %v4288_v14 = vsel %vm355_vm3, %v4286_v0, 0.0 }
0x20d7   :  { %4289 = vadd.xlane.f32.xlu1 %v4288_v14 }
0x20d8   :  { %v4287_v3 = vmul.f32 %v4285_v2, %v4285_v2 }
0x20da   :  { %v4291_v4 = vsel %vm355_vm3, %v4287_v3, 0.0 }
0x20db   :  { %4292 = vadd.xlane.f32.xlu0 %v4291_v4 }
0x2160   :  { %v4290_v8 = vpop.xlane.xlu1 %4289 }
0x2161   :  { %v4294_v53 = vmul.f32 0.03125, %v4290_v8 }
0x2163   :  { %v4296_v39 = vadd.f32 1e-05, %v4294_v53 }
0x2164   :  { %v4293_v23 = vpop.xlane.xlu0 %4292 }
0x2165   :  { %7648 = vrsqrt.f32 %v4296_v39  ;;  %v4295_v37 = vmul.f32 0.03125, %v4293_v23 }
0x2167   :  { %v4297_v57 = vadd.f32 1e-05, %v4295_v37 }
0x2169   :  { %7650 = vrsqrt.f32 %v4297_v57 }
0x2172   :  { %v7649_v9 = vpop.eup %7648 }
0x2173   :  { %v4300_v44 = vmul.f32 %v7649_v9, %v4284_v13 }
0x2175   :  { %v4308_v35 = vmul.f32 %v6444_v10, %v4300_v44 }
0x2176   :  { %v7651_v25 = vpop.eup %7650 }
0x2177   :  { %v4301_v38 = vmul.f32 %v7651_v25, %v4285_v2  ;;  %v8925_v51 = vadd.f32 %v6445_v11, %v4308_v35  ;;  %v8981_v2 = vld [vmem:[%s9251_s18] sm:$0xff] }
0x2179   :  { %v4309_v16 = vmul.f32 %v6444_v10, %v4301_v38 }
0x217b   :  { %v8927_v18 = vadd.f32 %v6445_v11, %v4309_v16 }
0x217d   :  { %v4323_v19 = vpack.c.bf16 %v8927_v18, %v8925_v51 }
0x217f   :  { %7132 = vmatmul.mubr.msk.bf16.vlgmr.msra.gmra.mxu1 %vm355_vm3, %v4323_v19  ;;  %7148 = vmatmul.mubr.msk.bf16.vlgmr.msra.gmra.mxu0 %vm355_vm3, %v4323_v19 }
0x2180   :  { %7136 = vmatpush3.bf16.msra.mxu1 %v7474_v15  ;;  %7139 = vmatprep.mubr.msk.bf16.mxu1 %vm8007_vm2, %v8006_v1 }
0x2181   :  { %7137 = vmatprep.subr.bf16.mxu1 %v8006_v1  ;;  %7159 = vmatprep.mubr.msk.bf16.mxu0 %vm8007_vm2, %v8006_v1 }
0x2184   :  { %7138 = vmatpush3.bf16.msra.mxu1 %v7475_v54 }
0x2185   :  { %7151 = vmatprep.subr.bf16.mxu1 %v8006_v1 }
0x2187   :  { %7140 = vmatmul.mubr.msk.bf16.vlgmr.msra.gmra.mxu1 %vm355_vm3, %v4323_v19 }
0x2188   :  { %7153 = vmatprep.mubr.msk.bf16.mxu1 %vm8007_vm2, %v8006_v1 }
0x223f   :  { %v4381_v55 = vpop.f32.mrf.mxu1  ;;  %v4513_v28 = vpop.f32.mrf.mxu0 }
0x2240   :  { %v4382_v27 = vadd.f32 %v6450_v20, %v4381_v55  ;;  %v4514_v29 = vadd.f32 %v6466_v56, %v4513_v28 }
0x2241   :  { %v7133_v21 = vpop.f32.mrf.mxu1  ;;  %v7149_v22 = vpop.f32.mrf.mxu0 }
0x2243   :  { %v4384_v24 = vpop.f32.mrf.mxu1  ;;  %v4516_v26 = vpop.f32.mrf.mxu0 }
0x2244   :  { %v4385_v30 = vadd.f32 %v6450_v20, %v4384_v24  ;;  %v4517_v31 = vadd.f32 %v6466_v56, %v4516_v26 }
0x2245   :  { %v7134_v32 = vpop.f32.mrf.mxu1  ;;  %v7150_v33 = vpop.f32.mrf.mxu0 }
0x2246   :  { %v4520_v34 = vpack.c.bf16 %v4385_v30, %v4382_v27  ;;  %v8948_v36 = vpack.c.bf16 %v4517_v31, %v4514_v29 }
0x2247   :  { %v4447_v40 = vpop.f32.mrf.mxu1 }
0x2248   :  { %7158 = vmatpush3.bf16.msra.mxu0 %v8948_v36  ;;  %4638 = vrot.lane.b32.xlu0 %v4520_v34, %s8009_s23  ;;  %v4448_v45 = vadd.f32 %v6458_v41, %v4447_v40 }
0x2249   :  { %v7141_v42 = vpop.f32.mrf.mxu1  ;;  %7169 = vmatprep.subr.bf16.mxu0 %v8006_v1 }
0x224b   :  { %v4450_v43 = vpop.f32.mrf.mxu1 }
0x224c   :  { %v4451_v46 = vadd.f32 %v6458_v41, %v4450_v43 }
0x224d   :  { %v7142_v47 = vpop.f32.mrf.mxu1 }
0x224e   :  { %v4521_v48 = vpack.c.bf16 %v4451_v46, %v4448_v45 }
0x2250   :  { %4884 = vrot.lane.b32.xlu0 %v4521_v48, %s8010_s15  ;;  %4641 = vrot.lane.b32.xlu1 %v4521_v48, %s8009_s23  ;;  %v4527_v49 = vsel %vm535_vm4, %v4521_v48, 0 }
0x2251   :  { %7152 = vmatpush3.bf16.xpose.msra.mxu1 %v4527_v49 }
0x2252   :  { %7163 = vmatprep.subr.bf16.mxu1 %v8006_v1 }
0x2254   :  { %4763 = vrot.lane.b32.xlu1 %v4521_v48, %s8008_s29 }
0x2258   :  { %4761 = vrot.lane.b32.xlu1 %v4520_v34, %s8008_s29  ;;  %7154 = vmatmul.mubr.msk.bf16.vlgmr.msra.gmra.mxu1 %vm535_vm4, %v4520_v34 }
0x2259   :  { %7165 = vmatprep.mubr.msk.bf16.mxu1 %vm8007_vm2, %v8006_v1 }
0x225c   :  { %4882 = vrot.lane.b32.xlu1 %v4520_v34, %s8010_s15 }
0x22ba   :  { %v4639_v60 = vpop.permute.xlu0 %4638 }
0x22c2   :  { %v4642_v52 = vpop.permute.xlu1 %4641  ;;  %v4885_v17 = vpop.permute.xlu0 %4884 }
0x22c3   :  { %v4647_v58 = vsel %vm535_vm4, %v4642_v52, 0  ;;  %v4890_v62 = vsel %vm535_vm4, %v4885_v17, 0 }
0x22c4   :  { %7164 = vmatpush3.bf16.xpose.msra.mxu1 %v4647_v58 }
0x22c5   :  { %7175 = vmatprep.subr.bf16.mxu1 %v8006_v1 }
0x22c6   :  { %v4764_v59 = vpop.permute.xlu1 %4763 }
0x22c7   :  { %v4769_v61 = vsel %vm535_vm4, %v4764_v59, 0 }
0x22ca   :  { %v4762_v13 = vpop.permute.xlu1 %4761 }
0x22cb   :  { %7166 = vmatmul.mubr.msk.bf16.vlgmr.msra.gmra.mxu1 %vm535_vm4, %v4639_v60 }
0x22cc   :  { %7176 = vmatpush3.bf16.xpose.msra.mxu1 %v4769_v61  ;;  %7177 = vmatprep.mubr.msk.bf16.mxu1 %vm8007_vm2, %v8006_v1 }
0x22cd   :  { %7187 = vmatprep.subr.bf16.mxu1 %v8006_v1 }
0x22ce   :  { %v4883_v63 = vpop.permute.xlu1 %4882 }
0x22d3   :  { %7178 = vmatmul.mubr.msk.bf16.vlgmr.msra.gmra.mxu1 %vm535_vm4, %v4762_v13 }
0x22d4   :  { %7188 = vmatpush3.bf16.xpose.msra.mxu1 %v4890_v62  ;;  %7189 = vmatprep.mubr.msk.bf16.mxu1 %vm8007_vm2, %v8006_v1 }
0x22d5   :  { %7199 = vmatprep.subr.bf16.mxu1 %v8006_v1 }
0x22db   :  { %7190 = vmatmul.mubr.msk.bf16.vlgmr.msra.gmra.mxu1 %vm535_vm4, %v4883_v63 }
0x22dc   :  { %7203 = vmatprep.mubr.msk.bf16.mxu1 %vm8007_vm2, %v8006_v1 }
0x2318   :  { %v4563_v0 = vpop.f32.mrf.mxu1 }
0x2319   :  { %v4564_v14 = vadd.f32 %v8981_v2, %v4563_v0 }
0x231a   :  { %v7155_v3 = vpop.f32.mrf.mxu1 }
0x231b   :  { %v4570_v4 = vsel %vm583_vm5, %v4564_v14, -inf }
0x231c   :  { %4571 = vmax.xlane.f32.xlu0 %v4570_v4  ;;  %v4566_v5 = vpop.f32.mrf.mxu1 }
0x231d   :  { %v4567_v12 = vadd.f32 %v8988_v6, %v4566_v5 }
0x231e   :  { %v7156_v7 = vpop.f32.mrf.mxu1 }
0x231f   :  { %v4573_v8 = vsel %vm583_vm5, %v4567_v12, -inf }
0x2320   :  { %4574 = vmax.xlane.f32.xlu1 %v4573_v8 }
0x238b   :  { %v4683_v53 = vpop.f32.mrf.mxu1 }
0x238c   :  { %v4684_v39 = vadd.f32 %v8981_v2, %v4683_v53 }
0x238d   :  { %v7167_v23 = vpop.f32.mrf.mxu1 }
0x238e   :  { %v4690_v37 = vsel %vm583_vm5, %v4684_v39, -inf }
0x238f   :  { %4691 = vmax.xlane.f32.xlu0 %v4690_v37  ;;  %v4686_v57 = vpop.f32.mrf.mxu1 }
0x2390   :  { %v4687_v9 = vadd.f32 %v8988_v6, %v4686_v57 }
0x2391   :  { %v7168_v44 = vpop.f32.mrf.mxu1 }
0x2392   :  { %v4693_v10 = vsel %vm583_vm5, %v4687_v9, -inf }
0x2393   :  { %4694 = vmax.xlane.f32.xlu0 %v4693_v10  ;;  %v4805_v25 = vpop.f32.mrf.mxu1 }
0x2394   :  { %v4806_v38 = vadd.f32 %v8981_v2, %v4805_v25 }
0x2395   :  { %v7179_v35 = vpop.f32.mrf.mxu1 }
0x2396   :  { %v4812_v11 = vsel %vm583_vm5, %v4806_v38, -inf }
0x2397   :  { %4813 = vmax.xlane.f32.xlu1 %v4812_v11  ;;  %v4808_v16 = vpop.f32.mrf.mxu1 }
0x2398   :  { %v4809_v15 = vadd.f32 %v8988_v6, %v4808_v16 }
0x2399   :  { %v7180_v19 = vpop.f32.mrf.mxu1 }
0x239a   :  { %v4815_v54 = vsel %vm583_vm5, %v4809_v15, -inf }
0x239b   :  { %4816 = vmax.xlane.f32.xlu0 %v4815_v54  ;;  %v4926_v55 = vpop.f32.mrf.mxu1 }
0x239c   :  { %v4927_v28 = vadd.f32 %v8981_v2, %v4926_v55 }
0x239d   :  { %v7191_v20 = vpop.f32.mrf.mxu1 }
0x239e   :  { %v4933_v56 = vsel %vm583_vm5, %v4927_v28, -inf }
0x239f   :  { %4934 = vmax.xlane.f32.xlu1 %v4933_v56  ;;  %v4929_v21 = vpop.f32.mrf.mxu1 }
0x23a0   :  { %v4930_v22 = vadd.f32 %v8988_v6, %v4929_v21 }
0x23a1   :  { %v7192_v24 = vpop.f32.mrf.mxu1 }
0x23a2   :  { %v4936_v26 = vsel %vm583_vm5, %v4930_v22, -inf }
0x23a3   :  { %4937 = vmax.xlane.f32.xlu0 %v4936_v26 }
0x23a5   :  { %v4572_v27 = vpop.xlane.xlu0 %4571 }
0x23a6   :  { %v4576_v29 = vsub.f32 %v4564_v14, %v4572_v27 }
0x23a8   :  { %v4578_v30 = vmul.f32 1.442695, %v4576_v29 }
0x23a9   :  { %v4575_v31 = vpop.xlane.xlu1 %4574 }
0x23aa   :  { %7652 = vpow2.f32 %v4578_v30  ;;  %v4577_v32 = vsub.f32 %v4567_v12, %v4575_v31 }
0x23ac   :  { %v4580_v33 = vmul.f32 1.442695, %v4577_v32 }
0x23ae   :  { %7654 = vpow2.f32 %v4580_v33 }
0x23b7   :  { %v7653_v34 = vpop.eup %7652 }
0x23b8   :  { %v4582_v40 = vsel %vm583_vm5, %v7653_v34, 0.0 }
0x23b9   :  { %4583 = vadd.xlane.f32.xlu1 %v4582_v40 }
0x23bb   :  { %v7655_v41 = vpop.eup %7654 }
0x23bc   :  { %v4585_v42 = vsel %vm583_vm5, %v7655_v41, 0.0 }
0x23bd   :  { %4586 = vadd.xlane.f32.xlu0 %v4585_v42 }
0x23ca   :  { %4714 = vrot.lane.b32.xlu1 %v8948_v36, %s8009_s23 }
0x2418   :  { %v4692_v43 = vpop.xlane.xlu0 %4691 }
0x2419   :  { %v4696_v45 = vsub.f32 %v4684_v39, %v4692_v43 }
0x241b   :  { %v4698_v46 = vmul.f32 1.442695, %v4696_v45 }
0x241c   :  { %v4695_v47 = vpop.xlane.xlu0 %4694 }
0x241d   :  { %7656 = vpow2.f32 %v4698_v46  ;;  %v4697_v48 = vsub.f32 %v4687_v9, %v4695_v47 }
0x241f   :  { %v4700_v49 = vmul.f32 1.442695, %v4697_v48 }
0x2420   :  { %v4814_v52 = vpop.xlane.xlu1 %4813 }
0x2421   :  { %7658 = vpow2.f32 %v4700_v49  ;;  %v4818_v58 = vsub.f32 %v4806_v38, %v4814_v52 }
0x2423   :  { %v4820_v59 = vmul.f32 1.442695, %v4818_v58 }
0x2424   :  { %v4817_v60 = vpop.xlane.xlu0 %4816 }
0x2425   :  { %7660 = vpow2.f32 %v4820_v59  ;;  %v4819_v61 = vsub.f32 %v4809_v15, %v4817_v60 }
0x2427   :  { %v4822_v17 = vmul.f32 1.442695, %v4819_v61  ;;  %v7476_v61 = vld [vmem:[%s9223_s11 + $0x78] sm:$0xff]  }
0x2428   :  { %v4935_v13 = vpop.xlane.xlu1 %4934  ;;  %7200 = vmatpush3.bf16.msra.mxu1 %v7476_v61 }
0x2429   :  { %7662 = vpow2.f32 %v4822_v17  ;;  %v4939_v62 = vsub.f32 %v4927_v28, %v4935_v13  ;;  %7201 = vmatprep.subr.bf16.mxu1 %v8006_v1 }
0x242a   :  { %v7657_v63 = vpop.eup %7656 }
0x242b   :  { %v4941_v0 = vmul.f32 1.442695, %v4939_v62  ;;  %v4702_v14 = vsel %vm583_vm5, %v7657_v63, 0.0 }
0x242c   :  { %4703 = vadd.xlane.f32.xlu1 %v4702_v14  ;;  %v4938_v3 = vpop.xlane.xlu0 %4937  ;;  %v7477_v14 = vld [vmem:[%s9223_s11 + $0x70] sm:$0xff]  }
0x242d   :  { %7664 = vpow2.f32 %v4941_v0  ;;  %v4940_v4 = vsub.f32 %v4930_v22, %v4938_v3  ;;  %7202 = vmatpush3.bf16.msra.mxu1 %v7477_v14 }
0x242e   :  { %v7659_v5 = vpop.eup %7658  ;;  %7215 = vmatprep.subr.bf16.mxu1 %v8006_v1 }
0x242f   :  { %v4943_v12 = vmul.f32 1.442695, %v4940_v4  ;;  %v4705_v7 = vsel %vm583_vm5, %v7659_v5, 0.0 }
0x2430   :  { %4706 = vadd.xlane.f32.xlu0 %v4705_v7 }
0x2431   :  { %7666 = vpow2.f32 %v4943_v12 }
0x2432   :  { %v7661_v8 = vpop.eup %7660 }
0x2433   :  { %v4824_v53 = vsel %vm583_vm5, %v7661_v8, 0.0 }
0x2434   :  { %4825 = vadd.xlane.f32.xlu1 %v4824_v53 }
0x2436   :  { %v7663_v39 = vpop.eup %7662 }
0x2437   :  { %v4827_v23 = vsel %vm583_vm5, %v7663_v39, 0.0 }
0x2438   :  { %4828 = vadd.xlane.f32.xlu0 %v4827_v23 }
0x243a   :  { %v7665_v37 = vpop.eup %7664 }
0x243b   :  { %v4945_v57 = vsel %vm583_vm5, %v7665_v37, 0.0 }
0x243c   :  { %4946 = vadd.xlane.f32.xlu1 %v4945_v57 }
0x243e   :  { %v7667_v9 = vpop.eup %7666 }
0x243f   :  { %v4948_v44 = vsel %vm583_vm5, %v7667_v9, 0.0 }
0x2440   :  { %4949 = vadd.xlane.f32.xlu0 %v4948_v44 }
0x2442   :  { %v4584_v10 = vpop.xlane.xlu1 %4583 }
0x2443   :  { %7668 = vrcp.f32 %v4584_v10 }
0x2446   :  { %v4587_v25 = vpop.xlane.xlu0 %4586  ;;  %v4715_v19 = vpop.permute.xlu1 %4714 }
0x2447   :  { %7670 = vrcp.f32 %v4587_v25 }
0x244d   :  { %4956 = vrot.lane.b32.xlu1 %v8948_v36, %s8010_s15 }
0x2450   :  { %v7669_v38 = vpop.eup %7668 }
0x2451   :  { %v4589_v11 = vmul.f32 %v7669_v38, %v7653_v34 }
0x2454   :  { %v7671_v35 = vpop.eup %7670 }
0x2455   :  { %v4591_v16 = vmul.f32 %v7671_v35, %v7655_v41 }
0x2456   :  { %4835 = vrot.lane.b32.xlu0 %v8948_v36, %s8008_s29 }
0x2457   :  { %v4592_v15 = vpack.c.bf16 %v4591_v16, %v4589_v11 }
0x2459   :  { %7160 = vmatmul.mubr.msk.bf16.vlgmr.msra.gmra.mxu0 %vm583_vm5, %v4592_v15 }
0x245a   :  { %7170 = vmatpush3.bf16.msra.mxu0 %v4715_v19  ;;  %7171 = vmatprep.mubr.msk.bf16.mxu0 %vm8007_vm2, %v8006_v1 }
0x245b   :  { %7181 = vmatprep.subr.bf16.mxu0 %v8006_v1 }
0x24b5   :  { %v4704_v54 = vpop.xlane.xlu1 %4703 }
0x24b6   :  { %7672 = vrcp.f32 %v4704_v54 }
0x24b9   :  { %v4707_v55 = vpop.xlane.xlu0 %4706 }
0x24ba   :  { %7674 = vrcp.f32 %v4707_v55  ;;  %v7478_v55 = vld [vmem:[#allocation13 + $0x58] sm:$0xff]  }
0x24bd   :  { %v4826_v28 = vpop.xlane.xlu1 %4825 }
0x24be   :  { %7676 = vrcp.f32 %v4826_v28 }
0x24c1   :  { %v4829_v20 = vpop.xlane.xlu0 %4828 }
0x24c2   :  { %7678 = vrcp.f32 %v4829_v20  ;;  %v7479_v20 = vld [vmem:[#allocation13 + $0x50] sm:$0xff]  }
0x24c3   :  { %v7673_v56 = vpop.eup %7672 }
0x24c4   :  { %v4709_v22 = vmul.f32 %v7673_v56, %v7657_v63  ;;  %v6482_v56 = vld [vmem:[#allocation11 + $0x7] ss:$0 sm:$0xff] }
0x24c5   :  { %v4947_v36 = vpop.xlane.xlu1 %4946 }
0x24c6   :  { %7680 = vrcp.f32 %v4947_v36 }
0x24c7   :  { %v7675_v21 = vpop.eup %7674 }
0x24c8   :  { %v4711_v24 = vmul.f32 %v7675_v21, %v7659_v5 }
0x24c9   :  { %v4950_v26 = vpop.xlane.xlu0 %4949  ;;  %v4957_v40 = vpop.permute.xlu1 %4956 }
0x24ca   :  { %v4712_v27 = vpack.c.bf16 %v4711_v24, %v4709_v22  ;;  %7682 = vrcp.f32 %v4950_v26 }
0x24cb   :  { %v7677_v29 = vpop.eup %7676 }
0x24cc   :  { %7172 = vmatmul.mubr.msk.bf16.vlgmr.msra.gmra.mxu0 %vm583_vm5, %v4712_v27  ;;  %v4831_v32 = vmul.f32 %v7677_v29, %v7661_v8 }
0x24cd   :  { %v4836_v30 = vpop.permute.xlu0 %4835  ;;  %7183 = vmatprep.mubr.msk.bf16.mxu0 %vm8007_vm2, %v8006_v1 }
0x24ce   :  { %7182 = vmatpush3.bf16.msra.mxu0 %v4836_v30 }
0x24cf   :  { %v7679_v31 = vpop.eup %7678  ;;  %7193 = vmatprep.subr.bf16.mxu0 %v8006_v1 }
0x24d0   :  { %v4833_v33 = vmul.f32 %v7679_v31, %v7663_v39 }
0x24d2   :  { %v4834_v34 = vpack.c.bf16 %v4833_v33, %v4831_v32 }
0x24d3   :  { %v7681_v41 = vpop.eup %7680 }
0x24d4   :  { %7184 = vmatmul.mubr.msk.bf16.vlgmr.msra.gmra.mxu0 %vm583_vm5, %v4834_v34  ;;  %v4952_v43 = vmul.f32 %v7681_v41, %v7665_v37  ;;  %v6492_v34 = vld [vmem:[#allocation14 + $0x5] ss:$0 sm:$0xff] }
0x24d5   :  { %7194 = vmatpush3.bf16.msra.mxu0 %v4957_v40  ;;  %7195 = vmatprep.mubr.msk.bf16.mxu0 %vm8007_vm2, %v8006_v1 }
0x24d6   :  { %7207 = vmatprep.subr.bf16.mxu0 %v8006_v1 }
0x24d7   :  { %v7683_v42 = vpop.eup %7682 }
0x24d8   :  { %v4954_v45 = vmul.f32 %v7683_v42, %v7667_v9 }
0x24da   :  { %v4955_v46 = vpack.c.bf16 %v4954_v45, %v4952_v43 }
0x24dc   :  { %7196 = vmatmul.mubr.msk.bf16.vlgmr.msra.gmra.mxu0 %vm583_vm5, %v4955_v46 }
0x24dd   :  { %7211 = vmatprep.mubr.msk.bf16.mxu0 %vm8007_vm2, %v8006_v1 }
0x2519   :  { %v4630_v47 = vpop.f32.mrf.mxu0 }
0x251b   :  { %v7161_v48 = vpop.f32.mrf.mxu0 }
0x251d   :  { %v4633_v49 = vpop.f32.mrf.mxu0 }
0x251f   :  { %v7162_v52 = vpop.f32.mrf.mxu0 }
0x258c   :  { %v4754_v58 = vpop.f32.mrf.mxu0 }
0x258e   :  { %v7173_v59 = vpop.f32.mrf.mxu0 }
0x2590   :  { %v4757_v60 = vpop.f32.mrf.mxu0 }
0x2591   :  { %v7390_v17 = vpack.i.bf16 %v4757_v60, %v4754_v58 }
0x2592   :  { %v7174_v13 = vpop.f32.mrf.mxu0 }
0x2593   :  { %7391 = vrot.lane.b32.xlu1 %v7390_v17, %s8011_s5  ;;  %v7480_v13 = vld [vmem:[#allocation13 + $0x48] sm:$0xff]  }
0x2594   :  { %v4875_v62 = vpop.f32.mrf.mxu0  ;;  %7208 = vmatpush3.bf16.msra.mxu0 %v7480_v13 }
0x2595   :  { %7209 = vmatprep.subr.bf16.mxu0 %v8006_v1 }
0x2596   :  { %v7185_v63 = vpop.f32.mrf.mxu0 }
0x2598   :  { %v4878_v0 = vpop.f32.mrf.mxu0 }
0x2599   :  { %v7395_v3 = vpack.i.bf16 %v4878_v0, %v4875_v62  ;;  %v7481_v62 = vld [vmem:[#allocation13 + $0x40] sm:$0xff]  }
0x259a   :  { %v7186_v4 = vpop.f32.mrf.mxu0  ;;  %7210 = vmatpush3.bf16.msra.mxu0 %v7481_v62 }
0x259b   :  { %7396 = vrot.lane.b32.xlu0 %v7395_v3, %s7996_s1  ;;  %7223 = vmatprep.subr.bf16.mxu0 %v8006_v1 }
0x259c   :  { %v4996_v5 = vpop.f32.mrf.mxu0 }
0x259e   :  { %v7197_v12 = vpop.f32.mrf.mxu0 }
0x25a0   :  { %v4999_v7 = vpop.f32.mrf.mxu0 }
0x25a1   :  { %v7400_v8 = vpack.i.bf16 %v4999_v7, %v4996_v5 }
0x25a2   :  { %v7198_v53 = vpop.f32.mrf.mxu0 }
0x25a3   :  { %7401 = vrot.lane.b32.xlu1 %v7400_v8, %s8012_s2  ;;  %v6486_v8 = vld [vmem:[#allocation19 + $0x7] ss:$0 sm:$0xff] }
0x2605   :  { %v7392_v39 = vpop.permute.xlu1 %7391 }
0x2606   :  { %v7394_v37 = vunpack.i.h.bf16 %v7392_v39  ;;  %v7393_v57 = vunpack.i.l.bf16 %v7392_v39 }
0x2608   :  { %v5028_v25 = vsel %vm535_vm4, %v4633_v49, %v7394_v37  ;;  %v5027_v38 = vsel %vm535_vm4, %v4630_v47, %v7393_v57  ;;  %v6487_v37 = vld [vmem:[#allocation19 + $0x8] ss:$0 sm:$0xff] }
0x260d   :  { %v7397_v23 = vpop.permute.xlu0 %7396 }
0x260e   :  { %v7399_v9 = vunpack.i.h.bf16 %v7397_v23  ;;  %v7398_v44 = vunpack.i.l.bf16 %v7397_v23 }
0x2610   :  { %v5030_v16 = vsel %vm583_vm5, %v5028_v25, %v7399_v9  ;;  %v5029_v15 = vsel %vm583_vm5, %v5027_v38, %v7398_v44  ;;  %v7483_v38 = vld [vmem:[#allocation13 + $0x60] sm:$0xff]  }
0x2615   :  { %v7402_v10 = vpop.permute.xlu1 %7401 }
0x2616   :  { %v7404_v35 = vunpack.i.h.bf16 %v7402_v10  ;;  %v7403_v11 = vunpack.i.l.bf16 %v7402_v10  ;;  %v7482_v10 = vld [vmem:[#allocation13 + $0x68] sm:$0xff]  }
0x2618   :  { %v5032_v19 = vsel %vm1045_vm6, %v5030_v16, %v7404_v35  ;;  %v5031_v54 = vsel %vm1045_vm6, %v5029_v15, %v7403_v11  ;;  %v6488_v11 = vld [vmem:[#allocation14 + $0x4] ss:$0 sm:$0xff] }
0x2619   :  { %v5038_v28 = vpack.c.bf16 %v5032_v19, %v5031_v54 }
0x261b   :  { %7204 = vmatmul.mubr.msk.bf16.vlgmr.msra.gmra.mxu1 %vm355_vm3, %v5038_v28 }
0x261c   :  { %7216 = vmatpush3.bf16.msra.mxu1 %v7478_v55  ;;  %7219 = vmatprep.mubr.msk.bf16.mxu1 %vm8007_vm2, %v8006_v1 }
0x261d   :  { %7217 = vmatprep.subr.bf16.mxu1 %v8006_v1 }
0x2620   :  { %7218 = vmatpush3.bf16.msra.mxu1 %v7479_v20 }
0x2621   :  { %7231 = vmatprep.subr.bf16.mxu1 %v8006_v1 }
0x2623   :  { %7220 = vmatmul.mubr.msk.bf16.vlgmr.msra.gmra.mxu1 %vm355_vm3, %v8765_v50 }
0x2624   :  { %7233 = vmatprep.mubr.msk.bf16.mxu1 %vm8007_vm2, %v8006_v1 }
0x26db   :  { %v5096_v36 = vpop.f32.mrf.mxu1 }
0x26dc   :  { %v5097_v21 = vadd.f32 %v6482_v56, %v5096_v36 }
0x26dd   :  { %v7205_v22 = vpop.f32.mrf.mxu1 }
0x26de   :  { %v5103_v24 = vadd.f32 %v5097_v21, %v8925_v51 }
0x26df   :  { %v5099_v26 = vpop.f32.mrf.mxu1 }
0x26e0   :  { %v5100_v27 = vadd.f32 %v6482_v56, %v5099_v26  ;;  %v5109_v29 = vsel %vm355_vm3, %v5103_v24, 0.0 }
0x26e1   :  { %5110 = vadd.xlane.f32.xlu0 %v5109_v29  ;;  %v7206_v30 = vpop.f32.mrf.mxu1 }
0x26e2   :  { %v5104_v31 = vadd.f32 %v5100_v27, %v8927_v18 }
0x26e3   :  { %v5280_v32 = vpop.f32.mrf.mxu1 }
0x26e4   :  { %v5112_v33 = vsel %vm355_vm3, %v5104_v31, 0.0  ;;  %v5281_v42 = vadd.f32 %v6492_v34, %v5280_v32 }
0x26e5   :  { %5113 = vadd.xlane.f32.xlu1 %v5112_v33  ;;  %v7221_v40 = vpop.f32.mrf.mxu1 }
0x26e7   :  { %v5283_v41 = vpop.f32.mrf.mxu1 }
0x26e8   :  { %v5284_v43 = vadd.f32 %v6492_v34, %v5283_v41 }
0x26e9   :  { %v7222_v45 = vpop.f32.mrf.mxu1 }
0x26ea   :  { %v9063_v46 = vpack.c.bf16 %v5284_v43, %v5281_v42 }
0x26ec   :  { %v5360_v51 = vsel %vm535_vm4, %v9063_v46, 0 }
0x26ed   :  { %7232 = vmatpush3.bf16.xpose.msra.mxu1 %v5360_v51 }
0x26ee   :  { %7243 = vmatprep.subr.bf16.mxu1 %v8006_v1 }
0x26f6   :  { %5474 = vrot.lane.b32.xlu1 %v9063_v46, %s8009_s23 }
0x26fa   :  { %5596 = vrot.lane.b32.xlu1 %v9063_v46, %s8008_s29 }
0x276a   :  { %v5111_v18 = vpop.xlane.xlu0 %5110 }
0x276b   :  { %v5115_v47 = vmul.f32 0.03125, %v5111_v18 }
0x276d   :  { %v5117_v48 = vsub.f32 %v5103_v24, %v5115_v47 }
0x276e   :  { %v5114_v49 = vpop.xlane.xlu1 %5113 }
0x276f   :  { %v5116_v52 = vmul.f32 0.03125, %v5114_v49  ;;  %v5119_v58 = vmul.f32 %v5117_v48, %v5117_v48 }
0x2771   :  { %v5118_v59 = vsub.f32 %v5104_v31, %v5116_v52  ;;  %v5121_v60 = vsel %vm355_vm3, %v5119_v58, 0.0 }
0x2772   :  { %5122 = vadd.xlane.f32.xlu0 %v5121_v60  ;;  %v5475_v28 = vpop.permute.xlu1 %5474 }
0x2773   :  { %v5120_v61 = vmul.f32 %v5118_v59, %v5118_v59  ;;  %v5480_v36 = vsel %vm535_vm4, %v5475_v28, 0 }
0x2775   :  { %v5124_v17 = vsel %vm355_vm3, %v5120_v61, 0.0 }
0x2776   :  { %5125 = vadd.xlane.f32.xlu0 %v5124_v17  ;;  %v5597_v30 = vpop.permute.xlu1 %5596 }
0x2777   :  { %v5602_v32 = vsel %vm535_vm4, %v5597_v30, 0 }
0x27fb   :  { %v5123_v63 = vpop.xlane.xlu0 %5122 }
0x27fc   :  { %v5127_v0 = vmul.f32 0.03125, %v5123_v63 }
0x27fe   :  { %v5129_v14 = vadd.f32 1e-05, %v5127_v0 }
0x27ff   :  { %v5126_v3 = vpop.xlane.xlu0 %5125 }
0x2800   :  { %7684 = vrsqrt.f32 %v5129_v14  ;;  %v5128_v4 = vmul.f32 0.03125, %v5126_v3 }
0x2802   :  { %v5130_v5 = vadd.f32 1e-05, %v5128_v4 }
0x2804   :  { %7686 = vrsqrt.f32 %v5130_v5 }
0x280d   :  { %v7685_v12 = vpop.eup %7684 }
0x280e   :  { %v5133_v7 = vmul.f32 %v7685_v12, %v5117_v48 }
0x2810   :  { %v5141_v39 = vmul.f32 %v6486_v8, %v5133_v7 }
0x2811   :  { %v7687_v53 = vpop.eup %7686 }
0x2812   :  { %v5134_v23 = vmul.f32 %v7687_v53, %v5118_v59  ;;  %v9076_v9 = vadd.f32 %v6487_v37, %v5141_v39 }
0x2814   :  { %v5142_v57 = vmul.f32 %v6486_v8, %v5134_v23 }
0x2816   :  { %v9078_v44 = vadd.f32 %v6487_v37, %v5142_v57 }
0x2818   :  { %v5156_v25 = vpack.c.bf16 %v9078_v44, %v9076_v9 }
0x281a   :  { %7212 = vmatmul.mubr.msk.bf16.vlgmr.msra.gmra.mxu0 %vm355_vm3, %v5156_v25 }
0x281b   :  { %7224 = vmatpush3.bf16.msra.mxu0 %v7482_v10  ;;  %7227 = vmatprep.mubr.msk.bf16.mxu0 %vm8007_vm2, %v8006_v1 }
0x281c   :  { %7225 = vmatprep.subr.bf16.mxu0 %v8006_v1 }
0x281f   :  { %7226 = vmatpush3.bf16.msra.mxu0 %v7483_v38 }
0x2820   :  { %7237 = vmatprep.subr.bf16.mxu0 %v8006_v1 }
0x2822   :  { %7228 = vmatmul.mubr.msk.bf16.vlgmr.msra.gmra.mxu0 %vm355_vm3, %v8765_v50  ;;  %v6496_v50 = vld [vmem:[#allocation14 + $0x6] ss:$0 sm:$0xff] }
0x2823   :  { %7239 = vmatprep.mubr.msk.bf16.mxu0 %vm8007_vm2, %v8006_v1 }
0x28da   :  { %v5214_v35 = vpop.f32.mrf.mxu0 }
0x28db   :  { %v5215_v19 = vadd.f32 %v6488_v11, %v5214_v35 }
0x28dc   :  { %v7213_v16 = vpop.f32.mrf.mxu0 }
0x28de   :  { %v5217_v15 = vpop.f32.mrf.mxu0 }
0x28df   :  { %v5218_v54 = vadd.f32 %v6488_v11, %v5217_v15 }
0x28e0   :  { %v7214_v55 = vpop.f32.mrf.mxu0 }
0x28e1   :  { %v5353_v20 = vpack.c.bf16 %v5218_v54, %v5215_v19 }
0x28e2   :  { %v5346_v56 = vpop.f32.mrf.mxu0 }
0x28e3   :  { %5471 = vrot.lane.b32.xlu0 %v5353_v20, %s8009_s23  ;;  %5594 = vrot.lane.b32.xlu1 %v5353_v20, %s8008_s29  ;;  %v5347_v24 = vadd.f32 %v6496_v50, %v5346_v56 }
0x28e4   :  { %7234 = vmatmul.mubr.msk.bf16.vlgmr.msra.gmra.mxu1 %vm535_vm4, %v5353_v20  ;;  %v7229_v21 = vpop.f32.mrf.mxu0 }
0x28e5   :  { %7244 = vmatpush3.bf16.xpose.msra.mxu1 %v5480_v36  ;;  %7245 = vmatprep.mubr.msk.bf16.mxu1 %vm8007_vm2, %v8006_v1 }
0x28e6   :  { %v5349_v22 = vpop.f32.mrf.mxu0  ;;  %7255 = vmatprep.subr.bf16.mxu1 %v8006_v1 }
0x28e7   :  { %v5350_v26 = vadd.f32 %v6496_v50, %v5349_v22  ;;  %5717 = vrot.lane.b32.xlu0 %v9063_v46, %s8010_s15  ;;  %5715 = vrot.lane.b32.xlu1 %v5353_v20, %s8010_s15 }
0x28e8   :  { %v7230_v27 = vpop.f32.mrf.mxu0 }
0x28e9   :  { %v9101_v29 = vpack.c.bf16 %v5350_v26, %v5347_v24 }
0x28eb   :  { %7238 = vmatpush3.bf16.msra.mxu0 %v9101_v29 }
0x28ec   :  { %7249 = vmatprep.subr.bf16.mxu0 %v8006_v1 }
0x2955   :  { %v5472_v31 = vpop.permute.xlu0 %5471  ;;  %v5595_v34 = vpop.permute.xlu1 %5594 }
0x2956   :  { %7246 = vmatmul.mubr.msk.bf16.vlgmr.msra.gmra.mxu1 %vm535_vm4, %v5472_v31 }
0x2957   :  { %7256 = vmatpush3.bf16.xpose.msra.mxu1 %v5602_v32  ;;  %7257 = vmatprep.mubr.msk.bf16.mxu1 %vm8007_vm2, %v8006_v1 }
0x2958   :  { %7267 = vmatprep.subr.bf16.mxu1 %v8006_v1 }
0x2959   :  { %v5718_v33 = vpop.permute.xlu0 %5717  ;;  %v5716_v41 = vpop.permute.xlu1 %5715 }
0x295a   :  { %v5723_v40 = vsel %vm535_vm4, %v5718_v33, 0 }
0x295e   :  { %7258 = vmatmul.mubr.msk.bf16.vlgmr.msra.gmra.mxu1 %vm535_vm4, %v5595_v34 }
0x295f   :  { %7268 = vmatpush3.bf16.xpose.msra.mxu1 %v5723_v40  ;;  %7269 = vmatprep.mubr.msk.bf16.mxu1 %vm8007_vm2, %v8006_v1 }
0x2960   :  { %7279 = vmatprep.subr.bf16.mxu1 %v8006_v1 }
0x2966   :  { %7270 = vmatmul.mubr.msk.bf16.vlgmr.msra.gmra.mxu1 %vm535_vm4, %v5716_v41 }
0x2967   :  { %7283 = vmatprep.mubr.msk.bf16.mxu1 %vm8007_vm2, %v8006_v1 }
0x29a4   :  { %v5396_v42 = vpop.f32.mrf.mxu1 }
0x29a5   :  { %v5397_v43 = vadd.f32 %v8981_v2, %v5396_v42 }
0x29a6   :  { %v7235_v45 = vpop.f32.mrf.mxu1 }
0x29a7   :  { %v5403_v46 = vsel %vm583_vm5, %v5397_v43, -inf }
0x29a8   :  { %5404 = vmax.xlane.f32.xlu0 %v5403_v46  ;;  %v5399_v51 = vpop.f32.mrf.mxu1 }
0x29a9   :  { %v5400_v18 = vadd.f32 %v8988_v6, %v5399_v51 }
0x29aa   :  { %v7236_v47 = vpop.f32.mrf.mxu1 }
0x29ab   :  { %v5406_v48 = vsel %vm583_vm5, %v5400_v18, -inf }
0x29ac   :  { %5407 = vmax.xlane.f32.xlu1 %v5406_v48 }
0x2a16   :  { %v5516_v49 = vpop.f32.mrf.mxu1 }
0x2a17   :  { %v5517_v52 = vadd.f32 %v8981_v2, %v5516_v49 }
0x2a18   :  { %v7247_v58 = vpop.f32.mrf.mxu1 }
0x2a19   :  { %v5523_v59 = vsel %vm583_vm5, %v5517_v52, -inf }
0x2a1a   :  { %5524 = vmax.xlane.f32.xlu0 %v5523_v59  ;;  %v5519_v60 = vpop.f32.mrf.mxu1 }
0x2a1b   :  { %v5520_v61 = vadd.f32 %v8988_v6, %v5519_v60 }
0x2a1c   :  { %v7248_v17 = vpop.f32.mrf.mxu1 }
0x2a1d   :  { %v5526_v13 = vsel %vm583_vm5, %v5520_v61, -inf }
0x2a1e   :  { %5527 = vmax.xlane.f32.xlu0 %v5526_v13  ;;  %v5638_v62 = vpop.f32.mrf.mxu1 }
0x2a1f   :  { %v5639_v63 = vadd.f32 %v8981_v2, %v5638_v62 }
0x2a20   :  { %v7259_v0 = vpop.f32.mrf.mxu1 }
0x2a21   :  { %v5645_v14 = vsel %vm583_vm5, %v5639_v63, -inf }
0x2a22   :  { %5646 = vmax.xlane.f32.xlu1 %v5645_v14  ;;  %v5641_v3 = vpop.f32.mrf.mxu1 }
0x2a23   :  { %v5642_v4 = vadd.f32 %v8988_v6, %v5641_v3 }
0x2a24   :  { %v7260_v5 = vpop.f32.mrf.mxu1 }
0x2a25   :  { %v5648_v12 = vsel %vm583_vm5, %v5642_v4, -inf }
0x2a26   :  { %5649 = vmax.xlane.f32.xlu0 %v5648_v12  ;;  %v5759_v7 = vpop.f32.mrf.mxu1 }
0x2a27   :  { %v5760_v8 = vadd.f32 %v8981_v2, %v5759_v7 }
0x2a28   :  { %v7271_v53 = vpop.f32.mrf.mxu1 }
0x2a29   :  { %v5766_v39 = vsel %vm583_vm5, %v5760_v8, -inf }
0x2a2a   :  { %5767 = vmax.xlane.f32.xlu1 %v5766_v39  ;;  %v5762_v23 = vpop.f32.mrf.mxu1 }
0x2a2b   :  { %v5763_v37 = vadd.f32 %v8988_v6, %v5762_v23 }
0x2a2c   :  { %v7272_v57 = vpop.f32.mrf.mxu1 }
0x2a2d   :  { %v5769_v10 = vsel %vm583_vm5, %v5763_v37, -inf }
0x2a2e   :  { %5770 = vmax.xlane.f32.xlu0 %v5769_v10 }
0x2a31   :  { %v5405_v25 = vpop.xlane.xlu0 %5404 }
0x2a32   :  { %v5409_v38 = vsub.f32 %v5397_v43, %v5405_v25 }
0x2a34   :  { %v5411_v35 = vmul.f32 1.442695, %v5409_v38 }
0x2a35   :  { %v5408_v11 = vpop.xlane.xlu1 %5407 }
0x2a36   :  { %7688 = vpow2.f32 %v5411_v35  ;;  %v5410_v16 = vsub.f32 %v5400_v18, %v5408_v11 }
0x2a38   :  { %v5413_v15 = vmul.f32 1.442695, %v5410_v16 }
0x2a3a   :  { %7690 = vpow2.f32 %v5413_v15 }
0x2a43   :  { %v7689_v2 = vpop.eup %7688 }
0x2a44   :  { %v5415_v19 = vsel %vm583_vm5, %v7689_v2, 0.0 }
0x2a45   :  { %5416 = vadd.xlane.f32.xlu1 %v5415_v19 }
0x2a47   :  { %v7691_v54 = vpop.eup %7690 }
0x2a48   :  { %v5418_v55 = vsel %vm583_vm5, %v7691_v54, 0.0 }
0x2a49   :  { %5419 = vadd.xlane.f32.xlu0 %v5418_v55 }
0x2a56   :  { %5547 = vrot.lane.b32.xlu1 %v9101_v29, %s8009_s23 }
0x2aa3   :  { %v5525_v6 = vpop.xlane.xlu0 %5524 }
0x2aa4   :  { %v5529_v28 = vsub.f32 %v5517_v52, %v5525_v6 }
0x2aa6   :  { %v5531_v20 = vmul.f32 1.442695, %v5529_v28 }
0x2aa7   :  { %v5528_v56 = vpop.xlane.xlu0 %5527 }
0x2aa8   :  { %7692 = vpow2.f32 %v5531_v20  ;;  %v5530_v36 = vsub.f32 %v5520_v61, %v5528_v56 }
0x2aaa   :  { %v5533_v50 = vmul.f32 1.442695, %v5530_v36 }
0x2aab   :  { %v5647_v21 = vpop.xlane.xlu1 %5646 }
0x2aac   :  { %7694 = vpow2.f32 %v5533_v50  ;;  %v5651_v22 = vsub.f32 %v5639_v63, %v5647_v21 }
0x2aae   :  { %v5653_v24 = vmul.f32 1.442695, %v5651_v22  ;;  %v7484_v22 = vld [vmem:[#allocation13 + $0x78] sm:$0xff]  }
0x2aaf   :  { %v5650_v26 = vpop.xlane.xlu0 %5649  ;;  %7280 = vmatpush3.bf16.msra.mxu1 %v7484_v22 }
0x2ab0   :  { %7696 = vpow2.f32 %v5653_v24  ;;  %v5652_v27 = vsub.f32 %v5642_v4, %v5650_v26  ;;  %7281 = vmatprep.subr.bf16.mxu1 %v8006_v1 }
0x2ab2   :  { %v5655_v30 = vmul.f32 1.442695, %v5652_v27 }
0x2ab3   :  { %v5768_v31 = vpop.xlane.xlu1 %5767 }
0x2ab4   :  { %7698 = vpow2.f32 %v5655_v30  ;;  %v5772_v32 = vsub.f32 %v5760_v8, %v5768_v31 }
0x2ab5   :  { %v7693_v33 = vpop.eup %7692 }
0x2ab6   :  { %v5774_v34 = vmul.f32 1.442695, %v5772_v32  ;;  %v5535_v40 = vsel %vm583_vm5, %v7693_v33, 0.0  ;;  %v7485_v32 = vld [vmem:[#allocation13 + $0x70] sm:$0xff]  }
0x2ab7   :  { %5536 = vadd.xlane.f32.xlu1 %v5535_v40  ;;  %v5771_v41 = vpop.xlane.xlu0 %5770  ;;  %7282 = vmatpush3.bf16.msra.mxu1 %v7485_v32 }
0x2ab8   :  { %7700 = vpow2.f32 %v5774_v34  ;;  %v5773_v42 = vsub.f32 %v5763_v37, %v5771_v41  ;;  %7295 = vmatprep.subr.bf16.mxu1 %v8006_v1 }
0x2ab9   :  { %v7695_v43 = vpop.eup %7694 }
0x2aba   :  { %v5776_v45 = vmul.f32 1.442695, %v5773_v42  ;;  %v5538_v46 = vsel %vm583_vm5, %v7695_v43, 0.0 }
0x2abb   :  { %5539 = vadd.xlane.f32.xlu0 %v5538_v46 }
0x2abc   :  { %7702 = vpow2.f32 %v5776_v45 }
0x2abd   :  { %v7697_v51 = vpop.eup %7696 }
0x2abe   :  { %v5657_v18 = vsel %vm583_vm5, %v7697_v51, 0.0 }
0x2abf   :  { %5658 = vadd.xlane.f32.xlu1 %v5657_v18 }
0x2ac1   :  { %v7699_v47 = vpop.eup %7698 }
0x2ac2   :  { %v5660_v48 = vsel %vm583_vm5, %v7699_v47, 0.0 }
0x2ac3   :  { %5661 = vadd.xlane.f32.xlu0 %v5660_v48 }
0x2ac5   :  { %v7701_v49 = vpop.eup %7700 }
0x2ac6   :  { %v5778_v52 = vsel %vm583_vm5, %v7701_v49, 0.0 }
0x2ac7   :  { %5779 = vadd.xlane.f32.xlu1 %v5778_v52 }
0x2ac9   :  { %v7703_v58 = vpop.eup %7702 }
0x2aca   :  { %v5781_v59 = vsel %vm583_vm5, %v7703_v58, 0.0 }
0x2acb   :  { %5782 = vadd.xlane.f32.xlu0 %v5781_v59 }
0x2ace   :  { %v5417_v60 = vpop.xlane.xlu1 %5416 }
0x2acf   :  { %7704 = vrcp.f32 %v5417_v60 }
0x2ad2   :  { %v5420_v61 = vpop.xlane.xlu0 %5419  ;;  %v5548_v14 = vpop.permute.xlu1 %5547 }
0x2ad3   :  { %7706 = vrcp.f32 %v5420_v61 }
0x2ad8   :  { %5789 = vrot.lane.b32.xlu1 %v9101_v29, %s8010_s15 }
0x2adc   :  { %v7705_v17 = vpop.eup %7704 }
0x2add   :  { %v5422_v62 = vmul.f32 %v7705_v17, %v7689_v2 }
0x2ae0   :  { %v7707_v13 = vpop.eup %7706 }
0x2ae1   :  { %v5424_v63 = vmul.f32 %v7707_v13, %v7691_v54  ;;  %5668 = vrot.lane.b32.xlu0 %v9101_v29, %s8008_s29 }
0x2ae3   :  { %v5425_v0 = vpack.c.bf16 %v5424_v63, %v5422_v62 }
0x2ae5   :  { %7240 = vmatmul.mubr.msk.bf16.vlgmr.msra.gmra.mxu0 %vm583_vm5, %v5425_v0 }
0x2ae6   :  { %7250 = vmatpush3.bf16.msra.mxu0 %v5548_v14  ;;  %7251 = vmatprep.mubr.msk.bf16.mxu0 %vm8007_vm2, %v8006_v1  ;;  %v6508_v14 = vld [vmem:[#allocation14 + $0x7] ss:$0 sm:$0xff] }
0x2ae7   :  { %7261 = vmatprep.subr.bf16.mxu0 %v8006_v1 }
0x2b40   :  { %v5537_v3 = vpop.xlane.xlu1 %5536 }
0x2b41   :  { %7708 = vrcp.f32 %v5537_v3 }
0x2b44   :  { %v5540_v4 = vpop.xlane.xlu0 %5539 }
0x2b45   :  { %7710 = vrcp.f32 %v5540_v4 }
0x2b48   :  { %v5659_v5 = vpop.xlane.xlu1 %5658 }
0x2b49   :  { %7712 = vrcp.f32 %v5659_v5 }
0x2b4c   :  { %v5662_v12 = vpop.xlane.xlu0 %5661 }
0x2b4d   :  { %7714 = vrcp.f32 %v5662_v12 }
0x2b4e   :  { %v7709_v7 = vpop.eup %7708 }
0x2b4f   :  { %v5542_v53 = vmul.f32 %v7709_v7, %v7693_v33 }
0x2b50   :  { %v5780_v29 = vpop.xlane.xlu1 %5779 }
0x2b51   :  { %7716 = vrcp.f32 %v5780_v29 }
0x2b52   :  { %v7711_v8 = vpop.eup %7710 }
0x2b53   :  { %v5544_v39 = vmul.f32 %v7711_v8, %v7695_v43 }
0x2b54   :  { %v5783_v23 = vpop.xlane.xlu0 %5782  ;;  %v5790_v16 = vpop.permute.xlu1 %5789 }
0x2b55   :  { %v5545_v37 = vpack.c.bf16 %v5544_v39, %v5542_v53  ;;  %7718 = vrcp.f32 %v5783_v23 }
0x2b56   :  { %v7713_v57 = vpop.eup %7712 }
0x2b57   :  { %7252 = vmatmul.mubr.msk.bf16.vlgmr.msra.gmra.mxu0 %vm583_vm5, %v5545_v37  ;;  %v5664_v38 = vmul.f32 %v7713_v57, %v7697_v51 }
0x2b58   :  { %v5669_v10 = vpop.permute.xlu0 %5668  ;;  %7263 = vmatprep.mubr.msk.bf16.mxu0 %vm8007_vm2, %v8006_v1 }
0x2b59   :  { %7262 = vmatpush3.bf16.msra.mxu0 %v5669_v10 }
0x2b5a   :  { %v7715_v25 = vpop.eup %7714  ;;  %7273 = vmatprep.subr.bf16.mxu0 %v8006_v1 }
0x2b5b   :  { %v5666_v35 = vmul.f32 %v7715_v25, %v7699_v47 }
0x2b5d   :  { %v5667_v11 = vpack.c.bf16 %v5666_v35, %v5664_v38 }
0x2b5e   :  { %v7717_v15 = vpop.eup %7716 }
0x2b5f   :  { %7264 = vmatmul.mubr.msk.bf16.vlgmr.msra.gmra.mxu0 %vm583_vm5, %v5667_v11  ;;  %v5785_v19 = vmul.f32 %v7717_v15, %v7701_v49 }
0x2b60   :  { %7274 = vmatpush3.bf16.msra.mxu0 %v5790_v16  ;;  %7275 = vmatprep.mubr.msk.bf16.mxu0 %vm8007_vm2, %v8006_v1 }
0x2b61   :  { %7287 = vmatprep.subr.bf16.mxu0 %v8006_v1 }
0x2b62   :  { %v7719_v2 = vpop.eup %7718 }
0x2b63   :  { %v5787_v54 = vmul.f32 %v7719_v2, %v7703_v58  ;;  %v7486_v2 = vld [vmem:[#allocation16 + $0x18] sm:$0xff]  }
0x2b65   :  { %v5788_v55 = vpack.c.bf16 %v5787_v54, %v5785_v19  ;;  %v7488_v19 = vld [vmem:[%s9229_s17 + $0x38] sm:$0xff]  }
0x2b67   :  { %7276 = vmatmul.mubr.msk.bf16.vlgmr.msra.gmra.mxu0 %vm583_vm5, %v5788_v55 }
0x2b68   :  { %7291 = vmatprep.mubr.msk.bf16.mxu0 %vm8007_vm2, %v8006_v1  ;;  %7288 = vmatpush3.bf16.msra.mxu0 %v7486_v2 }
0x2b69   :  { %7289 = vmatprep.subr.bf16.mxu0 %v8006_v1 }
0x2ba5   :  { %v5463_v6 = vpop.f32.mrf.mxu0 }
0x2ba7   :  { %v7241_v28 = vpop.f32.mrf.mxu0 }
0x2ba9   :  { %v5466_v20 = vpop.f32.mrf.mxu0 }
0x2bab   :  { %v7242_v56 = vpop.f32.mrf.mxu0 }
0x2c17   :  { %v5587_v36 = vpop.f32.mrf.mxu0 }
0x2c19   :  { %v7253_v50 = vpop.f32.mrf.mxu0 }
0x2c1b   :  { %v5590_v21 = vpop.f32.mrf.mxu0 }
0x2c1c   :  { %v7405_v24 = vpack.i.bf16 %v5590_v21, %v5587_v36  ;;  %v6512_v21 = vld [vmem:[#allocation19 + $0x9] ss:$0 sm:$0xff] }
0x2c1d   :  { %v7254_v26 = vpop.f32.mrf.mxu0 }
0x2c1e   :  { %7406 = vrot.lane.b32.xlu1 %v7405_v24, %s8011_s5 }
0x2c1f   :  { %v5708_v27 = vpop.f32.mrf.mxu0 }
0x2c21   :  { %v7265_v30 = vpop.f32.mrf.mxu0 }
0x2c23   :  { %v5711_v31 = vpop.f32.mrf.mxu0 }
0x2c24   :  { %v7410_v33 = vpack.i.bf16 %v5711_v31, %v5708_v27  ;;  %v6513_v27 = vld [vmem:[#allocation19 + $0xa] ss:$0 sm:$0xff] }
0x2c25   :  { %v7266_v34 = vpop.f32.mrf.mxu0 }
0x2c26   :  { %7411 = vrot.lane.b32.xlu0 %v7410_v33, %s7996_s1  ;;  %v7489_v34 = vld [vmem:[%s9229_s17 + $0x30] sm:$0xff]  }
0x2c27   :  { %v5829_v40 = vpop.f32.mrf.mxu0 }
0x2c29   :  { %v7277_v41 = vpop.f32.mrf.mxu0 }
0x2c2a   :  { %v7491_v41 = vld [vmem:[%s9229_s17 + $0x20] sm:$0xff]  }
0x2c2b   :  { %v5832_v42 = vpop.f32.mrf.mxu0 }
0x2c2c   :  { %v7415_v43 = vpack.i.bf16 %v5832_v42, %v5829_v40  ;;  %v7490_v40 = vld [vmem:[%s9229_s17 + $0x28] sm:$0xff]   ;;  %v6514_v42 = vld [vmem:[#allocation17 + $0x1] ss:$0 sm:$0xff] }
0x2c2d   :  { %v7278_v45 = vpop.f32.mrf.mxu0 }
0x2c2e   :  { %7416 = vrot.lane.b32.xlu1 %v7415_v43, %s8012_s2 }
0x2c90   :  { %v7407_v46 = vpop.permute.xlu1 %7406 }
0x2c91   :  { %v7409_v18 = vunpack.i.h.bf16 %v7407_v46  ;;  %v7408_v47 = vunpack.i.l.bf16 %v7407_v46 }
0x2c93   :  { %v5861_v58 = vsel %vm535_vm4, %v5466_v20, %v7409_v18  ;;  %v5860_v59 = vsel %vm535_vm4, %v5463_v6, %v7408_v47 }
0x2c98   :  { %v7412_v51 = vpop.permute.xlu0 %7411 }
0x2c99   :  { %v7414_v48 = vunpack.i.h.bf16 %v7412_v51  ;;  %v7413_v49 = vunpack.i.l.bf16 %v7412_v51 }
0x2c9b   :  { %v5863_v17 = vsel %vm583_vm5, %v5861_v58, %v7414_v48  ;;  %v5862_v13 = vsel %vm583_vm5, %v5860_v59, %v7413_v49 }
0x2ca0   :  { %v7417_v52 = vpop.permute.xlu1 %7416 }
0x2ca1   :  { %v7419_v60 = vunpack.i.h.bf16 %v7417_v52  ;;  %v7418_v61 = vunpack.i.l.bf16 %v7417_v52 }
0x2ca3   :  { %v5865_v62 = vsel %vm1045_vm6, %v5863_v17, %v7419_v60  ;;  %v5864_v63 = vsel %vm1045_vm6, %v5862_v13, %v7418_v61 }
0x2ca4   :  { %v5871_v0 = vpack.c.bf16 %v5865_v62, %v5864_v63 }
0x2ca6   :  { %7284 = vmatmul.mubr.msk.bf16.vlgmr.msra.gmra.mxu1 %vm355_vm3, %v5871_v0 }
0x2ca7   :  { %7303 = vmatprep.mubr.msk.bf16.mxu1 %vm8007_vm2, %v8006_v1  ;;  %7296 = vmatpush3.bf16.msra.mxu1 %v7488_v19 }
0x2ca8   :  { %7297 = vmatprep.subr.bf16.mxu1 %v8006_v1 }
0x2cab   :  { %7298 = vmatpush3.bf16.msra.mxu1 %v7489_v34 }
0x2cac   :  { %7299 = vmatprep.subr.bf16.mxu1 %v8006_v1 }
0x2caf   :  { %7300 = vmatpush3.bf16.msra.mxu1 %v7490_v40 }
0x2cb0   :  { %7301 = vmatprep.subr.bf16.mxu1 %v8006_v1  ;;  %v6526_v1 = vld [vmem:[#allocation19 + $0xb] ss:$0 sm:$0xff] }
0x2cb3   :  { %7302 = vmatpush3.bf16.msra.mxu1 %v7491_v41 }
0x2d66   :  { %v5929_v3 = vpop.f32.mrf.mxu1 }
0x2d67   :  { %v5930_v4 = vadd.f32 %v6508_v14, %v5929_v3 }
0x2d68   :  { %v7285_v5 = vpop.f32.mrf.mxu1 }
0x2d69   :  { %v5936_v12 = vadd.f32 %v5930_v4, %v9076_v9 }
0x2d6a   :  { %v5932_v7 = vpop.f32.mrf.mxu1 }
0x2d6b   :  { %v5933_v29 = vadd.f32 %v6508_v14, %v5932_v7  ;;  %v5942_v8 = vsel %vm355_vm3, %v5936_v12, 0.0 }
0x2d6c   :  { %5943 = vadd.xlane.f32.xlu0 %v5942_v8  ;;  %v7286_v53 = vpop.f32.mrf.mxu1  ;;  %v6532_v8 = vld [vmem:[#allocation19 + $0xc] ss:$0 sm:$0xff] }
0x2d6d   :  { %v5937_v39 = vadd.f32 %v5933_v29, %v9078_v44  ;;  %v7487_v44 = vld [vmem:[#allocation16 + $0x10] sm:$0xff]  }
0x2d6e   :  { %7290 = vmatpush3.bf16.msra.mxu0 %v7487_v44  ;;  %v6534_v44 = vld [vmem:[#allocation20] ss:$0 sm:$0xff] }
0x2d6f   :  { %v5945_v23 = vsel %vm355_vm3, %v5937_v39, 0.0 }
0x2d70   :  { %5946 = vadd.xlane.f32.xlu1 %v5945_v23 }
0x2df5   :  { %v5944_v37 = vpop.xlane.xlu0 %5943 }
0x2df6   :  { %v5948_v57 = vmul.f32 0.03125, %v5944_v37 }
0x2df8   :  { %v5950_v10 = vsub.f32 %v5936_v12, %v5948_v57 }
0x2df9   :  { %v5947_v25 = vpop.xlane.xlu1 %5946 }
0x2dfa   :  { %v5949_v38 = vmul.f32 0.03125, %v5947_v25  ;;  %v5952_v35 = vmul.f32 %v5950_v10, %v5950_v10 }
0x2dfc   :  { %v5951_v11 = vsub.f32 %v5937_v39, %v5949_v38  ;;  %v5954_v9 = vsel %vm355_vm3, %v5952_v35, 0.0  ;;  %v6533_v39 = vld [vmem:[#allocation19 + $0xd] ss:$0 sm:$0xff] }
0x2dfd   :  { %5955 = vadd.xlane.f32.xlu0 %v5954_v9 }
0x2dfe   :  { %v5953_v16 = vmul.f32 %v5951_v11, %v5951_v11 }
0x2e00   :  { %v5957_v15 = vsel %vm355_vm3, %v5953_v16, 0.0 }
0x2e01   :  { %5958 = vadd.xlane.f32.xlu0 %v5957_v15 }
0x2e86   :  { %v5956_v54 = vpop.xlane.xlu0 %5955 }
0x2e87   :  { %v5960_v55 = vmul.f32 0.03125, %v5956_v54  ;;  %v6535_v54 = vld [vmem:[#allocation20 + $0x1] ss:$0 sm:$0xff] }
0x2e89   :  { %v5962_v6 = vadd.f32 1e-05, %v5960_v55 }
0x2e8a   :  { %v5959_v28 = vpop.xlane.xlu0 %5958 }
0x2e8b   :  { %7720 = vrsqrt.f32 %v5962_v6  ;;  %v5961_v20 = vmul.f32 0.03125, %v5959_v28  ;;  %v6536_v6 = vld [vmem:[%s9232_s20] ss:$0 sm:$0xff] }
0x2e8d   :  { %v5963_v56 = vadd.f32 1e-05, %v5961_v20 }
0x2e8f   :  { %7722 = vrsqrt.f32 %v5963_v56 }
0x2e98   :  { %v7721_v36 = vpop.eup %7720 }
0x2e99   :  { %v5966_v50 = vmul.f32 %v7721_v36, %v5950_v10  ;;  %v6537_v36 = vld [vmem:[#allocation2] ss:$0 sm:$0xff] }
0x2e9b   :  { %v5974_v24 = vmul.f32 %v6512_v21, %v5966_v50 }
0x2e9c   :  { %v7723_v22 = vpop.eup %7722 }
0x2e9d   :  { %v5967_v26 = vmul.f32 %v7723_v22, %v5951_v11  ;;  %v5982_v31 = vadd.f32 %v6513_v27, %v5974_v24 }
0x2e9f   :  { %v5975_v30 = vmul.f32 %v6512_v21, %v5967_v26 }
0x2ea1   :  { %v5983_v32 = vadd.f32 %v6513_v27, %v5975_v30 }
0x2ea3   :  { %v5991_v33 = vpack.c.bf16 %v5983_v32, %v5982_v31 }
0x2ea5   :  { %7292 = vmatmul.mubr.msk.bf16.vlgmr.msra.gmra.mxu0 %vm355_vm3, %v5991_v33 }
0x2f65   :  { %v6049_v43 = vpop.f32.mrf.mxu0 }
0x2f66   :  { %v6050_v46 = vadd.f32 %v6514_v42, %v6049_v43 }
0x2f67   :  { %v7293_v45 = vpop.f32.mrf.mxu0 }
0x2f68   :  { %v6056_v48 = vmax.f32 %v6050_v46, 0.0 }
0x2f69   :  { %v6052_v51 = vpop.f32.mrf.mxu0 }
0x2f6a   :  { %v6053_v18 = vadd.f32 %v6514_v42, %v6052_v51 }
0x2f6b   :  { %v7294_v47 = vpop.f32.mrf.mxu0 }
0x2f6c   :  { %v6057_v49 = vmax.f32 %v6053_v18, 0.0 }
0x2f6e   :  { %v6067_v52 = vpack.c.bf16 %v6057_v49, %v6056_v48 }
0x2f70   :  { %7304 = vmatmul.mubr.msk.bf16.vlgmr.msra.gmra.mxu1 %vm1277_vm7, %v6067_v52 }
0x3030   :  { %v6135_v58 = vpop.f32.mrf.mxu1 }
0x3032   :  { %v7305_v59 = vpop.f32.mrf.mxu1 }
0x3034   :  { %v6137_v60 = vpop.f32.mrf.mxu1 }
0x3035   :  { %v6138_v61 = vadd.f32 %v6526_v1, %v6137_v60 }
0x3036   :  { %v7306_v17 = vpop.f32.mrf.mxu1 }
0x3037   :  { %v6141_v13 = vadd.f32 %v6138_v61, %v5983_v32 }
0x3039   :  { %v6146_v62 = vsel %vm355_vm3, %v6141_v13, 0.0 }
0x303a   :  { %6147 = vadd.xlane.f32.xlu1 %v6146_v62 }
0x30c3   :  { %v6148_v63 = vpop.xlane.xlu1 %6147 }
0x30c4   :  { %v6149_v0 = vmul.f32 0.03125, %v6148_v63 }
0x30c6   :  { %v6150_v14 = vsub.f32 %v6141_v13, %v6149_v0 }
0x30c8   :  { %v6151_v3 = vmul.f32 %v6150_v14, %v6150_v14 }
0x30ca   :  { %v6152_v4 = vsel %vm355_vm3, %v6151_v3, 0.0 }
0x30cb   :  { %6153 = vadd.xlane.f32.xlu0 %v6152_v4 }
0x3154   :  { %v6154_v5 = vpop.xlane.xlu0 %6153 }
0x3155   :  { %v6155_v12 = vmul.f32 0.03125, %v6154_v5 }
0x3157   :  { %v6156_v7 = vadd.f32 1e-05, %v6155_v12 }
0x3159   :  { %7724 = vrsqrt.f32 %v6156_v7 }
0x3166   :  { %v7725_v29 = vpop.eup %7724 }
0x3167   :  { %v6158_v53 = vmul.f32 %v7725_v29, %v6150_v14 }
0x3169   :  { %v6165_v23 = vmul.f32 %v6532_v8, %v6158_v53 }
0x316b   :  { %v6172_v37 = vadd.f32 %v6533_v39, %v6165_v23 }
0x316d   :  { %v6177_v57 = vsel %vm6176_vm8, %v6172_v37, 0.0 }
0x316e   :  { %6178 = vadd.xlane.f32.xlu1 %v6177_v57 }
0x31f7   :  { %v6179_v10 = vpop.xlane.xlu1 %6178 }
0x31f8   :  { %v6180_v25 = vmul.f32 0.03125, %v6179_v10 }
0x31fa   :  { %v6181_v38 = vsub.f32 %v6172_v37, %v6180_v25 }
0x31fc   :  { %v6182_v35 = vmul.f32 %v6181_v38, %v6181_v38 }
0x31fe   :  { %v6183_v11 = vsel %vm6176_vm8, %v6182_v35, 0.0 }
0x31ff   :  { %6184 = vadd.xlane.f32.xlu0 %v6183_v11 }
0x3288   :  { %v6185_v9 = vpop.xlane.xlu0 %6184 }
0x3289   :  { %v6186_v16 = vmul.f32 0.03125, %v6185_v9 }
0x328b   :  { %v6187_v15 = vadd.f32 1e-05, %v6186_v16 }
0x328d   :  { %7726 = vrsqrt.f32 %v6187_v15 }
0x329a   :  { %v7727_v2 = vpop.eup %7726 }
0x329b   :  { %v6189_v19 = vmul.f32 %v7727_v2, %v6181_v38 }
0x329d   :  { %v6196_v55 = vmul.f32 %v6534_v44, %v6189_v19 }
0x329f   :  { %v6203_v28 = vadd.f32 %v6535_v54, %v6196_v55 }
0x32a1   :  { %v6211_v20 = vmul.f32 %v6536_v6, %v6203_v28 }
0x32a3   :  { %v6212_v56 = vsel %vm6176_vm8, %v6211_v20, 0.0 }
0x32a4   :  { %6213 = vadd.xlane.f32.xlu1 %v6212_v56 }
0x332d   :  { %v6214_v50 = vpop.xlane.xlu1 %6213 }
0x332e   :  { %v6222_v21 = vadd.f32 %v6537_v36, %v6214_v50 }
0x3330   :  { %v6538_v22 = vmul.f32 -1.442695, %v6222_v21 }
0x3332   :  { %7728 = vpow2.f32 %v6538_v22 }
0x333f   :  { %v7729_v24 = vpop.eup %7728 }
0x3340   :  { %v6226_v26 = vadd.f32 1.0, %v7729_v24 }
0x3342   :  { %7730 = vrcp.f32 %v6226_v26 }
0x334f   :  { %v7731_v27 = vpop.eup %7730 }
0x3350   :  { %6230 = vst.msk [vmem:[%s9234_s22] sm:$0x3] %vm6229_vm9, %v7731_v27 }
0x3351   :  { %6235 = vsyncpa [#allocation4], 1 }
0x3352   :  { %6236 = vsyncpa [#allocation6], 1 }
0x3353   :  { %6237 = vsyncpa [#allocation9], 1 }
0x3354   :  { %6238 = vsyncpa [#allocation12], 1 }
0x3355   :  { %6239 = vsyncpa [#allocation15], 1 }
0x3356   :  { %6240 = vsyncpa [#allocation18], 1 }
0x3357   :  { %6241 = vsyncpa [#allocation21], 1 }

</bundles_post_ra>
